<compile_context>
chip_gen: v7x
topology: tpu7x:2x2x1
jax: 0.10.0
libtpu: 0.0.40
codegen_flags: <defaults>
</compile_context>

<pallas_src>
import functools

import jax
import jax.numpy as jnp
from jax.experimental import pallas as pl
from jax.experimental.pallas import tpu as pltpu


CP = 128          # lane padding for conv channel dimensions
_TM_MAX = 512     # cap on the M tile


def _round_up(x, m):
    return (x + m - 1) // m * m


# --------------------------------------------------------------------------
# Pallas kernel: fused [bf16 BN+ReLU prologue] -> bf16 MXU matmul (f32 acc)
# -> [f32 affine + relu/sigmoid epilogue].  1-D grid over M only; K and N are
# full-extent blocks.
# --------------------------------------------------------------------------
def _make_fused_mm_kernel(has_pro, pro_relu, has_epi, epi_act):
    def kernel(*refs):
        i = 0
        a_ref = refs[i]; i += 1
        b_ref = refs[i]; i += 1
        pro_ref = None
        epi_ref = None
        if has_pro:
            pro_ref = refs[i]; i += 1
        if has_epi:
            epi_ref = refs[i]; i += 1
        o_ref = refs[i]

        a = a_ref[...]                                   # bf16 (tm, K)
        if has_pro:
            pv = pro_ref[...]                            # bf16 (2, K)
            a = a * pv[0:1] + pv[1:2]
            if pro_relu:
                a = jnp.maximum(a, 0)
        acc = jnp.dot(a, b_ref[...], preferred_element_type=jnp.float32)
        if has_epi:
            ev = epi_ref[...]                            # f32 (2, N)
            acc = acc * ev[0:1] + ev[1:2]
        if epi_act == "relu":
            acc = jnp.maximum(acc, 0.0)
        elif epi_act == "sigmoid":
            acc = jax.nn.sigmoid(acc)
        o_ref[...] = acc.astype(o_ref.dtype)
    return kernel


def fused_matmul(a, b, *, pro=None, pro_relu=False, epi=None, epi_act="none",
                 out_dtype=jnp.bfloat16):
    """(M,K)@(K,N).  a, b are bf16 and pre-padded at init time (K multiple of
    8/16, N multiple of 128 for all conv weights).  `pro` is an optional
    (2,K) bf16 [scale; bias] applied per-K on A (+ReLU); `epi` is an optional
    (2,N) f32 [scale; bias] applied per-N on the f32 accumulator."""
    M, K = a.shape
    Kb, N = b.shape
    assert K == Kb, (K, Kb)

    if M < 8:
        # TODO(synk): degenerate batch-2 matmuls (temporal block-3 convs,
        # attention denses, FC heads) - a Pallas launch is pure overhead.
        a32 = a.astype(jnp.float32)
        if pro is not None:
            a32 = a32 * pro[0].astype(jnp.float32) + pro[1].astype(jnp.float32)
            if pro_relu:
                a32 = jnp.maximum(a32, 0.0)
        acc = a32 @ b.astype(jnp.float32)
        if epi is not None:
            acc = acc * epi[0] + epi[1]
        if epi_act == "relu":
            acc = jnp.maximum(acc, 0.0)
        elif epi_act == "sigmoid":
            acc = jax.nn.sigmoid(acc)
        return acc.astype(out_dtype)

    # M-tile policy: >=2 M-blocks for mid/large M (v7x dual TensorCore),
    # capped at 512 rows per block.
    if M <= 128:
        tm, Mp = M, M
    else:
        tm = min(_TM_MAX, max(128, _round_up(-(-M // 2), 8)))
        Mp = _round_up(M, tm)
    if Mp != M:
        a = jnp.pad(a, ((0, Mp - M), (0, 0)))

    has_pro = pro is not None
    has_epi = epi is not None
    inputs = [a, b]
    in_specs = [pl.BlockSpec((tm, K), lambda i: (i, 0)),
                pl.BlockSpec((K, N), lambda i: (0, 0))]
    if has_pro:
        inputs.append(pro)
        in_specs.append(pl.BlockSpec((2, K), lambda i: (0, 0)))
    if has_epi:
        inputs.append(epi)
        in_specs.append(pl.BlockSpec((2, N), lambda i: (0, 0)))

    out = pl.pallas_call(
        _make_fused_mm_kernel(has_pro, pro_relu, has_epi, epi_act),
        out_shape=jax.ShapeDtypeStruct((Mp, N), out_dtype),
        grid=(Mp // tm,),
        in_specs=in_specs,
        out_specs=pl.BlockSpec((tm, N), lambda i: (i, 0)),
        compiler_params=pltpu.CompilerParams(
            dimension_semantics=("parallel",)),
    )(*inputs)
    return out[:M] if Mp != M else out


# --------------------------------------------------------------------------
# Conv wrappers (bias=False everywhere in the reference).
# --------------------------------------------------------------------------
def conv1x1_fused(x, w, *, pro=None, pro_relu=False, epi=None, epi_act="none"):
    shp = x.shape
    y = fused_matmul(x.reshape(-1, shp[-1]), w, pro=pro, pro_relu=pro_relu,
                     epi=epi, epi_act=epi_act)
    return y.reshape(shp[:-1] + (w.shape[-1],))


def conv3d_im2col(x, w, *, ksize, stride=(1, 1, 1), padding=(0, 0, 0),
                  epi=None, epi_act="none"):
    # TODO(synk): im2col is still materialized by XLA (bf16); a per-tap grid
    # axis streaming shifted windows would remove the 3x/9x/75x inflation.
    N, H, W, D, C = x.shape
    kh, kw, kd = ksize
    sh, sw, sd = stride
    ph, pw, pd = padding
    xp = jnp.pad(x, ((0, 0), (ph, ph), (pw, pw), (pd, pd), (0, 0)))
    Ho = (H + 2 * ph - kh) // sh + 1
    Wo = (W + 2 * pw - kw) // sw + 1
    Do = (D + 2 * pd - kd) // sd + 1
    patches = []
    for i in range(kh):
        for j in range(kw):
            for k in range(kd):
                patches.append(
                    xp[:, i:i + Ho * sh:sh, j:j + Wo * sw:sw,
                       k:k + Do * sd:sd, :])
    a = jnp.stack(patches, axis=-2)                 # (N,Ho,Wo,Do,taps,C)
    a = a.reshape(N * Ho * Wo * Do, kh * kw * kd * C)
    Kw = w.shape[0]
    assert a.shape[1] <= Kw
    if a.shape[1] < Kw:                             # first conv only (Cin=1)
        a = jnp.pad(a, ((0, 0), (0, Kw - a.shape[1])))
    out = fused_matmul(a, w, epi=epi, epi_act=epi_act)
    return out.reshape(N, Ho, Wo, Do, w.shape[-1])


# --------------------------------------------------------------------------
# Pooling glue (plain JAX; negligible compute, fused by XLA under jit).
# --------------------------------------------------------------------------
def avg_pool_2x2x2(x):
    N, H, W, D, C = x.shape
    Ho, Wo, Do = (H - 2) // 2 + 1, (W - 2) // 2 + 1, (D - 2) // 2 + 1
    xc = x[:, :Ho * 2, :Wo * 2, :Do * 2, :].astype(jnp.float32)
    xc = xc.reshape(N, Ho, 2, Wo, 2, Do, 2, C)
    return xc.mean(axis=(2, 4, 6)).astype(jnp.bfloat16)


def max_pool_2x2x2_pad_d(x):
    # MaxPool3d((2,2,2), stride=(2,2,2), padding=(0,0,1))
    N, H, W, D, C = x.shape
    xp = jnp.pad(x, ((0, 0), (0, 0), (0, 0), (1, 1), (0, 0)),
                 constant_values=float("-inf"))
    Dp = D + 2
    Ho, Wo, Do = (H - 2) // 2 + 1, (W - 2) // 2 + 1, (Dp - 2) // 2 + 1
    xc = xp[:, :Ho * 2, :Wo * 2, :Do * 2, :]
    xc = xc.reshape(N, Ho, 2, Wo, 2, Do, 2, C)
    return xc.max(axis=(2, 4, 6))


# --------------------------------------------------------------------------
# Module forwards (mirroring the PyTorch classes).
# --------------------------------------------------------------------------
def attention_forward(x, p):
    # x: (N, H, W, D, Cp), padded channels are exactly zero so sum/real_C is
    # the correct channel mean.  M = batch = 2 -> the two tiny dense layers
    # run in XLA (Pallas launch would be pure overhead).
    N, H, W, D, _ = x.shape
    xm = jnp.sum(x.astype(jnp.float32), axis=-1) * p["inv_c"]   # (N,H,W,D)
    spatial = jnp.mean(xm, axis=3).reshape(N, H * W)
    spatial = jax.nn.sigmoid(spatial @ p["sw"] + p["sb"])
    temporal = jnp.mean(xm, axis=(1, 2))
    temporal = jax.nn.sigmoid(temporal @ p["tw"] + p["tb"])
    scale = spatial.reshape(N, H, W, 1, 1) * temporal.reshape(N, 1, 1, D, 1)
    return x * scale.astype(x.dtype)


def conv_block_forward(x, p):
    # BN1+ReLU -> 1x1x1 bottleneck conv -> BN2+ReLU : one pallas_call.
    y = conv1x1_fused(x, p["w_bottleneck"],
                      pro=p["bn1_pro"], pro_relu=True,
                      epi=p["bn2_epi"], epi_act="relu")
    # (3,3,1) conv folded at init with the following (1,1,1) conv.
    y = conv3d_im2col(y, p["w33_fused"], ksize=(3, 3, 1), padding=(1, 1, 0))
    # (1,1,3) conv, zero padding along depth.
    y = conv3d_im2col(y, p["w113"], ksize=(1, 1, 3), padding=(0, 0, 1))
    return y


def transition_forward(x, p):
    y = conv1x1_fused(x, p["w"], pro=p["bn_pro"], pro_relu=True)
    return avg_pool_2x2x2(y)


def densenet3d_forward(x, P, subsample):
    # x: (N, H, W, D) raw grid (torch x.unsqueeze(1) -> feature channel 1)
    x = x[..., None].astype(jnp.bfloat16)
    if subsample:
        x = conv3d_im2col(x, P["conv1_w"], ksize=(5, 5, 3), stride=(2, 2, 1),
                          padding=(2, 2, 1), epi=P["conv1_epi"],
                          epi_act="relu")
        x = max_pool_2x2x2_pad_d(x)
    else:
        x = conv3d_im2col(x, P["conv1_w"], ksize=(3, 3, 1),
                          padding=(1, 1, 0))
    for blk in P["blocks"]:
        x = attention_forward(x, blk["attention"])
        for lp in blk["dense"]:
            cb = conv_block_forward(x, lp)
            # TODO(synk): write cb into a preallocated channel slab
            # (lane-offset out BlockSpec + input_output_aliases) to drop this
            # concat copy.
            x = jnp.concatenate([x, cb], axis=-1)       # torch cat dim=1
        if blk["transition"] is not None:
            x = transition_forward(x, blk["transition"])
    # Final BN+ReLU + global AvgPool3d on a tiny tensor (plain-JAX glue).
    scale, bias = P["final_bn"]
    xf = jnp.maximum(x.astype(jnp.float32) * scale + bias, 0.0)
    return jnp.mean(xf, axis=(1, 2, 3))                 # (N, Cp) padded feats


@functools.partial(jax.jit, static_argnums=(2,))
def sst_emotion_net_forward(x, params, spectral_in_channels):
    # x: (N, spectral_in + temporal_in, grid_h, grid_w)  (PyTorch NCHW input)
    sc = spectral_in_channels
    spectral_input = jnp.transpose(x[:, :sc], (0, 2, 3, 1))   # (N,H,W,D)
    temporal_input = jnp.transpose(x[:, sc:], (0, 2, 3, 1))
    spec_feat = densenet3d_forward(spectral_input, params["spectral"], False)
    temp_feat = densenet3d_forward(temporal_input, params["temporal"], True)
    feat = jnp.concatenate([spec_feat, temp_feat], axis=1)    # padded feats
    # fc1 weight has zero rows at padded feature positions (built at init),
    # so no gather/slice is needed.  M = batch = 2 -> XLA.
    w1, b1 = params["fc1"]
    h = feat @ w1 + b1
    # Dropout(p=task_dropout=0.0) is identity.
    w2, b2 = params["fc2"]
    return h @ w2 + b2


# --------------------------------------------------------------------------
# Deterministic parameter construction (mirrors PyTorch __init__ shapes).
# All padding / casting / BN folding / operand packing happens here, once.
# --------------------------------------------------------------------------
class KeyGen:
    def __init__(self, key):
        self.key = key

    def __call__(self):
        self.key, sub = jax.random.split(self.key)
        return sub


def conv_init(kg, ksize, cin, cout):
    kh, kw, kd = ksize
    std = (2.0 / (kh * kw * kd * cin)) ** 0.5
    return jax.random.normal(kg(), (kh, kw, kd, cin, cout), jnp.float32) * std


def linear_init(kg, cin, cout):
    std = (1.0 / cin) ** 0.5
    w = jax.random.normal(kg(), (cin, cout), jnp.float32) * std
    b = jax.random.normal(kg(), (cout,), jnp.float32) * std
    return w, b


def bn_init(c, eps=1.1e-5):
    # PyTorch BatchNorm3d(eps=1.1e-05) folded to per-channel scale/bias
    # (inference-mode running stats: mean=0, var=1, gamma=1, beta=0).
    gamma = jnp.ones((c,), jnp.float32)
    beta = jnp.zeros((c,), jnp.float32)
    mean = jnp.zeros((c,), jnp.float32)
    var = jnp.ones((c,), jnp.float32)
    scale = gamma / jnp.sqrt(var + eps)
    bias = beta - mean * scale
    return scale, bias


def _conv_out(s, k, stride, pad):
    return (s + 2 * pad - k) // stride + 1


def pack_epi(scale, bias, n_pad):
    # (2, n_pad) f32; padded positions scale=1, bias=0 so padded channels
    # stay exactly zero through the epilogue (and its ReLU).
    s = jnp.ones((n_pad,), jnp.float32).at[:scale.shape[0]].set(scale)
    b = jnp.zeros((n_pad,), jnp.float32).at[:bias.shape[0]].set(bias)
    return jnp.stack([s, b], axis=0)


def pack_pro_layout(scale, bias, layout):
    # (2, 128*len(layout)) bf16 with real channels scattered per segment.
    kp = CP * len(layout)
    s = jnp.ones((kp,), jnp.float32)
    b = jnp.zeros((kp,), jnp.float32)
    r = 0
    for si, cnt in enumerate(layout):
        s = s.at[si * CP:si * CP + cnt].set(scale[r:r + cnt])
        b = b.at[si * CP:si * CP + cnt].set(bias[r:r + cnt])
        r += cnt
    return jnp.stack([s, b], axis=0).astype(jnp.bfloat16)


def place_rows_by_layout(w_real, layout, n_pad):
    # 1x1x1 conv weight (sum(layout), n_real) -> (128*len(layout), n_pad)
    kp = CP * len(layout)
    wp = jnp.zeros((kp, n_pad), jnp.float32)
    r = 0
    for si, cnt in enumerate(layout):
        wp = wp.at[si * CP:si * CP + cnt, :w_real.shape[1]].set(
            w_real[r:r + cnt, :])
        r += cnt
    return wp.astype(jnp.bfloat16)


def place_vec_by_layout(v, layout, fill):
    kp = CP * len(layout)
    out = jnp.full((kp,), fill, jnp.float32)
    r = 0
    for si, cnt in enumerate(layout):
        out = out.at[si * CP:si * CP + cnt].set(v[r:r + cnt])
        r += cnt
    return out


def pad_spatial_weight(w):
    # (kh,kw,kd,cin,cout) -> (taps*128, 128) bf16, zero rows/cols at padding.
    kh, kw, kd, cin, cout = w.shape
    taps = kh * kw * kd
    wp = jnp.zeros((taps, CP, CP), jnp.float32)
    wp = wp.at[:, :cin, :cout].set(w.reshape(taps, cin, cout))
    return wp.reshape(taps * CP, CP).astype(jnp.bfloat16)


def pad_first_conv_weight(w):
    # Cin = 1 (unsqueezed input); K padded to a 16 multiple, N to 128.
    kh, kw, kd, _, cout = w.shape
    taps = kh * kw * kd
    kp = _round_up(taps, 16)
    wp = jnp.zeros((kp, CP), jnp.float32)
    wp = wp.at[:taps, :cout].set(w.reshape(taps, cout))
    return wp.astype(jnp.bfloat16)


def init_densenet3d(kg, grid_size, in_channels, depth, num_dense_block,
                    growth_rate, reduction, subsample):
    assert (depth - 4) % 3 == 0
    count = ((depth - 4) // 3) // 2     # bottleneck=True
    num_layers = [count] * num_dense_block
    num_filters = 2 * growth_rate
    compression = 1.0 - reduction

    P = {}
    if subsample:
        P["conv1_w"] = pad_first_conv_weight(
            conv_init(kg, (5, 5, 3), 1, num_filters))
        P["conv1_epi"] = pack_epi(*bn_init(num_filters), CP)
        gh = _conv_out(grid_size[0], 5, 2, 2)
        gw = _conv_out(grid_size[1], 5, 2, 2)
        gd = _conv_out(in_channels, 3, 1, 1)
        gh = _conv_out(gh, 2, 2, 0)
        gw = _conv_out(gw, 2, 2, 0)
        gd = _conv_out(gd, 2, 2, 1)
    else:
        P["conv1_w"] = pad_first_conv_weight(
            conv_init(kg, (3, 3, 1), 1, num_filters))
        P["conv1_epi"] = None
        gh = _conv_out(grid_size[0], 3, 1, 1)
        gw = _conv_out(grid_size[1], 3, 1, 1)
        gd = in_channels

    layout = [num_filters]              # real channel count per 128-wide slab
    blocks = []
    for bi in range(num_dense_block):
        blk = {}
        sw, sb = linear_init(kg, gh * gw, gh * gw)
        tw, tb = linear_init(kg, gd, gd)
        blk["attention"] = {
            "sw": sw, "sb": sb, "tw": tw, "tb": tb,
            "inv_c": jnp.asarray(1.0 / sum(layout), jnp.float32)}
        dense = []
        for _ in range(num_layers[bi]):
            nf = sum(layout)
            inter = growth_rate * 4
            wb = conv_init(kg, (1, 1, 1), nf, inter).reshape(nf, inter)
            w331 = conv_init(kg, (3, 3, 1), inter, growth_rate)
            w111 = conv_init(kg, (1, 1, 1), growth_rate,
                             growth_rate).reshape(growth_rate, growth_rate)
            # No nonlinearity between conv331 and conv111 -> fold once here.
            w33f = (w331.reshape(9 * inter, growth_rate) @ w111
                    ).reshape(3, 3, 1, inter, growth_rate)
            w113 = conv_init(kg, (1, 1, 3), growth_rate, growth_rate)
            dense.append({
                "bn1_pro": pack_pro_layout(*bn_init(nf), layout),
                "w_bottleneck": place_rows_by_layout(wb, layout, CP),
                "bn2_epi": pack_epi(*bn_init(inter), CP),
                "w33_fused": pad_spatial_weight(w33f),
                "w113": pad_spatial_weight(w113),
            })
            layout = layout + [growth_rate]
        blk["dense"] = dense
        if bi != num_dense_block - 1:
            nf = sum(layout)
            out_ch = int(nf * compression)
            wt = conv_init(kg, (1, 1, 1), nf, out_ch).reshape(nf, out_ch)
            blk["transition"] = {
                "bn_pro": pack_pro_layout(*bn_init(nf), layout),
                "w": place_rows_by_layout(wt, layout, CP),
            }
            layout = [out_ch]
            gh, gw, gd = gh // 2, gw // 2, gd // 2
        else:
            blk["transition"] = None
        blocks.append(blk)
    P["blocks"] = blocks
    nf = sum(layout)
    sF, bF = bn_init(nf)
    P["final_bn"] = (place_vec_by_layout(sF, layout, 1.0),
                     place_vec_by_layout(bF, layout, 0.0))
    return P, layout


def init_sst_emotion_net(key, grid_size=(16, 16), spectral_in_channels=4,
                         temporal_in_channels=8, spectral_depth=10,
                         temporal_depth=10, spectral_growth_rate=12,
                         temporal_growth_rate=12, num_dense_block=3,
                         hid_channels=32, num_classes=3):
    assert grid_size[0] >= 16 and grid_size[1] >= 16
    kg = KeyGen(key)
    spec_P, spec_layout = init_densenet3d(
        kg, grid_size, spectral_in_channels, spectral_depth, num_dense_block,
        spectral_growth_rate, reduction=0.5, subsample=False)
    temp_P, temp_layout = init_densenet3d(
        kg, grid_size, temporal_in_channels, temporal_depth, num_dense_block,
        temporal_growth_rate, reduction=0.0, subsample=True)
    # fc1 built directly in the padded feature space (zero rows at channel
    # padding -> identical to slicing the real features first).
    total_real = sum(spec_layout) + sum(temp_layout)
    w_real, b1 = linear_init(kg, total_real, hid_channels)
    wp = jnp.zeros((CP * (len(spec_layout) + len(temp_layout)), hid_channels),
                   jnp.float32)
    r, off = 0, 0
    for lay in (spec_layout, temp_layout):
        for cnt in lay:
            wp = wp.at[off:off + cnt, :].set(w_real[r:r + cnt])
            r += cnt
            off += CP
    fc2 = linear_init(kg, hid_channels, num_classes)
    return {
        "spectral": spec_P,
        "temporal": temp_P,
        "fc1": (wp, b1),
        "fc2": fc2,
    }


if __name__ == "__main__":
    key = jax.random.PRNGKey(0)
    pkey, xkey = jax.random.split(key)

    grid_size = (16, 16)
    spectral_in_channels = 4
    temporal_in_channels = 8
    num_classes = 3
    batch = 2

    params = init_sst_emotion_net(
        pkey, grid_size=grid_size,
        spectral_in_channels=spectral_in_channels,
        temporal_in_channels=temporal_in_channels,
        spectral_depth=10, temporal_depth=10,
        spectral_growth_rate=12, temporal_growth_rate=12,
        num_dense_block=3, hid_channels=32, num_classes=num_classes)

    # PyTorch-style NCHW input: (batch, spectral+temporal channels, H, W)
    x = jax.random.normal(
        xkey,
        (batch, spectral_in_channels + temporal_in_channels,
         grid_size[0], grid_size[1]),
        jnp.float32)

    out = sst_emotion_net_forward(x, params, spectral_in_channels)
    out = jax.block_until_ready(out)

    assert out.shape == (batch, num_classes), out.shape
    assert bool(jnp.all(jnp.isfinite(out)))
    print("KERNEL_OK")
</pallas_src>

<mosaic_0001>
module attributes {stable_mosaic.version = 11 : i64} {
  func.func @kernel(%arg0: i32, %arg1: memref<512x16xbf16, #tpu.memory_space<vmem>>, %arg2: memref<16x128xbf16, #tpu.memory_space<vmem>>, %arg3: memref<512x128xbf16, #tpu.memory_space<vmem>>) attributes {dimension_semantics = [#tpu.dimension_semantics<parallel>], iteration_bounds = array<i64: 4>, scalar_prefetch = 0 : i64, scratch_operands = 0 : i64, tpu.core_type = #tpu.core_type<tc>, window_params = [{transform_indices = @transform_0, window_bounds = array<i64: 512, 16>}, {pipeline_mode = #tpu.pipeline_mode<synchronous>, transform_indices = @transform_1, window_bounds = array<i64: 16, 128>}, {transform_indices = @transform_2, window_bounds = array<i64: 512, 128>}]} {
    %c0 = arith.constant 0 : index
    %c0_0 = arith.constant 0 : index
    %0 = vector.load %arg1[%c0, %c0_0] : memref<512x16xbf16, #tpu.memory_space<vmem>>, vector<512x16xbf16>
    %c0_1 = arith.constant 0 : index
    %c0_2 = arith.constant 0 : index
    %1 = vector.load %arg2[%c0_1, %c0_2] : memref<16x128xbf16, #tpu.memory_space<vmem>>, vector<16x128xbf16>
    %cst = arith.constant dense<0.000000e+00> : vector<512x128xf32>
    %2 = tpu.matmul %0, %1, %cst {dimension_numbers = #tpu.dot_dimension_numbers<[1], [0], [0], [1], [0, 0, 1, 1], [], []>} : vector<512x16xbf16>, vector<16x128xbf16>, vector<512x128xf32> -> vector<512x128xf32>
    %3 = arith.truncf %2 : vector<512x128xf32> to vector<512x128xbf16>
    %c0_3 = arith.constant 0 : index
    %c0_4 = arith.constant 0 : index
    %4 = vector.load %arg3[%c0_3, %c0_4] : memref<512x128xbf16, #tpu.memory_space<vmem>>, vector<512x128xbf16>
    tpu.vector_store %arg3[%c0_3, %c0_4], %3 {strides = array<i32>} : memref<512x128xbf16, #tpu.memory_space<vmem>>, vector<512x128xbf16>,
    return
  }
  func.func @transform_0(%arg0: i32) -> (i32, i32) {
    %c0_i32 = arith.constant 0 : i32
    %c0_i32_0 = arith.constant 0 : i32
    return %arg0, %c0_i32 : i32, i32
  }
  func.func @transform_1(%arg0: i32) -> (i32, i32) {
    %c0_i32 = arith.constant 0 : i32
    %c0_i32_0 = arith.constant 0 : i32
    %c0_i32_1 = arith.constant 0 : i32
    return %c0_i32, %c0_i32_0 : i32, i32
  }
  func.func @transform_2(%arg0: i32) -> (i32, i32) {
    %c0_i32 = arith.constant 0 : i32
    %c0_i32_0 = arith.constant 0 : i32
    return %arg0, %c0_i32 : i32, i32
  }
}

module attributes {stable_mosaic.version = 11 : i64} {
  func.func @kernel(%arg0: i32, %arg1: memref<512x128xbf16, #tpu.memory_space<vmem>>, %arg2: memref<128x128xbf16, #tpu.memory_space<vmem>>, %arg3: memref<2x128xbf16, #tpu.memory_space<vmem>>, %arg4: memref<2x128xf32, #tpu.memory_space<vmem>>, %arg5: memref<512x128xbf16, #tpu.memory_space<vmem>>) attributes {dimension_semantics = [#tpu.dimension_semantics<parallel>], iteration_bounds = array<i64: 4>, scalar_prefetch = 0 : i64, scratch_operands = 0 : i64, tpu.core_type = #tpu.core_type<tc>, window_params = [{transform_indices = @transform_0, window_bounds = array<i64: 512, 128>}, {pipeline_mode = #tpu.pipeline_mode<synchronous>, transform_indices = @transform_1, window_bounds = array<i64: 128, 128>}, {pipeline_mode = #tpu.pipeline_mode<synchronous>, transform_indices = @transform_2, window_bounds = array<i64: 2, 128>}, {pipeline_mode = #tpu.pipeline_mode<synchronous>, transform_indices = @transform_3, window_bounds = array<i64: 2, 128>}, {transform_indices = @transform_4, window_bounds = array<i64: 512, 128>}]} {
    %c0 = arith.constant 0 : index
    %c0_0 = arith.constant 0 : index
    %0 = vector.load %arg1[%c0, %c0_0] : memref<512x128xbf16, #tpu.memory_space<vmem>>, vector<512x128xbf16>
    %c0_1 = arith.constant 0 : index
    %c0_2 = arith.constant 0 : index
    %1 = vector.load %arg3[%c0_1, %c0_2] : memref<2x128xbf16, #tpu.memory_space<vmem>>, vector<2x128xbf16>
    %2 = vector.extract_strided_slice %1 {offsets = [0, 0], sizes = [1, 128], strides = [1, 1]} : vector<2x128xbf16> to vector<1x128xbf16>
    %3 = vector.broadcast %2 : vector<1x128xbf16> to vector<512x128xbf16>
    %4 = arith.mulf %0, %3 : vector<512x128xbf16>
    %5 = vector.extract_strided_slice %1 {offsets = [1, 0], sizes = [1, 128], strides = [1, 1]} : vector<2x128xbf16> to vector<1x128xbf16>
    %6 = vector.broadcast %5 : vector<1x128xbf16> to vector<512x128xbf16>
    %7 = arith.addf %4, %6 : vector<512x128xbf16>
    %cst = arith.constant 0.000000e+00 : bf16
    %8 = vector.broadcast %cst : bf16 to vector<512x128xbf16>
    %9 = arith.maximumf %7, %8 : vector<512x128xbf16>
    %c0_3 = arith.constant 0 : index
    %c0_4 = arith.constant 0 : index
    %10 = vector.load %arg2[%c0_3, %c0_4] : memref<128x128xbf16, #tpu.memory_space<vmem>>, vector<128x128xbf16>
    %cst_5 = arith.constant dense<0.000000e+00> : vector<512x128xf32>
    %11 = tpu.matmul %9, %10, %cst_5 {dimension_numbers = #tpu.dot_dimension_numbers<[1], [0], [0], [1], [0, 0, 1, 1], [], []>} : vector<512x128xbf16>, vector<128x128xbf16>, vector<512x128xf32> -> vector<512x128xf32>
    %c0_6 = arith.constant 0 : index
    %c0_7 = arith.constant 0 : index
    %12 = vector.load %arg4[%c0_6, %c0_7] : memref<2x128xf32, #tpu.memory_space<vmem>>, vector<2x128xf32>
    %13 = vector.extract_strided_slice %12 {offsets = [0, 0], sizes = [1, 128], strides = [1, 1]} : vector<2x128xf32> to vector<1x128xf32>
    %14 = vector.broadcast %13 : vector<1x128xf32> to vector<512x128xf32>
    %15 = arith.mulf %11, %14 : vector<512x128xf32>
    %16 = vector.extract_strided_slice %12 {offsets = [1, 0], sizes = [1, 128], strides = [1, 1]} : vector<2x128xf32> to vector<1x128xf32>
    %17 = vector.broadcast %16 : vector<1x128xf32> to vector<512x128xf32>
    %18 = arith.addf %15, %17 : vector<512x128xf32>
    %cst_8 = arith.constant 0.000000e+00 : f32
    %19 = vector.broadcast %cst_8 : f32 to vector<512x128xf32>
    %20 = arith.maximumf %18, %19 : vector<512x128xf32>
    %21 = arith.truncf %20 : vector<512x128xf32> to vector<512x128xbf16>
    %c0_9 = arith.constant 0 : index
    %c0_10 = arith.constant 0 : index
    %22 = vector.load %arg5[%c0_9, %c0_10] : memref<512x128xbf16, #tpu.memory_space<vmem>>, vector<512x128xbf16>
    tpu.vector_store %arg5[%c0_9, %c0_10], %21 {strides = array<i32>} : memref<512x128xbf16, #tpu.memory_space<vmem>>, vector<512x128xbf16>,
    return
  }
  func.func @transform_0(%arg0: i32) -> (i32, i32) {
    %c0_i32 = arith.constant 0 : i32
    %c0_i32_0 = arith.constant 0 : i32
    return %arg0, %c0_i32 : i32, i32
  }
  func.func @transform_1(%arg0: i32) -> (i32, i32) {
    %c0_i32 = arith.constant 0 : i32
    %c0_i32_0 = arith.constant 0 : i32
    %c0_i32_1 = arith.constant 0 : i32
    return %c0_i32, %c0_i32_0 : i32, i32
  }
  func.func @transform_2(%arg0: i32) -> (i32, i32) {
    %c0_i32 = arith.constant 0 : i32
    %c0_i32_0 = arith.constant 0 : i32
    %c0_i32_1 = arith.constant 0 : i32
    return %c0_i32, %c0_i32_0 : i32, i32
  }
  func.func @transform_3(%arg0: i32) -> (i32, i32) {
    %c0_i32 = arith.constant 0 : i32
    %c0_i32_0 = arith.constant 0 : i32
    %c0_i32_1 = arith.constant 0 : i32
    return %c0_i32, %c0_i32_0 : i32, i32
  }
  func.func @transform_4(%arg0: i32) -> (i32, i32) {
    %c0_i32 = arith.constant 0 : i32
    %c0_i32_0 = arith.constant 0 : i32
    return %arg0, %c0_i32 : i32, i32
  }
}

module attributes {stable_mosaic.version = 11 : i64} {
  func.func @kernel(%arg0: i32, %arg1: memref<512x1152xbf16, #tpu.memory_space<vmem>>, %arg2: memref<1152x128xbf16, #tpu.memory_space<vmem>>, %arg3: memref<512x128xbf16, #tpu.memory_space<vmem>>) attributes {dimension_semantics = [#tpu.dimension_semantics<parallel>], iteration_bounds = array<i64: 4>, scalar_prefetch = 0 : i64, scratch_operands = 0 : i64, tpu.core_type = #tpu.core_type<tc>, window_params = [{transform_indices = @transform_0, window_bounds = array<i64: 512, 1152>}, {pipeline_mode = #tpu.pipeline_mode<synchronous>, transform_indices = @transform_1, window_bounds = array<i64: 1152, 128>}, {transform_indices = @transform_2, window_bounds = array<i64: 512, 128>}]} {
    %c0 = arith.constant 0 : index
    %c0_0 = arith.constant 0 : index
    %0 = vector.load %arg1[%c0, %c0_0] : memref<512x1152xbf16, #tpu.memory_space<vmem>>, vector<512x1152xbf16>
    %c0_1 = arith.constant 0 : index
    %c0_2 = arith.constant 0 : index
    %1 = vector.load %arg2[%c0_1, %c0_2] : memref<1152x128xbf16, #tpu.memory_space<vmem>>, vector<1152x128xbf16>
    %cst = arith.constant dense<0.000000e+00> : vector<512x128xf32>
    %2 = tpu.matmul %0, %1, %cst {dimension_numbers = #tpu.dot_dimension_numbers<[1], [0], [0], [1], [0, 0, 1, 1], [], []>} : vector<512x1152xbf16>, vector<1152x128xbf16>, vector<512x128xf32> -> vector<512x128xf32>
    %3 = arith.truncf %2 : vector<512x128xf32> to vector<512x128xbf16>
    %c0_3 = arith.constant 0 : index
    %c0_4 = arith.constant 0 : index
    %4 = vector.load %arg3[%c0_3, %c0_4] : memref<512x128xbf16, #tpu.memory_space<vmem>>, vector<512x128xbf16>
    tpu.vector_store %arg3[%c0_3, %c0_4], %3 {strides = array<i32>} : memref<512x128xbf16, #tpu.memory_space<vmem>>, vector<512x128xbf16>,
    return
  }
  func.func @transform_0(%arg0: i32) -> (i32, i32) {
    %c0_i32 = arith.constant 0 : i32
    %c0_i32_0 = arith.constant 0 : i32
    return %arg0, %c0_i32 : i32, i32
  }
  func.func @transform_1(%arg0: i32) -> (i32, i32) {
    %c0_i32 = arith.constant 0 : i32
    %c0_i32_0 = arith.constant 0 : i32
    %c0_i32_1 = arith.constant 0 : i32
    return %c0_i32, %c0_i32_0 : i32, i32
  }
  func.func @transform_2(%arg0: i32) -> (i32, i32) {
    %c0_i32 = arith.constant 0 : i32
    %c0_i32_0 = arith.constant 0 : i32
    return %arg0, %c0_i32 : i32, i32
  }
}

module attributes {stable_mosaic.version = 11 : i64} {
  func.func @kernel(%arg0: i32, %arg1: memref<512x384xbf16, #tpu.memory_space<vmem>>, %arg2: memref<384x128xbf16, #tpu.memory_space<vmem>>, %arg3: memref<512x128xbf16, #tpu.memory_space<vmem>>) attributes {dimension_semantics = [#tpu.dimension_semantics<parallel>], iteration_bounds = array<i64: 4>, scalar_prefetch = 0 : i64, scratch_operands = 0 : i64, tpu.core_type = #tpu.core_type<tc>, window_params = [{transform_indices = @transform_0, window_bounds = array<i64: 512, 384>}, {pipeline_mode = #tpu.pipeline_mode<synchronous>, transform_indices = @transform_1, window_bounds = array<i64: 384, 128>}, {transform_indices = @transform_2, window_bounds = array<i64: 512, 128>}]} {
    %c0 = arith.constant 0 : index
    %c0_0 = arith.constant 0 : index
    %0 = vector.load %arg1[%c0, %c0_0] : memref<512x384xbf16, #tpu.memory_space<vmem>>, vector<512x384xbf16>
    %c0_1 = arith.constant 0 : index
    %c0_2 = arith.constant 0 : index
    %1 = vector.load %arg2[%c0_1, %c0_2] : memref<384x128xbf16, #tpu.memory_space<vmem>>, vector<384x128xbf16>
    %cst = arith.constant dense<0.000000e+00> : vector<512x128xf32>
    %2 = tpu.matmul %0, %1, %cst {dimension_numbers = #tpu.dot_dimension_numbers<[1], [0], [0], [1], [0, 0, 1, 1], [], []>} : vector<512x384xbf16>, vector<384x128xbf16>, vector<512x128xf32> -> vector<512x128xf32>
    %3 = arith.truncf %2 : vector<512x128xf32> to vector<512x128xbf16>
    %c0_3 = arith.constant 0 : index
    %c0_4 = arith.constant 0 : index
    %4 = vector.load %arg3[%c0_3, %c0_4] : memref<512x128xbf16, #tpu.memory_space<vmem>>, vector<512x128xbf16>
    tpu.vector_store %arg3[%c0_3, %c0_4], %3 {strides = array<i32>} : memref<512x128xbf16, #tpu.memory_space<vmem>>, vector<512x128xbf16>,
    return
  }
  func.func @transform_0(%arg0: i32) -> (i32, i32) {
    %c0_i32 = arith.constant 0 : i32
    %c0_i32_0 = arith.constant 0 : i32
    return %arg0, %c0_i32 : i32, i32
  }
  func.func @transform_1(%arg0: i32) -> (i32, i32) {
    %c0_i32 = arith.constant 0 : i32
    %c0_i32_0 = arith.constant 0 : i32
    %c0_i32_1 = arith.constant 0 : i32
    return %c0_i32, %c0_i32_0 : i32, i32
  }
  func.func @transform_2(%arg0: i32) -> (i32, i32) {
    %c0_i32 = arith.constant 0 : i32
    %c0_i32_0 = arith.constant 0 : i32
    return %arg0, %c0_i32 : i32, i32
  }
}

module attributes {stable_mosaic.version = 11 : i64} {
  func.func @kernel(%arg0: i32, %arg1: memref<512x256xbf16, #tpu.memory_space<vmem>>, %arg2: memref<256x128xbf16, #tpu.memory_space<vmem>>, %arg3: memref<2x256xbf16, #tpu.memory_space<vmem>>, %arg4: memref<512x128xbf16, #tpu.memory_space<vmem>>) attributes {dimension_semantics = [#tpu.dimension_semantics<parallel>], iteration_bounds = array<i64: 4>, scalar_prefetch = 0 : i64, scratch_operands = 0 : i64, tpu.core_type = #tpu.core_type<tc>, window_params = [{transform_indices = @transform_0, window_bounds = array<i64: 512, 256>}, {pipeline_mode = #tpu.pipeline_mode<synchronous>, transform_indices = @transform_1, window_bounds = array<i64: 256, 128>}, {pipeline_mode = #tpu.pipeline_mode<synchronous>, transform_indices = @transform_2, window_bounds = array<i64: 2, 256>}, {transform_indices = @transform_3, window_bounds = array<i64: 512, 128>}]} {
    %c0 = arith.constant 0 : index
    %c0_0 = arith.constant 0 : index
    %0 = vector.load %arg1[%c0, %c0_0] : memref<512x256xbf16, #tpu.memory_space<vmem>>, vector<512x256xbf16>
    %c0_1 = arith.constant 0 : index
    %c0_2 = arith.constant 0 : index
    %1 = vector.load %arg3[%c0_1, %c0_2] : memref<2x256xbf16, #tpu.memory_space<vmem>>, vector<2x256xbf16>
    %2 = vector.extract_strided_slice %1 {offsets = [0, 0], sizes = [1, 256], strides = [1, 1]} : vector<2x256xbf16> to vector<1x256xbf16>
    %3 = vector.broadcast %2 : vector<1x256xbf16> to vector<512x256xbf16>
    %4 = arith.mulf %0, %3 : vector<512x256xbf16>
    %5 = vector.extract_strided_slice %1 {offsets = [1, 0], sizes = [1, 256], strides = [1, 1]} : vector<2x256xbf16> to vector<1x256xbf16>
    %6 = vector.broadcast %5 : vector<1x256xbf16> to vector<512x256xbf16>
    %7 = arith.addf %4, %6 : vector<512x256xbf16>
    %cst = arith.constant 0.000000e+00 : bf16
    %8 = vector.broadcast %cst : bf16 to vector<512x256xbf16>
    %9 = arith.maximumf %7, %8 : vector<512x256xbf16>
    %c0_3 = arith.constant 0 : index
    %c0_4 = arith.constant 0 : index
    %10 = vector.load %arg2[%c0_3, %c0_4] : memref<256x128xbf16, #tpu.memory_space<vmem>>, vector<256x128xbf16>
    %cst_5 = arith.constant dense<0.000000e+00> : vector<512x128xf32>
    %11 = tpu.matmul %9, %10, %cst_5 {dimension_numbers = #tpu.dot_dimension_numbers<[1], [0], [0], [1], [0, 0, 1, 1], [], []>} : vector<512x256xbf16>, vector<256x128xbf16>, vector<512x128xf32> -> vector<512x128xf32>
    %12 = arith.truncf %11 : vector<512x128xf32> to vector<512x128xbf16>
    %c0_6 = arith.constant 0 : index
    %c0_7 = arith.constant 0 : index
    %13 = vector.load %arg4[%c0_6, %c0_7] : memref<512x128xbf16, #tpu.memory_space<vmem>>, vector<512x128xbf16>
    tpu.vector_store %arg4[%c0_6, %c0_7], %12 {strides = array<i32>} : memref<512x128xbf16, #tpu.memory_space<vmem>>, vector<512x128xbf16>,
    return
  }
  func.func @transform_0(%arg0: i32) -> (i32, i32) {
    %c0_i32 = arith.constant 0 : i32
    %c0_i32_0 = arith.constant 0 : i32
    return %arg0, %c0_i32 : i32, i32
  }
  func.func @transform_1(%arg0: i32) -> (i32, i32) {
    %c0_i32 = arith.constant 0 : i32
    %c0_i32_0 = arith.constant 0 : i32
    %c0_i32_1 = arith.constant 0 : i32
    return %c0_i32, %c0_i32_0 : i32, i32
  }
  func.func @transform_2(%arg0: i32) -> (i32, i32) {
    %c0_i32 = arith.constant 0 : i32
    %c0_i32_0 = arith.constant 0 : i32
    %c0_i32_1 = arith.constant 0 : i32
    return %c0_i32, %c0_i32_0 : i32, i32
  }
  func.func @transform_3(%arg0: i32) -> (i32, i32) {
    %c0_i32 = arith.constant 0 : i32
    %c0_i32_0 = arith.constant 0 : i32
    return %arg0, %c0_i32 : i32, i32
  }
}

module attributes {stable_mosaic.version = 11 : i64} {
  func.func @kernel(%arg0: i32, %arg1: memref<128x128xbf16, #tpu.memory_space<vmem>>, %arg2: memref<128x128xbf16, #tpu.memory_space<vmem>>, %arg3: memref<2x128xbf16, #tpu.memory_space<vmem>>, %arg4: memref<2x128xf32, #tpu.memory_space<vmem>>, %arg5: memref<128x128xbf16, #tpu.memory_space<vmem>>) attributes {dimension_semantics = [#tpu.dimension_semantics<parallel>], iteration_bounds = array<i64: 2>, scalar_prefetch = 0 : i64, scratch_operands = 0 : i64, tpu.core_type = #tpu.core_type<tc>, window_params = [{transform_indices = @transform_0, window_bounds = array<i64: 128, 128>}, {pipeline_mode = #tpu.pipeline_mode<synchronous>, transform_indices = @transform_1, window_bounds = array<i64: 128, 128>}, {pipeline_mode = #tpu.pipeline_mode<synchronous>, transform_indices = @transform_2, window_bounds = array<i64: 2, 128>}, {pipeline_mode = #tpu.pipeline_mode<synchronous>, transform_indices = @transform_3, window_bounds = array<i64: 2, 128>}, {transform_indices = @transform_4, window_bounds = array<i64: 128, 128>}]} {
    %c0 = arith.constant 0 : index
    %c0_0 = arith.constant 0 : index
    %0 = vector.load %arg1[%c0, %c0_0] : memref<128x128xbf16, #tpu.memory_space<vmem>>, vector<128x128xbf16>
    %c0_1 = arith.constant 0 : index
    %c0_2 = arith.constant 0 : index
    %1 = vector.load %arg3[%c0_1, %c0_2] : memref<2x128xbf16, #tpu.memory_space<vmem>>, vector<2x128xbf16>
    %2 = vector.extract_strided_slice %1 {offsets = [0, 0], sizes = [1, 128], strides = [1, 1]} : vector<2x128xbf16> to vector<1x128xbf16>
    %3 = vector.broadcast %2 : vector<1x128xbf16> to vector<128x128xbf16>
    %4 = arith.mulf %0, %3 : vector<128x128xbf16>
    %5 = vector.extract_strided_slice %1 {offsets = [1, 0], sizes = [1, 128], strides = [1, 1]} : vector<2x128xbf16> to vector<1x128xbf16>
    %6 = vector.broadcast %5 : vector<1x128xbf16> to vector<128x128xbf16>
    %7 = arith.addf %4, %6 : vector<128x128xbf16>
    %cst = arith.constant 0.000000e+00 : bf16
    %8 = vector.broadcast %cst : bf16 to vector<128x128xbf16>
    %9 = arith.maximumf %7, %8 : vector<128x128xbf16>
    %c0_3 = arith.constant 0 : index
    %c0_4 = arith.constant 0 : index
    %10 = vector.load %arg2[%c0_3, %c0_4] : memref<128x128xbf16, #tpu.memory_space<vmem>>, vector<128x128xbf16>
    %cst_5 = arith.constant dense<0.000000e+00> : vector<128x128xf32>
    %11 = tpu.matmul %9, %10, %cst_5 {dimension_numbers = #tpu.dot_dimension_numbers<[1], [0], [0], [1], [0, 0, 1, 1], [], []>} : vector<128x128xbf16>, vector<128x128xbf16>, vector<128x128xf32> -> vector<128x128xf32>
    %c0_6 = arith.constant 0 : index
    %c0_7 = arith.constant 0 : index
    %12 = vector.load %arg4[%c0_6, %c0_7] : memref<2x128xf32, #tpu.memory_space<vmem>>, vector<2x128xf32>
    %13 = vector.extract_strided_slice %12 {offsets = [0, 0], sizes = [1, 128], strides = [1, 1]} : vector<2x128xf32> to vector<1x128xf32>
    %14 = vector.broadcast %13 : vector<1x128xf32> to vector<128x128xf32>
    %15 = arith.mulf %11, %14 : vector<128x128xf32>
    %16 = vector.extract_strided_slice %12 {offsets = [1, 0], sizes = [1, 128], strides = [1, 1]} : vector<2x128xf32> to vector<1x128xf32>
    %17 = vector.broadcast %16 : vector<1x128xf32> to vector<128x128xf32>
    %18 = arith.addf %15, %17 : vector<128x128xf32>
    %cst_8 = arith.constant 0.000000e+00 : f32
    %19 = vector.broadcast %cst_8 : f32 to vector<128x128xf32>
    %20 = arith.maximumf %18, %19 : vector<128x128xf32>
    %21 = arith.truncf %20 : vector<128x128xf32> to vector<128x128xbf16>
    %c0_9 = arith.constant 0 : index
    %c0_10 = arith.constant 0 : index
    %22 = vector.load %arg5[%c0_9, %c0_10] : memref<128x128xbf16, #tpu.memory_space<vmem>>, vector<128x128xbf16>
    tpu.vector_store %arg5[%c0_9, %c0_10], %21 {strides = array<i32>} : memref<128x128xbf16, #tpu.memory_space<vmem>>, vector<128x128xbf16>,
    return
  }
  func.func @transform_0(%arg0: i32) -> (i32, i32) {
    %c0_i32 = arith.constant 0 : i32
    %c0_i32_0 = arith.constant 0 : i32
    return %arg0, %c0_i32 : i32, i32
  }
  func.func @transform_1(%arg0: i32) -> (i32, i32) {
    %c0_i32 = arith.constant 0 : i32
    %c0_i32_0 = arith.constant 0 : i32
    %c0_i32_1 = arith.constant 0 : i32
    return %c0_i32, %c0_i32_0 : i32, i32
  }
  func.func @transform_2(%arg0: i32) -> (i32, i32) {
    %c0_i32 = arith.constant 0 : i32
    %c0_i32_0 = arith.constant 0 : i32
    %c0_i32_1 = arith.constant 0 : i32
    return %c0_i32, %c0_i32_0 : i32, i32
  }
  func.func @transform_3(%arg0: i32) -> (i32, i32) {
    %c0_i32 = arith.constant 0 : i32
    %c0_i32_0 = arith.constant 0 : i32
    %c0_i32_1 = arith.constant 0 : i32
    return %c0_i32, %c0_i32_0 : i32, i32
  }
  func.func @transform_4(%arg0: i32) -> (i32, i32) {
    %c0_i32 = arith.constant 0 : i32
    %c0_i32_0 = arith.constant 0 : i32
    return %arg0, %c0_i32 : i32, i32
  }
}

module attributes {stable_mosaic.version = 11 : i64} {
  func.func @kernel(%arg0: i32, %arg1: memref<128x1152xbf16, #tpu.memory_space<vmem>>, %arg2: memref<1152x128xbf16, #tpu.memory_space<vmem>>, %arg3: memref<128x128xbf16, #tpu.memory_space<vmem>>) attributes {dimension_semantics = [#tpu.dimension_semantics<parallel>], iteration_bounds = array<i64: 2>, scalar_prefetch = 0 : i64, scratch_operands = 0 : i64, tpu.core_type = #tpu.core_type<tc>, window_params = [{transform_indices = @transform_0, window_bounds = array<i64: 128, 1152>}, {pipeline_mode = #tpu.pipeline_mode<synchronous>, transform_indices = @transform_1, window_bounds = array<i64: 1152, 128>}, {transform_indices = @transform_2, window_bounds = array<i64: 128, 128>}]} {
    %c0 = arith.constant 0 : index
    %c0_0 = arith.constant 0 : index
    %0 = vector.load %arg1[%c0, %c0_0] : memref<128x1152xbf16, #tpu.memory_space<vmem>>, vector<128x1152xbf16>
    %c0_1 = arith.constant 0 : index
    %c0_2 = arith.constant 0 : index
    %1 = vector.load %arg2[%c0_1, %c0_2] : memref<1152x128xbf16, #tpu.memory_space<vmem>>, vector<1152x128xbf16>
    %cst = arith.constant dense<0.000000e+00> : vector<128x128xf32>
    %2 = tpu.matmul %0, %1, %cst {dimension_numbers = #tpu.dot_dimension_numbers<[1], [0], [0], [1], [0, 0, 1, 1], [], []>} : vector<128x1152xbf16>, vector<1152x128xbf16>, vector<128x128xf32> -> vector<128x128xf32>
    %3 = arith.truncf %2 : vector<128x128xf32> to vector<128x128xbf16>
    %c0_3 = arith.constant 0 : index
    %c0_4 = arith.constant 0 : index
    %4 = vector.load %arg3[%c0_3, %c0_4] : memref<128x128xbf16, #tpu.memory_space<vmem>>, vector<128x128xbf16>
    tpu.vector_store %arg3[%c0_3, %c0_4], %3 {strides = array<i32>} : memref<128x128xbf16, #tpu.memory_space<vmem>>, vector<128x128xbf16>,
    return
  }
  func.func @transform_0(%arg0: i32) -> (i32, i32) {
    %c0_i32 = arith.constant 0 : i32
    %c0_i32_0 = arith.constant 0 : i32
    return %arg0, %c0_i32 : i32, i32
  }
  func.func @transform_1(%arg0: i32) -> (i32, i32) {
    %c0_i32 = arith.constant 0 : i32
    %c0_i32_0 = arith.constant 0 : i32
    %c0_i32_1 = arith.constant 0 : i32
    return %c0_i32, %c0_i32_0 : i32, i32
  }
  func.func @transform_2(%arg0: i32) -> (i32, i32) {
    %c0_i32 = arith.constant 0 : i32
    %c0_i32_0 = arith.constant 0 : i32
    return %arg0, %c0_i32 : i32, i32
  }
}

module attributes {stable_mosaic.version = 11 : i64} {
  func.func @kernel(%arg0: i32, %arg1: memref<128x384xbf16, #tpu.memory_space<vmem>>, %arg2: memref<384x128xbf16, #tpu.memory_space<vmem>>, %arg3: memref<128x128xbf16, #tpu.memory_space<vmem>>) attributes {dimension_semantics = [#tpu.dimension_semantics<parallel>], iteration_bounds = array<i64: 2>, scalar_prefetch = 0 : i64, scratch_operands = 0 : i64, tpu.core_type = #tpu.core_type<tc>, window_params = [{transform_indices = @transform_0, window_bounds = array<i64: 128, 384>}, {pipeline_mode = #tpu.pipeline_mode<synchronous>, transform_indices = @transform_1, window_bounds = array<i64: 384, 128>}, {transform_indices = @transform_2, window_bounds = array<i64: 128, 128>}]} {
    %c0 = arith.constant 0 : index
    %c0_0 = arith.constant 0 : index
    %0 = vector.load %arg1[%c0, %c0_0] : memref<128x384xbf16, #tpu.memory_space<vmem>>, vector<128x384xbf16>
    %c0_1 = arith.constant 0 : index
    %c0_2 = arith.constant 0 : index
    %1 = vector.load %arg2[%c0_1, %c0_2] : memref<384x128xbf16, #tpu.memory_space<vmem>>, vector<384x128xbf16>
    %cst = arith.constant dense<0.000000e+00> : vector<128x128xf32>
    %2 = tpu.matmul %0, %1, %cst {dimension_numbers = #tpu.dot_dimension_numbers<[1], [0], [0], [1], [0, 0, 1, 1], [], []>} : vector<128x384xbf16>, vector<384x128xbf16>, vector<128x128xf32> -> vector<128x128xf32>
    %3 = arith.truncf %2 : vector<128x128xf32> to vector<128x128xbf16>
    %c0_3 = arith.constant 0 : index
    %c0_4 = arith.constant 0 : index
    %4 = vector.load %arg3[%c0_3, %c0_4] : memref<128x128xbf16, #tpu.memory_space<vmem>>, vector<128x128xbf16>
    tpu.vector_store %arg3[%c0_3, %c0_4], %3 {strides = array<i32>} : memref<128x128xbf16, #tpu.memory_space<vmem>>, vector<128x128xbf16>,
    return
  }
  func.func @transform_0(%arg0: i32) -> (i32, i32) {
    %c0_i32 = arith.constant 0 : i32
    %c0_i32_0 = arith.constant 0 : i32
    return %arg0, %c0_i32 : i32, i32
  }
  func.func @transform_1(%arg0: i32) -> (i32, i32) {
    %c0_i32 = arith.constant 0 : i32
    %c0_i32_0 = arith.constant 0 : i32
    %c0_i32_1 = arith.constant 0 : i32
    return %c0_i32, %c0_i32_0 : i32, i32
  }
  func.func @transform_2(%arg0: i32) -> (i32, i32) {
    %c0_i32 = arith.constant 0 : i32
    %c0_i32_0 = arith.constant 0 : i32
    return %arg0, %c0_i32 : i32, i32
  }
}

module attributes {stable_mosaic.version = 11 : i64} {
  func.func @kernel(%arg0: i32, %arg1: memref<128x256xbf16, #tpu.memory_space<vmem>>, %arg2: memref<256x128xbf16, #tpu.memory_space<vmem>>, %arg3: memref<2x256xbf16, #tpu.memory_space<vmem>>, %arg4: memref<128x128xbf16, #tpu.memory_space<vmem>>) attributes {dimension_semantics = [#tpu.dimension_semantics<parallel>], iteration_bounds = array<i64: 2>, scalar_prefetch = 0 : i64, scratch_operands = 0 : i64, tpu.core_type = #tpu.core_type<tc>, window_params = [{transform_indices = @transform_0, window_bounds = array<i64: 128, 256>}, {pipeline_mode = #tpu.pipeline_mode<synchronous>, transform_indices = @transform_1, window_bounds = array<i64: 256, 128>}, {pipeline_mode = #tpu.pipeline_mode<synchronous>, transform_indices = @transform_2, window_bounds = array<i64: 2, 256>}, {transform_indices = @transform_3, window_bounds = array<i64: 128, 128>}]} {
    %c0 = arith.constant 0 : index
    %c0_0 = arith.constant 0 : index
    %0 = vector.load %arg1[%c0, %c0_0] : memref<128x256xbf16, #tpu.memory_space<vmem>>, vector<128x256xbf16>
    %c0_1 = arith.constant 0 : index
    %c0_2 = arith.constant 0 : index
    %1 = vector.load %arg3[%c0_1, %c0_2] : memref<2x256xbf16, #tpu.memory_space<vmem>>, vector<2x256xbf16>
    %2 = vector.extract_strided_slice %1 {offsets = [0, 0], sizes = [1, 256], strides = [1, 1]} : vector<2x256xbf16> to vector<1x256xbf16>
    %3 = vector.broadcast %2 : vector<1x256xbf16> to vector<128x256xbf16>
    %4 = arith.mulf %0, %3 : vector<128x256xbf16>
    %5 = vector.extract_strided_slice %1 {offsets = [1, 0], sizes = [1, 256], strides = [1, 1]} : vector<2x256xbf16> to vector<1x256xbf16>
    %6 = vector.broadcast %5 : vector<1x256xbf16> to vector<128x256xbf16>
    %7 = arith.addf %4, %6 : vector<128x256xbf16>
    %cst = arith.constant 0.000000e+00 : bf16
    %8 = vector.broadcast %cst : bf16 to vector<128x256xbf16>
    %9 = arith.maximumf %7, %8 : vector<128x256xbf16>
    %c0_3 = arith.constant 0 : index
    %c0_4 = arith.constant 0 : index
    %10 = vector.load %arg2[%c0_3, %c0_4] : memref<256x128xbf16, #tpu.memory_space<vmem>>, vector<256x128xbf16>
    %cst_5 = arith.constant dense<0.000000e+00> : vector<128x128xf32>
    %11 = tpu.matmul %9, %10, %cst_5 {dimension_numbers = #tpu.dot_dimension_numbers<[1], [0], [0], [1], [0, 0, 1, 1], [], []>} : vector<128x256xbf16>, vector<256x128xbf16>, vector<128x128xf32> -> vector<128x128xf32>
    %12 = arith.truncf %11 : vector<128x128xf32> to vector<128x128xbf16>
    %c0_6 = arith.constant 0 : index
    %c0_7 = arith.constant 0 : index
    %13 = vector.load %arg4[%c0_6, %c0_7] : memref<128x128xbf16, #tpu.memory_space<vmem>>, vector<128x128xbf16>
    tpu.vector_store %arg4[%c0_6, %c0_7], %12 {strides = array<i32>} : memref<128x128xbf16, #tpu.memory_space<vmem>>, vector<128x128xbf16>,
    return
  }
  func.func @transform_0(%arg0: i32) -> (i32, i32) {
    %c0_i32 = arith.constant 0 : i32
    %c0_i32_0 = arith.constant 0 : i32
    return %arg0, %c0_i32 : i32, i32
  }
  func.func @transform_1(%arg0: i32) -> (i32, i32) {
    %c0_i32 = arith.constant 0 : i32
    %c0_i32_0 = arith.constant 0 : i32
    %c0_i32_1 = arith.constant 0 : i32
    return %c0_i32, %c0_i32_0 : i32, i32
  }
  func.func @transform_2(%arg0: i32) -> (i32, i32) {
    %c0_i32 = arith.constant 0 : i32
    %c0_i32_0 = arith.constant 0 : i32
    %c0_i32_1 = arith.constant 0 : i32
    return %c0_i32, %c0_i32_0 : i32, i32
  }
  func.func @transform_3(%arg0: i32) -> (i32, i32) {
    %c0_i32 = arith.constant 0 : i32
    %c0_i32_0 = arith.constant 0 : i32
    return %arg0, %c0_i32 : i32, i32
  }
}

module attributes {stable_mosaic.version = 11 : i64} {
  func.func @kernel(%arg0: i32, %arg1: memref<32x128xbf16, #tpu.memory_space<vmem>>, %arg2: memref<128x128xbf16, #tpu.memory_space<vmem>>, %arg3: memref<2x128xbf16, #tpu.memory_space<vmem>>, %arg4: memref<2x128xf32, #tpu.memory_space<vmem>>, %arg5: memref<32x128xbf16, #tpu.memory_space<vmem>>) attributes {dimension_semantics = [#tpu.dimension_semantics<parallel>], iteration_bounds = array<i64: 1>, scalar_prefetch = 0 : i64, scratch_operands = 0 : i64, tpu.core_type = #tpu.core_type<tc>, window_params = [{transform_indices = @transform_0, window_bounds = array<i64: 32, 128>}, {pipeline_mode = #tpu.pipeline_mode<synchronous>, transform_indices = @transform_1, window_bounds = array<i64: 128, 128>}, {pipeline_mode = #tpu.pipeline_mode<synchronous>, transform_indices = @transform_2, window_bounds = array<i64: 2, 128>}, {pipeline_mode = #tpu.pipeline_mode<synchronous>, transform_indices = @transform_3, window_bounds = array<i64: 2, 128>}, {transform_indices = @transform_4, window_bounds = array<i64: 32, 128>}]} {
    %c0 = arith.constant 0 : index
    %c0_0 = arith.constant 0 : index
    %0 = vector.load %arg1[%c0, %c0_0] : memref<32x128xbf16, #tpu.memory_space<vmem>>, vector<32x128xbf16>
    %c0_1 = arith.constant 0 : index
    %c0_2 = arith.constant 0 : index
    %1 = vector.load %arg3[%c0_1, %c0_2] : memref<2x128xbf16, #tpu.memory_space<vmem>>, vector<2x128xbf16>
    %2 = vector.extract_strided_slice %1 {offsets = [0, 0], sizes = [1, 128], strides = [1, 1]} : vector<2x128xbf16> to vector<1x128xbf16>
    %3 = vector.broadcast %2 : vector<1x128xbf16> to vector<32x128xbf16>
    %4 = arith.mulf %0, %3 : vector<32x128xbf16>
    %5 = vector.extract_strided_slice %1 {offsets = [1, 0], sizes = [1, 128], strides = [1, 1]} : vector<2x128xbf16> to vector<1x128xbf16>
    %6 = vector.broadcast %5 : vector<1x128xbf16> to vector<32x128xbf16>
    %7 = arith.addf %4, %6 : vector<32x128xbf16>
    %cst = arith.constant 0.000000e+00 : bf16
    %8 = vector.broadcast %cst : bf16 to vector<32x128xbf16>
    %9 = arith.maximumf %7, %8 : vector<32x128xbf16>
    %c0_3 = arith.constant 0 : index
    %c0_4 = arith.constant 0 : index
    %10 = vector.load %arg2[%c0_3, %c0_4] : memref<128x128xbf16, #tpu.memory_space<vmem>>, vector<128x128xbf16>
    %cst_5 = arith.constant dense<0.000000e+00> : vector<32x128xf32>
    %11 = tpu.matmul %9, %10, %cst_5 {dimension_numbers = #tpu.dot_dimension_numbers<[1], [0], [0], [1], [0, 0, 1, 1], [], []>} : vector<32x128xbf16>, vector<128x128xbf16>, vector<32x128xf32> -> vector<32x128xf32>
    %c0_6 = arith.constant 0 : index
    %c0_7 = arith.constant 0 : index
    %12 = vector.load %arg4[%c0_6, %c0_7] : memref<2x128xf32, #tpu.memory_space<vmem>>, vector<2x128xf32>
    %13 = vector.extract_strided_slice %12 {offsets = [0, 0], sizes = [1, 128], strides = [1, 1]} : vector<2x128xf32> to vector<1x128xf32>
    %14 = vector.broadcast %13 : vector<1x128xf32> to vector<32x128xf32>
    %15 = arith.mulf %11, %14 : vector<32x128xf32>
    %16 = vector.extract_strided_slice %12 {offsets = [1, 0], sizes = [1, 128], strides = [1, 1]} : vector<2x128xf32> to vector<1x128xf32>
    %17 = vector.broadcast %16 : vector<1x128xf32> to vector<32x128xf32>
    %18 = arith.addf %15, %17 : vector<32x128xf32>
    %cst_8 = arith.constant 0.000000e+00 : f32
    %19 = vector.broadcast %cst_8 : f32 to vector<32x128xf32>
    %20 = arith.maximumf %18, %19 : vector<32x128xf32>
    %21 = arith.truncf %20 : vector<32x128xf32> to vector<32x128xbf16>
    %c0_9 = arith.constant 0 : index
    %c0_10 = arith.constant 0 : index
    %22 = vector.load %arg5[%c0_9, %c0_10] : memref<32x128xbf16, #tpu.memory_space<vmem>>, vector<32x128xbf16>
    tpu.vector_store %arg5[%c0_9, %c0_10], %21 {strides = array<i32>} : memref<32x128xbf16, #tpu.memory_space<vmem>>, vector<32x128xbf16>,
    return
  }
  func.func @transform_0(%arg0: i32) -> (i32, i32) {
    %c0_i32 = arith.constant 0 : i32
    %c0_i32_0 = arith.constant 0 : i32
    return %arg0, %c0_i32 : i32, i32
  }
  func.func @transform_1(%arg0: i32) -> (i32, i32) {
    %c0_i32 = arith.constant 0 : i32
    %c0_i32_0 = arith.constant 0 : i32
    %c0_i32_1 = arith.constant 0 : i32
    return %c0_i32, %c0_i32_0 : i32, i32
  }
  func.func @transform_2(%arg0: i32) -> (i32, i32) {
    %c0_i32 = arith.constant 0 : i32
    %c0_i32_0 = arith.constant 0 : i32
    %c0_i32_1 = arith.constant 0 : i32
    return %c0_i32, %c0_i32_0 : i32, i32
  }
  func.func @transform_3(%arg0: i32) -> (i32, i32) {
    %c0_i32 = arith.constant 0 : i32
    %c0_i32_0 = arith.constant 0 : i32
    %c0_i32_1 = arith.constant 0 : i32
    return %c0_i32, %c0_i32_0 : i32, i32
  }
  func.func @transform_4(%arg0: i32) -> (i32, i32) {
    %c0_i32 = arith.constant 0 : i32
    %c0_i32_0 = arith.constant 0 : i32
    return %arg0, %c0_i32 : i32, i32
  }
}

module attributes {stable_mosaic.version = 11 : i64} {
  func.func @kernel(%arg0: i32, %arg1: memref<32x1152xbf16, #tpu.memory_space<vmem>>, %arg2: memref<1152x128xbf16, #tpu.memory_space<vmem>>, %arg3: memref<32x128xbf16, #tpu.memory_space<vmem>>) attributes {dimension_semantics = [#tpu.dimension_semantics<parallel>], iteration_bounds = array<i64: 1>, scalar_prefetch = 0 : i64, scratch_operands = 0 : i64, tpu.core_type = #tpu.core_type<tc>, window_params = [{transform_indices = @transform_0, window_bounds = array<i64: 32, 1152>}, {pipeline_mode = #tpu.pipeline_mode<synchronous>, transform_indices = @transform_1, window_bounds = array<i64: 1152, 128>}, {transform_indices = @transform_2, window_bounds = array<i64: 32, 128>}]} {
    %c0 = arith.constant 0 : index
    %c0_0 = arith.constant 0 : index
    %0 = vector.load %arg1[%c0, %c0_0] : memref<32x1152xbf16, #tpu.memory_space<vmem>>, vector<32x1152xbf16>
    %c0_1 = arith.constant 0 : index
    %c0_2 = arith.constant 0 : index
    %1 = vector.load %arg2[%c0_1, %c0_2] : memref<1152x128xbf16, #tpu.memory_space<vmem>>, vector<1152x128xbf16>
    %cst = arith.constant dense<0.000000e+00> : vector<32x128xf32>
    %2 = tpu.matmul %0, %1, %cst {dimension_numbers = #tpu.dot_dimension_numbers<[1], [0], [0], [1], [0, 0, 1, 1], [], []>} : vector<32x1152xbf16>, vector<1152x128xbf16>, vector<32x128xf32> -> vector<32x128xf32>
    %3 = arith.truncf %2 : vector<32x128xf32> to vector<32x128xbf16>
    %c0_3 = arith.constant 0 : index
    %c0_4 = arith.constant 0 : index
    %4 = vector.load %arg3[%c0_3, %c0_4] : memref<32x128xbf16, #tpu.memory_space<vmem>>, vector<32x128xbf16>
    tpu.vector_store %arg3[%c0_3, %c0_4], %3 {strides = array<i32>} : memref<32x128xbf16, #tpu.memory_space<vmem>>, vector<32x128xbf16>,
    return
  }
  func.func @transform_0(%arg0: i32) -> (i32, i32) {
    %c0_i32 = arith.constant 0 : i32
    %c0_i32_0 = arith.constant 0 : i32
    return %arg0, %c0_i32 : i32, i32
  }
  func.func @transform_1(%arg0: i32) -> (i32, i32) {
    %c0_i32 = arith.constant 0 : i32
    %c0_i32_0 = arith.constant 0 : i32
    %c0_i32_1 = arith.constant 0 : i32
    return %c0_i32, %c0_i32_0 : i32, i32
  }
  func.func @transform_2(%arg0: i32) -> (i32, i32) {
    %c0_i32 = arith.constant 0 : i32
    %c0_i32_0 = arith.constant 0 : i32
    return %arg0, %c0_i32 : i32, i32
  }
}

module attributes {stable_mosaic.version = 11 : i64} {
  func.func @kernel(%arg0: i32, %arg1: memref<32x384xbf16, #tpu.memory_space<vmem>>, %arg2: memref<384x128xbf16, #tpu.memory_space<vmem>>, %arg3: memref<32x128xbf16, #tpu.memory_space<vmem>>) attributes {dimension_semantics = [#tpu.dimension_semantics<parallel>], iteration_bounds = array<i64: 1>, scalar_prefetch = 0 : i64, scratch_operands = 0 : i64, tpu.core_type = #tpu.core_type<tc>, window_params = [{transform_indices = @transform_0, window_bounds = array<i64: 32, 384>}, {pipeline_mode = #tpu.pipeline_mode<synchronous>, transform_indices = @transform_1, window_bounds = array<i64: 384, 128>}, {transform_indices = @transform_2, window_bounds = array<i64: 32, 128>}]} {
    %c0 = arith.constant 0 : index
    %c0_0 = arith.constant 0 : index
    %0 = vector.load %arg1[%c0, %c0_0] : memref<32x384xbf16, #tpu.memory_space<vmem>>, vector<32x384xbf16>
    %c0_1 = arith.constant 0 : index
    %c0_2 = arith.constant 0 : index
    %1 = vector.load %arg2[%c0_1, %c0_2] : memref<384x128xbf16, #tpu.memory_space<vmem>>, vector<384x128xbf16>
    %cst = arith.constant dense<0.000000e+00> : vector<32x128xf32>
    %2 = tpu.matmul %0, %1, %cst {dimension_numbers = #tpu.dot_dimension_numbers<[1], [0], [0], [1], [0, 0, 1, 1], [], []>} : vector<32x384xbf16>, vector<384x128xbf16>, vector<32x128xf32> -> vector<32x128xf32>
    %3 = arith.truncf %2 : vector<32x128xf32> to vector<32x128xbf16>
    %c0_3 = arith.constant 0 : index
    %c0_4 = arith.constant 0 : index
    %4 = vector.load %arg3[%c0_3, %c0_4] : memref<32x128xbf16, #tpu.memory_space<vmem>>, vector<32x128xbf16>
    tpu.vector_store %arg3[%c0_3, %c0_4], %3 {strides = array<i32>} : memref<32x128xbf16, #tpu.memory_space<vmem>>, vector<32x128xbf16>,
    return
  }
  func.func @transform_0(%arg0: i32) -> (i32, i32) {
    %c0_i32 = arith.constant 0 : i32
    %c0_i32_0 = arith.constant 0 : i32
    return %arg0, %c0_i32 : i32, i32
  }
  func.func @transform_1(%arg0: i32) -> (i32, i32) {
    %c0_i32 = arith.constant 0 : i32
    %c0_i32_0 = arith.constant 0 : i32
    %c0_i32_1 = arith.constant 0 : i32
    return %c0_i32, %c0_i32_0 : i32, i32
  }
  func.func @transform_2(%arg0: i32) -> (i32, i32) {
    %c0_i32 = arith.constant 0 : i32
    %c0_i32_0 = arith.constant 0 : i32
    return %arg0, %c0_i32 : i32, i32
  }
}

module attributes {stable_mosaic.version = 11 : i64} {
  func.func @kernel(%arg0: i32, %arg1: memref<512x80xbf16, #tpu.memory_space<vmem>>, %arg2: memref<80x128xbf16, #tpu.memory_space<vmem>>, %arg3: memref<2x128xf32, #tpu.memory_space<vmem>>, %arg4: memref<512x128xbf16, #tpu.memory_space<vmem>>) attributes {dimension_semantics = [#tpu.dimension_semantics<parallel>], iteration_bounds = array<i64: 2>, scalar_prefetch = 0 : i64, scratch_operands = 0 : i64, tpu.core_type = #tpu.core_type<tc>, window_params = [{transform_indices = @transform_0, window_bounds = array<i64: 512, 80>}, {pipeline_mode = #tpu.pipeline_mode<synchronous>, transform_indices = @transform_1, window_bounds = array<i64: 80, 128>}, {pipeline_mode = #tpu.pipeline_mode<synchronous>, transform_indices = @transform_2, window_bounds = array<i64: 2, 128>}, {transform_indices = @transform_3, window_bounds = array<i64: 512, 128>}]} {
    %c0 = arith.constant 0 : index
    %c0_0 = arith.constant 0 : index
    %0 = vector.load %arg1[%c0, %c0_0] : memref<512x80xbf16, #tpu.memory_space<vmem>>, vector<512x80xbf16>
    %c0_1 = arith.constant 0 : index
    %c0_2 = arith.constant 0 : index
    %1 = vector.load %arg2[%c0_1, %c0_2] : memref<80x128xbf16, #tpu.memory_space<vmem>>, vector<80x128xbf16>
    %cst = arith.constant dense<0.000000e+00> : vector<512x128xf32>
    %2 = tpu.matmul %0, %1, %cst {dimension_numbers = #tpu.dot_dimension_numbers<[1], [0], [0], [1], [0, 0, 1, 1], [], []>} : vector<512x80xbf16>, vector<80x128xbf16>, vector<512x128xf32> -> vector<512x128xf32>
    %c0_3 = arith.constant 0 : index
    %c0_4 = arith.constant 0 : index
    %3 = vector.load %arg3[%c0_3, %c0_4] : memref<2x128xf32, #tpu.memory_space<vmem>>, vector<2x128xf32>
    %4 = vector.extract_strided_slice %3 {offsets = [0, 0], sizes = [1, 128], strides = [1, 1]} : vector<2x128xf32> to vector<1x128xf32>
    %5 = vector.broadcast %4 : vector<1x128xf32> to vector<512x128xf32>
    %6 = arith.mulf %2, %5 : vector<512x128xf32>
    %7 = vector.extract_strided_slice %3 {offsets = [1, 0], sizes = [1, 128], strides = [1, 1]} : vector<2x128xf32> to vector<1x128xf32>
    %8 = vector.broadcast %7 : vector<1x128xf32> to vector<512x128xf32>
    %9 = arith.addf %6, %8 : vector<512x128xf32>
    %cst_5 = arith.constant 0.000000e+00 : f32
    %10 = vector.broadcast %cst_5 : f32 to vector<512x128xf32>
    %11 = arith.maximumf %9, %10 : vector<512x128xf32>
    %12 = arith.truncf %11 : vector<512x128xf32> to vector<512x128xbf16>
    %c0_6 = arith.constant 0 : index
    %c0_7 = arith.constant 0 : index
    %13 = vector.load %arg4[%c0_6, %c0_7] : memref<512x128xbf16, #tpu.memory_space<vmem>>, vector<512x128xbf16>
    tpu.vector_store %arg4[%c0_6, %c0_7], %12 {strides = array<i32>} : memref<512x128xbf16, #tpu.memory_space<vmem>>, vector<512x128xbf16>,
    return
  }
  func.func @transform_0(%arg0: i32) -> (i32, i32) {
    %c0_i32 = arith.constant 0 : i32
    %c0_i32_0 = arith.constant 0 : i32
    return %arg0, %c0_i32 : i32, i32
  }
  func.func @transform_1(%arg0: i32) -> (i32, i32) {
    %c0_i32 = arith.constant 0 : i32
    %c0_i32_0 = arith.constant 0 : i32
    %c0_i32_1 = arith.constant 0 : i32
    return %c0_i32, %c0_i32_0 : i32, i32
  }
  func.func @transform_2(%arg0: i32) -> (i32, i32) {
    %c0_i32 = arith.constant 0 : i32
    %c0_i32_0 = arith.constant 0 : i32
    %c0_i32_1 = arith.constant 0 : i32
    return %c0_i32, %c0_i32_0 : i32, i32
  }
  func.func @transform_3(%arg0: i32) -> (i32, i32) {
    %c0_i32 = arith.constant 0 : i32
    %c0_i32_0 = arith.constant 0 : i32
    return %arg0, %c0_i32 : i32, i32
  }
}

module attributes {stable_mosaic.version = 11 : i64} {
  func.func @kernel(%arg0: i32, %arg1: memref<16x128xbf16, #tpu.memory_space<vmem>>, %arg2: memref<128x128xbf16, #tpu.memory_space<vmem>>, %arg3: memref<2x128xbf16, #tpu.memory_space<vmem>>, %arg4: memref<2x128xf32, #tpu.memory_space<vmem>>, %arg5: memref<16x128xbf16, #tpu.memory_space<vmem>>) attributes {dimension_semantics = [#tpu.dimension_semantics<parallel>], iteration_bounds = array<i64: 1>, scalar_prefetch = 0 : i64, scratch_operands = 0 : i64, tpu.core_type = #tpu.core_type<tc>, window_params = [{transform_indices = @transform_0, window_bounds = array<i64: 16, 128>}, {pipeline_mode = #tpu.pipeline_mode<synchronous>, transform_indices = @transform_1, window_bounds = array<i64: 128, 128>}, {pipeline_mode = #tpu.pipeline_mode<synchronous>, transform_indices = @transform_2, window_bounds = array<i64: 2, 128>}, {pipeline_mode = #tpu.pipeline_mode<synchronous>, transform_indices = @transform_3, window_bounds = array<i64: 2, 128>}, {transform_indices = @transform_4, window_bounds = array<i64: 16, 128>}]} {
    %c0 = arith.constant 0 : index
    %c0_0 = arith.constant 0 : index
    %0 = vector.load %arg1[%c0, %c0_0] : memref<16x128xbf16, #tpu.memory_space<vmem>>, vector<16x128xbf16>
    %c0_1 = arith.constant 0 : index
    %c0_2 = arith.constant 0 : index
    %1 = vector.load %arg3[%c0_1, %c0_2] : memref<2x128xbf16, #tpu.memory_space<vmem>>, vector<2x128xbf16>
    %2 = vector.extract_strided_slice %1 {offsets = [0, 0], sizes = [1, 128], strides = [1, 1]} : vector<2x128xbf16> to vector<1x128xbf16>
    %3 = vector.broadcast %2 : vector<1x128xbf16> to vector<16x128xbf16>
    %4 = arith.mulf %0, %3 : vector<16x128xbf16>
    %5 = vector.extract_strided_slice %1 {offsets = [1, 0], sizes = [1, 128], strides = [1, 1]} : vector<2x128xbf16> to vector<1x128xbf16>
    %6 = vector.broadcast %5 : vector<1x128xbf16> to vector<16x128xbf16>
    %7 = arith.addf %4, %6 : vector<16x128xbf16>
    %cst = arith.constant 0.000000e+00 : bf16
    %8 = vector.broadcast %cst : bf16 to vector<16x128xbf16>
    %9 = arith.maximumf %7, %8 : vector<16x128xbf16>
    %c0_3 = arith.constant 0 : index
    %c0_4 = arith.constant 0 : index
    %10 = vector.load %arg2[%c0_3, %c0_4] : memref<128x128xbf16, #tpu.memory_space<vmem>>, vector<128x128xbf16>
    %cst_5 = arith.constant dense<0.000000e+00> : vector<16x128xf32>
    %11 = tpu.matmul %9, %10, %cst_5 {dimension_numbers = #tpu.dot_dimension_numbers<[1], [0], [0], [1], [0, 0, 1, 1], [], []>} : vector<16x128xbf16>, vector<128x128xbf16>, vector<16x128xf32> -> vector<16x128xf32>
    %c0_6 = arith.constant 0 : index
    %c0_7 = arith.constant 0 : index
    %12 = vector.load %arg4[%c0_6, %c0_7] : memref<2x128xf32, #tpu.memory_space<vmem>>, vector<2x128xf32>
    %13 = vector.extract_strided_slice %12 {offsets = [0, 0], sizes = [1, 128], strides = [1, 1]} : vector<2x128xf32> to vector<1x128xf32>
    %14 = vector.broadcast %13 : vector<1x128xf32> to vector<16x128xf32>
    %15 = arith.mulf %11, %14 : vector<16x128xf32>
    %16 = vector.extract_strided_slice %12 {offsets = [1, 0], sizes = [1, 128], strides = [1, 1]} : vector<2x128xf32> to vector<1x128xf32>
    %17 = vector.broadcast %16 : vector<1x128xf32> to vector<16x128xf32>
    %18 = arith.addf %15, %17 : vector<16x128xf32>
    %cst_8 = arith.constant 0.000000e+00 : f32
    %19 = vector.broadcast %cst_8 : f32 to vector<16x128xf32>
    %20 = arith.maximumf %18, %19 : vector<16x128xf32>
    %21 = arith.truncf %20 : vector<16x128xf32> to vector<16x128xbf16>
    %c0_9 = arith.constant 0 : index
    %c0_10 = arith.constant 0 : index
    %22 = vector.load %arg5[%c0_9, %c0_10] : memref<16x128xbf16, #tpu.memory_space<vmem>>, vector<16x128xbf16>
    tpu.vector_store %arg5[%c0_9, %c0_10], %21 {strides = array<i32>} : memref<16x128xbf16, #tpu.memory_space<vmem>>, vector<16x128xbf16>,
    return
  }
  func.func @transform_0(%arg0: i32) -> (i32, i32) {
    %c0_i32 = arith.constant 0 : i32
    %c0_i32_0 = arith.constant 0 : i32
    return %arg0, %c0_i32 : i32, i32
  }
  func.func @transform_1(%arg0: i32) -> (i32, i32) {
    %c0_i32 = arith.constant 0 : i32
    %c0_i32_0 = arith.constant 0 : i32
    %c0_i32_1 = arith.constant 0 : i32
    return %c0_i32, %c0_i32_0 : i32, i32
  }
  func.func @transform_2(%arg0: i32) -> (i32, i32) {
    %c0_i32 = arith.constant 0 : i32
    %c0_i32_0 = arith.constant 0 : i32
    %c0_i32_1 = arith.constant 0 : i32
    return %c0_i32, %c0_i32_0 : i32, i32
  }
  func.func @transform_3(%arg0: i32) -> (i32, i32) {
    %c0_i32 = arith.constant 0 : i32
    %c0_i32_0 = arith.constant 0 : i32
    %c0_i32_1 = arith.constant 0 : i32
    return %c0_i32, %c0_i32_0 : i32, i32
  }
  func.func @transform_4(%arg0: i32) -> (i32, i32) {
    %c0_i32 = arith.constant 0 : i32
    %c0_i32_0 = arith.constant 0 : i32
    return %arg0, %c0_i32 : i32, i32
  }
}

module attributes {stable_mosaic.version = 11 : i64} {
  func.func @kernel(%arg0: i32, %arg1: memref<16x1152xbf16, #tpu.memory_space<vmem>>, %arg2: memref<1152x128xbf16, #tpu.memory_space<vmem>>, %arg3: memref<16x128xbf16, #tpu.memory_space<vmem>>) attributes {dimension_semantics = [#tpu.dimension_semantics<parallel>], iteration_bounds = array<i64: 1>, scalar_prefetch = 0 : i64, scratch_operands = 0 : i64, tpu.core_type = #tpu.core_type<tc>, window_params = [{transform_indices = @transform_0, window_bounds = array<i64: 16, 1152>}, {pipeline_mode = #tpu.pipeline_mode<synchronous>, transform_indices = @transform_1, window_bounds = array<i64: 1152, 128>}, {transform_indices = @transform_2, window_bounds = array<i64: 16, 128>}]} {
    %c0 = arith.constant 0 : index
    %c0_0 = arith.constant 0 : index
    %0 = vector.load %arg1[%c0, %c0_0] : memref<16x1152xbf16, #tpu.memory_space<vmem>>, vector<16x1152xbf16>
    %c0_1 = arith.constant 0 : index
    %c0_2 = arith.constant 0 : index
    %1 = vector.load %arg2[%c0_1, %c0_2] : memref<1152x128xbf16, #tpu.memory_space<vmem>>, vector<1152x128xbf16>
    %cst = arith.constant dense<0.000000e+00> : vector<16x128xf32>
    %2 = tpu.matmul %0, %1, %cst {dimension_numbers = #tpu.dot_dimension_numbers<[1], [0], [0], [1], [0, 0, 1, 1], [], []>} : vector<16x1152xbf16>, vector<1152x128xbf16>, vector<16x128xf32> -> vector<16x128xf32>
    %3 = arith.truncf %2 : vector<16x128xf32> to vector<16x128xbf16>
    %c0_3 = arith.constant 0 : index
    %c0_4 = arith.constant 0 : index
    %4 = vector.load %arg3[%c0_3, %c0_4] : memref<16x128xbf16, #tpu.memory_space<vmem>>, vector<16x128xbf16>
    tpu.vector_store %arg3[%c0_3, %c0_4], %3 {strides = array<i32>} : memref<16x128xbf16, #tpu.memory_space<vmem>>, vector<16x128xbf16>,
    return
  }
  func.func @transform_0(%arg0: i32) -> (i32, i32) {
    %c0_i32 = arith.constant 0 : i32
    %c0_i32_0 = arith.constant 0 : i32
    return %arg0, %c0_i32 : i32, i32
  }
  func.func @transform_1(%arg0: i32) -> (i32, i32) {
    %c0_i32 = arith.constant 0 : i32
    %c0_i32_0 = arith.constant 0 : i32
    %c0_i32_1 = arith.constant 0 : i32
    return %c0_i32, %c0_i32_0 : i32, i32
  }
  func.func @transform_2(%arg0: i32) -> (i32, i32) {
    %c0_i32 = arith.constant 0 : i32
    %c0_i32_0 = arith.constant 0 : i32
    return %arg0, %c0_i32 : i32, i32
  }
}

module attributes {stable_mosaic.version = 11 : i64} {
  func.func @kernel(%arg0: i32, %arg1: memref<16x384xbf16, #tpu.memory_space<vmem>>, %arg2: memref<384x128xbf16, #tpu.memory_space<vmem>>, %arg3: memref<16x128xbf16, #tpu.memory_space<vmem>>) attributes {dimension_semantics = [#tpu.dimension_semantics<parallel>], iteration_bounds = array<i64: 1>, scalar_prefetch = 0 : i64, scratch_operands = 0 : i64, tpu.core_type = #tpu.core_type<tc>, window_params = [{transform_indices = @transform_0, window_bounds = array<i64: 16, 384>}, {pipeline_mode = #tpu.pipeline_mode<synchronous>, transform_indices = @transform_1, window_bounds = array<i64: 384, 128>}, {transform_indices = @transform_2, window_bounds = array<i64: 16, 128>}]} {
    %c0 = arith.constant 0 : index
    %c0_0 = arith.constant 0 : index
    %0 = vector.load %arg1[%c0, %c0_0] : memref<16x384xbf16, #tpu.memory_space<vmem>>, vector<16x384xbf16>
    %c0_1 = arith.constant 0 : index
    %c0_2 = arith.constant 0 : index
    %1 = vector.load %arg2[%c0_1, %c0_2] : memref<384x128xbf16, #tpu.memory_space<vmem>>, vector<384x128xbf16>
    %cst = arith.constant dense<0.000000e+00> : vector<16x128xf32>
    %2 = tpu.matmul %0, %1, %cst {dimension_numbers = #tpu.dot_dimension_numbers<[1], [0], [0], [1], [0, 0, 1, 1], [], []>} : vector<16x384xbf16>, vector<384x128xbf16>, vector<16x128xf32> -> vector<16x128xf32>
    %3 = arith.truncf %2 : vector<16x128xf32> to vector<16x128xbf16>
    %c0_3 = arith.constant 0 : index
    %c0_4 = arith.constant 0 : index
    %4 = vector.load %arg3[%c0_3, %c0_4] : memref<16x128xbf16, #tpu.memory_space<vmem>>, vector<16x128xbf16>
    tpu.vector_store %arg3[%c0_3, %c0_4], %3 {strides = array<i32>} : memref<16x128xbf16, #tpu.memory_space<vmem>>, vector<16x128xbf16>,
    return
  }
  func.func @transform_0(%arg0: i32) -> (i32, i32) {
    %c0_i32 = arith.constant 0 : i32
    %c0_i32_0 = arith.constant 0 : i32
    return %arg0, %c0_i32 : i32, i32
  }
  func.func @transform_1(%arg0: i32) -> (i32, i32) {
    %c0_i32 = arith.constant 0 : i32
    %c0_i32_0 = arith.constant 0 : i32
    %c0_i32_1 = arith.constant 0 : i32
    return %c0_i32, %c0_i32_0 : i32, i32
  }
  func.func @transform_2(%arg0: i32) -> (i32, i32) {
    %c0_i32 = arith.constant 0 : i32
    %c0_i32_0 = arith.constant 0 : i32
    return %arg0, %c0_i32 : i32, i32
  }
}

module attributes {stable_mosaic.version = 11 : i64} {
  func.func @kernel(%arg0: i32, %arg1: memref<16x256xbf16, #tpu.memory_space<vmem>>, %arg2: memref<256x128xbf16, #tpu.memory_space<vmem>>, %arg3: memref<2x256xbf16, #tpu.memory_space<vmem>>, %arg4: memref<16x128xbf16, #tpu.memory_space<vmem>>) attributes {dimension_semantics = [#tpu.dimension_semantics<parallel>], iteration_bounds = array<i64: 1>, scalar_prefetch = 0 : i64, scratch_operands = 0 : i64, tpu.core_type = #tpu.core_type<tc>, window_params = [{transform_indices = @transform_0, window_bounds = array<i64: 16, 256>}, {pipeline_mode = #tpu.pipeline_mode<synchronous>, transform_indices = @transform_1, window_bounds = array<i64: 256, 128>}, {pipeline_mode = #tpu.pipeline_mode<synchronous>, transform_indices = @transform_2, window_bounds = array<i64: 2, 256>}, {transform_indices = @transform_3, window_bounds = array<i64: 16, 128>}]} {
    %c0 = arith.constant 0 : index
    %c0_0 = arith.constant 0 : index
    %0 = vector.load %arg1[%c0, %c0_0] : memref<16x256xbf16, #tpu.memory_space<vmem>>, vector<16x256xbf16>
    %c0_1 = arith.constant 0 : index
    %c0_2 = arith.constant 0 : index
    %1 = vector.load %arg3[%c0_1, %c0_2] : memref<2x256xbf16, #tpu.memory_space<vmem>>, vector<2x256xbf16>
    %2 = vector.extract_strided_slice %1 {offsets = [0, 0], sizes = [1, 256], strides = [1, 1]} : vector<2x256xbf16> to vector<1x256xbf16>
    %3 = vector.broadcast %2 : vector<1x256xbf16> to vector<16x256xbf16>
    %4 = arith.mulf %0, %3 : vector<16x256xbf16>
    %5 = vector.extract_strided_slice %1 {offsets = [1, 0], sizes = [1, 256], strides = [1, 1]} : vector<2x256xbf16> to vector<1x256xbf16>
    %6 = vector.broadcast %5 : vector<1x256xbf16> to vector<16x256xbf16>
    %7 = arith.addf %4, %6 : vector<16x256xbf16>
    %cst = arith.constant 0.000000e+00 : bf16
    %8 = vector.broadcast %cst : bf16 to vector<16x256xbf16>
    %9 = arith.maximumf %7, %8 : vector<16x256xbf16>
    %c0_3 = arith.constant 0 : index
    %c0_4 = arith.constant 0 : index
    %10 = vector.load %arg2[%c0_3, %c0_4] : memref<256x128xbf16, #tpu.memory_space<vmem>>, vector<256x128xbf16>
    %cst_5 = arith.constant dense<0.000000e+00> : vector<16x128xf32>
    %11 = tpu.matmul %9, %10, %cst_5 {dimension_numbers = #tpu.dot_dimension_numbers<[1], [0], [0], [1], [0, 0, 1, 1], [], []>} : vector<16x256xbf16>, vector<256x128xbf16>, vector<16x128xf32> -> vector<16x128xf32>
    %12 = arith.truncf %11 : vector<16x128xf32> to vector<16x128xbf16>
    %c0_6 = arith.constant 0 : index
    %c0_7 = arith.constant 0 : index
    %13 = vector.load %arg4[%c0_6, %c0_7] : memref<16x128xbf16, #tpu.memory_space<vmem>>, vector<16x128xbf16>
    tpu.vector_store %arg4[%c0_6, %c0_7], %12 {strides = array<i32>} : memref<16x128xbf16, #tpu.memory_space<vmem>>, vector<16x128xbf16>,
    return
  }
  func.func @transform_0(%arg0: i32) -> (i32, i32) {
    %c0_i32 = arith.constant 0 : i32
    %c0_i32_0 = arith.constant 0 : i32
    return %arg0, %c0_i32 : i32, i32
  }
  func.func @transform_1(%arg0: i32) -> (i32, i32) {
    %c0_i32 = arith.constant 0 : i32
    %c0_i32_0 = arith.constant 0 : i32
    %c0_i32_1 = arith.constant 0 : i32
    return %c0_i32, %c0_i32_0 : i32, i32
  }
  func.func @transform_2(%arg0: i32) -> (i32, i32) {
    %c0_i32 = arith.constant 0 : i32
    %c0_i32_0 = arith.constant 0 : i32
    %c0_i32_1 = arith.constant 0 : i32
    return %c0_i32, %c0_i32_0 : i32, i32
  }
  func.func @transform_3(%arg0: i32) -> (i32, i32) {
    %c0_i32 = arith.constant 0 : i32
    %c0_i32_0 = arith.constant 0 : i32
    return %arg0, %c0_i32 : i32, i32
  }
}

</mosaic_0001>

<bundles_post_ra>
// kernel: sst_emotion_net_forward.21
= control target key start
LH: loop header
LB: loop body
LE: loop exit
PB: predicated region body
PF: predicated region fallthrough
CT: control target
= control target key end

     0   :  { %s1702_s9 = smov 0   ;;  %s1829_s0 = inlined_call_operand.vmem [shape: bf16[2048,16], index: 0, kind: input, shape index: {}]   ;;  %s1830_s1 = inlined_call_operand.vmem [shape: bf16[16,128], index: 1, kind: input, shape index: {}]   ;;  %s1831_s2 = inlined_call_operand.vmem [shape: bf16[2048,128], index: 2, kind: output, shape index: {}]  }
   0x1 LB: > { %s1142_s10 = sadd.s32 4294967295, %s1685_s9   ;;  %p1146_p0 = scmp.ge.s32.totalorder %s1685_s9, 1  ;;  %s1685_s9 = sphi %s1702_s9, %s12_s9  }
   0x2   : > { %p113_p1 = scmp.lt.s32.totalorder %s1685_s9, 5 }
   0x4   : > { %p114_p2 = pnand %p1146_p0, %p113_p1 }
   0x5   : > { %v1646_v0 = vld [vmem:[%s1830_s1] sm:$0xff] (!%p114_p2)   ;;  %s1147_s13 = sshll.u32 (!%p114_p2), %s1142_s10, 6  ;;  %vm380_vm0 = vcmask (!%p114_p2), 130048  }
   0x6   : > { %117 = sbr.rel (%p114_p2) target bundleno = 293 (0x125), region = 28  ;;  %p136_p3 = scmp.lt.s32.totalorder (!%p114_p2), %s1147_s13, 255  ;;  %1570 = vmatprep.subr.bf16.mxu0 (!%p114_p2), %v1646_v0  ;;  %1636 = vmatprep.subr.bf16.mxu1 (!%p114_p2), %v1646_v0 }
   0x7   : > { %1571 = vmatpush3.bf16.msra.mxu0 (!%p114_p2), %v1646_v0  ;;  %1637 = vmatpush3.bf16.msra.mxu1 (!%p114_p2), %v1646_v0 }
   0xd   : > { %s1833_s13 = smov (!%p136_p3, %s1147_s13), 255 }
   0xe   : > { %s1148_s14 = sshll.u32 %s1833_s13, 2 }
   0xf   : > { %s1721_s17 = scalar_lea.vmem %s1829_s0, %s1148_s14  ;;  %s1792_s20 = scalar_lea.vmem %s1831_s2, %s1148_s14 }
  0x10   : > { %v1647_v1 = vld [vmem:[%s1721_s17] sm:$0xff]   ;;  %v1649_v3 = vld [vmem:[%s1721_s17 + $0x8] sm:$0xff]   ;;  %v1651_v5 = vld [vmem:[%s1721_s17 + $0x10] sm:$0xff]  }
  0x11   : > { %v1648_v2 = vld [vmem:[%s1721_s17 + $0x80] sm:$0xff]   ;;  %1572 = vmatprep.mubr.msk.bf16.mxu0 %vm380_vm0, %v1647_v1  ;;  %v1650_v4 = vld [vmem:[%s1721_s17 + $0x88] sm:$0xff]   ;;  %v1652_v6 = vld [vmem:[%s1721_s17 + $0x90] sm:$0xff]  }
  0x12   : > { %1604 = vmatprep.mubr.msk.bf16.mxu1 %vm380_vm0, %v1648_v2  ;;  %1573 = vmatmul.mubr.msk.bf16.vlgmr.msra.gmra.mrb[0].mxu0 %vm380_vm0, %v1649_v3  ;;  %v1653_v7 = vld [vmem:[%s1721_s17 + $0x18] sm:$0xff]   ;;  %v1655_v9 = vld [vmem:[%s1721_s17 + $0x20] sm:$0xff]   ;;  %v1657_v11 = vld [vmem:[%s1721_s17 + $0x28] sm:$0xff]  }
  0x13   : > { %1605 = vmatmul.mubr.msk.bf16.vlgmr.msra.gmra.mrb[0].mxu1 %vm380_vm0, %v1650_v4  ;;  %1576 = vmatprep.mubr.msk.bf16.mxu0 %vm380_vm0, %v1651_v5  ;;  %v1654_v8 = vld [vmem:[%s1721_s17 + $0x98] sm:$0xff]   ;;  %v1656_v10 = vld [vmem:[%s1721_s17 + $0xa0] sm:$0xff]   ;;  %v1658_v12 = vld [vmem:[%s1721_s17 + $0xa8] sm:$0xff]  }
  0x14   : > { %1608 = vmatprep.mubr.msk.bf16.mxu1 %vm380_vm0, %v1652_v6  ;;  %v1659_v13 = vld [vmem:[%s1721_s17 + $0x30] sm:$0xff]   ;;  %v1661_v15 = vld [vmem:[%s1721_s17 + $0x38] sm:$0xff]   ;;  %v1663_v17 = vld [vmem:[%s1721_s17 + $0x40] sm:$0xff]  }
  0x15   : > { %v1660_v14 = vld [vmem:[%s1721_s17 + $0xb0] sm:$0xff]   ;;  %v1662_v16 = vld [vmem:[%s1721_s17 + $0xb8] sm:$0xff]   ;;  %v1664_v18 = vld [vmem:[%s1721_s17 + $0xc0] sm:$0xff]  }
  0x16   : > { %v1665_v19 = vld [vmem:[%s1721_s17 + $0x48] sm:$0xff]   ;;  %v1667_v21 = vld [vmem:[%s1721_s17 + $0x50] sm:$0xff]   ;;  %v1669_v23 = vld [vmem:[%s1721_s17 + $0x58] sm:$0xff]  }
  0x17   : > { %v1666_v20 = vld [vmem:[%s1721_s17 + $0xc8] sm:$0xff]   ;;  %v1668_v22 = vld [vmem:[%s1721_s17 + $0xd0] sm:$0xff]   ;;  %v1670_v24 = vld [vmem:[%s1721_s17 + $0xd8] sm:$0xff]  }
  0x18   : > { %v1671_v25 = vld [vmem:[%s1721_s17 + $0x60] sm:$0xff]   ;;  %v1673_v27 = vld [vmem:[%s1721_s17 + $0x68] sm:$0xff]   ;;  %v1675_v29 = vld [vmem:[%s1721_s17 + $0x70] sm:$0xff]  }
  0x19   : > { %v1672_v26 = vld [vmem:[%s1721_s17 + $0xe0] sm:$0xff]   ;;  %v1674_v28 = vld [vmem:[%s1721_s17 + $0xe8] sm:$0xff]   ;;  %v1676_v30 = vld [vmem:[%s1721_s17 + $0xf0] sm:$0xff]  }
  0x1a   : > { %1577 = vmatmul.mubr.msk.bf16.gmra.mrb[4].mxu0 %vm380_vm0, %v1653_v7  ;;  %v1677_v31 = vld [vmem:[%s1721_s17 + $0x78] sm:$0xff]  }
  0x1b   : > { %1609 = vmatmul.mubr.msk.bf16.gmra.mrb[4].mxu1 %vm380_vm0, %v1654_v8  ;;  %1580 = vmatprep.mubr.msk.bf16.mxu0 %vm380_vm0, %v1655_v9  ;;  %v1678_v32 = vld [vmem:[%s1721_s17 + $0xf8] sm:$0xff]  }
  0x1c   : > { %1612 = vmatprep.mubr.msk.bf16.mxu1 %vm380_vm0, %v1656_v10 }
  0x22   : > { %1581 = vmatmul.mubr.msk.bf16.gmra.mrb[8].mxu0 %vm380_vm0, %v1657_v11 }
  0x23   : > { %1613 = vmatmul.mubr.msk.bf16.gmra.mrb[8].mxu1 %vm380_vm0, %v1658_v12  ;;  %1584 = vmatprep.mubr.msk.bf16.mxu0 %vm380_vm0, %v1659_v13 }
  0x24   : > { %1616 = vmatprep.mubr.msk.bf16.mxu1 %vm380_vm0, %v1660_v14 }
  0x2a   : > { %1585 = vmatmul.mubr.msk.bf16.gmra.mrb[12].mxu0 %vm380_vm0, %v1661_v15 }
  0x2b   : > { %1617 = vmatmul.mubr.msk.bf16.gmra.mrb[12].mxu1 %vm380_vm0, %v1662_v16  ;;  %1588 = vmatprep.mubr.msk.bf16.mxu0 %vm380_vm0, %v1663_v17 }
  0x2c   : > { %1620 = vmatprep.mubr.msk.bf16.mxu1 %vm380_vm0, %v1664_v18 }
  0x32   : > { %1589 = vmatmul.mubr.msk.bf16.gmra.mrb[16].mxu0 %vm380_vm0, %v1665_v19 }
  0x33   : > { %1621 = vmatmul.mubr.msk.bf16.gmra.mrb[16].mxu1 %vm380_vm0, %v1666_v20  ;;  %1592 = vmatprep.mubr.msk.bf16.mxu0 %vm380_vm0, %v1667_v21 }
  0x34   : > { %1624 = vmatprep.mubr.msk.bf16.mxu1 %vm380_vm0, %v1668_v22 }
  0x3a   : > { %1593 = vmatmul.mubr.msk.bf16.gmra.mrb[20].mxu0 %vm380_vm0, %v1669_v23 }
  0x3b   : > { %1625 = vmatmul.mubr.msk.bf16.gmra.mrb[20].mxu1 %vm380_vm0, %v1670_v24  ;;  %1596 = vmatprep.mubr.msk.bf16.mxu0 %vm380_vm0, %v1671_v25 }
  0x3c   : > { %1628 = vmatprep.mubr.msk.bf16.mxu1 %vm380_vm0, %v1672_v26 }
  0x42   : > { %1597 = vmatmul.mubr.msk.bf16.gmra.mrb[24].mxu0 %vm380_vm0, %v1673_v27 }
  0x43   : > { %1629 = vmatmul.mubr.msk.bf16.gmra.mrb[24].mxu1 %vm380_vm0, %v1674_v28  ;;  %1600 = vmatprep.mubr.msk.bf16.mxu0 %vm380_vm0, %v1675_v29 }
  0x44   : > { %1632 = vmatprep.mubr.msk.bf16.mxu1 %vm380_vm0, %v1676_v30 }
  0x4a   : > { %1601 = vmatmul.mubr.msk.bf16.gmra.mrb[28].mxu0 %vm380_vm0, %v1677_v31 }
  0x4b   : > { %1633 = vmatmul.mubr.msk.bf16.gmra.mrb[28].mxu1 %vm380_vm0, %v1678_v32 }
  0xe5   : > { %v1574_v33 = vpop.f32.mrb[0].mxu0 }
  0xe6   : > { %v1606_v34 = vpop.f32.mrb[0].mxu1  ;;  %v511_v35 = vpop.f32.mrb[1].mxu0 }
  0xe7   : > { %v639_v36 = vpop.f32.mrb[1].mxu1  ;;  %v1575_v37 = vpop.f32.mrb[2].mxu0 }
  0xe8   : > { %v1354_v38 = vpack.c.bf16 %v1575_v37, %v1574_v33  ;;  %v1607_v39 = vpop.f32.mrb[2].mxu1  ;;  %v514_v40 = vpop.f32.mrb[3].mxu0 }
  0xe9   : > { %v1434_v41 = vpack.c.bf16 %v1607_v39, %v1606_v34  ;;  %v1349_v42 = vpack.c.bf16 %v514_v40, %v511_v35  ;;  %v642_v43 = vpop.f32.mrb[3].mxu1 }
  0xea   : > { %1506 = vst [vmem:[%s1792_s20 + $0x8] sm:$0xff] %v1354_v38   ;;  %v1429_v44 = vpack.c.bf16 %v642_v43, %v639_v36 }
  0xeb   : > { %1522 = vst [vmem:[%s1792_s20 + $0x88] sm:$0xff] %v1434_v41   ;;  %1350 = vst [vmem:[%s1792_s20] sm:$0xff] %v1349_v42  }
  0xec   : > { %1521 = vst [vmem:[%s1792_s20 + $0x80] sm:$0xff] %v1429_v44  }
  0xed   : > { %v1578_v45 = vpop.f32.mrb[4].mxu0 }
  0xee   : > { %v1610_v46 = vpop.f32.mrb[4].mxu1  ;;  %v527_v47 = vpop.f32.mrb[5].mxu0 }
  0xef   : > { %v655_v48 = vpop.f32.mrb[5].mxu1  ;;  %v1579_v49 = vpop.f32.mrb[6].mxu0 }
  0xf0   : > { %v1364_v50 = vpack.c.bf16 %v1579_v49, %v1578_v45  ;;  %v1611_v51 = vpop.f32.mrb[6].mxu1  ;;  %v530_v52 = vpop.f32.mrb[7].mxu0 }
  0xf1   : > { %v1444_v53 = vpack.c.bf16 %v1611_v51, %v1610_v46  ;;  %v1359_v54 = vpack.c.bf16 %v530_v52, %v527_v47  ;;  %v658_v55 = vpop.f32.mrb[7].mxu1 }
  0xf2   : > { %1508 = vst [vmem:[%s1792_s20 + $0x18] sm:$0xff] %v1364_v50   ;;  %v1439_v56 = vpack.c.bf16 %v658_v55, %v655_v48 }
  0xf3   : > { %1524 = vst [vmem:[%s1792_s20 + $0x98] sm:$0xff] %v1444_v53   ;;  %1507 = vst [vmem:[%s1792_s20 + $0x10] sm:$0xff] %v1359_v54  }
  0xf4   : > { %1523 = vst [vmem:[%s1792_s20 + $0x90] sm:$0xff] %v1439_v56  }
  0xf5   : > { %v1582_v57 = vpop.f32.mrb[8].mxu0 }
  0xf6   : > { %v1614_v58 = vpop.f32.mrb[8].mxu1  ;;  %v543_v59 = vpop.f32.mrb[9].mxu0 }
  0xf7   : > { %v671_v60 = vpop.f32.mrb[9].mxu1  ;;  %v1583_v61 = vpop.f32.mrb[10].mxu0 }
  0xf8   : > { %v1374_v62 = vpack.c.bf16 %v1583_v61, %v1582_v57  ;;  %v1615_v63 = vpop.f32.mrb[10].mxu1  ;;  %v546_v0 = vpop.f32.mrb[11].mxu0 }
  0xf9   : > { %v1454_v1 = vpack.c.bf16 %v1615_v63, %v1614_v58  ;;  %v1369_v2 = vpack.c.bf16 %v546_v0, %v543_v59  ;;  %v674_v3 = vpop.f32.mrb[11].mxu1 }
  0xfa   : > { %1510 = vst [vmem:[%s1792_s20 + $0x28] sm:$0xff] %v1374_v62   ;;  %v1449_v4 = vpack.c.bf16 %v674_v3, %v671_v60 }
  0xfb   : > { %1526 = vst [vmem:[%s1792_s20 + $0xa8] sm:$0xff] %v1454_v1   ;;  %1509 = vst [vmem:[%s1792_s20 + $0x20] sm:$0xff] %v1369_v2  }
  0xfc   : > { %1525 = vst [vmem:[%s1792_s20 + $0xa0] sm:$0xff] %v1449_v4  }
  0xfd   : > { %v1586_v5 = vpop.f32.mrb[12].mxu0 }
  0xfe   : > { %v1618_v6 = vpop.f32.mrb[12].mxu1  ;;  %v559_v7 = vpop.f32.mrb[13].mxu0 }
  0xff   : > { %v687_v8 = vpop.f32.mrb[13].mxu1  ;;  %v1587_v9 = vpop.f32.mrb[14].mxu0 }
 0x100   : > { %v1384_v10 = vpack.c.bf16 %v1587_v9, %v1586_v5  ;;  %v1619_v11 = vpop.f32.mrb[14].mxu1  ;;  %v562_v12 = vpop.f32.mrb[15].mxu0 }
 0x101   : > { %v1464_v13 = vpack.c.bf16 %v1619_v11, %v1618_v6  ;;  %v1379_v14 = vpack.c.bf16 %v562_v12, %v559_v7  ;;  %v690_v15 = vpop.f32.mrb[15].mxu1 }
 0x102   : > { %1512 = vst [vmem:[%s1792_s20 + $0x38] sm:$0xff] %v1384_v10   ;;  %v1459_v16 = vpack.c.bf16 %v690_v15, %v687_v8 }
 0x103   : > { %1528 = vst [vmem:[%s1792_s20 + $0xb8] sm:$0xff] %v1464_v13   ;;  %1511 = vst [vmem:[%s1792_s20 + $0x30] sm:$0xff] %v1379_v14  }
 0x104   : > { %1527 = vst [vmem:[%s1792_s20 + $0xb0] sm:$0xff] %v1459_v16  }
 0x105   : > { %v1590_v17 = vpop.f32.mrb[16].mxu0 }
 0x106   : > { %v1622_v18 = vpop.f32.mrb[16].mxu1  ;;  %v575_v19 = vpop.f32.mrb[17].mxu0 }
 0x107   : > { %v703_v20 = vpop.f32.mrb[17].mxu1  ;;  %v1591_v21 = vpop.f32.mrb[18].mxu0 }
 0x108   : > { %v1394_v22 = vpack.c.bf16 %v1591_v21, %v1590_v17  ;;  %v1623_v23 = vpop.f32.mrb[18].mxu1  ;;  %v578_v24 = vpop.f32.mrb[19].mxu0 }
 0x109   : > { %v1474_v25 = vpack.c.bf16 %v1623_v23, %v1622_v18  ;;  %v1389_v26 = vpack.c.bf16 %v578_v24, %v575_v19  ;;  %v706_v27 = vpop.f32.mrb[19].mxu1 }
 0x10a   : > { %1514 = vst [vmem:[%s1792_s20 + $0x48] sm:$0xff] %v1394_v22   ;;  %v1469_v28 = vpack.c.bf16 %v706_v27, %v703_v20 }
 0x10b   : > { %1530 = vst [vmem:[%s1792_s20 + $0xc8] sm:$0xff] %v1474_v25   ;;  %1513 = vst [vmem:[%s1792_s20 + $0x40] sm:$0xff] %v1389_v26  }
 0x10c   : > { %1529 = vst [vmem:[%s1792_s20 + $0xc0] sm:$0xff] %v1469_v28  }
 0x10d   : > { %v1594_v29 = vpop.f32.mrb[20].mxu0 }
 0x10e   : > { %v1626_v30 = vpop.f32.mrb[20].mxu1  ;;  %v591_v31 = vpop.f32.mrb[21].mxu0 }
 0x10f   : > { %v719_v32 = vpop.f32.mrb[21].mxu1  ;;  %v1595_v33 = vpop.f32.mrb[22].mxu0 }
 0x110   : > { %v1404_v34 = vpack.c.bf16 %v1595_v33, %v1594_v29  ;;  %v1627_v35 = vpop.f32.mrb[22].mxu1  ;;  %v594_v36 = vpop.f32.mrb[23].mxu0 }
 0x111   : > { %v1484_v37 = vpack.c.bf16 %v1627_v35, %v1626_v30  ;;  %v1399_v38 = vpack.c.bf16 %v594_v36, %v591_v31  ;;  %v722_v39 = vpop.f32.mrb[23].mxu1 }
 0x112   : > { %1516 = vst [vmem:[%s1792_s20 + $0x58] sm:$0xff] %v1404_v34   ;;  %v1479_v40 = vpack.c.bf16 %v722_v39, %v719_v32 }
 0x113   : > { %1532 = vst [vmem:[%s1792_s20 + $0xd8] sm:$0xff] %v1484_v37   ;;  %1515 = vst [vmem:[%s1792_s20 + $0x50] sm:$0xff] %v1399_v38  }
 0x114   : > { %1531 = vst [vmem:[%s1792_s20 + $0xd0] sm:$0xff] %v1479_v40  }
 0x115   : > { %v1598_v41 = vpop.f32.mrb[24].mxu0 }
 0x116   : > { %v1630_v42 = vpop.f32.mrb[24].mxu1  ;;  %v607_v43 = vpop.f32.mrb[25].mxu0 }
 0x117   : > { %v735_v44 = vpop.f32.mrb[25].mxu1  ;;  %v1599_v45 = vpop.f32.mrb[26].mxu0 }
 0x118   : > { %v1414_v46 = vpack.c.bf16 %v1599_v45, %v1598_v41  ;;  %v1631_v47 = vpop.f32.mrb[26].mxu1  ;;  %v610_v48 = vpop.f32.mrb[27].mxu0 }
 0x119   : > { %v1494_v49 = vpack.c.bf16 %v1631_v47, %v1630_v42  ;;  %v1409_v50 = vpack.c.bf16 %v610_v48, %v607_v43  ;;  %v738_v51 = vpop.f32.mrb[27].mxu1 }
 0x11a   : > { %1518 = vst [vmem:[%s1792_s20 + $0x68] sm:$0xff] %v1414_v46   ;;  %v1489_v52 = vpack.c.bf16 %v738_v51, %v735_v44 }
 0x11b   : > { %1534 = vst [vmem:[%s1792_s20 + $0xe8] sm:$0xff] %v1494_v49   ;;  %1517 = vst [vmem:[%s1792_s20 + $0x60] sm:$0xff] %v1409_v50  }
 0x11c   : > { %1533 = vst [vmem:[%s1792_s20 + $0xe0] sm:$0xff] %v1489_v52  }
 0x11d   : > { %v1602_v53 = vpop.f32.mrb[28].mxu0 }
 0x11e   : > { %v1634_v54 = vpop.f32.mrb[28].mxu1  ;;  %v623_v55 = vpop.f32.mrb[29].mxu0 }
 0x11f   : > { %v751_v56 = vpop.f32.mrb[29].mxu1  ;;  %v1603_v57 = vpop.f32.mrb[30].mxu0 }
 0x120   : > { %v1424_v58 = vpack.c.bf16 %v1603_v57, %v1602_v53  ;;  %v1635_v59 = vpop.f32.mrb[30].mxu1  ;;  %v626_v60 = vpop.f32.mrb[31].mxu0 }
 0x121   : > { %v1504_v61 = vpack.c.bf16 %v1635_v59, %v1634_v54  ;;  %v1419_v62 = vpack.c.bf16 %v626_v60, %v623_v55  ;;  %v754_v63 = vpop.f32.mrb[31].mxu1 }
 0x122   : > { %1520 = vst [vmem:[%s1792_s20 + $0x78] sm:$0xff] %v1424_v58   ;;  %v1499_v0 = vpack.c.bf16 %v754_v63, %v751_v56 }
 0x123   : > { %1536 = vst [vmem:[%s1792_s20 + $0xf8] sm:$0xff] %v1504_v61   ;;  %1519 = vst [vmem:[%s1792_s20 + $0x70] sm:$0xff] %v1419_v62  }
 0x124   : > { %1535 = vst [vmem:[%s1792_s20 + $0xf0] sm:$0xff] %v1499_v0  }
 0x125 PF: > { %s12_s9 = sadd.s32 1, %s1685_s9  }
 0x126   : > { %p9_p4 = scmp.ge.s32.totalorder %s12_s9, 6  }
 0x128   :  { %11 = sbr.rel (!%p9_p4) target bundleno = 1 (0x1), region = 58 }

// kernel: sst_emotion_net_forward.22
= control target key start
LH: loop header
LB: loop body
LE: loop exit
PB: predicated region body
PF: predicated region fallthrough
CT: control target
= control target key end

     0   :  { %s2162_s15 = smov 0   ;;  %s2683_s0 = inlined_call_operand.vmem [shape: bf16[2048,128], index: 0, kind: input, shape index: {}]   ;;  %s2684_s1 = inlined_call_operand.vmem [shape: bf16[128,128], index: 1, kind: input, shape index: {}]   ;;  %s2685_s2 = inlined_call_operand.vmem [shape: bf16[2,128], index: 2, kind: input, shape index: {}]   ;;  %s2686_s3 = inlined_call_operand.vmem [shape: f32[2,128], index: 3, kind: input, shape index: {}]   ;;  %s2687_s4 = inlined_call_operand.vmem [shape: bf16[2048,128], index: 4, kind: output, shape index: {}]  }
   0x1 LB: > { %s1603_s16 = sadd.s32 4294967295, %s2134_s15   ;;  %p1607_p0 = scmp.ge.s32.totalorder %s2134_s15, 1  ;;  %s2134_s15 = sphi %s2162_s15, %s14_s15  }
   0x2   : > { %p163_p1 = scmp.lt.s32.totalorder %s2134_s15, 5 }
   0x4   : > { %p164_p2 = pnand %p1607_p0, %p163_p1 }
   0x5   : > { %v2120_v0 = vld [vmem:[%s2684_s1] sm:$0xff] (!%p164_p2)   ;;  %s1608_s19 = sshll.u32 (!%p164_p2), %s1603_s16, 6  ;;  %v270_v1 = vlaneseq (!%p164_p2)  ;;  %v2121_v2 = vld [vmem:[%s2684_s1 + $0x8] sm:$0xff] (!%p164_p2)   ;;  %v2122_v4 = vld [vmem:[%s2684_s1 + $0x10] sm:$0xff] (!%p164_p2)   ;;  %v2136_v38 = vmov (!%p164_p2), 0  }
   0x6   : > { %167 = sbr.rel (%p164_p2) target bundleno = 319 (0x13f), region = 36  ;;  %p190_p3 = scmp.lt.s32.totalorder (!%p164_p2), %s1608_s19, 255  ;;  %2015 = vmatprep.subr.bf16.mxu0 (!%p164_p2), %v2120_v0  ;;  %2095 = vmatprep.subr.bf16.mxu1 (!%p164_p2), %v2120_v0  ;;  %v2123_v6 = vld [vmem:[%s2684_s1 + $0x18] sm:$0xff] (!%p164_p2)   ;;  %v266_v7 = vld [vmem:[%s2685_s2] sm:$0x1] (!%p164_p2)  ;;  %v2125_v26 = vld [vmem:[%s2684_s1 + $0x28] sm:$0xff] (!%p164_p2)  }
   0x7   : > { %2016 = vmatpush3.bf16.msra.mxu0 (!%p164_p2), %v2120_v0  ;;  %2103 = vmatpush3.bf16.msra.mxu1 (!%p164_p2), %v2120_v0  ;;  %v2178_v3 = vshrl.u32 (!%p164_p2), %v270_v1, 7  ;;  %v268_v8 = vpack.i.b16 (!%p164_p2), %v266_v7, %v266_v7  ;;  %v342_v9 = vshrl.u32 (!%p164_p2), %v266_v7, 16  ;;  %v2124_v12 = vld [vmem:[%s2684_s1 + $0x20] sm:$0xff] (!%p164_p2)   ;;  %v2126_v45 = vld [vmem:[%s2684_s1 + $0x30] sm:$0xff] (!%p164_p2)   ;;  %v2127_v62 = vld [vmem:[%s2684_s1 + $0x38] sm:$0xff] (!%p164_p2)  }
   0x8   : > { %2017 = vmatprep.subr.bf16.mxu0 (!%p164_p2), %v2121_v2  ;;  %2096 = vmatprep.subr.bf16.mxu1 (!%p164_p2), %v2121_v2 }
   0x9   : > { %v2185_v5 = vsub.s32 (!%p164_p2), 0, %v2178_v3  ;;  %v343_v11 = vpack.i.b16 (!%p164_p2), %v342_v9, %v342_v9 }
   0xb   : > { %2018 = vmatpush3.bf16.msra.mxu0 (!%p164_p2), %v2121_v2  ;;  %2104 = vmatpush3.bf16.msra.mxu1 (!%p164_p2), %v2121_v2  ;;  %v273_v10 = vrot.slane (!%p164_p2), %v268_v8, %v2185_v5  ;;  %v348_v16 = vrot.slane (!%p164_p2), %v343_v11, %v2185_v5 }
   0xc   : > { %2019 = vmatprep.subr.bf16.mxu0 (!%p164_p2), %v2122_v4  ;;  %2097 = vmatprep.subr.bf16.mxu1 (!%p164_p2), %v2122_v4 }
   0xd   : > { %s2689_s19 = smov (!%p190_p3, %s1608_s19), 255  ;;  %v2206_v15 = vcombine.low %v273_v10, %v273_v10  ;;  %v2216_v24 = vcombine.low %v348_v16, %v348_v16 }
   0xe   : > { %s1609_s24 = sshll.u32 %s2689_s19, 2 }
   0xf   : > { %s2198_s5 = scalar_lea.vmem %s2683_s0, %s1609_s24  ;;  %2020 = vmatpush3.bf16.msra.mxu0 %v2122_v4  ;;  %2105 = vmatpush3.bf16.msra.mxu1 %v2122_v4  ;;  %s2534_s20 = scalar_lea.vmem %s2687_s4, %s1609_s24 }
  0x10   : > { %2021 = vmatprep.subr.bf16.mxu0 %v2123_v6  ;;  %2098 = vmatprep.subr.bf16.mxu1 %v2123_v6  ;;  %v202_v13 = vld [vmem:[%s2198_s5] sm:$0xf]  ;;  %v203_v14 = vld [vmem:[%s2198_s5 + $0x4] sm:$0xf]  ;;  %v204_v19 = vld [vmem:[%s2198_s5 + $0x8] sm:$0xf] }
  0x11   : > { %v234_v17 = vld [vmem:[%s2198_s5 + $0x80] sm:$0xf]  ;;  %v235_v18 = vld [vmem:[%s2198_s5 + $0x84] sm:$0xf]  ;;  %v205_v20 = vld [vmem:[%s2198_s5 + $0xc] sm:$0xf]  ;;  %v278_v22 = vmul.bf16 %v2206_v15, %v202_v13  ;;  %v279_v23 = vmul.bf16 %v2206_v15, %v203_v14  ;;  %v280_v29 = vmul.bf16 %v2206_v15, %v204_v19 }
  0x12   : > { %v236_v21 = vld [vmem:[%s2198_s5 + $0x88] sm:$0xf]  ;;  %v237_v25 = vld [vmem:[%s2198_s5 + $0x8c] sm:$0xf]  ;;  %v310_v27 = vmul.bf16 %v2206_v15, %v234_v17  ;;  %v311_v28 = vmul.bf16 %v2206_v15, %v235_v18  ;;  %v281_v32 = vmul.bf16 %v2206_v15, %v205_v20  ;;  %v206_v42 = vld [vmem:[%s2198_s5 + $0x10] sm:$0xf] }
  0x13   : > { %2022 = vmatpush3.bf16.msra.mxu0 %v2123_v6  ;;  %2106 = vmatpush3.bf16.msra.mxu1 %v2123_v6  ;;  %v353_v30 = vadd.bf16 %v2216_v24, %v278_v22  ;;  %v354_v31 = vadd.bf16 %v2216_v24, %v279_v23  ;;  %v312_v33 = vmul.bf16 %v2206_v15, %v236_v21  ;;  %v207_v43 = vld [vmem:[%s2198_s5 + $0x14] sm:$0xf]  ;;  %v238_v44 = vld [vmem:[%s2198_s5 + $0x90] sm:$0xf]  ;;  %v208_v58 = vld [vmem:[%s2198_s5 + $0x18] sm:$0xf] }
  0x14   : > { %2023 = vmatprep.subr.bf16.mxu0 %v2124_v12  ;;  %2099 = vmatprep.subr.bf16.mxu1 %v2124_v12  ;;  %v385_v34 = vadd.bf16 %v2216_v24, %v310_v27  ;;  %v386_v35 = vadd.bf16 %v2216_v24, %v311_v28  ;;  %v355_v36 = vadd.bf16 %v2216_v24, %v280_v29  ;;  %v239_v53 = vld [vmem:[%s2198_s5 + $0x94] sm:$0xf]  ;;  %v209_v61 = vld [vmem:[%s2198_s5 + $0x1c] sm:$0xf]  ;;  %v240_v2 = vld [vmem:[%s2198_s5 + $0x98] sm:$0xf] }
  0x15   : > { %v313_v37 = vmul.bf16 %v2206_v15, %v237_v25  ;;  %v417_v39 = vmax.bf16 %v2136_v38, %v353_v30  ;;  %v418_v40 = vmax.bf16 %v2136_v38, %v354_v31  ;;  %v356_v41 = vadd.bf16 %v2216_v24, %v281_v32  ;;  %v210_v13 = vld [vmem:[%s2198_s5 + $0x20] sm:$0xf]  ;;  %v211_v18 = vld [vmem:[%s2198_s5 + $0x24] sm:$0xf] }
  0x16   : > { %v449_v46 = vmax.bf16 %v2136_v38, %v385_v34  ;;  %v450_v47 = vmax.bf16 %v2136_v38, %v386_v35  ;;  %v2245_v48 = vmax.bf16 %v2136_v38, %v355_v36  ;;  %v387_v51 = vadd.bf16 %v2216_v24, %v312_v33  ;;  %v242_v19 = vld [vmem:[%s2198_s5 + $0xa0] sm:$0xf]  ;;  %v243_v28 = vld [vmem:[%s2198_s5 + $0xa4] sm:$0xf]  ;;  %v212_v33 = vld [vmem:[%s2198_s5 + $0x28] sm:$0xf] }
  0x17   : > { %2024 = vmatpush3.bf16.msra.mxu0 %v2124_v12  ;;  %2107 = vmatpush3.bf16.msra.mxu1 %v2124_v12  ;;  %v1614_v49 = vcombine.low %v417_v39, %v418_v40  ;;  %v2248_v50 = vmax.bf16 %v2136_v38, %v356_v41  ;;  %v388_v52 = vadd.bf16 %v2216_v24, %v313_v37  ;;  %v241_v12 = vld [vmem:[%s2198_s5 + $0x9c] sm:$0xf]  ;;  %v213_v34 = vld [vmem:[%s2198_s5 + $0x2c] sm:$0xf] }
  0x18   : > { %2025 = vmatprep.subr.bf16.mxu0 %v2125_v26  ;;  %2100 = vmatprep.subr.bf16.mxu1 %v2125_v26  ;;  %v1630_v54 = vcombine.low %v449_v46, %v450_v47  ;;  %v282_v55 = vmul.bf16 %v2206_v15, %v206_v42  ;;  %v283_v56 = vmul.bf16 %v2206_v15, %v207_v43  ;;  %v244_v47 = vld [vmem:[%s2198_s5 + $0xa8] sm:$0xf] }
  0x19   : > { %v314_v57 = vmul.bf16 %v2206_v15, %v238_v44  ;;  %v451_v59 = vmax.bf16 %v2136_v38, %v387_v51  ;;  %v452_v60 = vmax.bf16 %v2136_v38, %v388_v52  ;;  %v315_v1 = vmul.bf16 %v2206_v15, %v239_v53  ;;  %2031 = vmatprep.mubr.bf16.mxu0 %v1614_v49  ;;  %v214_v52 = vld [vmem:[%s2198_s5 + $0x30] sm:$0xf]  ;;  %v215_v53 = vld [vmem:[%s2198_s5 + $0x34] sm:$0xf] }
  0x1a   : > { %v357_v63 = vadd.bf16 %v2216_v24, %v282_v55  ;;  %v358_v0 = vadd.bf16 %v2216_v24, %v283_v56  ;;  %2063 = vmatprep.mubr.bf16.mxu1 %v1630_v54  ;;  %v1615_v4 = vcombine.low %v2245_v48, %v2248_v50  ;;  %v284_v7 = vmul.bf16 %v2206_v15, %v208_v58  ;;  %v245_v48 = vld [vmem:[%s2198_s5 + $0xac] sm:$0xf] }
  0x1b   : > { %2026 = vmatpush3.bf16.msra.mxu0 %v2125_v26  ;;  %2108 = vmatpush3.bf16.msra.mxu1 %v2125_v26  ;;  %v389_v6 = vadd.bf16 %v2216_v24, %v314_v57  ;;  %v390_v10 = vadd.bf16 %v2216_v24, %v315_v1  ;;  %v285_v11 = vmul.bf16 %v2206_v15, %v209_v61  ;;  %v246_v57 = vld [vmem:[%s2198_s5 + $0xb0] sm:$0xf] }
  0x1c   : > { %2027 = vmatprep.subr.bf16.mxu0 %v2126_v45  ;;  %2101 = vmatprep.subr.bf16.mxu1 %v2126_v45  ;;  %v421_v8 = vmax.bf16 %v2136_v38, %v357_v63  ;;  %v422_v9 = vmax.bf16 %v2136_v38, %v358_v0  ;;  %v359_v16 = vadd.bf16 %v2216_v24, %v284_v7 }
  0x1d   : > { %v453_v14 = vmax.bf16 %v2136_v38, %v389_v6  ;;  %v316_v17 = vmul.bf16 %v2206_v15, %v240_v2  ;;  %v1631_v20 = vcombine.low %v451_v59, %v452_v60  ;;  %v454_v21 = vmax.bf16 %v2136_v38, %v390_v10  ;;  %v217_v10 = vld [vmem:[%s2198_s5 + $0x3c] sm:$0xf] }
  0x1e   : > { %v360_v22 = vadd.bf16 %v2216_v24, %v285_v11  ;;  %v1616_v23 = vcombine.low %v421_v8, %v422_v9  ;;  %v317_v25 = vmul.bf16 %v2206_v15, %v241_v12  ;;  %v286_v27 = vmul.bf16 %v2206_v15, %v210_v13 }
  0x1f   : > { %2028 = vmatpush3.bf16.msra.mxu0 %v2126_v45  ;;  %2109 = vmatpush3.bf16.msra.mxu1 %v2126_v45  ;;  %v391_v26 = vadd.bf16 %v2216_v24, %v316_v17  ;;  %v2289_v29 = vmax.bf16 %v2136_v38, %v359_v16  ;;  %v287_v31 = vmul.bf16 %v2206_v15, %v211_v18 }
  0x20   : > { %2029 = vmatprep.subr.bf16.mxu0 %v2127_v62  ;;  %2102 = vmatprep.subr.bf16.mxu1 %v2127_v62  ;;  %v2292_v30 = vmax.bf16 %v2136_v38, %v360_v22  ;;  %v318_v32 = vmul.bf16 %v2206_v15, %v242_v19  ;;  %v1632_v35 = vcombine.low %v453_v14, %v454_v21 }
  0x21   : > { %v392_v36 = vadd.bf16 %v2216_v24, %v317_v25  ;;  %v361_v37 = vadd.bf16 %v2216_v24, %v286_v27  ;;  %v455_v39 = vmax.bf16 %v2136_v38, %v391_v26  ;;  %v362_v40 = vadd.bf16 %v2216_v24, %v287_v31  ;;  %v248_v25 = vld [vmem:[%s2198_s5 + $0xb8] sm:$0xf]  ;;  %v249_v26 = vld [vmem:[%s2198_s5 + $0xbc] sm:$0xf]  ;;  %v218_v27 = vld [vmem:[%s2198_s5 + $0x40] sm:$0xf] }
  0x22   : > { %v319_v41 = vmul.bf16 %v2206_v15, %v243_v28  ;;  %v393_v42 = vadd.bf16 %v2216_v24, %v318_v32  ;;  %v288_v45 = vmul.bf16 %v2206_v15, %v212_v33  ;;  %v289_v46 = vmul.bf16 %v2206_v15, %v213_v34  ;;  %v219_v31 = vld [vmem:[%s2198_s5 + $0x44] sm:$0xf]  ;;  %v250_v32 = vld [vmem:[%s2198_s5 + $0xc0] sm:$0xf] }
  0x23   : > { %2030 = vmatpush3.bf16.msra.mxu0 %v2127_v62  ;;  %2110 = vmatpush3.bf16.msra.mxu1 %v2127_v62  ;;  %v456_v43 = vmax.bf16 %v2136_v38, %v392_v36  ;;  %v425_v44 = vmax.bf16 %v2136_v38, %v361_v37  ;;  %v1617_v49 = vcombine.low %v2289_v29, %v2292_v30  ;;  %v247_v62 = vld [vmem:[%s2198_s5 + $0xb4] sm:$0xf]  ;;  %v251_v36 = vld [vmem:[%s2198_s5 + $0xc4] sm:$0xf] }
  0x24   : > { %v426_v50 = vmax.bf16 %v2136_v38, %v362_v40  ;;  %v394_v51 = vadd.bf16 %v2216_v24, %v319_v41  ;;  %v457_v54 = vmax.bf16 %v2136_v38, %v393_v42  ;;  %v363_v55 = vadd.bf16 %v2216_v24, %v288_v45  ;;  %v220_v42 = vld [vmem:[%s2198_s5 + $0x48] sm:$0xf] }
  0x25   : > { %v364_v56 = vadd.bf16 %v2216_v24, %v289_v46  ;;  %v1633_v58 = vcombine.low %v455_v39, %v456_v43  ;;  %v320_v60 = vmul.bf16 %v2206_v15, %v244_v47  ;;  %v321_v61 = vmul.bf16 %v2206_v15, %v245_v48 }
  0x26   : > { %2032 = vmatmul.mubr.bf16.vlgmr.msra.gmra.mrb[0].mxu0 %v1615_v4  ;;  %2064 = vmatmul.mubr.bf16.vlgmr.msra.gmra.mrb[0].mxu1 %v1631_v20  ;;  %v458_v59 = vmax.bf16 %v2136_v38, %v394_v51  ;;  %v1618_v63 = vcombine.low %v425_v44, %v426_v50  ;;  %v2325_v0 = vmax.bf16 %v2136_v38, %v363_v55  ;;  %v216_v4 = vld [vmem:[%s2198_s5 + $0x38] sm:$0xf]  ;;  %v221_v51 = vld [vmem:[%s2198_s5 + $0x4c] sm:$0xf] }
  0x27   : > { %2035 = vmatprep.mubr.bf16.mxu0 %v1616_v23  ;;  %2067 = vmatprep.mubr.bf16.mxu1 %v1632_v35  ;;  %v290_v1 = vmul.bf16 %v2206_v15, %v214_v52  ;;  %v291_v2 = vmul.bf16 %v2206_v15, %v215_v53  ;;  %v428_v6 = vmax.bf16 %v2136_v38, %v364_v56  ;;  %v252_v56 = vld [vmem:[%s2198_s5 + $0xc8] sm:$0xf] }
  0x28   : > { %v395_v7 = vadd.bf16 %v2216_v24, %v320_v60  ;;  %v396_v8 = vadd.bf16 %v2216_v24, %v321_v61  ;;  %v322_v9 = vmul.bf16 %v2206_v15, %v246_v57  ;;  %v1634_v11 = vcombine.low %v457_v54, %v458_v59 }
  0x29   : > { %v365_v12 = vadd.bf16 %v2216_v24, %v290_v1  ;;  %v366_v13 = vadd.bf16 %v2216_v24, %v291_v2  ;;  %v323_v14 = vmul.bf16 %v2206_v15, %v247_v62  ;;  %v292_v19 = vmul.bf16 %v2206_v15, %v216_v4  ;;  %v253_v1 = vld [vmem:[%s2198_s5 + $0xcc] sm:$0xf]  ;;  %v222_v2 = vld [vmem:[%s2198_s5 + $0x50] sm:$0xf] }
  0x2a   : > { %v459_v16 = vmax.bf16 %v2136_v38, %v395_v7  ;;  %v460_v17 = vmax.bf16 %v2136_v38, %v396_v8  ;;  %v397_v18 = vadd.bf16 %v2216_v24, %v322_v9  ;;  %v293_v23 = vmul.bf16 %v2206_v15, %v217_v10  ;;  %v223_v8 = vld [vmem:[%s2198_s5 + $0x54] sm:$0xf]  ;;  %v254_v9 = vld [vmem:[%s2198_s5 + $0xd0] sm:$0xf] }
  0x2b   : > { %v429_v20 = vmax.bf16 %v2136_v38, %v365_v12  ;;  %v430_v21 = vmax.bf16 %v2136_v38, %v366_v13  ;;  %v398_v22 = vadd.bf16 %v2216_v24, %v323_v14  ;;  %v1619_v28 = vcombine.low %v2325_v0, %v428_v6  ;;  %v255_v10 = vld [vmem:[%s2198_s5 + $0xd4] sm:$0xf]  ;;  %v224_v14 = vld [vmem:[%s2198_s5 + $0x58] sm:$0xf] }
  0x2c   : > { %v1635_v29 = vcombine.low %v459_v16, %v460_v17  ;;  %v367_v30 = vadd.bf16 %v2216_v24, %v292_v19  ;;  %v461_v33 = vmax.bf16 %v2136_v38, %v397_v18  ;;  %v368_v35 = vadd.bf16 %v2216_v24, %v293_v23 }
  0x2d   : > { %v462_v34 = vmax.bf16 %v2136_v38, %v398_v22  ;;  %v1620_v37 = vcombine.low %v429_v20, %v430_v21  ;;  %v324_v39 = vmul.bf16 %v2206_v15, %v248_v25  ;;  %v325_v40 = vmul.bf16 %v2206_v15, %v249_v26  ;;  %v225_v25 = vld [vmem:[%s2198_s5 + $0x5c] sm:$0xf] }
  0x2e   : > { %2036 = vmatmul.mubr.bf16.gmra.mrb[4].mxu0 %v1617_v49  ;;  %2068 = vmatmul.mubr.bf16.gmra.mrb[4].mxu1 %v1633_v58  ;;  %v294_v41 = vmul.bf16 %v2206_v15, %v218_v27  ;;  %v2362_v43 = vmax.bf16 %v2136_v38, %v367_v30  ;;  %v2365_v44 = vmax.bf16 %v2136_v38, %v368_v35  ;;  %v256_v30 = vld [vmem:[%s2198_s5 + $0xd8] sm:$0xf] }
  0x2f   : > { %2039 = vmatprep.mubr.bf16.mxu0 %v1618_v63  ;;  %2071 = vmatprep.mubr.bf16.mxu1 %v1634_v11  ;;  %v295_v45 = vmul.bf16 %v2206_v15, %v219_v31  ;;  %v326_v46 = vmul.bf16 %v2206_v15, %v250_v32  ;;  %v399_v47 = vadd.bf16 %v2216_v24, %v324_v39  ;;  %v257_v39 = vld [vmem:[%s2198_s5 + $0xdc] sm:$0xf] }
  0x30   : > { %v400_v48 = vadd.bf16 %v2216_v24, %v325_v40  ;;  %v369_v49 = vadd.bf16 %v2216_v24, %v294_v41  ;;  %v327_v50 = vmul.bf16 %v2206_v15, %v251_v36  ;;  %v1636_v52 = vcombine.low %v461_v33, %v462_v34 }
  0x31   : > { %v370_v53 = vadd.bf16 %v2216_v24, %v295_v45  ;;  %v401_v54 = vadd.bf16 %v2216_v24, %v326_v46  ;;  %v296_v55 = vmul.bf16 %v2206_v15, %v220_v42  ;;  %v463_v57 = vmax.bf16 %v2136_v38, %v399_v47 }
  0x32   : > { %v464_v58 = vmax.bf16 %v2136_v38, %v400_v48  ;;  %v433_v59 = vmax.bf16 %v2136_v38, %v369_v49  ;;  %v402_v60 = vadd.bf16 %v2216_v24, %v327_v50  ;;  %v297_v63 = vmul.bf16 %v2206_v15, %v221_v51  ;;  %v258_v48 = vld [vmem:[%s2198_s5 + $0xe0] sm:$0xf]  ;;  %v259_v49 = vld [vmem:[%s2198_s5 + $0xe4] sm:$0xf] }
  0x33   : > { %v434_v61 = vmax.bf16 %v2136_v38, %v370_v53  ;;  %v465_v62 = vmax.bf16 %v2136_v38, %v401_v54  ;;  %v371_v0 = vadd.bf16 %v2216_v24, %v296_v55  ;;  %v1621_v4 = vcombine.low %v2362_v43, %v2365_v44  ;;  %v226_v43 = vld [vmem:[%s2198_s5 + $0x60] sm:$0xf]  ;;  %v227_v44 = vld [vmem:[%s2198_s5 + $0x64] sm:$0xf] }
  0x34   : > { %v466_v6 = vmax.bf16 %v2136_v38, %v402_v60  ;;  %v328_v7 = vmul.bf16 %v2206_v15, %v252_v56  ;;  %v1637_v11 = vcombine.low %v463_v57, %v464_v58  ;;  %v372_v13 = vadd.bf16 %v2216_v24, %v297_v63  ;;  %v228_v57 = vld [vmem:[%s2198_s5 + $0x68] sm:$0xf]  ;;  %v229_v58 = vld [vmem:[%s2198_s5 + $0x6c] sm:$0xf] }
  0x35   : > { %v1622_v12 = vcombine.low %v433_v59, %v434_v61  ;;  %v2398_v16 = vmax.bf16 %v2136_v38, %v371_v0  ;;  %v329_v17 = vmul.bf16 %v2206_v15, %v253_v1  ;;  %v298_v19 = vmul.bf16 %v2206_v15, %v222_v2  ;;  %v260_v63 = vld [vmem:[%s2198_s5 + $0xe8] sm:$0xf] }
  0x36   : > { %2040 = vmatmul.mubr.bf16.gmra.mrb[8].mxu0 %v1619_v28  ;;  %2072 = vmatmul.mubr.bf16.gmra.mrb[8].mxu1 %v1635_v29  ;;  %v403_v18 = vadd.bf16 %v2216_v24, %v328_v7  ;;  %v1638_v20 = vcombine.low %v465_v62, %v466_v6  ;;  %v299_v21 = vmul.bf16 %v2206_v15, %v223_v8 }
  0x37   : > { %2043 = vmatprep.mubr.bf16.mxu0 %v1620_v37  ;;  %2075 = vmatprep.mubr.bf16.mxu1 %v1636_v52  ;;  %v330_v22 = vmul.bf16 %v2206_v15, %v254_v9  ;;  %v331_v23 = vmul.bf16 %v2206_v15, %v255_v10  ;;  %v436_v26 = vmax.bf16 %v2136_v38, %v372_v13  ;;  %v261_v10 = vld [vmem:[%s2198_s5 + $0xec] sm:$0xf] }
  0x38   : > { %v404_v27 = vadd.bf16 %v2216_v24, %v329_v17  ;;  %v373_v28 = vadd.bf16 %v2216_v24, %v298_v19  ;;  %v300_v29 = vmul.bf16 %v2206_v15, %v224_v14  ;;  %v467_v31 = vmax.bf16 %v2136_v38, %v403_v18  ;;  %v230_v18 = vld [vmem:[%s2198_s5 + $0x70] sm:$0xf]  ;;  %v231_v19 = vld [vmem:[%s2198_s5 + $0x74] sm:$0xf] }
  0x39   : > { %v374_v32 = vadd.bf16 %v2216_v24, %v299_v21  ;;  %v405_v33 = vadd.bf16 %v2216_v24, %v330_v22  ;;  %v406_v34 = vadd.bf16 %v2216_v24, %v331_v23  ;;  %v301_v36 = vmul.bf16 %v2206_v15, %v225_v25  ;;  %v263_v25 = vld [vmem:[%s2198_s5 + $0xf4] sm:$0xf] }
  0x3a   : > { %v468_v35 = vmax.bf16 %v2136_v38, %v404_v27  ;;  %v375_v37 = vadd.bf16 %v2216_v24, %v300_v29  ;;  %v437_v40 = vmax.bf16 %v2136_v38, %v373_v28  ;;  %v332_v42 = vmul.bf16 %v2206_v15, %v256_v30 }
  0x3b   : > { %v438_v41 = vmax.bf16 %v2136_v38, %v374_v32  ;;  %v469_v45 = vmax.bf16 %v2136_v38, %v405_v33  ;;  %v470_v46 = vmax.bf16 %v2136_v38, %v406_v34  ;;  %v376_v47 = vadd.bf16 %v2216_v24, %v301_v36  ;;  %v233_v34 = vld [vmem:[%s2198_s5 + $0x7c] sm:$0xf] }
  0x3c   : > { %v1623_v50 = vcombine.low %v2398_v16, %v436_v26  ;;  %v1639_v51 = vcombine.low %v467_v31, %v468_v35  ;;  %v333_v52 = vmul.bf16 %v2206_v15, %v257_v39  ;;  %v2433_v53 = vmax.bf16 %v2136_v38, %v375_v37  ;;  %v232_v26 = vld [vmem:[%s2198_s5 + $0x78] sm:$0xf] }
  0x3d   : > { %v2436_v54 = vmax.bf16 %v2136_v38, %v376_v47  ;;  %v302_v55 = vmul.bf16 %v2206_v15, %v226_v43  ;;  %v303_v56 = vmul.bf16 %v2206_v15, %v227_v44  ;;  %v407_v59 = vadd.bf16 %v2216_v24, %v332_v42  ;;  %v264_v35 = vld [vmem:[%s2198_s5 + $0xf8] sm:$0xf] }
  0x3e   : > { %2044 = vmatmul.mubr.bf16.gmra.mrb[12].mxu0 %v1621_v4  ;;  %2076 = vmatmul.mubr.bf16.gmra.mrb[12].mxu1 %v1637_v11  ;;  %v408_v60 = vadd.bf16 %v2216_v24, %v333_v52  ;;  %v334_v61 = vmul.bf16 %v2206_v15, %v258_v48  ;;  %v335_v62 = vmul.bf16 %v2206_v15, %v259_v49 }
  0x3f   : > { %2047 = vmatprep.mubr.bf16.mxu0 %v1622_v12  ;;  %2079 = vmatprep.mubr.bf16.mxu1 %v1638_v20  ;;  %v1624_v0 = vcombine.low %v437_v40, %v438_v41  ;;  %v1640_v1 = vcombine.low %v469_v45, %v470_v46  ;;  %v377_v2 = vadd.bf16 %v2216_v24, %v302_v55  ;;  %v262_v20 = vld [vmem:[%s2198_s5 + $0xf0] sm:$0xf]  ;;  %v265_v45 = vld [vmem:[%s2198_s5 + $0xfc] sm:$0xf] }
  0x40   : > { %v378_v4 = vadd.bf16 %v2216_v24, %v303_v56  ;;  %v409_v6 = vadd.bf16 %v2216_v24, %v334_v61  ;;  %v410_v7 = vadd.bf16 %v2216_v24, %v335_v62  ;;  %v304_v8 = vmul.bf16 %v2206_v15, %v228_v57 }
  0x41   : > { %v305_v9 = vmul.bf16 %v2206_v15, %v229_v58  ;;  %v1625_v11 = vcombine.low %v2433_v53, %v2436_v54  ;;  %v336_v12 = vmul.bf16 %v2206_v15, %v260_v63  ;;  %v471_v13 = vmax.bf16 %v2136_v38, %v407_v59 }
  0x42   : > { %v472_v14 = vmax.bf16 %v2136_v38, %v408_v60  ;;  %v441_v16 = vmax.bf16 %v2136_v38, %v377_v2  ;;  %v442_v17 = vmax.bf16 %v2136_v38, %v378_v4  ;;  %v473_v21 = vmax.bf16 %v2136_v38, %v409_v6 }
  0x43   : > { %v474_v22 = vmax.bf16 %v2136_v38, %v410_v7  ;;  %v337_v23 = vmul.bf16 %v2206_v15, %v261_v10  ;;  %v379_v27 = vadd.bf16 %v2216_v24, %v304_v8  ;;  %v380_v28 = vadd.bf16 %v2216_v24, %v305_v9 }
  0x44   : > { %v411_v29 = vadd.bf16 %v2216_v24, %v336_v12  ;;  %v306_v31 = vmul.bf16 %v2206_v15, %v230_v18  ;;  %v307_v32 = vmul.bf16 %v2206_v15, %v231_v19  ;;  %v338_v33 = vmul.bf16 %v2206_v15, %v262_v20 }
  0x45   : > { %v412_v30 = vadd.bf16 %v2216_v24, %v337_v23  ;;  %v1641_v36 = vcombine.low %v471_v13, %v472_v14  ;;  %v1626_v37 = vcombine.low %v441_v16, %v442_v17  ;;  %v339_v39 = vmul.bf16 %v2206_v15, %v263_v25 }
  0x46   : > { %2048 = vmatmul.mubr.bf16.gmra.mrb[16].mxu0 %v1623_v50  ;;  %2080 = vmatmul.mubr.bf16.gmra.mrb[16].mxu1 %v1639_v51  ;;  %v308_v40 = vmul.bf16 %v2206_v15, %v232_v26  ;;  %v1642_v41 = vcombine.low %v473_v21, %v474_v22  ;;  %v381_v42 = vadd.bf16 %v2216_v24, %v306_v31  ;;  %v1097_v9 = vsub.s32 1, %v2178_v3 }
  0x47   : > { %2051 = vmatprep.mubr.bf16.mxu0 %v1624_v0  ;;  %2083 = vmatprep.mubr.bf16.mxu1 %v1640_v1  ;;  %v382_v43 = vadd.bf16 %v2216_v24, %v307_v32  ;;  %v413_v44 = vadd.bf16 %v2216_v24, %v338_v33  ;;  %v414_v46 = vadd.bf16 %v2216_v24, %v339_v39 }
  0x48   : > { %v309_v47 = vmul.bf16 %v2206_v15, %v233_v34  ;;  %v383_v48 = vadd.bf16 %v2216_v24, %v308_v40  ;;  %v340_v49 = vmul.bf16 %v2206_v15, %v264_v35  ;;  %v443_v50 = vmax.bf16 %v2136_v38, %v379_v27 }
  0x49   : > { %v444_v51 = vmax.bf16 %v2136_v38, %v380_v28  ;;  %v475_v52 = vmax.bf16 %v2136_v38, %v411_v29  ;;  %v476_v53 = vmax.bf16 %v2136_v38, %v412_v30  ;;  %v445_v54 = vmax.bf16 %v2136_v38, %v381_v42 }
  0x4a   : > { %v384_v55 = vadd.bf16 %v2216_v24, %v309_v47  ;;  %v447_v56 = vmax.bf16 %v2136_v38, %v383_v48  ;;  %v341_v57 = vmul.bf16 %v2206_v15, %v265_v45  ;;  %v446_v58 = vmax.bf16 %v2136_v38, %v382_v43 }
  0x4b   : > { %v477_v59 = vmax.bf16 %v2136_v38, %v413_v44  ;;  %v415_v60 = vadd.bf16 %v2216_v24, %v340_v49  ;;  %v478_v61 = vmax.bf16 %v2136_v38, %v414_v46  ;;  %v1627_v2 = vcombine.low %v443_v50, %v444_v51 }
  0x4c   : > { %v448_v62 = vmax.bf16 %v2136_v38, %v384_v55  ;;  %v416_v63 = vadd.bf16 %v2216_v24, %v341_v57  ;;  %v1643_v4 = vcombine.low %v475_v52, %v476_v53  ;;  %v1628_v6 = vcombine.low %v445_v54, %v446_v58  ;;  %v1026_v24 = vld [vmem:[%s2686_s3] sm:$0x3] }
  0x4d   : > { %v479_v0 = vmax.bf16 %v2136_v38, %v415_v60  ;;  %v1644_v7 = vcombine.low %v477_v59, %v478_v61  ;;  %v2509_v10 = vrot.slane %v1026_v24, %v2185_v5 }
  0x4e   : > { %2052 = vmatmul.mubr.bf16.gmra.mrb[20].mxu0 %v1625_v11  ;;  %2084 = vmatmul.mubr.bf16.gmra.mrb[20].mxu1 %v1641_v36  ;;  %v1629_v1 = vcombine.low %v447_v56, %v448_v62  ;;  %v480_v15 = vmax.bf16 %v2136_v38, %v416_v63  ;;  %v2511_v38 = vrot.slane %v1026_v24, %v1097_v9 }
  0x4f   : > { %2055 = vmatprep.mubr.bf16.mxu0 %v1626_v37  ;;  %2087 = vmatprep.mubr.bf16.mxu1 %v1642_v41 }
  0x50   : > { %v1645_v8 = vcombine.low %v479_v0, %v480_v15 }
  0x56   : > { %2056 = vmatmul.mubr.bf16.gmra.mrb[24].mxu0 %v1627_v2  ;;  %2088 = vmatmul.mubr.bf16.gmra.mrb[24].mxu1 %v1643_v4 }
  0x57   : > { %2059 = vmatprep.mubr.bf16.mxu0 %v1628_v6  ;;  %2091 = vmatprep.mubr.bf16.mxu1 %v1644_v7 }
  0x5e   : > { %2060 = vmatmul.mubr.bf16.gmra.mrb[28].mxu0 %v1629_v1  ;;  %2092 = vmatmul.mubr.bf16.gmra.mrb[28].mxu1 %v1645_v8 }
  0xf9   : > { %v2033_v11 = vpop.f32.mrb[0].mxu0  ;;  %v2065_v12 = vpop.f32.mrb[0].mxu1 }
  0xfa   : > { %v1033_v13 = vmul.f32 %v2033_v11, %v2509_v10  ;;  %v1065_v14 = vmul.f32 %v2065_v12, %v2509_v10  ;;  %v771_v16 = vpop.f32.mrb[1].mxu0  ;;  %v899_v17 = vpop.f32.mrb[1].mxu1 }
  0xfb   : > { %v1031_v18 = vmul.f32 %v2509_v10, %v771_v16  ;;  %v1063_v19 = vmul.f32 %v2509_v10, %v899_v17  ;;  %v2034_v20 = vpop.f32.mrb[2].mxu0  ;;  %v2066_v21 = vpop.f32.mrb[2].mxu1 }
  0xfc   : > { %v1101_v3 = vadd.f32 %v2511_v38, %v1033_v13  ;;  %v1133_v5 = vadd.f32 %v2511_v38, %v1065_v14  ;;  %v1034_v22 = vmul.f32 %v2034_v20, %v2509_v10  ;;  %v1066_v23 = vmul.f32 %v2066_v21, %v2509_v10  ;;  %v774_v25 = vpop.f32.mrb[3].mxu0  ;;  %v902_v26 = vpop.f32.mrb[3].mxu1 }
  0xfd   : > { %v1099_v27 = vadd.f32 %v2511_v38, %v1031_v18  ;;  %v1131_v28 = vadd.f32 %v2511_v38, %v1063_v19  ;;  %v1032_v29 = vmul.f32 %v2509_v10, %v774_v25  ;;  %v1064_v30 = vmul.f32 %v2509_v10, %v902_v26 }
  0xfe   : > { %v1102_v31 = vadd.f32 %v2511_v38, %v1034_v22  ;;  %v1134_v32 = vadd.f32 %v2511_v38, %v1066_v23  ;;  %v1165_v35 = vmax.f32 %v1101_v3, 0.0  ;;  %v1197_v36 = vmax.f32 %v1133_v5, 0.0 }
  0xff   : > { %v1100_v33 = vadd.f32 %v2511_v38, %v1032_v29  ;;  %v1132_v34 = vadd.f32 %v2511_v38, %v1064_v30  ;;  %v1163_v40 = vmax.f32 %v1099_v27, 0.0  ;;  %v1195_v41 = vmax.f32 %v1131_v28, 0.0 }
 0x100   : > { %v1166_v37 = vmax.f32 %v1102_v31, 0.0  ;;  %v1198_v39 = vmax.f32 %v1134_v32, 0.0 }
 0x101   : > { %v1164_v42 = vmax.f32 %v1100_v33, 0.0  ;;  %v1196_v43 = vmax.f32 %v1132_v34, 0.0  ;;  %v2037_v44 = vpop.f32.mrb[4].mxu0  ;;  %v2069_v45 = vpop.f32.mrb[4].mxu1 }
 0x102   : > { %v1792_v46 = vpack.c.bf16 %v1166_v37, %v1165_v35  ;;  %v1872_v47 = vpack.c.bf16 %v1198_v39, %v1197_v36  ;;  %v1037_v48 = vmul.f32 %v2037_v44, %v2509_v10  ;;  %v1069_v49 = vmul.f32 %v2069_v45, %v2509_v10  ;;  %v787_v50 = vpop.f32.mrb[5].mxu0  ;;  %v915_v51 = vpop.f32.mrb[5].mxu1 }
 0x103   : > { %v1787_v52 = vpack.c.bf16 %v1164_v42, %v1163_v40  ;;  %v1867_v53 = vpack.c.bf16 %v1196_v43, %v1195_v41  ;;  %v1035_v54 = vmul.f32 %v2509_v10, %v787_v50  ;;  %v1067_v55 = vmul.f32 %v2509_v10, %v915_v51  ;;  %v2038_v56 = vpop.f32.mrb[6].mxu0  ;;  %v2070_v57 = vpop.f32.mrb[6].mxu1 }
 0x104   : > { %1944 = vst [vmem:[%s2534_s20 + $0x8] sm:$0xff] %v1792_v46   ;;  %1960 = vst [vmem:[%s2534_s20 + $0x88] sm:$0xff] %v1872_v47   ;;  %v1105_v58 = vadd.f32 %v2511_v38, %v1037_v48  ;;  %v1137_v59 = vadd.f32 %v2511_v38, %v1069_v49  ;;  %v1038_v60 = vmul.f32 %v2038_v56, %v2509_v10  ;;  %v790_v62 = vpop.f32.mrb[7].mxu0  ;;  %v918_v63 = vpop.f32.mrb[7].mxu1 }
 0x105   : > { %v1070_v61 = vmul.f32 %v2070_v57, %v2509_v10  ;;  %1788 = vst [vmem:[%s2534_s20] sm:$0xff] %v1787_v52   ;;  %1959 = vst [vmem:[%s2534_s20 + $0x80] sm:$0xff] %v1867_v53   ;;  %v1103_v0 = vadd.f32 %v2511_v38, %v1035_v54  ;;  %v1135_v1 = vadd.f32 %v2511_v38, %v1067_v55 }
 0x106   : > { %v1036_v15 = vmul.f32 %v2509_v10, %v790_v62  ;;  %v1068_v2 = vmul.f32 %v2509_v10, %v918_v63  ;;  %v1106_v4 = vadd.f32 %v2511_v38, %v1038_v60  ;;  %v1169_v24 = vmax.f32 %v1105_v58, 0.0 }
 0x107   : > { %v1138_v6 = vadd.f32 %v2511_v38, %v1070_v61  ;;  %v1201_v9 = vmax.f32 %v1137_v59, 0.0  ;;  %v1167_v13 = vmax.f32 %v1103_v0, 0.0  ;;  %v1199_v14 = vmax.f32 %v1135_v1, 0.0 }
 0x108   : > { %v1104_v7 = vadd.f32 %v2511_v38, %v1036_v15  ;;  %v1136_v8 = vadd.f32 %v2511_v38, %v1068_v2  ;;  %v1170_v11 = vmax.f32 %v1106_v4, 0.0 }
 0x109   : > { %v1202_v12 = vmax.f32 %v1138_v6, 0.0  ;;  %v2041_v18 = vpop.f32.mrb[8].mxu0  ;;  %v2073_v19 = vpop.f32.mrb[8].mxu1 }
 0x10a   : > { %v1168_v16 = vmax.f32 %v1104_v7, 0.0  ;;  %v1200_v17 = vmax.f32 %v1136_v8, 0.0  ;;  %v1802_v20 = vpack.c.bf16 %v1170_v11, %v1169_v24  ;;  %v1041_v3 = vmul.f32 %v2041_v18, %v2509_v10  ;;  %v803_v22 = vpop.f32.mrb[9].mxu0  ;;  %v931_v23 = vpop.f32.mrb[9].mxu1 }
 0x10b   : > { %v1882_v21 = vpack.c.bf16 %v1202_v12, %v1201_v9  ;;  %v1073_v5 = vmul.f32 %v2073_v19, %v2509_v10  ;;  %v1039_v27 = vmul.f32 %v2509_v10, %v803_v22  ;;  %v1071_v28 = vmul.f32 %v2509_v10, %v931_v23  ;;  %v2042_v29 = vpop.f32.mrb[10].mxu0  ;;  %v2074_v30 = vpop.f32.mrb[10].mxu1 }
 0x10c   : > { %v1797_v25 = vpack.c.bf16 %v1168_v16, %v1167_v13  ;;  %v1877_v26 = vpack.c.bf16 %v1200_v17, %v1199_v14  ;;  %1946 = vst [vmem:[%s2534_s20 + $0x18] sm:$0xff] %v1802_v20   ;;  %v1109_v31 = vadd.f32 %v2511_v38, %v1041_v3  ;;  %v1042_v33 = vmul.f32 %v2042_v29, %v2509_v10  ;;  %v806_v35 = vpop.f32.mrb[11].mxu0  ;;  %v934_v36 = vpop.f32.mrb[11].mxu1 }
 0x10d   : > { %1962 = vst [vmem:[%s2534_s20 + $0x98] sm:$0xff] %v1882_v21   ;;  %v1141_v32 = vadd.f32 %v2511_v38, %v1073_v5  ;;  %v1074_v34 = vmul.f32 %v2074_v30, %v2509_v10  ;;  %v1107_v37 = vadd.f32 %v2511_v38, %v1039_v27  ;;  %v1139_v39 = vadd.f32 %v2511_v38, %v1071_v28 }
 0x10e   : > { %1945 = vst [vmem:[%s2534_s20 + $0x10] sm:$0xff] %v1797_v25   ;;  %1961 = vst [vmem:[%s2534_s20 + $0x90] sm:$0xff] %v1877_v26   ;;  %v1040_v40 = vmul.f32 %v2509_v10, %v806_v35  ;;  %v1072_v41 = vmul.f32 %v2509_v10, %v934_v36  ;;  %v1110_v42 = vadd.f32 %v2511_v38, %v1042_v33  ;;  %v1173_v46 = vmax.f32 %v1109_v31, 0.0 }
 0x10f   : > { %v1142_v43 = vadd.f32 %v2511_v38, %v1074_v34  ;;  %v1205_v47 = vmax.f32 %v1141_v32, 0.0  ;;  %v1171_v50 = vmax.f32 %v1107_v37, 0.0  ;;  %v1203_v51 = vmax.f32 %v1139_v39, 0.0 }
 0x110   : > { %v1108_v44 = vadd.f32 %v2511_v38, %v1040_v40  ;;  %v1140_v45 = vadd.f32 %v2511_v38, %v1072_v41  ;;  %v1174_v48 = vmax.f32 %v1110_v42, 0.0 }
 0x111   : > { %v1206_v49 = vmax.f32 %v1142_v43, 0.0  ;;  %v2045_v54 = vpop.f32.mrb[12].mxu0  ;;  %v2077_v55 = vpop.f32.mrb[12].mxu1 }
 0x112   : > { %v1172_v52 = vmax.f32 %v1108_v44, 0.0  ;;  %v1204_v53 = vmax.f32 %v1140_v45, 0.0  ;;  %v1812_v56 = vpack.c.bf16 %v1174_v48, %v1173_v46  ;;  %v1045_v58 = vmul.f32 %v2045_v54, %v2509_v10  ;;  %v819_v60 = vpop.f32.mrb[13].mxu0  ;;  %v947_v61 = vpop.f32.mrb[13].mxu1 }
 0x113   : > { %v1892_v57 = vpack.c.bf16 %v1206_v49, %v1205_v47  ;;  %v1077_v59 = vmul.f32 %v2077_v55, %v2509_v10  ;;  %v1043_v0 = vmul.f32 %v2509_v10, %v819_v60  ;;  %v1075_v1 = vmul.f32 %v2509_v10, %v947_v61  ;;  %v2046_v15 = vpop.f32.mrb[14].mxu0  ;;  %v2078_v2 = vpop.f32.mrb[14].mxu1 }
 0x114   : > { %v1807_v62 = vpack.c.bf16 %v1172_v52, %v1171_v50  ;;  %v1887_v63 = vpack.c.bf16 %v1204_v53, %v1203_v51  ;;  %1948 = vst [vmem:[%s2534_s20 + $0x28] sm:$0xff] %v1812_v56   ;;  %v1113_v4 = vadd.f32 %v2511_v38, %v1045_v58  ;;  %v1046_v7 = vmul.f32 %v2046_v15, %v2509_v10  ;;  %v822_v24 = vpop.f32.mrb[15].mxu0  ;;  %v950_v9 = vpop.f32.mrb[15].mxu1 }
 0x115   : > { %1964 = vst [vmem:[%s2534_s20 + $0xa8] sm:$0xff] %v1892_v57   ;;  %v1145_v6 = vadd.f32 %v2511_v38, %v1077_v59  ;;  %v1078_v8 = vmul.f32 %v2078_v2, %v2509_v10  ;;  %v1111_v11 = vadd.f32 %v2511_v38, %v1043_v0  ;;  %v1143_v12 = vadd.f32 %v2511_v38, %v1075_v1 }
 0x116   : > { %1947 = vst [vmem:[%s2534_s20 + $0x20] sm:$0xff] %v1807_v62   ;;  %1963 = vst [vmem:[%s2534_s20 + $0xa0] sm:$0xff] %v1887_v63   ;;  %v1044_v13 = vmul.f32 %v2509_v10, %v822_v24  ;;  %v1076_v14 = vmul.f32 %v2509_v10, %v950_v9  ;;  %v1114_v16 = vadd.f32 %v2511_v38, %v1046_v7  ;;  %v1177_v20 = vmax.f32 %v1113_v4, 0.0 }
 0x117   : > { %v1146_v17 = vadd.f32 %v2511_v38, %v1078_v8  ;;  %v1209_v21 = vmax.f32 %v1145_v6, 0.0  ;;  %v1175_v22 = vmax.f32 %v1111_v11, 0.0  ;;  %v1207_v23 = vmax.f32 %v1143_v12, 0.0 }
 0x118   : > { %v1112_v18 = vadd.f32 %v2511_v38, %v1044_v13  ;;  %v1144_v19 = vadd.f32 %v2511_v38, %v1076_v14  ;;  %v1178_v3 = vmax.f32 %v1114_v16, 0.0 }
 0x119   : > { %v1210_v5 = vmax.f32 %v1146_v17, 0.0  ;;  %v2049_v27 = vpop.f32.mrb[16].mxu0  ;;  %v2081_v28 = vpop.f32.mrb[16].mxu1 }
 0x11a   : > { %v1176_v25 = vmax.f32 %v1112_v18, 0.0  ;;  %v1208_v26 = vmax.f32 %v1144_v19, 0.0  ;;  %v1822_v29 = vpack.c.bf16 %v1178_v3, %v1177_v20  ;;  %v1049_v31 = vmul.f32 %v2049_v27, %v2509_v10  ;;  %v835_v33 = vpop.f32.mrb[17].mxu0  ;;  %v963_v34 = vpop.f32.mrb[17].mxu1 }
 0x11b   : > { %v1902_v30 = vpack.c.bf16 %v1210_v5, %v1209_v21  ;;  %v1081_v32 = vmul.f32 %v2081_v28, %v2509_v10  ;;  %v1047_v37 = vmul.f32 %v2509_v10, %v835_v33  ;;  %v1079_v39 = vmul.f32 %v2509_v10, %v963_v34  ;;  %v2050_v40 = vpop.f32.mrb[18].mxu0  ;;  %v2082_v41 = vpop.f32.mrb[18].mxu1 }
 0x11c   : > { %v1817_v35 = vpack.c.bf16 %v1176_v25, %v1175_v22  ;;  %v1897_v36 = vpack.c.bf16 %v1208_v26, %v1207_v23  ;;  %1950 = vst [vmem:[%s2534_s20 + $0x38] sm:$0xff] %v1822_v29   ;;  %v1117_v42 = vadd.f32 %v2511_v38, %v1049_v31  ;;  %v1050_v44 = vmul.f32 %v2050_v40, %v2509_v10  ;;  %v838_v46 = vpop.f32.mrb[19].mxu0  ;;  %v966_v47 = vpop.f32.mrb[19].mxu1 }
 0x11d   : > { %1966 = vst [vmem:[%s2534_s20 + $0xb8] sm:$0xff] %v1902_v30   ;;  %v1149_v43 = vadd.f32 %v2511_v38, %v1081_v32  ;;  %v1082_v45 = vmul.f32 %v2082_v41, %v2509_v10  ;;  %v1115_v48 = vadd.f32 %v2511_v38, %v1047_v37  ;;  %v1147_v49 = vadd.f32 %v2511_v38, %v1079_v39 }
 0x11e   : > { %1949 = vst [vmem:[%s2534_s20 + $0x30] sm:$0xff] %v1817_v35   ;;  %1965 = vst [vmem:[%s2534_s20 + $0xb0] sm:$0xff] %v1897_v36   ;;  %v1048_v50 = vmul.f32 %v2509_v10, %v838_v46  ;;  %v1080_v51 = vmul.f32 %v2509_v10, %v966_v47  ;;  %v1118_v52 = vadd.f32 %v2511_v38, %v1050_v44  ;;  %v1181_v56 = vmax.f32 %v1117_v42, 0.0 }
 0x11f   : > { %v1150_v53 = vadd.f32 %v2511_v38, %v1082_v45  ;;  %v1213_v57 = vmax.f32 %v1149_v43, 0.0  ;;  %v1179_v60 = vmax.f32 %v1115_v48, 0.0  ;;  %v1211_v61 = vmax.f32 %v1147_v49, 0.0 }
 0x120   : > { %v1116_v54 = vadd.f32 %v2511_v38, %v1048_v50  ;;  %v1148_v55 = vadd.f32 %v2511_v38, %v1080_v51  ;;  %v1182_v58 = vmax.f32 %v1118_v52, 0.0 }
 0x121   : > { %v1214_v59 = vmax.f32 %v1150_v53, 0.0  ;;  %v2053_v0 = vpop.f32.mrb[20].mxu0  ;;  %v2085_v1 = vpop.f32.mrb[20].mxu1 }
 0x122   : > { %v1180_v62 = vmax.f32 %v1116_v54, 0.0  ;;  %v1212_v63 = vmax.f32 %v1148_v55, 0.0  ;;  %v1832_v15 = vpack.c.bf16 %v1182_v58, %v1181_v56  ;;  %v1053_v4 = vmul.f32 %v2053_v0, %v2509_v10  ;;  %v851_v7 = vpop.f32.mrb[21].mxu0  ;;  %v979_v8 = vpop.f32.mrb[21].mxu1 }
 0x123   : > { %v1912_v2 = vpack.c.bf16 %v1214_v59, %v1213_v57  ;;  %v1085_v6 = vmul.f32 %v2085_v1, %v2509_v10  ;;  %v1051_v11 = vmul.f32 %v2509_v10, %v851_v7  ;;  %v1083_v12 = vmul.f32 %v2509_v10, %v979_v8  ;;  %v2054_v13 = vpop.f32.mrb[22].mxu0  ;;  %v2086_v14 = vpop.f32.mrb[22].mxu1 }
 0x124   : > { %v1827_v24 = vpack.c.bf16 %v1180_v62, %v1179_v60  ;;  %v1907_v9 = vpack.c.bf16 %v1212_v63, %v1211_v61  ;;  %1952 = vst [vmem:[%s2534_s20 + $0x48] sm:$0xff] %v1832_v15   ;;  %v1121_v16 = vadd.f32 %v2511_v38, %v1053_v4  ;;  %v1054_v18 = vmul.f32 %v2054_v13, %v2509_v10  ;;  %v854_v20 = vpop.f32.mrb[23].mxu0  ;;  %v982_v21 = vpop.f32.mrb[23].mxu1 }
 0x125   : > { %1968 = vst [vmem:[%s2534_s20 + $0xc8] sm:$0xff] %v1912_v2   ;;  %v1153_v17 = vadd.f32 %v2511_v38, %v1085_v6  ;;  %v1086_v19 = vmul.f32 %v2086_v14, %v2509_v10  ;;  %v1119_v3 = vadd.f32 %v2511_v38, %v1051_v11  ;;  %v1151_v5 = vadd.f32 %v2511_v38, %v1083_v12 }
 0x126   : > { %1951 = vst [vmem:[%s2534_s20 + $0x40] sm:$0xff] %v1827_v24   ;;  %1967 = vst [vmem:[%s2534_s20 + $0xc0] sm:$0xff] %v1907_v9   ;;  %v1052_v22 = vmul.f32 %v2509_v10, %v854_v20  ;;  %v1084_v23 = vmul.f32 %v2509_v10, %v982_v21  ;;  %v1122_v25 = vadd.f32 %v2511_v38, %v1054_v18  ;;  %v1185_v29 = vmax.f32 %v1121_v16, 0.0 }
 0x127   : > { %v1154_v26 = vadd.f32 %v2511_v38, %v1086_v19  ;;  %v1217_v30 = vmax.f32 %v1153_v17, 0.0  ;;  %v1183_v33 = vmax.f32 %v1119_v3, 0.0  ;;  %v1215_v34 = vmax.f32 %v1151_v5, 0.0 }
 0x128   : > { %v1120_v27 = vadd.f32 %v2511_v38, %v1052_v22  ;;  %v1152_v28 = vadd.f32 %v2511_v38, %v1084_v23  ;;  %v1186_v31 = vmax.f32 %v1122_v25, 0.0 }
 0x129   : > { %v1218_v32 = vmax.f32 %v1154_v26, 0.0  ;;  %v2057_v37 = vpop.f32.mrb[24].mxu0  ;;  %v2089_v39 = vpop.f32.mrb[24].mxu1 }
 0x12a   : > { %v1184_v35 = vmax.f32 %v1120_v27, 0.0  ;;  %v1216_v36 = vmax.f32 %v1152_v28, 0.0  ;;  %v1842_v40 = vpack.c.bf16 %v1186_v31, %v1185_v29  ;;  %v1057_v42 = vmul.f32 %v2057_v37, %v2509_v10  ;;  %v867_v44 = vpop.f32.mrb[25].mxu0  ;;  %v995_v45 = vpop.f32.mrb[25].mxu1 }
 0x12b   : > { %v1922_v41 = vpack.c.bf16 %v1218_v32, %v1217_v30  ;;  %v1089_v43 = vmul.f32 %v2089_v39, %v2509_v10  ;;  %v1055_v48 = vmul.f32 %v2509_v10, %v867_v44  ;;  %v1087_v49 = vmul.f32 %v2509_v10, %v995_v45  ;;  %v2058_v50 = vpop.f32.mrb[26].mxu0  ;;  %v2090_v51 = vpop.f32.mrb[26].mxu1 }
 0x12c   : > { %v1837_v46 = vpack.c.bf16 %v1184_v35, %v1183_v33  ;;  %v1917_v47 = vpack.c.bf16 %v1216_v36, %v1215_v34  ;;  %1954 = vst [vmem:[%s2534_s20 + $0x58] sm:$0xff] %v1842_v40   ;;  %v1125_v52 = vadd.f32 %v2511_v38, %v1057_v42  ;;  %v1058_v54 = vmul.f32 %v2058_v50, %v2509_v10  ;;  %v870_v56 = vpop.f32.mrb[27].mxu0  ;;  %v998_v57 = vpop.f32.mrb[27].mxu1 }
 0x12d   : > { %1970 = vst [vmem:[%s2534_s20 + $0xd8] sm:$0xff] %v1922_v41   ;;  %v1157_v53 = vadd.f32 %v2511_v38, %v1089_v43  ;;  %v1090_v55 = vmul.f32 %v2090_v51, %v2509_v10  ;;  %v1123_v58 = vadd.f32 %v2511_v38, %v1055_v48  ;;  %v1155_v59 = vadd.f32 %v2511_v38, %v1087_v49 }
 0x12e   : > { %1953 = vst [vmem:[%s2534_s20 + $0x50] sm:$0xff] %v1837_v46   ;;  %1969 = vst [vmem:[%s2534_s20 + $0xd0] sm:$0xff] %v1917_v47   ;;  %v1056_v60 = vmul.f32 %v2509_v10, %v870_v56  ;;  %v1088_v61 = vmul.f32 %v2509_v10, %v998_v57  ;;  %v1126_v62 = vadd.f32 %v2511_v38, %v1058_v54  ;;  %v1189_v15 = vmax.f32 %v1125_v52, 0.0 }
 0x12f   : > { %v1158_v63 = vadd.f32 %v2511_v38, %v1090_v55  ;;  %v1221_v2 = vmax.f32 %v1157_v53, 0.0  ;;  %v1187_v7 = vmax.f32 %v1123_v58, 0.0  ;;  %v1219_v8 = vmax.f32 %v1155_v59, 0.0 }
 0x130   : > { %v1124_v0 = vadd.f32 %v2511_v38, %v1056_v60  ;;  %v1156_v1 = vadd.f32 %v2511_v38, %v1088_v61  ;;  %v1190_v4 = vmax.f32 %v1126_v62, 0.0 }
 0x131   : > { %v1222_v6 = vmax.f32 %v1158_v63, 0.0  ;;  %v2061_v11 = vpop.f32.mrb[28].mxu0  ;;  %v2093_v12 = vpop.f32.mrb[28].mxu1 }
 0x132   : > { %v1188_v24 = vmax.f32 %v1124_v0, 0.0  ;;  %v1220_v9 = vmax.f32 %v1156_v1, 0.0  ;;  %v1852_v13 = vpack.c.bf16 %v1190_v4, %v1189_v15  ;;  %v1061_v16 = vmul.f32 %v2061_v11, %v2509_v10  ;;  %v883_v18 = vpop.f32.mrb[29].mxu0  ;;  %v1011_v19 = vpop.f32.mrb[29].mxu1 }
 0x133   : > { %v1932_v14 = vpack.c.bf16 %v1222_v6, %v1221_v2  ;;  %v1093_v17 = vmul.f32 %v2093_v12, %v2509_v10  ;;  %v1059_v3 = vmul.f32 %v2509_v10, %v883_v18  ;;  %v1091_v5 = vmul.f32 %v2509_v10, %v1011_v19  ;;  %v2062_v22 = vpop.f32.mrb[30].mxu0  ;;  %v2094_v23 = vpop.f32.mrb[30].mxu1 }
 0x134   : > { %v1847_v20 = vpack.c.bf16 %v1188_v24, %v1187_v7  ;;  %v1927_v21 = vpack.c.bf16 %v1220_v9, %v1219_v8  ;;  %1956 = vst [vmem:[%s2534_s20 + $0x68] sm:$0xff] %v1852_v13   ;;  %v1129_v25 = vadd.f32 %v2511_v38, %v1061_v16  ;;  %v1062_v27 = vmul.f32 %v2062_v22, %v2509_v10  ;;  %v886_v29 = vpop.f32.mrb[31].mxu0  ;;  %v1014_v30 = vpop.f32.mrb[31].mxu1 }
 0x135   : > { %1972 = vst [vmem:[%s2534_s20 + $0xe8] sm:$0xff] %v1932_v14   ;;  %v1161_v26 = vadd.f32 %v2511_v38, %v1093_v17  ;;  %v1094_v28 = vmul.f32 %v2094_v23, %v2509_v10  ;;  %v1127_v31 = vadd.f32 %v2511_v38, %v1059_v3  ;;  %v1159_v32 = vadd.f32 %v2511_v38, %v1091_v5 }
 0x136   : > { %1955 = vst [vmem:[%s2534_s20 + $0x60] sm:$0xff] %v1847_v20   ;;  %1971 = vst [vmem:[%s2534_s20 + $0xe0] sm:$0xff] %v1927_v21   ;;  %v1060_v33 = vmul.f32 %v2509_v10, %v886_v29  ;;  %v1092_v34 = vmul.f32 %v2509_v10, %v1014_v30  ;;  %v1130_v35 = vadd.f32 %v2511_v38, %v1062_v27  ;;  %v1193_v40 = vmax.f32 %v1129_v25, 0.0 }
 0x137   : > { %v1162_v36 = vadd.f32 %v2511_v38, %v1094_v28  ;;  %v1225_v41 = vmax.f32 %v1161_v26, 0.0  ;;  %v1191_v44 = vmax.f32 %v1127_v31, 0.0  ;;  %v1223_v45 = vmax.f32 %v1159_v32, 0.0 }
 0x138   : > { %v1128_v37 = vadd.f32 %v2511_v38, %v1060_v33  ;;  %v1160_v39 = vadd.f32 %v2511_v38, %v1092_v34  ;;  %v1194_v42 = vmax.f32 %v1130_v35, 0.0 }
 0x139   : > { %v1226_v43 = vmax.f32 %v1162_v36, 0.0 }
 0x13a   : > { %v1192_v46 = vmax.f32 %v1128_v37, 0.0  ;;  %v1224_v10 = vmax.f32 %v1160_v39, 0.0  ;;  %v1862_v47 = vpack.c.bf16 %v1194_v42, %v1193_v40 }
 0x13b   : > { %v1942_v48 = vpack.c.bf16 %v1226_v43, %v1225_v41 }
 0x13c   : > { %v1857_v49 = vpack.c.bf16 %v1192_v46, %v1191_v44  ;;  %v1937_v50 = vpack.c.bf16 %v1224_v10, %v1223_v45  ;;  %1958 = vst [vmem:[%s2534_s20 + $0x78] sm:$0xff] %v1862_v47  }
 0x13d   : > { %1974 = vst [vmem:[%s2534_s20 + $0xf8] sm:$0xff] %v1942_v48  }
 0x13e   : > { %1957 = vst [vmem:[%s2534_s20 + $0x70] sm:$0xff] %v1857_v49   ;;  %1973 = vst [vmem:[%s2534_s20 + $0xf0] sm:$0xff] %v1937_v50  }
 0x13f PF: > { %s14_s15 = sadd.s32 1, %s2134_s15  }
 0x140   : > { %p11_p4 = scmp.ge.s32.totalorder %s14_s15, 6  }
 0x142   :  { %13 = sbr.rel (!%p11_p4) target bundleno = 1 (0x1), region = 66 }

// kernel: sst_emotion_net_forward.23
= control target key start
LH: loop header
LB: loop body
LE: loop exit
PB: predicated region body
PF: predicated region fallthrough
CT: control target
= control target key end

     0   :  { %s6024_s9 = smov 0   ;;  %s7077_s0 = inlined_call_operand.vmem [shape: bf16[2048,1152], index: 0, kind: input, shape index: {}]   ;;  %s7078_s1 = inlined_call_operand.vmem [shape: bf16[1152,128], index: 1, kind: input, shape index: {}]   ;;  %s7079_s2 = inlined_call_operand.vmem [shape: bf16[2048,128], index: 2, kind: output, shape index: {}]  }
   0x1 LB: > { %s4340_s10 = sadd.s32 4294967295, %s6006_s9   ;;  %p4344_p0 = scmp.ge.s32.totalorder %s6006_s9, 1  ;;  %s6006_s9 = sphi %s6024_s9, %s12_s9  }
   0x2   : > { %p114_p1 = scmp.lt.s32.totalorder %s6006_s9, 5 }
   0x4   : > { %p115_p2 = pnand %p4344_p0, %p114_p1 }
   0x6   : > { %118 = sbr.rel (%p115_p2) target bundleno = 868 (0x364), region = 28 }
   0xd   : > { %v5512_v0 = vld [vmem:[%s7078_s1] sm:$0xff]   ;;  %v6008_v1 = vmov 0   ;;  %v5514_v3 = vld [vmem:[%s7078_s1 + $0x8] sm:$0xff]   ;;  %v5516_v5 = vld [vmem:[%s7078_s1 + $0x10] sm:$0xff]   ;;  %s4345_s3 = sshll.u32 %s4340_s10, 6 }
   0xe   : > { %2519 = vmatprep.subr.bf16.mxu1 %v6008_v1  ;;  %2808 = vmatprep.subr.bf16.mxu0 %v6008_v1  ;;  %v6040_v2 = vld [vmem:[%s7078_s1 + $0x80] sm:$0xff]   ;;  %v6050_v4 = vld [vmem:[%s7078_s1 + $0x88] sm:$0xff]   ;;  %v6061_v6 = vld [vmem:[%s7078_s1 + $0x90] sm:$0xff]   ;;  %p138_p3 = scmp.lt.s32.totalorder %s4345_s3, 255 }
   0xf   : > { %2520 = vmatpush1.bf16.msra.mxu1 %v5512_v0  ;;  %2809 = vmatpush1.bf16.msra.mxu0 %v6040_v2  ;;  %v5518_v7 = vld [vmem:[%s7078_s1 + $0x18] sm:$0xff]   ;;  %v5520_v9 = vld [vmem:[%s7078_s1 + $0x20] sm:$0xff]   ;;  %v5522_v11 = vld [vmem:[%s7078_s1 + $0x28] sm:$0xff]  }
  0x10   : > { %2521 = vmatprep.subr.bf16.mxu1 %v6008_v1  ;;  %2810 = vmatprep.subr.bf16.mxu0 %v6008_v1  ;;  %v6072_v8 = vld [vmem:[%s7078_s1 + $0x98] sm:$0xff]   ;;  %v6083_v10 = vld [vmem:[%s7078_s1 + $0xa0] sm:$0xff]   ;;  %v6096_v12 = vld [vmem:[%s7078_s1 + $0xa8] sm:$0xff]   ;;  %s7109_s3 = smov (!%p138_p3, %s4345_s3), 255 }
  0x11   : > { %v5524_v13 = vld [vmem:[%s7078_s1 + $0x30] sm:$0xff]   ;;  %v5526_v15 = vld [vmem:[%s7078_s1 + $0x38] sm:$0xff]   ;;  %s5502_s15 = smul.u32 36, %s7109_s3  ;;  %v5528_v17 = vld [vmem:[%s7078_s1 + $0x40] sm:$0xff]  }
  0x12   : > { %v6109_v14 = vld [vmem:[%s7078_s1 + $0xb0] sm:$0xff]   ;;  %v6121_v16 = vld [vmem:[%s7078_s1 + $0xb8] sm:$0xff]   ;;  %v6137_v18 = vld [vmem:[%s7078_s1 + $0xc0] sm:$0xff]  }
  0x13   : > { %2522 = vmatpush1.bf16.msra.mxu1 %v5514_v3  ;;  %2811 = vmatpush1.bf16.msra.mxu0 %v6050_v4  ;;  %s6130_s22 = scalar_lea.vmem %s7077_s0, %s5502_s15  ;;  %v5530_v20 = vld [vmem:[%s7078_s1 + $0x48] sm:$0xff]   ;;  %v5532_v23 = vld [vmem:[%s7078_s1 + $0x50] sm:$0xff]   ;;  %v5534_v25 = vld [vmem:[%s7078_s1 + $0x58] sm:$0xff]  }
  0x14   : > { %2523 = vmatprep.subr.bf16.mxu1 %v6008_v1  ;;  %2812 = vmatprep.subr.bf16.mxu0 %v6008_v1  ;;  %v5546_v19 = vld [vmem:[%s6130_s22 + $0x4] ss:$36 sps:$4 sm:$0xff]   ;;  %v5549_v21 = vld [vmem:[%s6130_s22 + $0xc] ss:$36 sps:$4 sm:$0xff]   ;;  %v6172_v26 = vld [vmem:[%s7078_s1 + $0xd8] sm:$0xff]  }
  0x15   : > { %v6150_v22 = vld [vmem:[%s7078_s1 + $0xc8] sm:$0xff]   ;;  %2551 = vmatprep.mubr.bf16.mxu1 %v5546_v19  ;;  %2840 = vmatprep.mubr.bf16.mxu0 %v5549_v21  ;;  %v6161_v24 = vld [vmem:[%s7078_s1 + $0xd0] sm:$0xff]   ;;  %v5536_v27 = vld [vmem:[%s7078_s1 + $0x60] sm:$0xff]  }
  0x16   : > { %v6183_v28 = vld [vmem:[%s7078_s1 + $0xe0] sm:$0xff]   ;;  %v5538_v29 = vld [vmem:[%s7078_s1 + $0x68] sm:$0xff]   ;;  %v5540_v31 = vld [vmem:[%s7078_s1 + $0x70] sm:$0xff]  }
  0x17   : > { %2524 = vmatpush1.bf16.msra.mxu1 %v5516_v5  ;;  %2813 = vmatpush1.bf16.msra.mxu0 %v6061_v6  ;;  %v6194_v30 = vld [vmem:[%s7078_s1 + $0xe8] sm:$0xff]   ;;  %v6205_v32 = vld [vmem:[%s7078_s1 + $0xf0] sm:$0xff]   ;;  %v5542_v33 = vld [vmem:[%s7078_s1 + $0x78] sm:$0xff]  }
  0x18   : > { %2525 = vmatprep.subr.bf16.mxu1 %v6008_v1  ;;  %2814 = vmatprep.subr.bf16.mxu0 %v6008_v1  ;;  %v6216_v34 = vld [vmem:[%s7078_s1 + $0xf8] sm:$0xff]   ;;  %v5544_v35 = vld [vmem:[%s6130_s22] ss:$36 sps:$4 sm:$0xff]   ;;  %v5547_v36 = vld [vmem:[%s6130_s22 + $0x8] ss:$36 sps:$4 sm:$0xff]  }
  0x19   : > { %v5550_v37 = vld [vmem:[%s7078_s1 + $0x100] sm:$0xff]   ;;  %v5552_v38 = vld [vmem:[%s6130_s22 + $0x4c] ss:$36 sps:$4 sm:$0xff]   ;;  %v5554_v39 = vld [vmem:[%s6130_s22 + $0x54] ss:$36 sps:$4 sm:$0xff]  }
  0x1a   : > { %v5551_v40 = vld [vmem:[%s7078_s1 + $0x108] sm:$0xff]   ;;  %v5557_v42 = vld [vmem:[%s6130_s22 + $0x50] ss:$36 sps:$4 sm:$0xff]   ;;  %v5562_v45 = vld [vmem:[%s6130_s22 + $0x9c] ss:$36 sps:$4 sm:$0xff]  }
  0x1b   : > { %2526 = vmatpush1.bf16.msra.mxu1 %v5518_v7  ;;  %2815 = vmatpush1.bf16.msra.mxu0 %v6072_v8  ;;  %v5556_v41 = vld [vmem:[%s6130_s22 + $0x48] ss:$36 sps:$4 sm:$0xff]   ;;  %v5560_v43 = vld [vmem:[%s6130_s22 + $0x94] ss:$36 sps:$4 sm:$0xff]   ;;  %v5566_v49 = vld [vmem:[%s7078_s1 + $0x120] sm:$0xff]  }
  0x1c   : > { %2527 = vmatprep.subr.bf16.mxu1 %v6008_v1  ;;  %2816 = vmatprep.subr.bf16.mxu0 %v6008_v1  ;;  %v5558_v44 = vld [vmem:[%s7078_s1 + $0x110] sm:$0xff]   ;;  %v5559_v46 = vld [vmem:[%s7078_s1 + $0x118] sm:$0xff]   ;;  %v5570_v51 = vld [vmem:[%s6130_s22 + $0xe4] ss:$36 sps:$4 sm:$0xff]  }
  0x1d   : > { %v5564_v47 = vld [vmem:[%s6130_s22 + $0x90] ss:$36 sps:$4 sm:$0xff]   ;;  %v5565_v48 = vld [vmem:[%s6130_s22 + $0x98] ss:$36 sps:$4 sm:$0xff]   ;;  %v5567_v52 = vld [vmem:[%s7078_s1 + $0x128] sm:$0xff]  }
  0x1e   : > { %v5568_v50 = vld [vmem:[%s6130_s22 + $0xdc] ss:$36 sps:$4 sm:$0xff]   ;;  %v5576_v55 = vld [vmem:[%s6130_s22 + $0x124] ss:$36 sps:$4 sm:$0xff]   ;;  %v5574_v56 = vld [vmem:[%s7078_s1 + $0x130] sm:$0xff]  }
  0x1f   : > { %2528 = vmatpush1.bf16.msra.mxu1 %v5520_v9  ;;  %2817 = vmatpush1.bf16.msra.mxu0 %v6083_v10  ;;  %v5572_v53 = vld [vmem:[%s6130_s22 + $0xd8] ss:$36 sps:$4 sm:$0xff]   ;;  %v5573_v54 = vld [vmem:[%s6130_s22 + $0xe0] ss:$36 sps:$4 sm:$0xff]   ;;  %v5578_v57 = vld [vmem:[%s6130_s22 + $0x12c] ss:$36 sps:$4 sm:$0xff]  }
  0x20   : > { %2529 = vmatprep.subr.bf16.mxu1 %v6008_v1  ;;  %2818 = vmatprep.subr.bf16.mxu0 %v6008_v1  ;;  %v5575_v58 = vld [vmem:[%s7078_s1 + $0x138] sm:$0xff]   ;;  %v5580_v59 = vld [vmem:[%s6130_s22 + $0x120] ss:$36 sps:$4 sm:$0xff]   ;;  %v5581_v60 = vld [vmem:[%s6130_s22 + $0x128] ss:$36 sps:$4 sm:$0xff]  }
  0x21   : > { %v5582_v61 = vld [vmem:[%s7078_s1 + $0x140] sm:$0xff]   ;;  %v5584_v62 = vld [vmem:[%s6130_s22 + $0x16c] ss:$36 sps:$4 sm:$0xff]   ;;  %v5586_v63 = vld [vmem:[%s6130_s22 + $0x174] ss:$36 sps:$4 sm:$0xff]  }
  0x22   : > { %v5583_v0 = vld [vmem:[%s7078_s1 + $0x148] sm:$0xff]   ;;  %v5589_v3 = vld [vmem:[%s6130_s22 + $0x170] ss:$36 sps:$4 sm:$0xff]   ;;  %v5591_v7 = vld [vmem:[%s7078_s1 + $0x158] sm:$0xff]  }
  0x23   : > { %2530 = vmatpush1.bf16.msra.mxu1 %v5522_v11  ;;  %2819 = vmatpush1.bf16.msra.mxu0 %v6096_v12  ;;  %v5590_v5 = vld [vmem:[%s7078_s1 + $0x150] sm:$0xff]   ;;  %v5597_v9 = vld [vmem:[%s6130_s22 + $0x1b8] ss:$36 sps:$4 sm:$0xff]  }
  0x24   : > { %2531 = vmatprep.subr.bf16.mxu1 %v6008_v1  ;;  %2820 = vmatprep.subr.bf16.mxu0 %v6008_v1  ;;  %v5600_v11 = vld [vmem:[%s6130_s22 + $0x1fc] ss:$36 sps:$4 sm:$0xff]   ;;  %v5610_v21 = vld [vmem:[%s6130_s22 + $0x10] ss:$36 sps:$4 sm:$0xff]  }
  0x25   : > { %v5607_v19 = vld [vmem:[%s7078_s1 + $0x178] sm:$0xff]  }
  0x27   : > { %2532 = vmatpush1.bf16.msra.mxu1 %v5524_v13  ;;  %2821 = vmatpush1.bf16.msra.mxu0 %v6109_v14  ;;  %v5599_v13 = vld [vmem:[%s7078_s1 + $0x168] sm:$0xff]  }
  0x28   : > { %2533 = vmatprep.subr.bf16.mxu1 %v6008_v1  ;;  %2822 = vmatprep.subr.bf16.mxu0 %v6008_v1 }
  0x2b   : > { %2534 = vmatpush1.bf16.msra.mxu1 %v5526_v15  ;;  %2823 = vmatpush1.bf16.msra.mxu0 %v6121_v16  ;;  %v5605_v15 = vld [vmem:[%s6130_s22 + $0x200] ss:$36 sps:$4 sm:$0xff]  }
  0x2c   : > { %2535 = vmatprep.subr.bf16.mxu1 %v6008_v1  ;;  %2824 = vmatprep.subr.bf16.mxu0 %v6008_v1 }
  0x2f   : > { %2536 = vmatpush1.bf16.msra.mxu1 %v5528_v17  ;;  %2825 = vmatpush1.bf16.msra.mxu0 %v6137_v18  ;;  %v5606_v17 = vld [vmem:[%s7078_s1 + $0x170] sm:$0xff]  }
  0x30   : > { %2537 = vmatprep.subr.bf16.mxu1 %v6008_v1  ;;  %2826 = vmatprep.subr.bf16.mxu0 %v6008_v1 }
  0x33   : > { %2538 = vmatpush1.bf16.msra.mxu1 %v5530_v20  ;;  %2827 = vmatpush1.bf16.msra.mxu0 %v6150_v22  ;;  %v5613_v20 = vld [vmem:[%s6130_s22 + $0x240] ss:$36 sps:$4 sm:$0xff]  }
  0x34   : > { %2539 = vmatprep.subr.bf16.mxu1 %v6008_v1  ;;  %2828 = vmatprep.subr.bf16.mxu0 %v6008_v1 }
  0x37   : > { %2540 = vmatpush1.bf16.msra.mxu1 %v5532_v23  ;;  %2829 = vmatpush1.bf16.msra.mxu0 %v6161_v24  ;;  %v5614_v23 = vld [vmem:[%s7078_s1 + $0x180] sm:$0xff]  }
  0x38   : > { %2541 = vmatprep.subr.bf16.mxu1 %v6008_v1  ;;  %2830 = vmatprep.subr.bf16.mxu0 %v6008_v1 }
  0x3b   : > { %2542 = vmatpush1.bf16.msra.mxu1 %v5534_v25  ;;  %2831 = vmatpush1.bf16.msra.mxu0 %v6172_v26  ;;  %v5619_v25 = vld [vmem:[%s6130_s22 + $0x288] ss:$36 sps:$4 sm:$0xff]  }
  0x3c   : > { %2543 = vmatprep.subr.bf16.mxu1 %v6008_v1  ;;  %2832 = vmatprep.subr.bf16.mxu0 %v6008_v1 }
  0x3f   : > { %2544 = vmatpush1.bf16.msra.mxu1 %v5536_v27  ;;  %2833 = vmatpush1.bf16.msra.mxu0 %v6183_v28  ;;  %v5620_v27 = vld [vmem:[%s6130_s22 + $0x58] ss:$36 sps:$4 sm:$0xff]  }
  0x40   : > { %2545 = vmatprep.subr.bf16.mxu1 %v6008_v1  ;;  %2834 = vmatprep.subr.bf16.mxu0 %v6008_v1 }
  0x43   : > { %2546 = vmatpush1.bf16.msra.mxu1 %v5538_v29  ;;  %2835 = vmatpush1.bf16.msra.mxu0 %v6194_v30  ;;  %v5623_v29 = vld [vmem:[%s6130_s22 + $0xa4] ss:$36 sps:$4 sm:$0xff]  }
  0x44   : > { %2547 = vmatprep.subr.bf16.mxu1 %v6008_v1  ;;  %2836 = vmatprep.subr.bf16.mxu0 %v6008_v1 }
  0x47   : > { %2548 = vmatpush1.bf16.msra.mxu1 %v5540_v31  ;;  %2837 = vmatpush1.bf16.msra.mxu0 %v6205_v32  ;;  %v5625_v31 = vld [vmem:[%s6130_s22 + $0x2d0] ss:$36 sps:$4 sm:$0xff]  }
  0x48   : > { %2549 = vmatprep.subr.bf16.mxu1 %v6008_v1  ;;  %2838 = vmatprep.subr.bf16.mxu0 %v6008_v1 }
  0x4b   : > { %2550 = vmatpush1.bf16.msra.mxu1 %v5542_v33  ;;  %2839 = vmatpush1.bf16.msra.mxu0 %v6216_v34  ;;  %v5626_v33 = vld [vmem:[%s6130_s22 + $0xa0] ss:$36 sps:$4 sm:$0xff]  }
  0x4c   : > { %5150 = vmatprep.subr.bf16.mxu1 %v6008_v1  ;;  %3097 = vmatprep.subr.bf16.mxu0 %v6008_v1 }
  0x4e   : > { %2552 = vmatmul.mubr.bf16.vlgmr.msra.gmra.mrb[0].mxu1 %v5544_v35  ;;  %2841 = vmatmul.mubr.bf16.vlgmr.msra.gmra.mrb[0].mxu0 %v5547_v36  ;;  %v5630_v35 = vld [vmem:[%s6130_s22 + $0xec] ss:$36 sps:$4 sm:$0xff]   ;;  %v5666_v36 = vld [vmem:[%s7078_s1 + $0x1a0] sm:$0xff]  }
  0x4f   : > { %5166 = vmatpush1.bf16.msra.mxu1 %v6040_v2  ;;  %3098 = vmatpush1.bf16.msra.mxu0 %v5550_v37  ;;  %v5588_v2 = vld [vmem:[%s6130_s22 + $0x168] ss:$36 sps:$4 sm:$0xff]  }
  0x50   : > { %2559 = vmatprep.mubr.bf16.mxu1 %v5552_v38  ;;  %3099 = vmatprep.subr.bf16.mxu0 %v6008_v1  ;;  %v5679_v37 = vld [vmem:[%s7078_s1 + $0x1a8] sm:$0xff]   ;;  %v5632_v38 = vld [vmem:[%s6130_s22 + $0x318] ss:$36 sps:$4 sm:$0xff]  }
  0x51   : > { %2848 = vmatprep.mubr.bf16.mxu0 %v5554_v39  ;;  %5151 = vmatprep.subr.bf16.mxu1 %v6008_v1  ;;  %v5633_v39 = vld [vmem:[%s6130_s22 + $0xe8] ss:$36 sps:$4 sm:$0xff]  }
  0x53   : > { %5167 = vmatpush1.bf16.msra.mxu1 %v6050_v4  ;;  %3100 = vmatpush1.bf16.msra.mxu0 %v5551_v40  ;;  %v5592_v4 = vld [vmem:[%s6130_s22 + $0x1b4] ss:$36 sps:$4 sm:$0xff]   ;;  %v5634_v40 = vld [vmem:[%s6130_s22 + $0x364] ss:$36 sps:$4 sm:$0xff]  }
  0x54   : > { %5152 = vmatprep.subr.bf16.mxu1 %v6008_v1  ;;  %3101 = vmatprep.subr.bf16.mxu0 %v6008_v1 }
  0x56   : > { %2560 = vmatmul.mubr.bf16.gmra.mrb[4].mxu1 %v5556_v41  ;;  %2849 = vmatmul.mubr.bf16.gmra.mrb[4].mxu0 %v5557_v42  ;;  %v5636_v41 = vld [vmem:[%s6130_s22 + $0x134] ss:$36 sps:$4 sm:$0xff]  }
  0x57   : > { %2567 = vmatprep.mubr.bf16.mxu1 %v5560_v43  ;;  %3102 = vmatpush1.bf16.msra.mxu0 %v5558_v44  ;;  %v5692_v42 = vld [vmem:[%s7078_s1 + $0x1b0] sm:$0xff]   ;;  %v5705_v43 = vld [vmem:[%s7078_s1 + $0x1b8] sm:$0xff]   ;;  %v5638_v44 = vld [vmem:[%s6130_s22 + $0x360] ss:$36 sps:$4 sm:$0xff]  }
  0x58   : > { %2856 = vmatprep.mubr.bf16.mxu0 %v5562_v45  ;;  %3103 = vmatprep.subr.bf16.mxu0 %v6008_v1  ;;  %v5639_v45 = vld [vmem:[%s6130_s22 + $0x130] ss:$36 sps:$4 sm:$0xff]  }
  0x59   : > { %5168 = vmatpush1.bf16.msra.mxu1 %v6061_v6  ;;  %v5594_v6 = vld [vmem:[%s6130_s22 + $0x1bc] ss:$36 sps:$4 sm:$0xff]  }
  0x5a   : > { %5153 = vmatprep.subr.bf16.mxu1 %v6008_v1 }
  0x5b   : > { %3104 = vmatpush1.bf16.msra.mxu0 %v5559_v46  ;;  %v5641_v46 = vld [vmem:[%s6130_s22 + $0x3ac] ss:$36 sps:$4 sm:$0xff]  }
  0x5c   : > { %3105 = vmatprep.subr.bf16.mxu0 %v6008_v1 }
  0x5d   : > { %5169 = vmatpush1.bf16.msra.mxu1 %v6072_v8  ;;  %v5596_v8 = vld [vmem:[%s6130_s22 + $0x1b0] ss:$36 sps:$4 sm:$0xff]  }
  0x5e   : > { %2568 = vmatmul.mubr.bf16.gmra.mrb[8].mxu1 %v5564_v47  ;;  %5154 = vmatprep.subr.bf16.mxu1 %v6008_v1  ;;  %v5643_v47 = vld [vmem:[%s6130_s22 + $0x17c] ss:$36 sps:$4 sm:$0xff]  }
  0x5f   : > { %2857 = vmatmul.mubr.bf16.gmra.mrb[8].mxu0 %v5565_v48  ;;  %2575 = vmatprep.mubr.bf16.mxu1 %v5568_v50  ;;  %v5718_v48 = vld [vmem:[%s7078_s1 + $0x1c0] sm:$0xff]   ;;  %v5645_v50 = vld [vmem:[%s6130_s22 + $0x3a8] ss:$36 sps:$4 sm:$0xff]  }
  0x60   : > { %3106 = vmatpush1.bf16.msra.mxu0 %v5566_v49  ;;  %2864 = vmatprep.mubr.bf16.mxu0 %v5570_v51  ;;  %v5731_v49 = vld [vmem:[%s7078_s1 + $0x1c8] sm:$0xff]   ;;  %v5646_v51 = vld [vmem:[%s6130_s22 + $0x178] ss:$36 sps:$4 sm:$0xff]  }
  0x61   : > { %3107 = vmatprep.subr.bf16.mxu0 %v6008_v1  ;;  %5170 = vmatpush1.bf16.msra.mxu1 %v6083_v10  ;;  %v5598_v10 = vld [vmem:[%s7078_s1 + $0x160] sm:$0xff]  }
  0x62   : > { %5155 = vmatprep.subr.bf16.mxu1 %v6008_v1 }
  0x64   : > { %3108 = vmatpush1.bf16.msra.mxu0 %v5567_v52  ;;  %v5647_v52 = vld [vmem:[%s6130_s22 + $0x3f4] ss:$36 sps:$4 sm:$0xff]  }
  0x65   : > { %3109 = vmatprep.subr.bf16.mxu0 %v6008_v1  ;;  %5171 = vmatpush1.bf16.msra.mxu1 %v6096_v12  ;;  %v5602_v12 = vld [vmem:[%s6130_s22 + $0x204] ss:$36 sps:$4 sm:$0xff]  }
  0x66   : > { %2576 = vmatmul.mubr.bf16.gmra.mrb[12].mxu1 %v5572_v53  ;;  %5156 = vmatprep.subr.bf16.mxu1 %v6008_v1  ;;  %v5649_v53 = vld [vmem:[%s6130_s22 + $0x1c4] ss:$36 sps:$4 sm:$0xff]  }
  0x67   : > { %2865 = vmatmul.mubr.bf16.gmra.mrb[12].mxu0 %v5573_v54  ;;  %2583 = vmatprep.mubr.bf16.mxu1 %v5576_v55  ;;  %v5744_v54 = vld [vmem:[%s7078_s1 + $0x1d0] sm:$0xff]  }
  0x68   : > { %3110 = vmatpush1.bf16.msra.mxu0 %v5574_v56  ;;  %2872 = vmatprep.mubr.bf16.mxu0 %v5578_v57  ;;  %v5651_v55 = vld [vmem:[%s6130_s22 + $0x3f0] ss:$36 sps:$4 sm:$0xff]   ;;  %v5652_v56 = vld [vmem:[%s6130_s22 + $0x1c0] ss:$36 sps:$4 sm:$0xff]  }
  0x69   : > { %3111 = vmatprep.subr.bf16.mxu0 %v6008_v1  ;;  %5172 = vmatpush1.bf16.msra.mxu1 %v6109_v14  ;;  %v5604_v14 = vld [vmem:[%s6130_s22 + $0x1f8] ss:$36 sps:$4 sm:$0xff]  }
  0x6a   : > { %5157 = vmatprep.subr.bf16.mxu1 %v6008_v1  ;;  %v5654_v57 = vld [vmem:[%s6130_s22 + $0x43c] ss:$36 sps:$4 sm:$0xff]  }
  0x6c   : > { %3112 = vmatpush1.bf16.msra.mxu0 %v5575_v58  ;;  %v5656_v58 = vld [vmem:[%s6130_s22 + $0x20c] ss:$36 sps:$4 sm:$0xff]  }
  0x6d   : > { %3113 = vmatprep.subr.bf16.mxu0 %v6008_v1  ;;  %5173 = vmatpush1.bf16.msra.mxu1 %v6121_v16  ;;  %v5608_v16 = vld [vmem:[%s6130_s22 + $0x244] ss:$36 sps:$4 sm:$0xff]  }
  0x6e   : > { %2584 = vmatmul.mubr.bf16.gmra.mrb[16].mxu1 %v5580_v59  ;;  %5158 = vmatprep.subr.bf16.mxu1 %v6008_v1  ;;  %v5757_v59 = vld [vmem:[%s7078_s1 + $0x1d8] sm:$0xff]  }
  0x6f   : > { %2873 = vmatmul.mubr.bf16.gmra.mrb[16].mxu0 %v5581_v60  ;;  %2591 = vmatprep.mubr.bf16.mxu1 %v5584_v62  ;;  %v5658_v60 = vld [vmem:[%s6130_s22 + $0x438] ss:$36 sps:$4 sm:$0xff]   ;;  %v5660_v62 = vld [vmem:[%s6130_s22 + $0x484] ss:$36 sps:$4 sm:$0xff]  }
  0x70   : > { %3114 = vmatpush1.bf16.msra.mxu0 %v5582_v61  ;;  %2880 = vmatprep.mubr.bf16.mxu0 %v5586_v63  ;;  %v5659_v61 = vld [vmem:[%s6130_s22 + $0x208] ss:$36 sps:$4 sm:$0xff]   ;;  %v5662_v63 = vld [vmem:[%s6130_s22 + $0x254] ss:$36 sps:$4 sm:$0xff]  }
  0x71   : > { %3115 = vmatprep.subr.bf16.mxu0 %v6008_v1  ;;  %5174 = vmatpush1.bf16.msra.mxu1 %v6137_v18  ;;  %v5612_v18 = vld [vmem:[%s6130_s22 + $0x14] ss:$36 sps:$4 sm:$0xff]  }
  0x72   : > { %5159 = vmatprep.subr.bf16.mxu1 %v6008_v1 }
  0x74   : > { %3116 = vmatpush1.bf16.msra.mxu0 %v5583_v0  ;;  %v5664_v0 = vld [vmem:[%s6130_s22 + $0x480] ss:$36 sps:$4 sm:$0xff]  }
  0x75   : > { %3117 = vmatprep.subr.bf16.mxu0 %v6008_v1  ;;  %5175 = vmatpush1.bf16.msra.mxu1 %v6150_v22  ;;  %v5615_v22 = vld [vmem:[%s6130_s22 + $0x28c] ss:$36 sps:$4 sm:$0xff]  }
  0x76   : > { %2592 = vmatmul.mubr.bf16.gmra.mrb[20].mxu1 %v5588_v2  ;;  %5160 = vmatprep.subr.bf16.mxu1 %v6008_v1  ;;  %v5665_v2 = vld [vmem:[%s6130_s22 + $0x250] ss:$36 sps:$4 sm:$0xff]  }
  0x77   : > { %2881 = vmatmul.mubr.bf16.gmra.mrb[20].mxu0 %v5589_v3  ;;  %2599 = vmatprep.mubr.bf16.mxu1 %v5592_v4  ;;  %v5667_v3 = vld [vmem:[%s6130_s22 + $0x4cc] ss:$36 sps:$4 sm:$0xff]   ;;  %v5669_v4 = vld [vmem:[%s6130_s22 + $0x29c] ss:$36 sps:$4 sm:$0xff]  }
  0x78   : > { %3118 = vmatpush1.bf16.msra.mxu0 %v5590_v5  ;;  %2888 = vmatprep.mubr.bf16.mxu0 %v5594_v6  ;;  %v5770_v5 = vld [vmem:[%s7078_s1 + $0x1e0] sm:$0xff]  }
  0x79   : > { %3119 = vmatprep.subr.bf16.mxu0 %v6008_v1  ;;  %5176 = vmatpush1.bf16.msra.mxu1 %v6161_v24  ;;  %v5617_v24 = vld [vmem:[%s6130_s22 + $0x5c] ss:$36 sps:$4 sm:$0xff]  }
  0x7a   : > { %5161 = vmatprep.subr.bf16.mxu1 %v6008_v1  ;;  %v6439_v6 = vld [vmem:[%s7078_s1 + $0x200] sm:$0xff]  }
  0x7c   : > { %3120 = vmatpush1.bf16.msra.mxu0 %v5591_v7  ;;  %v5671_v7 = vld [vmem:[%s6130_s22 + $0x4c8] ss:$36 sps:$4 sm:$0xff]  }
  0x7d   : > { %3121 = vmatprep.subr.bf16.mxu0 %v6008_v1  ;;  %5177 = vmatpush1.bf16.msra.mxu1 %v6172_v26  ;;  %v5627_v26 = vld [vmem:[%s7078_s1 + $0x188] sm:$0xff]  }
  0x7e   : > { %2600 = vmatmul.mubr.bf16.gmra.mrb[24].mxu1 %v5596_v8  ;;  %5162 = vmatprep.subr.bf16.mxu1 %v6008_v1  ;;  %v5672_v8 = vld [vmem:[%s6130_s22 + $0x298] ss:$36 sps:$4 sm:$0xff]  }
  0x7f   : > { %2889 = vmatmul.mubr.bf16.gmra.mrb[24].mxu0 %v5597_v9  ;;  %2607 = vmatprep.mubr.bf16.mxu1 %v5600_v11  ;;  %v5673_v9 = vld [vmem:[%s6130_s22 + $0x514] ss:$36 sps:$4 sm:$0xff]  }
  0x80   : > { %3122 = vmatpush1.bf16.msra.mxu0 %v5598_v10  ;;  %2896 = vmatprep.mubr.bf16.mxu0 %v5602_v12  ;;  %v5675_v10 = vld [vmem:[%s6130_s22 + $0x2e4] ss:$36 sps:$4 sm:$0xff]   ;;  %v5677_v11 = vld [vmem:[%s6130_s22 + $0x510] ss:$36 sps:$4 sm:$0xff]  }
  0x81   : > { %3123 = vmatprep.subr.bf16.mxu0 %v6008_v1  ;;  %5178 = vmatpush1.bf16.msra.mxu1 %v6183_v28  ;;  %v5621_v28 = vld [vmem:[%s6130_s22 + $0x2d4] ss:$36 sps:$4 sm:$0xff]   ;;  %v5678_v12 = vld [vmem:[%s6130_s22 + $0x2e0] ss:$36 sps:$4 sm:$0xff]  }
  0x82   : > { %5163 = vmatprep.subr.bf16.mxu1 %v6008_v1 }
  0x84   : > { %3124 = vmatpush1.bf16.msra.mxu0 %v5599_v13  ;;  %v5680_v13 = vld [vmem:[%s6130_s22 + $0x55c] ss:$36 sps:$4 sm:$0xff]  }
  0x85   : > { %3125 = vmatprep.subr.bf16.mxu0 %v6008_v1  ;;  %5179 = vmatpush1.bf16.msra.mxu1 %v6194_v30  ;;  %v5640_v30 = vld [vmem:[%s7078_s1 + $0x190] sm:$0xff]  }
  0x86   : > { %2608 = vmatmul.mubr.bf16.gmra.mrb[28].mxu1 %v5604_v14  ;;  %5164 = vmatprep.subr.bf16.mxu1 %v6008_v1  ;;  %v5682_v14 = vld [vmem:[%s6130_s22 + $0x32c] ss:$36 sps:$4 sm:$0xff]  }
  0x87   : > { %2897 = vmatmul.mubr.bf16.gmra.mrb[28].mxu0 %v5605_v15  ;;  %2615 = vmatprep.mubr.bf16.mxu1 %v5608_v16  ;;  %v5784_v15 = vld [vmem:[%s7078_s1 + $0x1e8] sm:$0xff]   ;;  %v5684_v16 = vld [vmem:[%s6130_s22 + $0x558] ss:$36 sps:$4 sm:$0xff]  }
  0x88   : > { %3126 = vmatpush1.bf16.msra.mxu0 %v5606_v17  ;;  %3129 = vmatprep.mubr.bf16.mxu0 %v5612_v18  ;;  %v5685_v17 = vld [vmem:[%s6130_s22 + $0x328] ss:$36 sps:$4 sm:$0xff]  }
  0x89   : > { %3127 = vmatprep.subr.bf16.mxu0 %v6008_v1  ;;  %5180 = vmatpush1.bf16.msra.mxu1 %v6205_v32  ;;  %v5653_v32 = vld [vmem:[%s7078_s1 + $0x198] sm:$0xff]   ;;  %v5686_v18 = vld [vmem:[%s6130_s22 + $0x5a4] ss:$36 sps:$4 sm:$0xff]  }
  0x8a   : > { %5165 = vmatprep.subr.bf16.mxu1 %v6008_v1 }
  0x8c   : > { %3128 = vmatpush1.bf16.msra.mxu0 %v5607_v19  ;;  %v5688_v19 = vld [vmem:[%s6130_s22 + $0x374] ss:$36 sps:$4 sm:$0xff]  }
  0x8d   : > { %3386 = vmatprep.subr.bf16.mxu0 %v6008_v1  ;;  %5181 = vmatpush1.bf16.msra.mxu1 %v6216_v34  ;;  %v5628_v34 = vld [vmem:[%s6130_s22 + $0x31c] ss:$36 sps:$4 sm:$0xff]  }
  0x8e   : > { %2616 = vmatmul.mubr.bf16.gmra.mrb[32].mxu1 %v5613_v20  ;;  %5070 = vmatprep.subr.bf16.mxu1 %v6439_v6  ;;  %v5690_v20 = vld [vmem:[%s6130_s22 + $0x5a0] ss:$36 sps:$4 sm:$0xff]  }
  0x8f   : > { %3130 = vmatmul.mubr.bf16.vlgmr.msra.gmra.mrb[0].mxu0 %v5610_v21  ;;  %2623 = vmatprep.mubr.bf16.mxu1 %v5615_v22  ;;  %v5691_v21 = vld [vmem:[%s6130_s22 + $0x370] ss:$36 sps:$4 sm:$0xff]  }
  0x90   : > { %3387 = vmatpush1.bf16.msra.mxu0 %v5614_v23  ;;  %3137 = vmatprep.mubr.bf16.mxu0 %v5617_v24  ;;  %v5693_v22 = vld [vmem:[%s6130_s22 + $0x5ec] ss:$36 sps:$4 sm:$0xff]   ;;  %v5695_v23 = vld [vmem:[%s6130_s22 + $0x3bc] ss:$36 sps:$4 sm:$0xff]  }
  0x91   : > { %3388 = vmatprep.subr.bf16.mxu0 %v6008_v1  ;;  %v5798_v24 = vld [vmem:[%s7078_s1 + $0x1f0] sm:$0xff]  }
  0x94   : > { %3389 = vmatpush1.bf16.msra.mxu0 %v5627_v26  ;;  %v5698_v26 = vld [vmem:[%s6130_s22 + $0x3b8] ss:$36 sps:$4 sm:$0xff]  }
  0x95   : > { %3390 = vmatprep.subr.bf16.mxu0 %v6008_v1 }
  0x96   : > { %2624 = vmatmul.mubr.bf16.gmra.mrb[36].mxu1 %v5619_v25  ;;  %v5697_v25 = vld [vmem:[%s6130_s22 + $0x5e8] ss:$36 sps:$4 sm:$0xff]  }
  0x97   : > { %3138 = vmatmul.mubr.bf16.gmra.mrb[4].mxu0 %v5620_v27  ;;  %2631 = vmatprep.mubr.bf16.mxu1 %v5621_v28  ;;  %v5699_v27 = vld [vmem:[%s6130_s22 + $0x634] ss:$36 sps:$4 sm:$0xff]   ;;  %v5701_v28 = vld [vmem:[%s6130_s22 + $0x404] ss:$36 sps:$4 sm:$0xff]  }
  0x98   : > { %3145 = vmatprep.mubr.bf16.mxu0 %v5623_v29  ;;  %3391 = vmatpush1.bf16.msra.mxu0 %v5640_v30  ;;  %v5703_v29 = vld [vmem:[%s6130_s22 + $0x630] ss:$36 sps:$4 sm:$0xff]   ;;  %v5704_v30 = vld [vmem:[%s6130_s22 + $0x400] ss:$36 sps:$4 sm:$0xff]  }
  0x99   : > { %3392 = vmatprep.subr.bf16.mxu0 %v6008_v1 }
  0x9c   : > { %3393 = vmatpush1.bf16.msra.mxu0 %v5653_v32  ;;  %v5708_v32 = vld [vmem:[%s6130_s22 + $0x44c] ss:$36 sps:$4 sm:$0xff]  }
  0x9d   : > { %3394 = vmatprep.subr.bf16.mxu0 %v6008_v1 }
  0x9e   : > { %2632 = vmatmul.mubr.bf16.gmra.mrb[40].mxu1 %v5625_v31  ;;  %v5706_v31 = vld [vmem:[%s6130_s22 + $0x67c] ss:$36 sps:$4 sm:$0xff]  }
  0x9f   : > { %3146 = vmatmul.mubr.bf16.gmra.mrb[8].mxu0 %v5626_v33  ;;  %2639 = vmatprep.mubr.bf16.mxu1 %v5628_v34  ;;  %v5710_v33 = vld [vmem:[%s6130_s22 + $0x678] ss:$36 sps:$4 sm:$0xff]   ;;  %v5711_v34 = vld [vmem:[%s6130_s22 + $0x448] ss:$36 sps:$4 sm:$0xff]  }
  0xa0   : > { %3153 = vmatprep.mubr.bf16.mxu0 %v5630_v35  ;;  %3395 = vmatpush1.bf16.msra.mxu0 %v5666_v36  ;;  %v5712_v35 = vld [vmem:[%s6130_s22 + $0x6c4] ss:$36 sps:$4 sm:$0xff]   ;;  %v5714_v36 = vld [vmem:[%s6130_s22 + $0x494] ss:$36 sps:$4 sm:$0xff]  }
  0xa1   : > { %3396 = vmatprep.subr.bf16.mxu0 %v6008_v1 }
  0xa4   : > { %3397 = vmatpush1.bf16.msra.mxu0 %v5679_v37  ;;  %v5716_v37 = vld [vmem:[%s6130_s22 + $0x6c0] ss:$36 sps:$4 sm:$0xff]  }
  0xa5   : > { %3398 = vmatprep.subr.bf16.mxu0 %v6008_v1 }
  0xa6   : > { %2640 = vmatmul.mubr.bf16.gmra.mrb[44].mxu1 %v5632_v38  ;;  %v5717_v38 = vld [vmem:[%s6130_s22 + $0x490] ss:$36 sps:$4 sm:$0xff]  }
  0xa7   : > { %3154 = vmatmul.mubr.bf16.gmra.mrb[12].mxu0 %v5633_v39  ;;  %2647 = vmatprep.mubr.bf16.mxu1 %v5634_v40  ;;  %v5719_v39 = vld [vmem:[%s6130_s22 + $0x70c] ss:$36 sps:$4 sm:$0xff]   ;;  %v5721_v40 = vld [vmem:[%s6130_s22 + $0x4dc] ss:$36 sps:$4 sm:$0xff]  }
  0xa8   : > { %3161 = vmatprep.mubr.bf16.mxu0 %v5636_v41  ;;  %3399 = vmatpush1.bf16.msra.mxu0 %v5692_v42  ;;  %v5723_v41 = vld [vmem:[%s6130_s22 + $0x708] ss:$36 sps:$4 sm:$0xff]   ;;  %v5724_v42 = vld [vmem:[%s6130_s22 + $0x4d8] ss:$36 sps:$4 sm:$0xff]  }
  0xa9   : > { %3400 = vmatprep.subr.bf16.mxu0 %v6008_v1 }
  0xac   : > { %3401 = vmatpush1.bf16.msra.mxu0 %v5705_v43  ;;  %v5725_v43 = vld [vmem:[%s6130_s22 + $0x754] ss:$36 sps:$4 sm:$0xff]  }
  0xad   : > { %3402 = vmatprep.subr.bf16.mxu0 %v6008_v1 }
  0xae   : > { %2648 = vmatmul.mubr.bf16.gmra.mrb[48].mxu1 %v5638_v44  ;;  %v5727_v44 = vld [vmem:[%s6130_s22 + $0x524] ss:$36 sps:$4 sm:$0xff]  }
  0xaf   : > { %3162 = vmatmul.mubr.bf16.gmra.mrb[16].mxu0 %v5639_v45  ;;  %2655 = vmatprep.mubr.bf16.mxu1 %v5641_v46  ;;  %v5729_v45 = vld [vmem:[%s6130_s22 + $0x750] ss:$36 sps:$4 sm:$0xff]   ;;  %v5730_v46 = vld [vmem:[%s6130_s22 + $0x520] ss:$36 sps:$4 sm:$0xff]  }
  0xb0   : > { %3169 = vmatprep.mubr.bf16.mxu0 %v5643_v47  ;;  %3403 = vmatpush1.bf16.msra.mxu0 %v5718_v48  ;;  %v5732_v47 = vld [vmem:[%s6130_s22 + $0x79c] ss:$36 sps:$4 sm:$0xff]   ;;  %v5734_v48 = vld [vmem:[%s6130_s22 + $0x56c] ss:$36 sps:$4 sm:$0xff]  }
  0xb1   : > { %3404 = vmatprep.subr.bf16.mxu0 %v6008_v1 }
  0xb4   : > { %3405 = vmatpush1.bf16.msra.mxu0 %v5731_v49 }
  0xb5   : > { %3406 = vmatprep.subr.bf16.mxu0 %v6008_v1 }
  0xb6   : > { %2656 = vmatmul.mubr.bf16.gmra.mrb[52].mxu1 %v5645_v50 }
  0xb7   : > { %3170 = vmatmul.mubr.bf16.gmra.mrb[20].mxu0 %v5646_v51  ;;  %2663 = vmatprep.mubr.bf16.mxu1 %v5647_v52  ;;  %v5736_v51 = vld [vmem:[%s6130_s22 + $0x798] ss:$36 sps:$4 sm:$0xff]  }
  0xb8   : > { %3177 = vmatprep.mubr.bf16.mxu0 %v5649_v53  ;;  %3407 = vmatpush1.bf16.msra.mxu0 %v5744_v54  ;;  %v5737_v53 = vld [vmem:[%s6130_s22 + $0x568] ss:$36 sps:$4 sm:$0xff]  }
  0xb9   : > { %3408 = vmatprep.subr.bf16.mxu0 %v6008_v1  ;;  %v5738_v54 = vld [vmem:[%s6130_s22 + $0x7e4] ss:$36 sps:$4 sm:$0xff]  }
  0xbc   : > { %3409 = vmatpush1.bf16.msra.mxu0 %v5757_v59  ;;  %v5742_v59 = vld [vmem:[%s6130_s22 + $0x7e0] ss:$36 sps:$4 sm:$0xff]  }
  0xbd   : > { %3410 = vmatprep.subr.bf16.mxu0 %v6008_v1 }
  0xbe   : > { %2664 = vmatmul.mubr.bf16.gmra.mrb[56].mxu1 %v5651_v55 }
  0xbf   : > { %3178 = vmatmul.mubr.bf16.gmra.mrb[24].mxu0 %v5652_v56  ;;  %2671 = vmatprep.mubr.bf16.mxu1 %v5654_v57  ;;  %v5740_v56 = vld [vmem:[%s6130_s22 + $0x5b4] ss:$36 sps:$4 sm:$0xff]  }
  0xc0   : > { %3185 = vmatprep.mubr.bf16.mxu0 %v5656_v58  ;;  %3411 = vmatpush1.bf16.msra.mxu0 %v5770_v5 }
  0xc1   : > { %3412 = vmatprep.subr.bf16.mxu0 %v6008_v1 }
  0xc4   : > { %3413 = vmatpush1.bf16.msra.mxu0 %v5784_v15  ;;  %v5756_v15 = vld [vmem:[%s6130_s22 + $0x640] ss:$36 sps:$4 sm:$0xff]  }
  0xc5   : > { %3414 = vmatprep.subr.bf16.mxu0 %v6008_v1 }
  0xc6   : > { %2672 = vmatmul.mubr.bf16.gmra.mrb[60].mxu1 %v5658_v60 }
  0xc7   : > { %3186 = vmatmul.mubr.bf16.gmra.mrb[28].mxu0 %v5659_v61  ;;  %2679 = vmatprep.mubr.bf16.mxu1 %v5660_v62  ;;  %v5743_v61 = vld [vmem:[%s6130_s22 + $0x5b0] ss:$36 sps:$4 sm:$0xff]  }
  0xc8   : > { %3193 = vmatprep.mubr.bf16.mxu0 %v5662_v63  ;;  %3415 = vmatpush1.bf16.msra.mxu0 %v5798_v24  ;;  %v5745_v62 = vld [vmem:[%s6130_s22 + $0x82c] ss:$36 sps:$4 sm:$0xff]  }
  0xc9   : > { %3416 = vmatprep.subr.bf16.mxu0 %v6008_v1  ;;  %v5811_v1 = vld [vmem:[%s7078_s1 + $0x1f8] sm:$0xff]   ;;  %v5766_v24 = vld [vmem:[%s6130_s22 + $0x24c] ss:$36 sps:$4 sm:$0xff]  }
  0xcc   : > { %3417 = vmatpush1.bf16.msra.mxu0 %v5811_v1  ;;  %v5772_v1 = vld [vmem:[%s6130_s22 + $0x294] ss:$36 sps:$4 sm:$0xff]  }
  0xce   : > { %2680 = vmatmul.mubr.bf16.gmra.mrb[64].mxu1 %v5664_v0  ;;  %v5747_v0 = vld [vmem:[%s6130_s22 + $0x5fc] ss:$36 sps:$4 sm:$0xff]  }
  0xcf   : > { %3194 = vmatmul.mubr.bf16.gmra.mrb[32].mxu0 %v5665_v2  ;;  %2687 = vmatprep.mubr.bf16.mxu1 %v5667_v3 }
  0xd0   : > { %3201 = vmatprep.mubr.bf16.mxu0 %v5669_v4  ;;  %v5749_v4 = vld [vmem:[%s6130_s22 + $0x828] ss:$36 sps:$4 sm:$0xff]  }
  0xd6   : > { %2688 = vmatmul.mubr.bf16.gmra.mrb[68].mxu1 %v5671_v7  ;;  %v5750_v7 = vld [vmem:[%s6130_s22 + $0x5f8] ss:$36 sps:$4 sm:$0xff]  }
  0xd7   : > { %3202 = vmatmul.mubr.bf16.gmra.mrb[36].mxu0 %v5672_v8  ;;  %2695 = vmatprep.mubr.bf16.mxu1 %v5673_v9  ;;  %v5751_v8 = vld [vmem:[%s6130_s22 + $0x874] ss:$36 sps:$4 sm:$0xff]  }
  0xd8   : > { %3209 = vmatprep.mubr.bf16.mxu0 %v5675_v10  ;;  %v5753_v10 = vld [vmem:[%s6130_s22 + $0x644] ss:$36 sps:$4 sm:$0xff]  }
  0xde   : > { %2696 = vmatmul.mubr.bf16.gmra.mrb[72].mxu1 %v5677_v11 }
  0xdf   : > { %3210 = vmatmul.mubr.bf16.gmra.mrb[40].mxu0 %v5678_v12  ;;  %2703 = vmatprep.mubr.bf16.mxu1 %v5680_v13  ;;  %v5755_v13 = vld [vmem:[%s6130_s22 + $0x870] ss:$36 sps:$4 sm:$0xff]  }
  0xe0   : > { %3217 = vmatprep.mubr.bf16.mxu0 %v5682_v14 }
  0xe6   : > { %2704 = vmatmul.mubr.bf16.gmra.mrb[76].mxu1 %v5684_v16  ;;  %v5758_v16 = vld [vmem:[%s6130_s22 + $0x8bc] ss:$36 sps:$4 sm:$0xff]  }
  0xe7   : > { %3218 = vmatmul.mubr.bf16.gmra.mrb[44].mxu0 %v5685_v17  ;;  %2711 = vmatprep.mubr.bf16.mxu1 %v5686_v18  ;;  %v5760_v18 = vld [vmem:[%s6130_s22 + $0x68c] ss:$36 sps:$4 sm:$0xff]  }
  0xe8   : > { %3225 = vmatprep.mubr.bf16.mxu0 %v5688_v19 }
  0xee   : > { %2712 = vmatmul.mubr.bf16.gmra.mrb[80].mxu1 %v5690_v20 }
  0xef   : > { %3226 = vmatmul.mubr.bf16.gmra.mrb[48].mxu0 %v5691_v21  ;;  %2719 = vmatprep.mubr.bf16.mxu1 %v5693_v22  ;;  %v5762_v21 = vld [vmem:[%s6130_s22 + $0x8b8] ss:$36 sps:$4 sm:$0xff]  }
  0xf0   : > { %3233 = vmatprep.mubr.bf16.mxu0 %v5695_v23  ;;  %v5763_v23 = vld [vmem:[%s6130_s22 + $0x688] ss:$36 sps:$4 sm:$0xff]  }
  0xf6   : > { %2720 = vmatmul.mubr.bf16.gmra.mrb[84].mxu1 %v5697_v25 }
  0xf7   : > { %3234 = vmatmul.mubr.bf16.gmra.mrb[52].mxu0 %v5698_v26  ;;  %2727 = vmatprep.mubr.bf16.mxu1 %v5699_v27  ;;  %v5767_v26 = vld [vmem:[%s6130_s22 + $0x6d4] ss:$36 sps:$4 sm:$0xff]  }
  0xf8   : > { %3241 = vmatprep.mubr.bf16.mxu0 %v5701_v28 }
  0xfe   : > { %2728 = vmatmul.mubr.bf16.gmra.mrb[88].mxu1 %v5703_v29  ;;  %v5764_v29 = vld [vmem:[%s6130_s22 + $0x248] ss:$36 sps:$4 sm:$0xff]  }
  0xff   : > { %3242 = vmatmul.mubr.bf16.gmra.mrb[56].mxu0 %v5704_v30  ;;  %2735 = vmatprep.mubr.bf16.mxu1 %v5706_v31  ;;  %v5769_v31 = vld [vmem:[%s6130_s22 + $0x6d0] ss:$36 sps:$4 sm:$0xff]  }
 0x100   : > { %3249 = vmatprep.mubr.bf16.mxu0 %v5708_v32 }
 0x106   : > { %2736 = vmatmul.mubr.bf16.gmra.mrb[92].mxu1 %v5710_v33  ;;  %v5774_v33 = vld [vmem:[%s6130_s22 + $0x71c] ss:$36 sps:$4 sm:$0xff]  }
 0x107   : > { %3250 = vmatmul.mubr.bf16.gmra.mrb[60].mxu0 %v5711_v34  ;;  %2743 = vmatprep.mubr.bf16.mxu1 %v5712_v35  ;;  %v5791_v34 = vld [vmem:[%s7078_s1 + $0x208] sm:$0xff]   ;;  %v5812_v35 = vld [vmem:[%s7078_s1 + $0x210] sm:$0xff]  }
 0x108   : > { %3257 = vmatprep.mubr.bf16.mxu0 %v5714_v36 }
 0x10e   : > { %2744 = vmatmul.mubr.bf16.gmra.mrb[96].mxu1 %v5716_v37 }
 0x10f   : > { %3258 = vmatmul.mubr.bf16.gmra.mrb[64].mxu0 %v5717_v38  ;;  %2751 = vmatprep.mubr.bf16.mxu1 %v5719_v39  ;;  %v5776_v38 = vld [vmem:[%s6130_s22 + $0x290] ss:$36 sps:$4 sm:$0xff]  }
 0x110   : > { %3265 = vmatprep.mubr.bf16.mxu0 %v5721_v40  ;;  %v5777_v40 = vld [vmem:[%s6130_s22 + $0x718] ss:$36 sps:$4 sm:$0xff]  }
 0x116   : > { %2752 = vmatmul.mubr.bf16.gmra.mrb[100].mxu1 %v5723_v41  ;;  %v5778_v41 = vld [vmem:[%s6130_s22 + $0x2dc] ss:$36 sps:$4 sm:$0xff]  }
 0x117   : > { %3266 = vmatmul.mubr.bf16.gmra.mrb[68].mxu0 %v5724_v42  ;;  %2759 = vmatprep.mubr.bf16.mxu1 %v5725_v43  ;;  %v5831_v43 = vld [vmem:[%s7078_s1 + $0x218] sm:$0xff]  }
 0x118   : > { %3273 = vmatprep.mubr.bf16.mxu0 %v5727_v44 }
 0x11e   : > { %2760 = vmatmul.mubr.bf16.gmra.mrb[104].mxu1 %v5729_v45  ;;  %v5850_v45 = vld [vmem:[%s7078_s1 + $0x220] sm:$0xff]  }
 0x11f   : > { %3274 = vmatmul.mubr.bf16.gmra.mrb[72].mxu0 %v5730_v46  ;;  %2767 = vmatprep.mubr.bf16.mxu1 %v5732_v47  ;;  %v5782_v47 = vld [vmem:[%s6130_s22 + $0x2d8] ss:$36 sps:$4 sm:$0xff]  }
 0x120   : > { %3281 = vmatprep.mubr.bf16.mxu0 %v5734_v48 }
 0x121   : > { %v6494_v49 = vpop.f32.mrb[0].mxu1 }
 0x122   : > { %v2555_v50 = vpop.f32.mrb[1].mxu1 }
 0x123   : > { %v6497_v52 = vpop.f32.mrb[2].mxu1  ;;  %v5783_v50 = vld [vmem:[%s6130_s22 + $0x760] ss:$36 sps:$4 sm:$0xff]  }
 0x124   : > { %v2558_v55 = vpop.f32.mrb[3].mxu1 }
 0x125   : > { %v5869_v55 = vld [vmem:[%s7078_s1 + $0x228] sm:$0xff]  }
 0x126   : > { %2768 = vmatmul.mubr.bf16.gmra.mrb[108].mxu1 %v5736_v51  ;;  %v5785_v51 = vld [vmem:[%s6130_s22 + $0x324] ss:$36 sps:$4 sm:$0xff]  }
 0x127   : > { %3282 = vmatmul.mubr.bf16.gmra.mrb[76].mxu0 %v5737_v53  ;;  %2775 = vmatprep.mubr.bf16.mxu1 %v5738_v54  ;;  %v5787_v54 = vld [vmem:[%s6130_s22 + $0x7ac] ss:$36 sps:$4 sm:$0xff]  }
 0x128   : > { %3289 = vmatprep.mubr.bf16.mxu0 %v5740_v56  ;;  %v5888_v56 = vld [vmem:[%s7078_s1 + $0x230] sm:$0xff]  }
 0x129   : > { %v6502_v57 = vpop.f32.mrb[4].mxu1 }
 0x12a   : > { %v2563_v58 = vpop.f32.mrb[5].mxu1 }
 0x12b   : > { %v6505_v60 = vpop.f32.mrb[6].mxu1  ;;  %v5789_v58 = vld [vmem:[%s6130_s22 + $0x320] ss:$36 sps:$4 sm:$0xff]  }
 0x12c   : > { %v2566_v63 = vpop.f32.mrb[7].mxu1 }
 0x12d   : > { %v5796_v63 = vld [vmem:[%s6130_s22 + $0x368] ss:$36 sps:$4 sm:$0xff]  }
 0x12e   : > { %2776 = vmatmul.mubr.bf16.gmra.mrb[112].mxu1 %v5742_v59  ;;  %v5790_v59 = vld [vmem:[%s6130_s22 + $0x7a8] ss:$36 sps:$4 sm:$0xff]  }
 0x12f   : > { %3290 = vmatmul.mubr.bf16.gmra.mrb[80].mxu0 %v5743_v61  ;;  %2783 = vmatprep.mubr.bf16.mxu1 %v5745_v62  ;;  %v5792_v61 = vld [vmem:[%s6130_s22 + $0x36c] ss:$36 sps:$4 sm:$0xff]   ;;  %v5794_v62 = vld [vmem:[%s6130_s22 + $0x7f4] ss:$36 sps:$4 sm:$0xff]  }
 0x130   : > { %3297 = vmatprep.mubr.bf16.mxu0 %v5747_v0  ;;  %v5797_v0 = vld [vmem:[%s6130_s22 + $0x7f0] ss:$36 sps:$4 sm:$0xff]  }
 0x131   : > { %v6510_v2 = vpop.f32.mrb[8].mxu1 }
 0x132   : > { %v2571_v3 = vpop.f32.mrb[9].mxu1 }
 0x133   : > { %v6513_v5 = vpop.f32.mrb[10].mxu1  ;;  %v5799_v3 = vld [vmem:[%s6130_s22 + $0x3b4] ss:$36 sps:$4 sm:$0xff]  }
 0x134   : > { %v2574_v9 = vpop.f32.mrb[11].mxu1 }
 0x135   : > { %v5805_v9 = vld [vmem:[%s6130_s22 + $0x3fc] ss:$36 sps:$4 sm:$0xff]  }
 0x136   : > { %2784 = vmatmul.mubr.bf16.gmra.mrb[116].mxu1 %v5749_v4  ;;  %v5801_v4 = vld [vmem:[%s6130_s22 + $0x83c] ss:$36 sps:$4 sm:$0xff]  }
 0x137   : > { %3298 = vmatmul.mubr.bf16.gmra.mrb[84].mxu0 %v5750_v7  ;;  %2791 = vmatprep.mubr.bf16.mxu1 %v5751_v8  ;;  %v5803_v7 = vld [vmem:[%s6130_s22 + $0x3b0] ss:$36 sps:$4 sm:$0xff]   ;;  %v5804_v8 = vld [vmem:[%s6130_s22 + $0x838] ss:$36 sps:$4 sm:$0xff]  }
 0x138   : > { %3305 = vmatprep.mubr.bf16.mxu0 %v5753_v10  ;;  %v5807_v10 = vld [vmem:[%s6130_s22 + $0x884] ss:$36 sps:$4 sm:$0xff]  }
 0x139   : > { %v6518_v11 = vpop.f32.mrb[12].mxu1 }
 0x13a   : > { %v2579_v12 = vpop.f32.mrb[13].mxu1 }
 0x13b   : > { %v6521_v14 = vpop.f32.mrb[14].mxu1  ;;  %v5907_v12 = vld [vmem:[%s7078_s1 + $0x238] sm:$0xff]  }
 0x13c   : > { %v2582_v17 = vpop.f32.mrb[15].mxu1 }
 0x13d   : > { %v5815_v17 = vld [vmem:[%s6130_s22 + $0x8cc] ss:$36 sps:$4 sm:$0xff]  }
 0x13e   : > { %2792 = vmatmul.mubr.bf16.gmra.mrb[120].mxu1 %v5755_v13  ;;  %v5809_v13 = vld [vmem:[%s6130_s22 + $0x3f8] ss:$36 sps:$4 sm:$0xff]  }
 0x13f   : > { %3306 = vmatmul.mubr.bf16.gmra.mrb[88].mxu0 %v5756_v15  ;;  %2799 = vmatprep.mubr.bf16.mxu1 %v5758_v16  ;;  %v5810_v15 = vld [vmem:[%s6130_s22 + $0x880] ss:$36 sps:$4 sm:$0xff]  }
 0x140   : > { %3313 = vmatprep.mubr.bf16.mxu0 %v5760_v18  ;;  %v5813_v16 = vld [vmem:[%s6130_s22 + $0x444] ss:$36 sps:$4 sm:$0xff]  }
 0x141   : > { %v6526_v19 = vpop.f32.mrb[16].mxu1  ;;  %v5817_v18 = vld [vmem:[%s6130_s22 + $0x440] ss:$36 sps:$4 sm:$0xff]  }
 0x142   : > { %v2587_v20 = vpop.f32.mrb[17].mxu1 }
 0x143   : > { %v6529_v22 = vpop.f32.mrb[18].mxu1  ;;  %v5818_v20 = vld [vmem:[%s6130_s22 + $0x8c8] ss:$36 sps:$4 sm:$0xff]  }
 0x144   : > { %v2590_v25 = vpop.f32.mrb[19].mxu1 }
 0x145   : > { %v5821_v25 = vld [vmem:[%s6130_s22 + $0x18] ss:$36 sps:$4 sm:$0xff]  }
 0x146   : > { %2800 = vmatmul.mubr.bf16.gmra.mrb[124].mxu1 %v5762_v21  ;;  %v5819_v21 = vld [vmem:[%s6130_s22 + $0x48c] ss:$36 sps:$4 sm:$0xff]  }
 0x147   : > { %3314 = vmatmul.mubr.bf16.gmra.mrb[92].mxu0 %v5763_v23  ;;  %2904 = vmatprep.mubr.bf16.mxu1 %v5766_v24  ;;  %v5823_v23 = vld [vmem:[%s6130_s22 + $0x1c] ss:$36 sps:$4 sm:$0xff]   ;;  %v5824_v24 = vld [vmem:[%s6130_s22 + $0x488] ss:$36 sps:$4 sm:$0xff]  }
 0x148   : > { %3321 = vmatprep.mubr.bf16.mxu0 %v5767_v26  ;;  %v5825_v26 = vld [vmem:[%s6130_s22 + $0x4d4] ss:$36 sps:$4 sm:$0xff]  }
 0x149   : > { %v6534_v27 = vpop.f32.mrb[20].mxu1 }
 0x14a   : > { %v2595_v28 = vpop.f32.mrb[21].mxu1 }
 0x14b   : > { %v6537_v30 = vpop.f32.mrb[22].mxu1  ;;  %v5827_v28 = vld [vmem:[%s6130_s22 + $0x64] ss:$36 sps:$4 sm:$0xff]  }
 0x14c   : > { %v2598_v32 = vpop.f32.mrb[23].mxu1 }
 0x14d   : > { %v5832_v32 = vld [vmem:[%s6130_s22 + $0x51c] ss:$36 sps:$4 sm:$0xff]  }
 0x14e   : > { %2905 = vmatmul.mubr.bf16.vlgmr.msra.gmra.mrb[32].mxu1 %v5764_v29  ;;  %v5829_v29 = vld [vmem:[%s6130_s22 + $0x4d0] ss:$36 sps:$4 sm:$0xff]  }
 0x14f   : > { %3322 = vmatmul.mubr.bf16.gmra.mrb[96].mxu0 %v5769_v31  ;;  %5071 = vmatpush3.bf16.msra.mxu1 %v6439_v6  ;;  %v5780_v6 = vld [vmem:[%s6130_s22 + $0x764] ss:$36 sps:$4 sm:$0xff]  }
 0x150   : > { %2912 = vmatprep.mubr.bf16.mxu1 %v5772_v1  ;;  %3329 = vmatprep.mubr.bf16.mxu0 %v5774_v33  ;;  %v5830_v31 = vld [vmem:[%s6130_s22 + $0x60] ss:$36 sps:$4 sm:$0xff]   ;;  %v5834_v1 = vld [vmem:[%s6130_s22 + $0xac] ss:$36 sps:$4 sm:$0xff]   ;;  %v5836_v33 = vld [vmem:[%s6130_s22 + $0x518] ss:$36 sps:$4 sm:$0xff]  }
 0x151   : > { %v6549_v36 = vpop.f32.mrb[24].mxu1  ;;  %5072 = vmatprep.subr.bf16.mxu1 %v5791_v34 }
 0x152   : > { %v2603_v37 = vpop.f32.mrb[25].mxu1 }
 0x153   : > { %v6552_v39 = vpop.f32.mrb[26].mxu1  ;;  %5073 = vmatpush3.bf16.msra.mxu1 %v5791_v34  ;;  %v5837_v34 = vld [vmem:[%s6130_s22 + $0xa8] ss:$36 sps:$4 sm:$0xff]   ;;  %v5840_v37 = vld [vmem:[%s6130_s22 + $0xf4] ss:$36 sps:$4 sm:$0xff]  }
 0x154   : > { %v2606_v42 = vpop.f32.mrb[27].mxu1  ;;  %5074 = vmatprep.subr.bf16.mxu1 %v5812_v35 }
 0x155   : > { %v5846_v42 = vld [vmem:[%s6130_s22 + $0x13c] ss:$36 sps:$4 sm:$0xff]  }
 0x156   : > { %2913 = vmatmul.mubr.bf16.gmra.mrb[36].mxu1 %v5776_v38  ;;  %v5842_v38 = vld [vmem:[%s6130_s22 + $0x560] ss:$36 sps:$4 sm:$0xff]  }
 0x157   : > { %3330 = vmatmul.mubr.bf16.gmra.mrb[100].mxu0 %v5777_v40  ;;  %2920 = vmatprep.mubr.bf16.mxu1 %v5778_v41  ;;  %v5843_v40 = vld [vmem:[%s6130_s22 + $0xf0] ss:$36 sps:$4 sm:$0xff]  }
 0x158   : > { %3337 = vmatprep.mubr.bf16.mxu0 %v5780_v6  ;;  %5075 = vmatpush3.bf16.msra.mxu1 %v5812_v35  ;;  %v5838_v35 = vld [vmem:[%s6130_s22 + $0x564] ss:$36 sps:$4 sm:$0xff]   ;;  %v5844_v41 = vld [vmem:[%s6130_s22 + $0x5ac] ss:$36 sps:$4 sm:$0xff]  }
 0x159   : > { %v6560_v44 = vpop.f32.mrb[28].mxu1  ;;  %5076 = vmatprep.subr.bf16.mxu1 %v5831_v43  ;;  %v5848_v6 = vld [vmem:[%s6130_s22 + $0x5a8] ss:$36 sps:$4 sm:$0xff]  }
 0x15a   : > { %v2611_v46 = vpop.f32.mrb[29].mxu1 }
 0x15b   : > { %v6566_v48 = vpop.f32.mrb[30].mxu1  ;;  %v5853_v46 = vld [vmem:[%s6130_s22 + $0x184] ss:$36 sps:$4 sm:$0xff]  }
 0x15c   : > { %v2614_v53 = vpop.f32.mrb[31].mxu1  ;;  %5077 = vmatpush3.bf16.msra.mxu1 %v5831_v43  ;;  %v5849_v43 = vld [vmem:[%s6130_s22 + $0x138] ss:$36 sps:$4 sm:$0xff]  }
 0x15d   : > { %5078 = vmatprep.subr.bf16.mxu1 %v5850_v45  ;;  %v5859_v53 = vld [vmem:[%s6130_s22 + $0x1cc] ss:$36 sps:$4 sm:$0xff]  }
 0x15e   : > { %2921 = vmatmul.mubr.bf16.gmra.mrb[40].mxu1 %v5782_v47  ;;  %v5855_v47 = vld [vmem:[%s6130_s22 + $0x5f0] ss:$36 sps:$4 sm:$0xff]  }
 0x15f   : > { %3338 = vmatmul.mubr.bf16.gmra.mrb[104].mxu0 %v5783_v50  ;;  %2928 = vmatprep.mubr.bf16.mxu1 %v5785_v51  ;;  %v5856_v50 = vld [vmem:[%s6130_s22 + $0x180] ss:$36 sps:$4 sm:$0xff]  }
 0x160   : > { %3345 = vmatprep.mubr.bf16.mxu0 %v5787_v54  ;;  %5079 = vmatpush3.bf16.msra.mxu1 %v5850_v45  ;;  %v5851_v45 = vld [vmem:[%s6130_s22 + $0x5f4] ss:$36 sps:$4 sm:$0xff]   ;;  %v5857_v51 = vld [vmem:[%s6130_s22 + $0x63c] ss:$36 sps:$4 sm:$0xff]  }
 0x161   : > { %5080 = vmatprep.subr.bf16.mxu1 %v5869_v55  ;;  %v5861_v54 = vld [vmem:[%s6130_s22 + $0x638] ss:$36 sps:$4 sm:$0xff]  }
 0x164   : > { %5081 = vmatpush3.bf16.msra.mxu1 %v5869_v55  ;;  %v5862_v55 = vld [vmem:[%s6130_s22 + $0x1c8] ss:$36 sps:$4 sm:$0xff]  }
 0x165   : > { %5082 = vmatprep.subr.bf16.mxu1 %v5888_v56 }
 0x166   : > { %2929 = vmatmul.mubr.bf16.gmra.mrb[44].mxu1 %v5789_v58  ;;  %v5865_v58 = vld [vmem:[%s6130_s22 + $0x214] ss:$36 sps:$4 sm:$0xff]  }
 0x167   : > { %3346 = vmatmul.mubr.bf16.gmra.mrb[108].mxu0 %v5790_v59  ;;  %2936 = vmatprep.mubr.bf16.mxu1 %v5792_v61  ;;  %v5867_v59 = vld [vmem:[%s6130_s22 + $0x680] ss:$36 sps:$4 sm:$0xff]   ;;  %v5868_v61 = vld [vmem:[%s6130_s22 + $0x210] ss:$36 sps:$4 sm:$0xff]  }
 0x168   : > { %3353 = vmatprep.mubr.bf16.mxu0 %v5794_v62  ;;  %5083 = vmatpush3.bf16.msra.mxu1 %v5888_v56  ;;  %v5863_v56 = vld [vmem:[%s6130_s22 + $0x684] ss:$36 sps:$4 sm:$0xff]   ;;  %v5870_v62 = vld [vmem:[%s6130_s22 + $0x6cc] ss:$36 sps:$4 sm:$0xff]  }
 0x169   : > { %5084 = vmatprep.subr.bf16.mxu1 %v5907_v12 }
 0x16c   : > { %5085 = vmatpush3.bf16.msra.mxu1 %v5907_v12  ;;  %v5884_v12 = vld [vmem:[%s6130_s22 + $0x2ec] ss:$36 sps:$4 sm:$0xff]  }
 0x16e   : > { %2937 = vmatmul.mubr.bf16.gmra.mrb[48].mxu1 %v5796_v63  ;;  %v5872_v63 = vld [vmem:[%s6130_s22 + $0x25c] ss:$36 sps:$4 sm:$0xff]  }
 0x16f   : > { %3354 = vmatmul.mubr.bf16.gmra.mrb[112].mxu0 %v5797_v0  ;;  %2944 = vmatprep.mubr.bf16.mxu1 %v5799_v3  ;;  %v5874_v0 = vld [vmem:[%s6130_s22 + $0x6c8] ss:$36 sps:$4 sm:$0xff]   ;;  %v5875_v3 = vld [vmem:[%s6130_s22 + $0x258] ss:$36 sps:$4 sm:$0xff]  }
 0x170   : > { %3361 = vmatprep.mubr.bf16.mxu0 %v5801_v4  ;;  %v5876_v4 = vld [vmem:[%s6130_s22 + $0x714] ss:$36 sps:$4 sm:$0xff]  }
 0x176   : > { %2945 = vmatmul.mubr.bf16.gmra.mrb[52].mxu1 %v5803_v7  ;;  %v5878_v7 = vld [vmem:[%s6130_s22 + $0x2a4] ss:$36 sps:$4 sm:$0xff]  }
 0x177   : > { %3362 = vmatmul.mubr.bf16.gmra.mrb[116].mxu0 %v5804_v8  ;;  %2952 = vmatprep.mubr.bf16.mxu1 %v5805_v9  ;;  %v5880_v8 = vld [vmem:[%s6130_s22 + $0x710] ss:$36 sps:$4 sm:$0xff]   ;;  %v5881_v9 = vld [vmem:[%s6130_s22 + $0x2a0] ss:$36 sps:$4 sm:$0xff]  }
 0x178   : > { %3369 = vmatprep.mubr.bf16.mxu0 %v5807_v10  ;;  %v5882_v10 = vld [vmem:[%s6130_s22 + $0x75c] ss:$36 sps:$4 sm:$0xff]  }
 0x17e   : > { %2953 = vmatmul.mubr.bf16.gmra.mrb[56].mxu1 %v5809_v13  ;;  %v5886_v13 = vld [vmem:[%s6130_s22 + $0x758] ss:$36 sps:$4 sm:$0xff]  }
 0x17f   : > { %3370 = vmatmul.mubr.bf16.gmra.mrb[120].mxu0 %v5810_v15  ;;  %2960 = vmatprep.mubr.bf16.mxu1 %v5813_v16  ;;  %v5887_v15 = vld [vmem:[%s6130_s22 + $0x2e8] ss:$36 sps:$4 sm:$0xff]  }
 0x180   : > { %3377 = vmatprep.mubr.bf16.mxu0 %v5815_v17  ;;  %v5889_v16 = vld [vmem:[%s6130_s22 + $0x7a4] ss:$36 sps:$4 sm:$0xff]   ;;  %v5891_v17 = vld [vmem:[%s6130_s22 + $0x334] ss:$36 sps:$4 sm:$0xff]  }
 0x186   : > { %2961 = vmatmul.mubr.bf16.gmra.mrb[60].mxu1 %v5817_v18  ;;  %v5893_v18 = vld [vmem:[%s6130_s22 + $0x7a0] ss:$36 sps:$4 sm:$0xff]  }
 0x187   : > { %3378 = vmatmul.mubr.bf16.gmra.mrb[124].mxu0 %v5818_v20  ;;  %2968 = vmatprep.mubr.bf16.mxu1 %v5819_v21  ;;  %v5894_v20 = vld [vmem:[%s6130_s22 + $0x330] ss:$36 sps:$4 sm:$0xff]  }
 0x188   : > { %3418 = vmatprep.mubr.bf16.mxu0 %v5823_v23  ;;  %v5895_v21 = vld [vmem:[%s6130_s22 + $0x7ec] ss:$36 sps:$4 sm:$0xff]   ;;  %v5897_v23 = vld [vmem:[%s6130_s22 + $0x37c] ss:$36 sps:$4 sm:$0xff]  }
 0x18e   : > { %2969 = vmatmul.mubr.bf16.gmra.mrb[64].mxu1 %v5824_v24  ;;  %v5899_v24 = vld [vmem:[%s6130_s22 + $0x7e8] ss:$36 sps:$4 sm:$0xff]  }
 0x18f   : > { %3419 = vmatmul.mubr.bf16.vlgmr.msra.gmra.mrb[0].mxu0 %v5821_v25  ;;  %2976 = vmatprep.mubr.bf16.mxu1 %v5825_v26  ;;  %v5900_v25 = vld [vmem:[%s6130_s22 + $0x378] ss:$36 sps:$4 sm:$0xff]  }
 0x190   : > { %3426 = vmatprep.mubr.bf16.mxu0 %v5827_v28  ;;  %v5901_v26 = vld [vmem:[%s6130_s22 + $0x834] ss:$36 sps:$4 sm:$0xff]   ;;  %v5903_v28 = vld [vmem:[%s6130_s22 + $0x3c4] ss:$36 sps:$4 sm:$0xff]  }
 0x196   : > { %2977 = vmatmul.mubr.bf16.gmra.mrb[68].mxu1 %v5829_v29  ;;  %v5905_v29 = vld [vmem:[%s6130_s22 + $0x830] ss:$36 sps:$4 sm:$0xff]  }
 0x197   : > { %3427 = vmatmul.mubr.bf16.gmra.mrb[4].mxu0 %v5830_v31  ;;  %2984 = vmatprep.mubr.bf16.mxu1 %v5832_v32  ;;  %v5906_v31 = vld [vmem:[%s6130_s22 + $0x3c0] ss:$36 sps:$4 sm:$0xff]  }
 0x198   : > { %3434 = vmatprep.mubr.bf16.mxu0 %v5834_v1  ;;  %v5908_v32 = vld [vmem:[%s6130_s22 + $0x87c] ss:$36 sps:$4 sm:$0xff]   ;;  %v5910_v1 = vld [vmem:[%s6130_s22 + $0x40c] ss:$36 sps:$4 sm:$0xff]  }
 0x19e   : > { %2985 = vmatmul.mubr.bf16.gmra.mrb[72].mxu1 %v5836_v33  ;;  %v5912_v33 = vld [vmem:[%s6130_s22 + $0x878] ss:$36 sps:$4 sm:$0xff]  }
 0x19f   : > { %3435 = vmatmul.mubr.bf16.gmra.mrb[8].mxu0 %v5837_v34  ;;  %2992 = vmatprep.mubr.bf16.mxu1 %v5838_v35  ;;  %v5913_v34 = vld [vmem:[%s6130_s22 + $0x408] ss:$36 sps:$4 sm:$0xff]  }
 0x1a0   : > { %3442 = vmatprep.mubr.bf16.mxu0 %v5840_v37  ;;  %v5914_v35 = vld [vmem:[%s6130_s22 + $0x8c4] ss:$36 sps:$4 sm:$0xff]   ;;  %v5916_v37 = vld [vmem:[%s6130_s22 + $0x454] ss:$36 sps:$4 sm:$0xff]  }
 0x1a6   : > { %2993 = vmatmul.mubr.bf16.gmra.mrb[76].mxu1 %v5842_v38  ;;  %v5918_v38 = vld [vmem:[%s6130_s22 + $0x8c0] ss:$36 sps:$4 sm:$0xff]  }
 0x1a7   : > { %3443 = vmatmul.mubr.bf16.gmra.mrb[12].mxu0 %v5843_v40  ;;  %3000 = vmatprep.mubr.bf16.mxu1 %v5844_v41  ;;  %v5919_v40 = vld [vmem:[%s6130_s22 + $0x450] ss:$36 sps:$4 sm:$0xff]   ;;  %v5922_v41 = vld [vmem:[%s6130_s22 + $0x20] ss:$36 sps:$4 sm:$0xff]  }
 0x1a8   : > { %3450 = vmatprep.mubr.bf16.mxu0 %v5846_v42  ;;  %v5920_v42 = vld [vmem:[%s6130_s22 + $0x49c] ss:$36 sps:$4 sm:$0xff]  }
 0x1ae   : > { %3001 = vmatmul.mubr.bf16.gmra.mrb[80].mxu1 %v5848_v6  ;;  %v5924_v6 = vld [vmem:[%s6130_s22 + $0x68] ss:$36 sps:$4 sm:$0xff]  }
 0x1af   : > { %3451 = vmatmul.mubr.bf16.gmra.mrb[16].mxu0 %v5849_v43  ;;  %3008 = vmatprep.mubr.bf16.mxu1 %v5851_v45  ;;  %v5923_v43 = vld [vmem:[%s6130_s22 + $0x498] ss:$36 sps:$4 sm:$0xff]   ;;  %v5927_v45 = vld [vmem:[%s6130_s22 + $0xb0] ss:$36 sps:$4 sm:$0xff]  }
 0x1b0   : > { %3458 = vmatprep.mubr.bf16.mxu0 %v5853_v46  ;;  %v5925_v46 = vld [vmem:[%s6130_s22 + $0x4e4] ss:$36 sps:$4 sm:$0xff]  }
 0x1b6   : > { %3009 = vmatmul.mubr.bf16.gmra.mrb[84].mxu1 %v5855_v47  ;;  %v5929_v47 = vld [vmem:[%s6130_s22 + $0xf8] ss:$36 sps:$4 sm:$0xff]  }
 0x1b7   : > { %3459 = vmatmul.mubr.bf16.gmra.mrb[20].mxu0 %v5856_v50  ;;  %3016 = vmatprep.mubr.bf16.mxu1 %v5857_v51  ;;  %v5928_v50 = vld [vmem:[%s6130_s22 + $0x4e0] ss:$36 sps:$4 sm:$0xff]  }
 0x1b8   : > { %3466 = vmatprep.mubr.bf16.mxu0 %v5859_v53  ;;  %v5932_v51 = vld [vmem:[%s6130_s22 + $0x140] ss:$36 sps:$4 sm:$0xff]   ;;  %v5930_v53 = vld [vmem:[%s6130_s22 + $0x52c] ss:$36 sps:$4 sm:$0xff]  }
 0x1be   : > { %3017 = vmatmul.mubr.bf16.gmra.mrb[88].mxu1 %v5861_v54  ;;  %v5934_v54 = vld [vmem:[%s6130_s22 + $0x188] ss:$36 sps:$4 sm:$0xff]  }
 0x1bf   : > { %3467 = vmatmul.mubr.bf16.gmra.mrb[24].mxu0 %v5862_v55  ;;  %3024 = vmatprep.mubr.bf16.mxu1 %v5863_v56  ;;  %v5933_v55 = vld [vmem:[%s6130_s22 + $0x528] ss:$36 sps:$4 sm:$0xff]   ;;  %v5937_v56 = vld [vmem:[%s6130_s22 + $0x1d0] ss:$36 sps:$4 sm:$0xff]  }
 0x1c0   : > { %3474 = vmatprep.mubr.bf16.mxu0 %v5865_v58  ;;  %v5935_v58 = vld [vmem:[%s6130_s22 + $0x574] ss:$36 sps:$4 sm:$0xff]  }
 0x1c6   : > { %3025 = vmatmul.mubr.bf16.gmra.mrb[92].mxu1 %v5867_v59 }
 0x1c7   : > { %3475 = vmatmul.mubr.bf16.gmra.mrb[28].mxu0 %v5868_v61  ;;  %3032 = vmatprep.mubr.bf16.mxu1 %v5870_v62  ;;  %v5939_v62 = vld [vmem:[%s6130_s22 + $0x218] ss:$36 sps:$4 sm:$0xff]  }
 0x1c8   : > { %3482 = vmatprep.mubr.bf16.mxu0 %v5872_v63 }
 0x1ce   : > { %3033 = vmatmul.mubr.bf16.gmra.mrb[96].mxu1 %v5874_v0  ;;  %v5938_v0 = vld [vmem:[%s6130_s22 + $0x570] ss:$36 sps:$4 sm:$0xff]  }
 0x1cf   : > { %3483 = vmatmul.mubr.bf16.gmra.mrb[32].mxu0 %v5875_v3  ;;  %3040 = vmatprep.mubr.bf16.mxu1 %v5876_v4  ;;  %v5942_v3 = vld [vmem:[%s6130_s22 + $0x260] ss:$36 sps:$4 sm:$0xff]  }
 0x1d0   : > { %3490 = vmatprep.mubr.bf16.mxu0 %v5878_v7  ;;  %v5940_v7 = vld [vmem:[%s6130_s22 + $0x5bc] ss:$36 sps:$4 sm:$0xff]  }
 0x1d6   : > { %3041 = vmatmul.mubr.bf16.gmra.mrb[100].mxu1 %v5880_v8 }
 0x1d7   : > { %3491 = vmatmul.mubr.bf16.gmra.mrb[36].mxu0 %v5881_v9  ;;  %3048 = vmatprep.mubr.bf16.mxu1 %v5882_v10  ;;  %v5944_v10 = vld [vmem:[%s6130_s22 + $0x2a8] ss:$36 sps:$4 sm:$0xff]  }
 0x1d8   : > { %3498 = vmatprep.mubr.bf16.mxu0 %v5884_v12 }
 0x1de   : > { %3049 = vmatmul.mubr.bf16.gmra.mrb[104].mxu1 %v5886_v13  ;;  %v5943_v13 = vld [vmem:[%s6130_s22 + $0x5b8] ss:$36 sps:$4 sm:$0xff]  }
 0x1df   : > { %3499 = vmatmul.mubr.bf16.gmra.mrb[40].mxu0 %v5887_v15  ;;  %3056 = vmatprep.mubr.bf16.mxu1 %v5889_v16  ;;  %v5947_v15 = vld [vmem:[%s6130_s22 + $0x2f0] ss:$36 sps:$4 sm:$0xff]  }
 0x1e0   : > { %3506 = vmatprep.mubr.bf16.mxu0 %v5891_v17  ;;  %v5945_v17 = vld [vmem:[%s6130_s22 + $0x604] ss:$36 sps:$4 sm:$0xff]  }
 0x1e6   : > { %3057 = vmatmul.mubr.bf16.gmra.mrb[108].mxu1 %v5893_v18 }
 0x1e7   : > { %3507 = vmatmul.mubr.bf16.gmra.mrb[44].mxu0 %v5894_v20  ;;  %3064 = vmatprep.mubr.bf16.mxu1 %v5895_v21  ;;  %v5949_v21 = vld [vmem:[%s6130_s22 + $0x338] ss:$36 sps:$4 sm:$0xff]  }
 0x1e8   : > { %3514 = vmatprep.mubr.bf16.mxu0 %v5897_v23 }
 0x1ee   : > { %3065 = vmatmul.mubr.bf16.gmra.mrb[112].mxu1 %v5899_v24  ;;  %v5948_v24 = vld [vmem:[%s6130_s22 + $0x600] ss:$36 sps:$4 sm:$0xff]  }
 0x1ef   : > { %3515 = vmatmul.mubr.bf16.gmra.mrb[48].mxu0 %v5900_v25  ;;  %3072 = vmatprep.mubr.bf16.mxu1 %v5901_v26  ;;  %v5952_v25 = vld [vmem:[%s6130_s22 + $0x380] ss:$36 sps:$4 sm:$0xff]  }
 0x1f0   : > { %3522 = vmatprep.mubr.bf16.mxu0 %v5903_v28  ;;  %v5950_v28 = vld [vmem:[%s6130_s22 + $0x64c] ss:$36 sps:$4 sm:$0xff]  }
 0x1f6   : > { %3073 = vmatmul.mubr.bf16.gmra.mrb[116].mxu1 %v5905_v29 }
 0x1f7   : > { %3523 = vmatmul.mubr.bf16.gmra.mrb[52].mxu0 %v5906_v31  ;;  %3080 = vmatprep.mubr.bf16.mxu1 %v5908_v32  ;;  %v5954_v32 = vld [vmem:[%s6130_s22 + $0x3c8] ss:$36 sps:$4 sm:$0xff]  }
 0x1f8   : > { %3530 = vmatprep.mubr.bf16.mxu0 %v5910_v1 }
 0x1fe   : > { %3081 = vmatmul.mubr.bf16.gmra.mrb[120].mxu1 %v5912_v33  ;;  %v5953_v33 = vld [vmem:[%s6130_s22 + $0x648] ss:$36 sps:$4 sm:$0xff]  }
 0x1ff   : > { %3531 = vmatmul.mubr.bf16.gmra.mrb[56].mxu0 %v5913_v34  ;;  %3088 = vmatprep.mubr.bf16.mxu1 %v5914_v35  ;;  %v5957_v34 = vld [vmem:[%s6130_s22 + $0x410] ss:$36 sps:$4 sm:$0xff]  }
 0x200   : > { %3538 = vmatprep.mubr.bf16.mxu0 %v5916_v37  ;;  %v5955_v37 = vld [vmem:[%s6130_s22 + $0x694] ss:$36 sps:$4 sm:$0xff]  }
 0x206   : > { %3089 = vmatmul.mubr.bf16.gmra.mrb[124].mxu1 %v5918_v38 }
 0x207   : > { %3539 = vmatmul.mubr.bf16.gmra.mrb[60].mxu0 %v5919_v40  ;;  %5086 = vmatprep.mubr.bf16.mxu1 %v5922_v41  ;;  %v5959_v41 = vld [vmem:[%s6130_s22 + $0x458] ss:$36 sps:$4 sm:$0xff]  }
 0x208   : > { %3546 = vmatprep.mubr.bf16.mxu0 %v5920_v42 }
 0x20e   : > { %5087 = vmatmul.mubr.bf16.vlgmr.msra.gmra.mrb[128].mxu1 %v5924_v6  ;;  %v5958_v6 = vld [vmem:[%s6130_s22 + $0x690] ss:$36 sps:$4 sm:$0xff]  }
 0x20f   : > { %3547 = vmatmul.mubr.bf16.gmra.mrb[64].mxu0 %v5923_v43  ;;  %5090 = vmatprep.mubr.bf16.mxu1 %v5927_v45  ;;  %v5962_v43 = vld [vmem:[%s6130_s22 + $0x4a0] ss:$36 sps:$4 sm:$0xff]  }
 0x210   : > { %3554 = vmatprep.mubr.bf16.mxu0 %v5925_v46  ;;  %v5960_v46 = vld [vmem:[%s6130_s22 + $0x6dc] ss:$36 sps:$4 sm:$0xff]  }
 0x216   : > { %5091 = vmatmul.mubr.bf16.gmra.mrb[132].mxu1 %v5929_v47 }
 0x217   : > { %3555 = vmatmul.mubr.bf16.gmra.mrb[68].mxu0 %v5928_v50  ;;  %5094 = vmatprep.mubr.bf16.mxu1 %v5932_v51  ;;  %v5964_v51 = vld [vmem:[%s6130_s22 + $0x4e8] ss:$36 sps:$4 sm:$0xff]  }
 0x218   : > { %3562 = vmatprep.mubr.bf16.mxu0 %v5930_v53 }
 0x21e   : > { %5095 = vmatmul.mubr.bf16.gmra.mrb[136].mxu1 %v5934_v54  ;;  %v5963_v54 = vld [vmem:[%s6130_s22 + $0x6d8] ss:$36 sps:$4 sm:$0xff]  }
 0x21f   : > { %3563 = vmatmul.mubr.bf16.gmra.mrb[72].mxu0 %v5933_v55  ;;  %5098 = vmatprep.mubr.bf16.mxu1 %v5937_v56  ;;  %v5967_v55 = vld [vmem:[%s6130_s22 + $0x530] ss:$36 sps:$4 sm:$0xff]  }
 0x220   : > { %3570 = vmatprep.mubr.bf16.mxu0 %v5935_v58  ;;  %v5965_v58 = vld [vmem:[%s6130_s22 + $0x724] ss:$36 sps:$4 sm:$0xff]  }
 0x221   : > { %v6676_v59 = vpop.f32.mrb[32].mxu1 }
 0x222   : > { %v2908_v61 = vpop.f32.mrb[33].mxu1 }
 0x223   : > { %v6679_v63 = vpop.f32.mrb[34].mxu1 }
 0x224   : > { %v2911_v4 = vpop.f32.mrb[35].mxu1 }
 0x225   : > { %v5968_v4 = vld [vmem:[%s6130_s22 + $0x720] ss:$36 sps:$4 sm:$0xff]  }
 0x226   : > { %5099 = vmatmul.mubr.bf16.gmra.mrb[140].mxu1 %v5939_v62 }
 0x227   : > { %3571 = vmatmul.mubr.bf16.gmra.mrb[76].mxu0 %v5938_v0  ;;  %5102 = vmatprep.mubr.bf16.mxu1 %v5942_v3  ;;  %v5969_v0 = vld [vmem:[%s6130_s22 + $0x578] ss:$36 sps:$4 sm:$0xff]  }
 0x228   : > { %3578 = vmatprep.mubr.bf16.mxu0 %v5940_v7  ;;  %v5972_v7 = vld [vmem:[%s6130_s22 + $0x5c0] ss:$36 sps:$4 sm:$0xff]  }
 0x229   : > { %v6684_v8 = vpop.f32.mrb[36].mxu1 }
 0x22a   : > { %v2916_v9 = vpop.f32.mrb[37].mxu1 }
 0x22b   : > { %v6687_v12 = vpop.f32.mrb[38].mxu1 }
 0x22c   : > { %v2919_v16 = vpop.f32.mrb[39].mxu1 }
 0x22d   : > { %v5974_v16 = vld [vmem:[%s6130_s22 + $0x608] ss:$36 sps:$4 sm:$0xff]  }
 0x22e   : > { %5103 = vmatmul.mubr.bf16.gmra.mrb[144].mxu1 %v5944_v10  ;;  %v5970_v10 = vld [vmem:[%s6130_s22 + $0x76c] ss:$36 sps:$4 sm:$0xff]  }
 0x22f   : > { %3579 = vmatmul.mubr.bf16.gmra.mrb[80].mxu0 %v5943_v13  ;;  %5106 = vmatprep.mubr.bf16.mxu1 %v5947_v15 }
 0x230   : > { %3586 = vmatprep.mubr.bf16.mxu0 %v5945_v17 }
 0x231   : > { %v6692_v18 = vpop.f32.mrb[40].mxu1 }
 0x232   : > { %v2924_v20 = vpop.f32.mrb[41].mxu1 }
 0x233   : > { %v6695_v23 = vpop.f32.mrb[42].mxu1  ;;  %v5973_v20 = vld [vmem:[%s6130_s22 + $0x768] ss:$36 sps:$4 sm:$0xff]  }
 0x234   : > { %v2927_v26 = vpop.f32.mrb[43].mxu1 }
 0x236   : > { %5107 = vmatmul.mubr.bf16.gmra.mrb[148].mxu1 %v5949_v21  ;;  %v5977_v21 = vld [vmem:[%s6130_s22 + $0x650] ss:$36 sps:$4 sm:$0xff]  }
 0x237   : > { %3587 = vmatmul.mubr.bf16.gmra.mrb[84].mxu0 %v5948_v24  ;;  %5110 = vmatprep.mubr.bf16.mxu1 %v5952_v25  ;;  %v5975_v25 = vld [vmem:[%s6130_s22 + $0x7b4] ss:$36 sps:$4 sm:$0xff]  }
 0x238   : > { %3594 = vmatprep.mubr.bf16.mxu0 %v5950_v28 }
 0x239   : > { %v6700_v29 = vpop.f32.mrb[44].mxu1 }
 0x23a   : > { %v2932_v31 = vpop.f32.mrb[45].mxu1 }
 0x23b   : > { %v6703_v1 = vpop.f32.mrb[46].mxu1 }
 0x23c   : > { %v2935_v35 = vpop.f32.mrb[47].mxu1 }
 0x23e   : > { %5111 = vmatmul.mubr.bf16.gmra.mrb[152].mxu1 %v5954_v32  ;;  %v5979_v32 = vld [vmem:[%s6130_s22 + $0x698] ss:$36 sps:$4 sm:$0xff]  }
 0x23f   : > { %3595 = vmatmul.mubr.bf16.gmra.mrb[88].mxu0 %v5953_v33  ;;  %5114 = vmatprep.mubr.bf16.mxu1 %v5957_v34 }
 0x240   : > { %3602 = vmatprep.mubr.bf16.mxu0 %v5955_v37  ;;  %v5978_v37 = vld [vmem:[%s6130_s22 + $0x7b0] ss:$36 sps:$4 sm:$0xff]  }
 0x241   : > { %v6708_v38 = vpop.f32.mrb[48].mxu1 }
 0x242   : > { %v2940_v40 = vpop.f32.mrb[49].mxu1 }
 0x243   : > { %v6711_v42 = vpop.f32.mrb[50].mxu1  ;;  %v5982_v40 = vld [vmem:[%s6130_s22 + $0x6e0] ss:$36 sps:$4 sm:$0xff]  }
 0x244   : > { %v2943_v45 = vpop.f32.mrb[51].mxu1 }
 0x246   : > { %5115 = vmatmul.mubr.bf16.gmra.mrb[156].mxu1 %v5959_v41 }
 0x247   : > { %3603 = vmatmul.mubr.bf16.gmra.mrb[92].mxu0 %v5958_v6  ;;  %5118 = vmatprep.mubr.bf16.mxu1 %v5962_v43  ;;  %v5980_v43 = vld [vmem:[%s6130_s22 + $0x7fc] ss:$36 sps:$4 sm:$0xff]  }
 0x248   : > { %3610 = vmatprep.mubr.bf16.mxu0 %v5960_v46 }
 0x249   : > { %v6716_v47 = vpop.f32.mrb[52].mxu1 }
 0x24a   : > { %v2948_v50 = vpop.f32.mrb[53].mxu1 }
 0x24b   : > { %v6719_v53 = vpop.f32.mrb[54].mxu1 }
 0x24c   : > { %v2951_v56 = vpop.f32.mrb[55].mxu1 }
 0x24e   : > { %5119 = vmatmul.mubr.bf16.gmra.mrb[160].mxu1 %v5964_v51 }
 0x24f   : > { %3611 = vmatmul.mubr.bf16.gmra.mrb[96].mxu0 %v5963_v54  ;;  %5122 = vmatprep.mubr.bf16.mxu1 %v5967_v55  ;;  %v5984_v54 = vld [vmem:[%s6130_s22 + $0x728] ss:$36 sps:$4 sm:$0xff]  }
 0x250   : > { %3618 = vmatprep.mubr.bf16.mxu0 %v5965_v58 }
 0x251   : > { %v6724_v61 = vpop.f32.mrb[56].mxu1 }
 0x252   : > { %v2956_v62 = vpop.f32.mrb[57].mxu1 }
 0x253   : > { %v6727_v3 = vpop.f32.mrb[58].mxu1  ;;  %v5987_v62 = vld [vmem:[%s6130_s22 + $0x770] ss:$36 sps:$4 sm:$0xff]  }
 0x254   : > { %v2959_v9 = vpop.f32.mrb[59].mxu1 }
 0x256   : > { %5123 = vmatmul.mubr.bf16.gmra.mrb[164].mxu1 %v5969_v0 }
 0x257   : > { %3619 = vmatmul.mubr.bf16.gmra.mrb[100].mxu0 %v5968_v4  ;;  %5126 = vmatprep.mubr.bf16.mxu1 %v5972_v7  ;;  %v5985_v7 = vld [vmem:[%s6130_s22 + $0x844] ss:$36 sps:$4 sm:$0xff]  }
 0x258   : > { %3626 = vmatprep.mubr.bf16.mxu0 %v5970_v10 }
 0x259   : > { %v6732_v13 = vpop.f32.mrb[60].mxu1 }
 0x25a   : > { %v2964_v15 = vpop.f32.mrb[61].mxu1 }
 0x25b   : > { %v6735_v17 = vpop.f32.mrb[62].mxu1 }
 0x25c   : > { %v2967_v24 = vpop.f32.mrb[63].mxu1 }
 0x25e   : > { %5127 = vmatmul.mubr.bf16.gmra.mrb[168].mxu1 %v5974_v16 }
 0x25f   : > { %3627 = vmatmul.mubr.bf16.gmra.mrb[104].mxu0 %v5973_v20  ;;  %5130 = vmatprep.mubr.bf16.mxu1 %v5977_v21  ;;  %v5989_v20 = vld [vmem:[%s6130_s22 + $0x7b8] ss:$36 sps:$4 sm:$0xff]  }
 0x260   : > { %3634 = vmatprep.mubr.bf16.mxu0 %v5975_v25 }
 0x261   : > { %v6740_v26 = vpop.f32.mrb[64].mxu1 }
 0x262   : > { %v3420_v28 = vpop.f32.mrb[0].mxu0  ;;  %v2972_v31 = vpop.f32.mrb[65].mxu1 }
 0x263   : > { %v6744_v33 = vadd.f32 %v3420_v28, %v6494_v49  ;;  %v3422_v34 = vpop.f32.mrb[1].mxu0  ;;  %v6746_v35 = vpop.f32.mrb[66].mxu1  ;;  %v5992_v28 = vld [vmem:[%s6130_s22 + $0x800] ss:$36 sps:$4 sm:$0xff]  }
 0x264   : > { %v3423_v41 = vpop.f32.mrb[2].mxu0  ;;  %v2975_v6 = vpop.f32.mrb[67].mxu1  ;;  %v5990_v34 = vld [vmem:[%s6130_s22 + $0x88c] ss:$36 sps:$4 sm:$0xff]  }
 0x265   : > { %v6752_v45 = vadd.f32 %v3423_v41, %v6497_v52  ;;  %v3425_v46 = vpop.f32.mrb[3].mxu0  ;;  %v5983_v52 = vld [vmem:[%s6130_s22 + $0x7f8] ss:$36 sps:$4 sm:$0xff]  }
 0x266   : > { %5131 = vmatmul.mubr.bf16.gmra.mrb[172].mxu1 %v5979_v32 }
 0x267   : > { %3635 = vmatmul.mubr.bf16.gmra.mrb[108].mxu0 %v5978_v37  ;;  %5134 = vmatprep.mubr.bf16.mxu1 %v5982_v40 }
 0x268   : > { %3642 = vmatprep.mubr.bf16.mxu0 %v5980_v43  ;;  %v5994_v43 = vld [vmem:[%s6130_s22 + $0x848] ss:$36 sps:$4 sm:$0xff]  }
 0x269   : > { %v6754_v49 = vpop.f32.mrb[68].mxu1 }
 0x26a   : > { %v3428_v50 = vpop.f32.mrb[4].mxu0  ;;  %v2980_v51 = vpop.f32.mrb[69].mxu1 }
 0x26b   : > { %v6758_v55 = vadd.f32 %v3428_v50, %v6502_v57  ;;  %v3430_v56 = vpop.f32.mrb[5].mxu0  ;;  %v6760_v58 = vpop.f32.mrb[70].mxu1 }
 0x26c   : > { %v3431_v0 = vpop.f32.mrb[6].mxu0  ;;  %v2983_v4 = vpop.f32.mrb[71].mxu1 }
 0x26d   : > { %v6766_v9 = vadd.f32 %v3431_v0, %v6505_v60  ;;  %v3433_v10 = vpop.f32.mrb[7].mxu0  ;;  %v5988_v60 = vld [vmem:[%s6130_s22 + $0x840] ss:$36 sps:$4 sm:$0xff]  }
 0x26e   : > { %5135 = vmatmul.mubr.bf16.gmra.mrb[176].mxu1 %v5984_v54  ;;  %v5997_v54 = vld [vmem:[%s6130_s22 + $0x890] ss:$36 sps:$4 sm:$0xff]  }
 0x26f   : > { %3643 = vmatmul.mubr.bf16.gmra.mrb[112].mxu0 %v5983_v52  ;;  %5138 = vmatprep.mubr.bf16.mxu1 %v5987_v62  ;;  %v5995_v62 = vld [vmem:[%s6130_s22 + $0x8d4] ss:$36 sps:$4 sm:$0xff]  }
 0x270   : > { %3650 = vmatprep.mubr.bf16.mxu0 %v5985_v7 }
 0x271   : > { %v6768_v57 = vpop.f32.mrb[72].mxu1 }
 0x272   : > { %v3436_v15 = vpop.f32.mrb[8].mxu0  ;;  %v2988_v16 = vpop.f32.mrb[73].mxu1 }
 0x273   : > { %v6772_v21 = vadd.f32 %v3436_v15, %v6510_v2  ;;  %v3438_v24 = vpop.f32.mrb[9].mxu0  ;;  %v6774_v25 = vpop.f32.mrb[74].mxu1  ;;  %v5999_v15 = vld [vmem:[%s6130_s22 + $0x8d8] ss:$36 sps:$4 sm:$0xff]  }
 0x274   : > { %v3439_v31 = vpop.f32.mrb[10].mxu0  ;;  %v2991_v32 = vpop.f32.mrb[75].mxu1 }
 0x275   : > { %v6780_v37 = vadd.f32 %v3439_v31, %v6513_v5  ;;  %v3441_v40 = vpop.f32.mrb[11].mxu0  ;;  %v5993_v5 = vld [vmem:[%s6130_s22 + $0x888] ss:$36 sps:$4 sm:$0xff]  }
 0x276   : > { %5139 = vmatmul.mubr.bf16.gmra.mrb[180].mxu1 %v5989_v20 }
 0x277   : > { %3651 = vmatmul.mubr.bf16.gmra.mrb[116].mxu0 %v5988_v60  ;;  %5142 = vmatprep.mubr.bf16.mxu1 %v5992_v28  ;;  %v5998_v60 = vld [vmem:[%s6130_s22 + $0x8d0] ss:$36 sps:$4 sm:$0xff]   ;;  %s4348_s22 = sshll.u32 %s7109_s3, 2 }
 0x278   : > { %3658 = vmatprep.mubr.bf16.mxu0 %v5990_v34  ;;  %s6931_s8 = scalar_lea.vmem %s7079_s2, %s4348_s22 }
 0x279   : > { %v6782_v2 = vpop.f32.mrb[76].mxu1 }
 0x27a   : > { %v3444_v41 = vpop.f32.mrb[12].mxu0  ;;  %v2996_v6 = vpop.f32.mrb[77].mxu1 }
 0x27b   : > { %v6786_v46 = vadd.f32 %v3444_v41, %v6518_v11  ;;  %v3446_v50 = vpop.f32.mrb[13].mxu0  ;;  %v6788_v51 = vpop.f32.mrb[78].mxu1 }
 0x27c   : > { %v3447_v56 = vpop.f32.mrb[14].mxu0  ;;  %v2999_v52 = vpop.f32.mrb[79].mxu1 }
 0x27d   : > { %v6794_v0 = vadd.f32 %v3447_v56, %v6521_v14  ;;  %v3449_v4 = vpop.f32.mrb[15].mxu0 }
 0x27e   : > { %5143 = vmatmul.mubr.bf16.gmra.mrb[184].mxu1 %v5994_v43 }
 0x27f   : > { %3659 = vmatmul.mubr.bf16.gmra.mrb[120].mxu0 %v5993_v5  ;;  %5146 = vmatprep.mubr.bf16.mxu1 %v5997_v54 }
 0x280   : > { %3666 = vmatprep.mubr.bf16.mxu0 %v5995_v62 }
 0x281   : > { %v6796_v11 = vpop.f32.mrb[80].mxu1 }
 0x282   : > { %v3452_v7 = vpop.f32.mrb[16].mxu0  ;;  %v3004_v10 = vpop.f32.mrb[81].mxu1 }
 0x283   : > { %v6800_v16 = vadd.f32 %v3452_v7, %v6526_v19  ;;  %v3454_v20 = vpop.f32.mrb[17].mxu0  ;;  %v6802_v24 = vpop.f32.mrb[82].mxu1 }
 0x284   : > { %v3455_v28 = vpop.f32.mrb[18].mxu0  ;;  %v3007_v14 = vpop.f32.mrb[83].mxu1 }
 0x285   : > { %v6806_v31 = vadd.f32 %v3455_v28, %v6529_v22  ;;  %v3457_v32 = vpop.f32.mrb[19].mxu0 }
 0x286   : > { %5147 = vmatmul.mubr.bf16.gmra.mrb[188].mxu1 %v5999_v15 }
 0x287   : > { %3667 = vmatmul.mubr.bf16.gmra.mrb[124].mxu0 %v5998_v60 }
 0x289   : > { %v6808_v34 = vpop.f32.mrb[84].mxu1 }
 0x28a   : > { %v3460_v40 = vpop.f32.mrb[20].mxu0  ;;  %v3012_v41 = vpop.f32.mrb[85].mxu1 }
 0x28b   : > { %v6811_v6 = vadd.f32 %v3460_v40, %v6534_v27  ;;  %v3462_v19 = vpop.f32.mrb[21].mxu0  ;;  %v6813_v43 = vpop.f32.mrb[86].mxu1 }
 0x28c   : > { %v3463_v50 = vpop.f32.mrb[22].mxu0  ;;  %v3015_v5 = vpop.f32.mrb[87].mxu1 }
 0x28d   : > { %v6816_v54 = vadd.f32 %v3463_v50, %v6537_v30  ;;  %v3465_v22 = vpop.f32.mrb[23].mxu0 }
 0x291   : > { %v6818_v56 = vpop.f32.mrb[88].mxu1 }
 0x292   : > { %v3468_v52 = vpop.f32.mrb[24].mxu0  ;;  %v3020_v62 = vpop.f32.mrb[89].mxu1 }
 0x293   : > { %v6821_v4 = vadd.f32 %v3468_v52, %v6549_v36  ;;  %v3470_v7 = vpop.f32.mrb[25].mxu0  ;;  %v6823_v10 = vpop.f32.mrb[90].mxu1 }
 0x294   : > { %v3471_v27 = vpop.f32.mrb[26].mxu0  ;;  %v3023_v15 = vpop.f32.mrb[91].mxu1 }
 0x295   : > { %v6826_v20 = vadd.f32 %v3471_v27, %v6552_v39  ;;  %v3473_v60 = vpop.f32.mrb[27].mxu0 }
 0x299   : > { %v6828_v28 = vpop.f32.mrb[92].mxu1 }
 0x29a   : > { %v3476_v30 = vpop.f32.mrb[28].mxu0  ;;  %v3028_v14 = vpop.f32.mrb[93].mxu1 }
 0x29b   : > { %v6831_v32 = vadd.f32 %v3476_v30, %v6560_v44  ;;  %v3478_v40 = vpop.f32.mrb[29].mxu0  ;;  %v6833_v41 = vpop.f32.mrb[94].mxu1 }
 0x29c   : > { %v3479_v36 = vpop.f32.mrb[30].mxu0  ;;  %v3031_v19 = vpop.f32.mrb[95].mxu1 }
 0x29d   : > { %v6836_v50 = vadd.f32 %v3479_v36, %v6566_v48  ;;  %v3481_v5 = vpop.f32.mrb[31].mxu0 }
 0x2a1   : > { %v6838_v22 = vpop.f32.mrb[96].mxu1 }
 0x2a2   : > { %v3484_v39 = vpop.f32.mrb[32].mxu0  ;;  %v3036_v52 = vpop.f32.mrb[97].mxu1 }
 0x2a3   : > { %v6841_v62 = vadd.f32 %v3484_v39, %v6676_v59  ;;  %v3486_v7 = vpop.f32.mrb[33].mxu0  ;;  %v6843_v27 = vpop.f32.mrb[98].mxu1 }
 0x2a4   : > { %v3487_v44 = vpop.f32.mrb[34].mxu0  ;;  %v3039_v15 = vpop.f32.mrb[99].mxu1 }
 0x2a5   : > { %v6846_v60 = vadd.f32 %v3487_v44, %v6679_v63  ;;  %v3489_v30 = vpop.f32.mrb[35].mxu0 }
 0x2a9   : > { %v6848_v14 = vpop.f32.mrb[100].mxu1 }
 0x2aa   : > { %7080 = vst [vmem:[#allocation2_spill] sm:$0xff] %v6848_v14  ;;  %v3492_v48 = vpop.f32.mrb[36].mxu0  ;;  %v3044_v40 = vpop.f32.mrb[101].mxu1 }
 0x2ab   : > { %v6851_v36 = vadd.f32 %v3492_v48, %v6684_v8  ;;  %v3494_v19 = vpop.f32.mrb[37].mxu0  ;;  %v6853_v5 = vpop.f32.mrb[102].mxu1 }
 0x2ac   : > { %7081 = vst [vmem:[#allocation3_spill] sm:$0xff] %v6853_v5  ;;  %v3495_v59 = vpop.f32.mrb[38].mxu0  ;;  %v3047_v39 = vpop.f32.mrb[103].mxu1 }
 0x2ad   : > { %v6856_v52 = vadd.f32 %v3495_v59, %v6687_v12  ;;  %v3497_v7 = vpop.f32.mrb[39].mxu0 }
 0x2b1   : > { %v6858_v15 = vpop.f32.mrb[104].mxu1 }
 0x2b2   : > { %7082 = vst [vmem:[#allocation4_spill] sm:$0xff] %v6858_v15  ;;  %v3500_v63 = vpop.f32.mrb[40].mxu0  ;;  %v3052_v44 = vpop.f32.mrb[105].mxu1 }
 0x2b3   : > { %v6861_v30 = vadd.f32 %v3500_v63, %v6692_v18  ;;  %v3502_v40 = vpop.f32.mrb[41].mxu0  ;;  %v6863_v14 = vpop.f32.mrb[106].mxu1 }
 0x2b4   : > { %7083 = vst [vmem:[#allocation5_spill] sm:$0xff] %v6863_v14  ;;  %v3503_v8 = vpop.f32.mrb[42].mxu0  ;;  %v3055_v48 = vpop.f32.mrb[107].mxu1 }
 0x2b5   : > { %v6866_v19 = vadd.f32 %v3503_v8, %v6695_v23  ;;  %v3505_v39 = vpop.f32.mrb[43].mxu0 }
 0x2b9   : > { %v6868_v5 = vpop.f32.mrb[108].mxu1 }
 0x2ba   : > { %7084 = vst [vmem:[#allocation6_spill] sm:$0xff] %v6868_v5  ;;  %v3508_v12 = vpop.f32.mrb[44].mxu0  ;;  %v3060_v59 = vpop.f32.mrb[109].mxu1 }
 0x2bb   : > { %v6871_v7 = vadd.f32 %v3508_v12, %v6700_v29  ;;  %v3510_v44 = vpop.f32.mrb[45].mxu0  ;;  %v6873_v15 = vpop.f32.mrb[110].mxu1 }
 0x2bc   : > { %7085 = vst [vmem:[#allocation7_spill] sm:$0xff] %v6873_v15  ;;  %v3511_v18 = vpop.f32.mrb[46].mxu0  ;;  %v3063_v63 = vpop.f32.mrb[111].mxu1 }
 0x2bd   : > { %v6876_v40 = vadd.f32 %v3511_v18, %v6703_v1  ;;  %v3513_v48 = vpop.f32.mrb[47].mxu0 }
 0x2c1   : > { %v6878_v14 = vpop.f32.mrb[112].mxu1 }
 0x2c2   : > { %7086 = vst [vmem:[#allocation8_spill] sm:$0xff] %v6878_v14  ;;  %v3516_v23 = vpop.f32.mrb[48].mxu0  ;;  %v3068_v8 = vpop.f32.mrb[113].mxu1 }
 0x2c3   : > { %v6881_v39 = vadd.f32 %v3516_v23, %v6708_v38  ;;  %v3518_v59 = vpop.f32.mrb[49].mxu0  ;;  %v6883_v5 = vpop.f32.mrb[114].mxu1 }
 0x2c4   : > { %7087 = vst [vmem:[#allocation9_spill] sm:$0xff] %v6883_v5  ;;  %v3519_v29 = vpop.f32.mrb[50].mxu0  ;;  %v3071_v12 = vpop.f32.mrb[115].mxu1 }
 0x2c5   : > { %v6886_v44 = vadd.f32 %v3519_v29, %v6711_v42  ;;  %v3521_v63 = vpop.f32.mrb[51].mxu0 }
 0x2c9   : > { %v6888_v15 = vpop.f32.mrb[116].mxu1 }
 0x2ca   : > { %7088 = vst [vmem:[#allocation10_spill] sm:$0xff] %v6888_v15  ;;  %v3524_v1 = vpop.f32.mrb[52].mxu0  ;;  %v3076_v18 = vpop.f32.mrb[117].mxu1 }
 0x2cb   : > { %v6891_v48 = vadd.f32 %v3524_v1, %v6716_v47  ;;  %v3526_v8 = vpop.f32.mrb[53].mxu0  ;;  %v6893_v14 = vpop.f32.mrb[118].mxu1 }
 0x2cc   : > { %7089 = vst [vmem:[#allocation11_spill] sm:$0xff] %v6893_v14  ;;  %v3527_v38 = vpop.f32.mrb[54].mxu0  ;;  %v3079_v23 = vpop.f32.mrb[119].mxu1 }
 0x2cd   : > { %v6896_v59 = vadd.f32 %v3527_v38, %v6719_v53  ;;  %v3529_v12 = vpop.f32.mrb[55].mxu0 }
 0x2d1   : > { %v6898_v5 = vpop.f32.mrb[120].mxu1 }
 0x2d2   : > { %7090 = vst [vmem:[#allocation12_spill] sm:$0xff] %v6898_v5  ;;  %v3532_v42 = vpop.f32.mrb[56].mxu0  ;;  %v3084_v29 = vpop.f32.mrb[121].mxu1 }
 0x2d3   : > { %v6901_v63 = vadd.f32 %v3532_v42, %v6724_v61  ;;  %v3534_v18 = vpop.f32.mrb[57].mxu0  ;;  %v6903_v15 = vpop.f32.mrb[122].mxu1 }
 0x2d4   : > { %7091 = vst [vmem:[#allocation13_spill] sm:$0xff] %v6903_v15  ;;  %v3535_v47 = vpop.f32.mrb[58].mxu0  ;;  %v3087_v1 = vpop.f32.mrb[123].mxu1 }
 0x2d5   : > { %v6906_v8 = vadd.f32 %v3535_v47, %v6727_v3  ;;  %v3537_v23 = vpop.f32.mrb[59].mxu0 }
 0x2d9   : > { %v6908_v53 = vpop.f32.mrb[124].mxu1 }
 0x2da   : > { %7092 = vst [vmem:[#allocation14_spill] sm:$0xff] %v6908_v53  ;;  %v3540_v38 = vpop.f32.mrb[60].mxu0  ;;  %v3092_v12 = vpop.f32.mrb[125].mxu1 }
 0x2db   : > { %v6911_v5 = vadd.f32 %v3540_v38, %v6732_v13  ;;  %v3542_v29 = vpop.f32.mrb[61].mxu0  ;;  %v6913_v61 = vpop.f32.mrb[126].mxu1 }
 0x2dc   : > { %7093 = vst [vmem:[#allocation15_spill] sm:$0xff] %v6913_v61  ;;  %v3543_v42 = vpop.f32.mrb[62].mxu0  ;;  %v3095_v18 = vpop.f32.mrb[127].mxu1 }
 0x2dd   : > { %v6916_v15 = vadd.f32 %v3543_v42, %v6735_v17  ;;  %v3545_v1 = vpop.f32.mrb[63].mxu0 }
 0x2e1   : > { %v5088_v3 = vpop.f32.mrb[128].mxu1 }
 0x2e2   : > { %v3548_v47 = vpop.f32.mrb[64].mxu0  ;;  %v3718_v23 = vadd.f32 %v6758_v55, %v5088_v3  ;;  %v3709_v14 = vpop.f32.mrb[129].mxu1 }
 0x2e3   : > { %v6921_v12 = vadd.f32 %v3548_v47, %v6740_v26  ;;  %v3550_v13 = vpop.f32.mrb[65].mxu0  ;;  %v3710_v38 = vadd.f32 %v6744_v33, %v3709_v14  ;;  %v5089_v29 = vpop.f32.mrb[130].mxu1 }
 0x2e4   : > { %v3551_v61 = vpop.f32.mrb[66].mxu0  ;;  %v3721_v18 = vadd.f32 %v6766_v9, %v5089_v29  ;;  %v3712_v53 = vpop.f32.mrb[131].mxu1 }
 0x2e5   : > { %v6926_v17 = vadd.f32 %v3551_v61, %v6746_v35  ;;  %v3553_v26 = vpop.f32.mrb[67].mxu0  ;;  %v3713_v55 = vadd.f32 %v6752_v45, %v3712_v53 }
 0x2e6   : > { %v4847_v42 = vpack.c.bf16 %v3721_v18, %v3718_v23 }
 0x2e7   : > { %v4842_v33 = vpack.c.bf16 %v3713_v55, %v3710_v38 }
 0x2e8   : > { %4999 = vst [vmem:[%s6931_s8 + $0x8] sm:$0xff] %v4847_v42  }
 0x2e9   : > { %4843 = vst [vmem:[%s6931_s8] sm:$0xff] %v4842_v33   ;;  %v5092_v14 = vpop.f32.mrb[132].mxu1 }
 0x2ea   : > { %v3556_v9 = vpop.f32.mrb[68].mxu0  ;;  %v3734_v35 = vadd.f32 %v6786_v46, %v5092_v14  ;;  %v3725_v61 = vpop.f32.mrb[133].mxu1 }
 0x2eb   : > { %v6938_v1 = vadd.f32 %v3556_v9, %v6754_v49  ;;  %v3558_v3 = vpop.f32.mrb[69].mxu0  ;;  %v3726_v47 = vadd.f32 %v6772_v21, %v3725_v61  ;;  %v5093_v13 = vpop.f32.mrb[134].mxu1 }
 0x2ec   : > { %v3559_v29 = vpop.f32.mrb[70].mxu0  ;;  %v3737_v45 = vadd.f32 %v6794_v0, %v5093_v13  ;;  %v3728_v53 = vpop.f32.mrb[135].mxu1 }
 0x2ed   : > { %v6943_v23 = vadd.f32 %v3559_v29, %v6760_v58  ;;  %v3561_v38 = vpop.f32.mrb[71].mxu0  ;;  %v3729_v18 = vadd.f32 %v6780_v37, %v3728_v53 }
 0x2ee   : > { %v4857_v26 = vpack.c.bf16 %v3737_v45, %v3734_v35 }
 0x2ef   : > { %v4852_v46 = vpack.c.bf16 %v3729_v18, %v3726_v47 }
 0x2f0   : > { %5001 = vst [vmem:[%s6931_s8 + $0x18] sm:$0xff] %v4857_v26  }
 0x2f1   : > { %5000 = vst [vmem:[%s6931_s8 + $0x10] sm:$0xff] %v4852_v46   ;;  %v5096_v49 = vpop.f32.mrb[136].mxu1 }
 0x2f2   : > { %v3564_v55 = vpop.f32.mrb[72].mxu0  ;;  %v3750_v21 = vadd.f32 %v6811_v6, %v5096_v49  ;;  %v3741_v42 = vpop.f32.mrb[137].mxu1 }
 0x2f3   : > { %v6950_v0 = vadd.f32 %v3564_v55, %v6768_v57  ;;  %v3566_v33 = vpop.f32.mrb[73].mxu0  ;;  %v3742_v58 = vadd.f32 %v6800_v16, %v3741_v42  ;;  %v5097_v14 = vpop.f32.mrb[138].mxu1 }
 0x2f4   : > { %v3567_v9 = vpop.f32.mrb[74].mxu0  ;;  %v3753_v37 = vadd.f32 %v6816_v54, %v5097_v14  ;;  %v3744_v35 = vpop.f32.mrb[139].mxu1 }
 0x2f5   : > { %v6955_v61 = vadd.f32 %v3567_v9, %v6774_v25  ;;  %v3569_v3 = vpop.f32.mrb[75].mxu0  ;;  %v3745_v47 = vadd.f32 %v6806_v31, %v3744_v35 }
 0x2f6   : > { %v4867_v13 = vpack.c.bf16 %v3753_v37, %v3750_v21 }
 0x2f7   : > { %v4862_v6 = vpack.c.bf16 %v3745_v47, %v3742_v58 }
 0x2f8   : > { %5003 = vst [vmem:[%s6931_s8 + $0x28] sm:$0xff] %v4867_v13  }
 0x2f9   : > { %5002 = vst [vmem:[%s6931_s8 + $0x20] sm:$0xff] %v4862_v6   ;;  %v5100_v57 = vpop.f32.mrb[140].mxu1 }
 0x2fa   : > { %v3572_v29 = vpop.f32.mrb[76].mxu0  ;;  %v3766_v16 = vadd.f32 %v6831_v32, %v5100_v57  ;;  %v3757_v45 = vpop.f32.mrb[141].mxu1 }
 0x2fb   : > { %v6962_v54 = vadd.f32 %v3572_v29, %v6782_v2  ;;  %v3574_v53 = vpop.f32.mrb[77].mxu0  ;;  %v3758_v25 = vadd.f32 %v6821_v4, %v3757_v45  ;;  %v5101_v38 = vpop.f32.mrb[142].mxu1 }
 0x2fc   : > { %v3575_v18 = vpop.f32.mrb[78].mxu0  ;;  %v3769_v31 = vadd.f32 %v6836_v50, %v5101_v38  ;;  %v3760_v26 = vpop.f32.mrb[143].mxu1 }
 0x2fd   : > { %v6967_v46 = vadd.f32 %v3575_v18, %v6788_v51  ;;  %v3577_v49 = vpop.f32.mrb[79].mxu0  ;;  %v3761_v55 = vadd.f32 %v6826_v20, %v3760_v26 }
 0x2fe   : > { %v4877_v21 = vpack.c.bf16 %v3769_v31, %v3766_v16 }
 0x2ff   : > { %v4872_v32 = vpack.c.bf16 %v3761_v55, %v3758_v25 }
 0x300   : > { %5005 = vst [vmem:[%s6931_s8 + $0x38] sm:$0xff] %v4877_v21  }
 0x301   : > { %5004 = vst [vmem:[%s6931_s8 + $0x30] sm:$0xff] %v4872_v32   ;;  %v5104_v2 = vpop.f32.mrb[144].mxu1 }
 0x302   : > { %v3580_v42 = vpop.f32.mrb[80].mxu0  ;;  %v3782_v4 = vadd.f32 %v6851_v36, %v5104_v2  ;;  %v3773_v33 = vpop.f32.mrb[145].mxu1 }
 0x303   : > { %v6974_v50 = vadd.f32 %v3580_v42, %v6796_v11  ;;  %v3582_v58 = vpop.f32.mrb[81].mxu0  ;;  %v3774_v51 = vadd.f32 %v6841_v62, %v3773_v33  ;;  %v5105_v14 = vpop.f32.mrb[146].mxu1 }
 0x304   : > { %v3583_v9 = vpop.f32.mrb[82].mxu0  ;;  %v3785_v20 = vadd.f32 %v6856_v52, %v5105_v14  ;;  %v3776_v37 = vpop.f32.mrb[147].mxu1 }
 0x305   : > { %v6979_v35 = vadd.f32 %v3583_v9, %v6802_v24  ;;  %v3585_v3 = vpop.f32.mrb[83].mxu0  ;;  %v3777_v47 = vadd.f32 %v6846_v60, %v3776_v37 }
 0x306   : > { %v4887_v13 = vpack.c.bf16 %v3785_v20, %v3782_v4 }
 0x307   : > { %v4882_v36 = vpack.c.bf16 %v3777_v47, %v3774_v51 }
 0x308   : > { %5007 = vst [vmem:[%s6931_s8 + $0x48] sm:$0xff] %v4887_v13  }
 0x309   : > { %5006 = vst [vmem:[%s6931_s8 + $0x40] sm:$0xff] %v4882_v36   ;;  %v5108_v11 = vpop.f32.mrb[148].mxu1 }
 0x30a   : > { %v3588_v6 = vpop.f32.mrb[84].mxu0  ;;  %v3798_v62 = vadd.f32 %v6871_v7, %v5108_v11  ;;  %v3789_v57 = vpop.f32.mrb[149].mxu1 }
 0x30b   : > { %v6986_v52 = vadd.f32 %v3588_v6, %v6808_v34  ;;  %v3590_v29 = vpop.f32.mrb[85].mxu0  ;;  %v3790_v24 = vadd.f32 %v6861_v30, %v3789_v57  ;;  %v5109_v16 = vpop.f32.mrb[150].mxu1 }
 0x30c   : > { %v3591_v45 = vpop.f32.mrb[86].mxu0  ;;  %v3801_v60 = vadd.f32 %v6876_v40, %v5109_v16  ;;  %v3792_v53 = vpop.f32.mrb[151].mxu1 }
 0x30d   : > { %v6991_v25 = vadd.f32 %v3591_v45, %v6813_v43  ;;  %v3593_v38 = vpop.f32.mrb[87].mxu0  ;;  %v3793_v18 = vadd.f32 %v6866_v19, %v3792_v53 }
 0x30e   : > { %v4897_v31 = vpack.c.bf16 %v3801_v60, %v3798_v62 }
 0x30f   : > { %v4892_v7 = vpack.c.bf16 %v3793_v18, %v3790_v24 }
 0x310   : > { %5009 = vst [vmem:[%s6931_s8 + $0x58] sm:$0xff] %v4897_v31  }
 0x311   : > { %5008 = vst [vmem:[%s6931_s8 + $0x50] sm:$0xff] %v4892_v7   ;;  %v5112_v34 = vpop.f32.mrb[152].mxu1  ;;  %v7094_v7 = vld [vmem:[#allocation2_spill] sm:$0xff] }
 0x312   : > { %v3596_v26 = vpop.f32.mrb[88].mxu0  ;;  %v3814_v30 = vadd.f32 %v6891_v48, %v5112_v34  ;;  %v3805_v49 = vpop.f32.mrb[153].mxu1 }
 0x313   : > { %v6998_v40 = vadd.f32 %v3596_v26, %v6818_v56  ;;  %v3598_v55 = vpop.f32.mrb[89].mxu0  ;;  %v3806_v43 = vadd.f32 %v6881_v39, %v3805_v49  ;;  %v5113_v21 = vpop.f32.mrb[154].mxu1 }
 0x314   : > { %v3599_v32 = vpop.f32.mrb[90].mxu0  ;;  %v3817_v19 = vadd.f32 %v6896_v59, %v5113_v21  ;;  %v3808_v2 = vpop.f32.mrb[155].mxu1  ;;  %v7095_v55 = vld [vmem:[#allocation3_spill] sm:$0xff] }
 0x315   : > { %v7003_v42 = vadd.f32 %v3599_v32, %v6823_v10  ;;  %v3601_v4 = vpop.f32.mrb[91].mxu0  ;;  %v3809_v33 = vadd.f32 %v6886_v44, %v3808_v2 }
 0x316   : > { %v4907_v58 = vpack.c.bf16 %v3817_v19, %v3814_v30 }
 0x317   : > { %v4902_v48 = vpack.c.bf16 %v3809_v33, %v3806_v43 }
 0x318   : > { %5011 = vst [vmem:[%s6931_s8 + $0x68] sm:$0xff] %v4907_v58   ;;  %v7096_v58 = vld [vmem:[#allocation4_spill] sm:$0xff] }
 0x319   : > { %5010 = vst [vmem:[%s6931_s8 + $0x60] sm:$0xff] %v4902_v48   ;;  %v5116_v56 = vpop.f32.mrb[156].mxu1 }
 0x31a   : > { %v3604_v51 = vpop.f32.mrb[92].mxu0  ;;  %v3830_v39 = vadd.f32 %v6911_v5, %v5116_v56  ;;  %v3821_v14 = vpop.f32.mrb[157].mxu1 }
 0x31b   : > { %v7010_v59 = vadd.f32 %v3604_v51, %v6828_v28  ;;  %v3606_v9 = vpop.f32.mrb[93].mxu0  ;;  %v3822_v10 = vadd.f32 %v6901_v63, %v3821_v14  ;;  %v5117_v20 = vpop.f32.mrb[158].mxu1 }
 0x31c   : > { %v3607_v37 = vpop.f32.mrb[94].mxu0  ;;  %v3833_v44 = vadd.f32 %v6916_v15, %v5117_v20  ;;  %v3824_v3 = vpop.f32.mrb[159].mxu1  ;;  %v7097_v9 = vld [vmem:[#allocation5_spill] sm:$0xff] }
 0x31d   : > { %v7015_v47 = vadd.f32 %v3607_v37, %v6833_v41  ;;  %v3609_v13 = vpop.f32.mrb[95].mxu0  ;;  %v3825_v36 = vadd.f32 %v6906_v8, %v3824_v3 }
 0x31e   : > { %v4917_v11 = vpack.c.bf16 %v3833_v44, %v3830_v39 }
 0x31f   : > { %v4912_v5 = vpack.c.bf16 %v3825_v36, %v3822_v10 }
 0x320   : > { %5013 = vst [vmem:[%s6931_s8 + $0x78] sm:$0xff] %v4917_v11   ;;  %v7098_v11 = vld [vmem:[#allocation6_spill] sm:$0xff] }
 0x321   : > { %5012 = vst [vmem:[%s6931_s8 + $0x70] sm:$0xff] %v4912_v5   ;;  %v5120_v28 = vpop.f32.mrb[160].mxu1 }
 0x322   : > { %v3612_v6 = vpop.f32.mrb[96].mxu0  ;;  %v3846_v63 = vadd.f32 %v6938_v1, %v5120_v28  ;;  %v3837_v62 = vpop.f32.mrb[161].mxu1 }
 0x323   : > { %v7022_v15 = vadd.f32 %v3612_v6, %v6838_v22  ;;  %v3614_v57 = vpop.f32.mrb[97].mxu0  ;;  %v3838_v41 = vadd.f32 %v6921_v12, %v3837_v62  ;;  %v5121_v29 = vpop.f32.mrb[162].mxu1 }
 0x324   : > { %v3615_v24 = vpop.f32.mrb[98].mxu0  ;;  %v3849_v8 = vadd.f32 %v6943_v23, %v5121_v29  ;;  %v3840_v16 = vpop.f32.mrb[163].mxu1  ;;  %v7099_v57 = vld [vmem:[#allocation7_spill] sm:$0xff] }
 0x325   : > { %v7027_v45 = vadd.f32 %v3615_v24, %v6843_v27  ;;  %v3617_v60 = vpop.f32.mrb[99].mxu0  ;;  %v3841_v53 = vadd.f32 %v6926_v17, %v3840_v16 }
 0x326   : > { %v4927_v38 = vpack.c.bf16 %v3849_v8, %v3846_v63 }
 0x327   : > { %v4922_v1 = vpack.c.bf16 %v3841_v53, %v3838_v41 }
 0x328   : > { %5015 = vst [vmem:[%s6931_s8 + $0x88] sm:$0xff] %v4927_v38   ;;  %v7100_v38 = vld [vmem:[#allocation8_spill] sm:$0xff] }
 0x329   : > { %5014 = vst [vmem:[%s6931_s8 + $0x80] sm:$0xff] %v4922_v1   ;;  %v5124_v22 = vpop.f32.mrb[164].mxu1 }
 0x32a   : > { %v3620_v18 = vpop.f32.mrb[100].mxu0  ;;  %v3862_v12 = vadd.f32 %v6962_v54, %v5124_v22  ;;  %v3853_v31 = vpop.f32.mrb[165].mxu1 }
 0x32b   : > { %v5232_v23 = vadd.f32 %v3620_v18, %v7094_v7  ;;  %v3622_v34 = vpop.f32.mrb[101].mxu0  ;;  %v3854_v27 = vadd.f32 %v6950_v0, %v3853_v31  ;;  %v5125_v26 = vpop.f32.mrb[166].mxu1 }
 0x32c   : > { %v3623_v30 = vpop.f32.mrb[102].mxu0  ;;  %v3865_v17 = vadd.f32 %v6967_v46, %v5125_v26  ;;  %v3856_v49 = vpop.f32.mrb[167].mxu1 }
 0x32d   : > { %v5233_v43 = vadd.f32 %v3623_v30, %v7095_v55  ;;  %v3625_v21 = vpop.f32.mrb[103].mxu0  ;;  %v3857_v32 = vadd.f32 %v6955_v61, %v3856_v49 }
 0x32e   : > { %v4937_v19 = vpack.c.bf16 %v3865_v17, %v3862_v12 }
 0x32f   : > { %v4932_v2 = vpack.c.bf16 %v3857_v32, %v3854_v27 }
 0x330   : > { %5017 = vst [vmem:[%s6931_s8 + $0x98] sm:$0xff] %v4937_v19  }
 0x331   : > { %5016 = vst [vmem:[%s6931_s8 + $0x90] sm:$0xff] %v4932_v2   ;;  %v5128_v54 = vpop.f32.mrb[168].mxu1 }
 0x332   : > { %v3628_v4 = vpop.f32.mrb[104].mxu0  ;;  %v3878_v0 = vadd.f32 %v6986_v52, %v5128_v54  ;;  %v3869_v33 = vpop.f32.mrb[169].mxu1 }
 0x333   : > { %v5234_v48 = vadd.f32 %v3628_v4, %v7096_v58  ;;  %v3630_v46 = vpop.f32.mrb[105].mxu0  ;;  %v3870_v56 = vadd.f32 %v6974_v50, %v3869_v33  ;;  %v5129_v51 = vpop.f32.mrb[170].mxu1  ;;  %v7103_v33 = vld [vmem:[#allocation11_spill] sm:$0xff] }
 0x334   : > { %v3631_v39 = vpop.f32.mrb[106].mxu0  ;;  %v3881_v61 = vadd.f32 %v6991_v25, %v5129_v51  ;;  %v3872_v14 = vpop.f32.mrb[171].mxu1 }
 0x335   : > { %v5235_v10 = vadd.f32 %v3631_v39, %v7097_v9  ;;  %v3633_v20 = vpop.f32.mrb[107].mxu0  ;;  %v3873_v37 = vadd.f32 %v6979_v35, %v3872_v14 }
 0x336   : > { %v4947_v44 = vpack.c.bf16 %v3881_v61, %v3878_v0  ;;  %v7104_v20 = vld [vmem:[#allocation12_spill] sm:$0xff] }
 0x337   : > { %v4942_v3 = vpack.c.bf16 %v3873_v37, %v3870_v56 }
 0x338   : > { %5019 = vst [vmem:[%s6931_s8 + $0xa8] sm:$0xff] %v4947_v44  }
 0x339   : > { %5018 = vst [vmem:[%s6931_s8 + $0xa0] sm:$0xff] %v4942_v3   ;;  %v5132_v52 = vpop.f32.mrb[172].mxu1 }
 0x33a   : > { %v3636_v13 = vpop.f32.mrb[108].mxu0  ;;  %v3894_v50 = vadd.f32 %v7010_v59, %v5132_v52  ;;  %v3885_v36 = vpop.f32.mrb[173].mxu1 }
 0x33b   : > { %v5236_v5 = vadd.f32 %v3636_v13, %v7098_v11  ;;  %v3638_v25 = vpop.f32.mrb[109].mxu0  ;;  %v3886_v28 = vadd.f32 %v6998_v40, %v3885_v36  ;;  %v5133_v6 = vpop.f32.mrb[174].mxu1  ;;  %v7105_v36 = vld [vmem:[#allocation13_spill] sm:$0xff] }
 0x33c   : > { %v3639_v63 = vpop.f32.mrb[110].mxu0  ;;  %v3897_v35 = vadd.f32 %v7015_v47, %v5133_v6  ;;  %v3888_v62 = vpop.f32.mrb[175].mxu1 }
 0x33d   : > { %v5237_v41 = vadd.f32 %v3639_v63, %v7099_v57  ;;  %v3641_v29 = vpop.f32.mrb[111].mxu0  ;;  %v3889_v24 = vadd.f32 %v7003_v42, %v3888_v62  ;;  %v7101_v42 = vld [vmem:[#allocation9_spill] sm:$0xff]  ;;  %v7106_v62 = vld [vmem:[#allocation14_spill] sm:$0xff] }
 0x33e   : > { %v4957_v8 = vpack.c.bf16 %v3897_v35, %v3894_v50 }
 0x33f   : > { %v4952_v16 = vpack.c.bf16 %v3889_v24, %v3886_v28 }
 0x340   : > { %5021 = vst [vmem:[%s6931_s8 + $0xb8] sm:$0xff] %v4957_v8  }
 0x341   : > { %5020 = vst [vmem:[%s6931_s8 + $0xb0] sm:$0xff] %v4952_v16   ;;  %v5136_v59 = vpop.f32.mrb[176].mxu1 }
 0x342   : > { %v3644_v60 = vpop.f32.mrb[112].mxu0  ;;  %v3910_v53 = vadd.f32 %v5232_v23, %v5136_v59  ;;  %v3901_v40 = vpop.f32.mrb[177].mxu1 }
 0x343   : > { %v5238_v1 = vadd.f32 %v3644_v60, %v7100_v38  ;;  %v3646_v22 = vpop.f32.mrb[113].mxu0  ;;  %v3902_v47 = vadd.f32 %v7022_v15, %v3901_v40  ;;  %v5137_v18 = vpop.f32.mrb[178].mxu1  ;;  %v7102_v15 = vld [vmem:[#allocation10_spill] sm:$0xff]  ;;  %v7107_v60 = vld [vmem:[#allocation15_spill] sm:$0xff] }
 0x344   : > { %v3647_v12 = vpop.f32.mrb[114].mxu0  ;;  %v3913_v31 = vadd.f32 %v5233_v43, %v5137_v18  ;;  %v3904_v7 = vpop.f32.mrb[179].mxu1 }
 0x345   : > { %v5239_v34 = vadd.f32 %v3647_v12, %v7101_v42  ;;  %v3649_v27 = vpop.f32.mrb[115].mxu0  ;;  %v3905_v26 = vadd.f32 %v7027_v45, %v3904_v7 }
 0x346   : > { %v4967_v30 = vpack.c.bf16 %v3913_v31, %v3910_v53 }
 0x347   : > { %v4962_v17 = vpack.c.bf16 %v3905_v26, %v3902_v47 }
 0x348   : > { %5023 = vst [vmem:[%s6931_s8 + $0xc8] sm:$0xff] %v4967_v30  }
 0x349   : > { %5022 = vst [vmem:[%s6931_s8 + $0xc0] sm:$0xff] %v4962_v17   ;;  %v5140_v23 = vpop.f32.mrb[180].mxu1 }
 0x34a   : > { %v3652_v49 = vpop.f32.mrb[116].mxu0  ;;  %v3926_v55 = vadd.f32 %v5236_v5, %v5140_v23  ;;  %v3917_v21 = vpop.f32.mrb[181].mxu1 }
 0x34b   : > { %v5240_v32 = vadd.f32 %v3652_v49, %v7102_v15  ;;  %v3654_v19 = vpop.f32.mrb[117].mxu0  ;;  %v3918_v43 = vadd.f32 %v5234_v48, %v3917_v21  ;;  %v5141_v2 = vpop.f32.mrb[182].mxu1 }
 0x34c   : > { %v3655_v54 = vpop.f32.mrb[118].mxu0  ;;  %v3929_v4 = vadd.f32 %v5237_v41, %v5141_v2  ;;  %v3920_v0 = vpop.f32.mrb[183].mxu1 }
 0x34d   : > { %v5241_v45 = vadd.f32 %v3655_v54, %v7103_v33  ;;  %v3657_v58 = vpop.f32.mrb[119].mxu0  ;;  %v3921_v46 = vadd.f32 %v5235_v10, %v3920_v0 }
 0x34e   : > { %v4977_v56 = vpack.c.bf16 %v3929_v4, %v3926_v55 }
 0x34f   : > { %v4972_v51 = vpack.c.bf16 %v3921_v46, %v3918_v43 }
 0x350   : > { %5025 = vst [vmem:[%s6931_s8 + $0xd8] sm:$0xff] %v4977_v56  }
 0x351   : > { %5024 = vst [vmem:[%s6931_s8 + $0xd0] sm:$0xff] %v4972_v51   ;;  %v5144_v39 = vpop.f32.mrb[184].mxu1 }
 0x352   : > { %v3660_v61 = vpop.f32.mrb[120].mxu0  ;;  %v3942_v14 = vadd.f32 %v5240_v32, %v5144_v39  ;;  %v3933_v9 = vpop.f32.mrb[185].mxu1 }
 0x353   : > { %v5242_v48 = vadd.f32 %v3660_v61, %v7104_v20  ;;  %v3662_v37 = vpop.f32.mrb[121].mxu0  ;;  %v3934_v44 = vadd.f32 %v5238_v1, %v3933_v9  ;;  %v5145_v3 = vpop.f32.mrb[186].mxu1 }
 0x354   : > { %v3663_v52 = vpop.f32.mrb[122].mxu0  ;;  %v3945_v13 = vadd.f32 %v5241_v45, %v5145_v3  ;;  %v3936_v50 = vpop.f32.mrb[187].mxu1 }
 0x355   : > { %v5243_v10 = vadd.f32 %v3663_v52, %v7105_v36  ;;  %v3665_v11 = vpop.f32.mrb[123].mxu0  ;;  %v3937_v5 = vadd.f32 %v5239_v34, %v3936_v50 }
 0x356   : > { %v4987_v25 = vpack.c.bf16 %v3945_v13, %v3942_v14 }
 0x357   : > { %v4982_v28 = vpack.c.bf16 %v3937_v5, %v3934_v44 }
 0x358   : > { %5027 = vst [vmem:[%s6931_s8 + $0xe8] sm:$0xff] %v4987_v25  }
 0x359   : > { %5026 = vst [vmem:[%s6931_s8 + $0xe0] sm:$0xff] %v4982_v28   ;;  %v5148_v6 = vpop.f32.mrb[188].mxu1 }
 0x35a   : > { %v3668_v63 = vpop.f32.mrb[124].mxu0  ;;  %v3949_v35 = vpop.f32.mrb[189].mxu1 }
 0x35b   : > { %v5244_v57 = vadd.f32 %v3668_v63, %v7106_v62  ;;  %v3670_v41 = vpop.f32.mrb[125].mxu0  ;;  %v3950_v29 = vadd.f32 %v5242_v48, %v3949_v35  ;;  %v5149_v24 = vpop.f32.mrb[190].mxu1 }
 0x35c   : > { %v3671_v8 = vpop.f32.mrb[126].mxu0  ;;  %v3952_v16 = vpop.f32.mrb[191].mxu1 }
 0x35d   : > { %v3958_v59 = vadd.f32 %v5244_v57, %v5148_v6  ;;  %v5245_v53 = vadd.f32 %v3671_v8, %v7107_v60  ;;  %v3673_v40 = vpop.f32.mrb[127].mxu0  ;;  %v3953_v38 = vadd.f32 %v5243_v10, %v3952_v16 }
 0x35f   : > { %v3961_v1 = vadd.f32 %v5245_v53, %v5149_v24  ;;  %v4992_v22 = vpack.c.bf16 %v3953_v38, %v3950_v29 }
 0x361   : > { %v4997_v47 = vpack.c.bf16 %v3961_v1, %v3958_v59  ;;  %5028 = vst [vmem:[%s6931_s8 + $0xf0] sm:$0xff] %v4992_v22  }
 0x363   : > { %5029 = vst [vmem:[%s6931_s8 + $0xf8] sm:$0xff] %v4997_v47  }
 0x364 PF: > { %s12_s9 = sadd.s32 1, %s6006_s9  }
 0x365   : > { %p9_p4 = scmp.ge.s32.totalorder %s12_s9, 6  }
 0x367   :  { %11 = sbr.rel (!%p9_p4) target bundleno = 1 (0x1), region = 58 }

// kernel: sst_emotion_net_forward.24
= control target key start
LH: loop header
LB: loop body
LE: loop exit
PB: predicated region body
PF: predicated region fallthrough
CT: control target
= control target key end

     0   :  { %s2725_s9 = smov 0   ;;  %s3066_s0 = inlined_call_operand.vmem [shape: bf16[2048,384], index: 0, kind: input, shape index: {}]   ;;  %s3067_s1 = inlined_call_operand.vmem [shape: bf16[384,128], index: 1, kind: input, shape index: {}]   ;;  %s3068_s2 = inlined_call_operand.vmem [shape: bf16[2048,128], index: 2, kind: output, shape index: {}]  }
   0x1 LB: > { %s1937_s10 = sadd.s32 4294967295, %s2707_s9   ;;  %p1941_p0 = scmp.ge.s32.totalorder %s2707_s9, 1  ;;  %s2707_s9 = sphi %s2725_s9, %s12_s9  }
   0x2   : > { %p114_p1 = scmp.lt.s32.totalorder %s2707_s9, 5 }
   0x4   : > { %p115_p2 = pnand %p1941_p0, %p114_p1 }
   0x5   : > { %v2549_v0 = vld [vmem:[%s3067_s1] sm:$0xff] (!%p115_p2)   ;;  %v2709_v1 = vmov (!%p115_p2), 0   ;;  %s1942_s13 = sshll.u32 (!%p115_p2), %s1937_s10, 6  ;;  %v2550_v2 = vld [vmem:[%s3067_s1 + $0x8] sm:$0xff] (!%p115_p2)   ;;  %v2551_v3 = vld [vmem:[%s3067_s1 + $0x10] sm:$0xff] (!%p115_p2)  }
   0x6   : > { %118 = sbr.rel (%p115_p2) target bundleno = 474 (0x1da), region = 28  ;;  %983 = vmatprep.subr.bf16.mxu0 (!%p115_p2), %v2709_v1  ;;  %2507 = vmatprep.subr.bf16.mxu1 (!%p115_p2), %v2709_v1  ;;  %p138_p3 = scmp.lt.s32.totalorder (!%p115_p2), %s1942_s13, 255  ;;  %v2552_v4 = vld [vmem:[%s3067_s1 + $0x18] sm:$0xff] (!%p115_p2)   ;;  %v2553_v5 = vld [vmem:[%s3067_s1 + $0x20] sm:$0xff] (!%p115_p2)   ;;  %v2554_v7 = vld [vmem:[%s3067_s1 + $0x28] sm:$0xff] (!%p115_p2)  }
   0x7   : > { %984 = vmatpush1.bf16.msra.mxu0 (!%p115_p2), %v2549_v0  ;;  %2523 = vmatpush1.bf16.msra.mxu1 (!%p115_p2), %v2549_v0  ;;  %v2555_v9 = vld [vmem:[%s3067_s1 + $0x30] sm:$0xff] (!%p115_p2)   ;;  %v2556_v10 = vld [vmem:[%s3067_s1 + $0x38] sm:$0xff] (!%p115_p2)   ;;  %v2557_v11 = vld [vmem:[%s3067_s1 + $0x40] sm:$0xff] (!%p115_p2)  }
   0x8   : > { %985 = vmatprep.subr.bf16.mxu0 (!%p115_p2), %v2709_v1  ;;  %2508 = vmatprep.subr.bf16.mxu1 (!%p115_p2), %v2709_v1  ;;  %v2558_v12 = vld [vmem:[%s3067_s1 + $0x48] sm:$0xff] (!%p115_p2)   ;;  %v2559_v13 = vld [vmem:[%s3067_s1 + $0x50] sm:$0xff] (!%p115_p2)   ;;  %v2560_v14 = vld [vmem:[%s3067_s1 + $0x58] sm:$0xff] (!%p115_p2)  }
   0x9   : > { %v2561_v15 = vld [vmem:[%s3067_s1 + $0x60] sm:$0xff] (!%p115_p2)   ;;  %v2562_v16 = vld [vmem:[%s3067_s1 + $0x68] sm:$0xff] (!%p115_p2)   ;;  %v2563_v17 = vld [vmem:[%s3067_s1 + $0x70] sm:$0xff] (!%p115_p2)  }
   0xa   : > { %v2564_v18 = vld [vmem:[%s3067_s1 + $0x78] sm:$0xff] (!%p115_p2)   ;;  %v2571_v19 = vld [vmem:[%s3067_s1 + $0x80] sm:$0xff] (!%p115_p2)   ;;  %v2578_v24 = vld [vmem:[%s3067_s1 + $0x88] sm:$0xff] (!%p115_p2)  }
   0xb   : > { %986 = vmatpush1.bf16.msra.mxu0 (!%p115_p2), %v2550_v2  ;;  %2524 = vmatpush1.bf16.msra.mxu1 (!%p115_p2), %v2550_v2  ;;  %v2585_v25 = vld [vmem:[%s3067_s1 + $0x90] sm:$0xff] (!%p115_p2)   ;;  %v2592_v30 = vld [vmem:[%s3067_s1 + $0x98] sm:$0xff] (!%p115_p2)   ;;  %v2599_v32 = vld [vmem:[%s3067_s1 + $0xa0] sm:$0xff] (!%p115_p2)  }
   0xc   : > { %987 = vmatprep.subr.bf16.mxu0 (!%p115_p2), %v2709_v1  ;;  %2509 = vmatprep.subr.bf16.mxu1 (!%p115_p2), %v2709_v1  ;;  %v2606_v36 = vld [vmem:[%s3067_s1 + $0xa8] sm:$0xff] (!%p115_p2)   ;;  %v2613_v41 = vld [vmem:[%s3067_s1 + $0xb0] sm:$0xff] (!%p115_p2)   ;;  %v2620_v42 = vld [vmem:[%s3067_s1 + $0xb8] sm:$0xff] (!%p115_p2)  }
   0xd   : > { %s3070_s13 = smov (!%p138_p3, %s1942_s13), 255 }
   0xe   : > { %s2539_s20 = smul.u32 12, %s3070_s13 }
   0xf   : > { %988 = vmatpush1.bf16.msra.mxu0 %v2551_v3  ;;  %2525 = vmatpush1.bf16.msra.mxu1 %v2551_v3 }
  0x10   : > { %989 = vmatprep.subr.bf16.mxu0 %v2709_v1  ;;  %2510 = vmatprep.subr.bf16.mxu1 %v2709_v1  ;;  %s2762_s25 = scalar_lea.vmem %s3066_s0, %s2539_s20 }
  0x11   : > { %v2567_v6 = vld [vmem:[%s2762_s25 + $0x4] ss:$12 sps:$4 sm:$0xff]   ;;  %v2565_v20 = vld [vmem:[%s2762_s25] ss:$12 sps:$4 sm:$0xff]   ;;  %v2572_v22 = vld [vmem:[%s2762_s25 + $0x1c] ss:$12 sps:$4 sm:$0xff]  }
  0x12   : > { %v2570_v8 = vld [vmem:[%s2762_s25 + $0x244] ss:$12 sps:$4 sm:$0xff]   ;;  %1015 = vmatprep.mubr.bf16.mxu0 %v2567_v6  ;;  %v2568_v21 = vld [vmem:[%s2762_s25 + $0x240] ss:$12 sps:$4 sm:$0xff]   ;;  %v2574_v23 = vld [vmem:[%s2762_s25 + $0x25c] ss:$12 sps:$4 sm:$0xff]  }
  0x13   : > { %990 = vmatpush1.bf16.msra.mxu0 %v2552_v4  ;;  %2526 = vmatpush1.bf16.msra.mxu1 %v2552_v4  ;;  %v2576_v26 = vld [vmem:[%s2762_s25 + $0x18] ss:$12 sps:$4 sm:$0xff]   ;;  %v2579_v28 = vld [vmem:[%s2762_s25 + $0x34] ss:$12 sps:$4 sm:$0xff]   ;;  %v2583_v31 = vld [vmem:[%s2762_s25 + $0x30] ss:$12 sps:$4 sm:$0xff]  }
  0x14   : > { %991 = vmatprep.subr.bf16.mxu0 %v2709_v1  ;;  %2511 = vmatprep.subr.bf16.mxu1 %v2709_v1  ;;  %v2577_v27 = vld [vmem:[%s2762_s25 + $0x258] ss:$12 sps:$4 sm:$0xff]   ;;  %v2581_v29 = vld [vmem:[%s2762_s25 + $0x274] ss:$12 sps:$4 sm:$0xff]   ;;  %v2584_v33 = vld [vmem:[%s2762_s25 + $0x270] ss:$12 sps:$4 sm:$0xff]  }
  0x15   : > { %1207 = vmatprep.mubr.bf16.mxu1 %v2570_v8  ;;  %v2586_v34 = vld [vmem:[%s2762_s25 + $0x4c] ss:$12 sps:$4 sm:$0xff]   ;;  %v2590_v37 = vld [vmem:[%s2762_s25 + $0x48] ss:$12 sps:$4 sm:$0xff]   ;;  %v2593_v39 = vld [vmem:[%s2762_s25 + $0x64] ss:$12 sps:$4 sm:$0xff]  }
  0x16   : > { %v2588_v35 = vld [vmem:[%s2762_s25 + $0x28c] ss:$12 sps:$4 sm:$0xff]   ;;  %v2591_v38 = vld [vmem:[%s2762_s25 + $0x288] ss:$12 sps:$4 sm:$0xff]   ;;  %v2595_v40 = vld [vmem:[%s2762_s25 + $0x2a4] ss:$12 sps:$4 sm:$0xff]  }
  0x17   : > { %992 = vmatpush1.bf16.msra.mxu0 %v2553_v5  ;;  %2527 = vmatpush1.bf16.msra.mxu1 %v2553_v5  ;;  %v2597_v43 = vld [vmem:[%s2762_s25 + $0x60] ss:$12 sps:$4 sm:$0xff]   ;;  %v2600_v45 = vld [vmem:[%s2762_s25 + $0x7c] ss:$12 sps:$4 sm:$0xff]   ;;  %v2604_v47 = vld [vmem:[%s2762_s25 + $0x78] ss:$12 sps:$4 sm:$0xff]  }
  0x18   : > { %993 = vmatprep.subr.bf16.mxu0 %v2709_v1  ;;  %2512 = vmatprep.subr.bf16.mxu1 %v2709_v1  ;;  %v2598_v44 = vld [vmem:[%s2762_s25 + $0x2a0] ss:$12 sps:$4 sm:$0xff]   ;;  %v2602_v46 = vld [vmem:[%s2762_s25 + $0x2bc] ss:$12 sps:$4 sm:$0xff]   ;;  %v2605_v48 = vld [vmem:[%s2762_s25 + $0x2b8] ss:$12 sps:$4 sm:$0xff]  }
  0x19   : > { %v2607_v49 = vld [vmem:[%s2762_s25 + $0x94] ss:$12 sps:$4 sm:$0xff]   ;;  %v2611_v51 = vld [vmem:[%s2762_s25 + $0x90] ss:$12 sps:$4 sm:$0xff]   ;;  %v2614_v53 = vld [vmem:[%s2762_s25 + $0xac] ss:$12 sps:$4 sm:$0xff]  }
  0x1a   : > { %v2609_v50 = vld [vmem:[%s2762_s25 + $0x2d4] ss:$12 sps:$4 sm:$0xff]   ;;  %v2612_v52 = vld [vmem:[%s2762_s25 + $0x2d0] ss:$12 sps:$4 sm:$0xff]   ;;  %v2616_v54 = vld [vmem:[%s2762_s25 + $0x2ec] ss:$12 sps:$4 sm:$0xff]  }
  0x1b   : > { %994 = vmatpush1.bf16.msra.mxu0 %v2554_v7  ;;  %2528 = vmatpush1.bf16.msra.mxu1 %v2554_v7  ;;  %v2618_v55 = vld [vmem:[%s2762_s25 + $0xa8] ss:$12 sps:$4 sm:$0xff]   ;;  %v2621_v57 = vld [vmem:[%s2762_s25 + $0xc4] ss:$12 sps:$4 sm:$0xff]   ;;  %v2624_v59 = vld [vmem:[%s2762_s25 + $0xc0] ss:$12 sps:$4 sm:$0xff]  }
  0x1c   : > { %995 = vmatprep.subr.bf16.mxu0 %v2709_v1  ;;  %2513 = vmatprep.subr.bf16.mxu1 %v2709_v1  ;;  %v2619_v56 = vld [vmem:[%s2762_s25 + $0x2e8] ss:$12 sps:$4 sm:$0xff]   ;;  %v2625_v60 = vld [vmem:[%s2762_s25 + $0x20] ss:$12 sps:$4 sm:$0xff]   ;;  %v2628_v62 = vld [vmem:[%s2762_s25 + $0x38] ss:$12 sps:$4 sm:$0xff]  }
  0x1d   : > { %v2623_v58 = vld [vmem:[%s2762_s25 + $0x8] ss:$12 sps:$4 sm:$0xff]   ;;  %v2629_v63 = vld [vmem:[%s2762_s25 + $0xd8] ss:$12 sps:$4 sm:$0xff]   ;;  %v2630_v0 = vld [vmem:[%s2762_s25 + $0x50] ss:$12 sps:$4 sm:$0xff]  }
  0x1e   : > { %v2626_v61 = vld [vmem:[%s2762_s25 + $0xdc] ss:$12 sps:$4 sm:$0xff]   ;;  %v2635_v4 = vld [vmem:[%s2762_s25 + $0x80] ss:$12 sps:$4 sm:$0xff]   ;;  %v2638_v6 = vld [vmem:[%s2762_s25 + $0x98] ss:$12 sps:$4 sm:$0xff]  }
  0x1f   : > { %996 = vmatpush1.bf16.msra.mxu0 %v2555_v9  ;;  %2529 = vmatpush1.bf16.msra.mxu1 %v2555_v9  ;;  %v2633_v2 = vld [vmem:[%s2762_s25 + $0x68] ss:$12 sps:$4 sm:$0xff]   ;;  %v2634_v3 = vld [vmem:[%s2762_s25 + $0xf0] ss:$12 sps:$4 sm:$0xff]   ;;  %v2636_v5 = vld [vmem:[%s2762_s25 + $0x10c] ss:$12 sps:$4 sm:$0xff]  }
  0x20   : > { %997 = vmatprep.subr.bf16.mxu0 %v2709_v1  ;;  %2514 = vmatprep.subr.bf16.mxu1 %v2709_v1  ;;  %v2639_v7 = vld [vmem:[%s2762_s25 + $0x108] ss:$12 sps:$4 sm:$0xff]   ;;  %v2640_v8 = vld [vmem:[%s2762_s25 + $0xb0] ss:$12 sps:$4 sm:$0xff]  }
  0x21   : > { %v2641_v9 = vld [vmem:[%s2762_s25 + $0x124] ss:$12 sps:$4 sm:$0xff]  }
  0x23   : > { %998 = vmatpush1.bf16.msra.mxu0 %v2556_v10  ;;  %2530 = vmatpush1.bf16.msra.mxu1 %v2556_v10  ;;  %v2643_v10 = vld [vmem:[%s2762_s25 + $0xc8] ss:$12 sps:$4 sm:$0xff]  }
  0x24   : > { %999 = vmatprep.subr.bf16.mxu0 %v2709_v1  ;;  %2515 = vmatprep.subr.bf16.mxu1 %v2709_v1 }
  0x27   : > { %1000 = vmatpush1.bf16.msra.mxu0 %v2557_v11  ;;  %2531 = vmatpush1.bf16.msra.mxu1 %v2557_v11  ;;  %v2644_v11 = vld [vmem:[%s2762_s25 + $0x120] ss:$12 sps:$4 sm:$0xff]  }
  0x28   : > { %1001 = vmatprep.subr.bf16.mxu0 %v2709_v1  ;;  %2516 = vmatprep.subr.bf16.mxu1 %v2709_v1 }
  0x2b   : > { %1002 = vmatpush1.bf16.msra.mxu0 %v2558_v12  ;;  %2532 = vmatpush1.bf16.msra.mxu1 %v2558_v12  ;;  %v2645_v12 = vld [vmem:[%s2762_s25 + $0xe0] ss:$12 sps:$4 sm:$0xff]  }
  0x2c   : > { %1003 = vmatprep.subr.bf16.mxu0 %v2709_v1  ;;  %2517 = vmatprep.subr.bf16.mxu1 %v2709_v1 }
  0x2f   : > { %1004 = vmatpush1.bf16.msra.mxu0 %v2559_v13  ;;  %2533 = vmatpush1.bf16.msra.mxu1 %v2559_v13  ;;  %v2646_v13 = vld [vmem:[%s2762_s25 + $0x13c] ss:$12 sps:$4 sm:$0xff]  }
  0x30   : > { %1005 = vmatprep.subr.bf16.mxu0 %v2709_v1  ;;  %2518 = vmatprep.subr.bf16.mxu1 %v2709_v1 }
  0x33   : > { %1006 = vmatpush1.bf16.msra.mxu0 %v2560_v14  ;;  %2534 = vmatpush1.bf16.msra.mxu1 %v2560_v14  ;;  %v2648_v14 = vld [vmem:[%s2762_s25 + $0xf8] ss:$12 sps:$4 sm:$0xff]  }
  0x34   : > { %1007 = vmatprep.subr.bf16.mxu0 %v2709_v1  ;;  %2519 = vmatprep.subr.bf16.mxu1 %v2709_v1 }
  0x37   : > { %1008 = vmatpush1.bf16.msra.mxu0 %v2561_v15  ;;  %2535 = vmatpush1.bf16.msra.mxu1 %v2561_v15  ;;  %v2649_v15 = vld [vmem:[%s2762_s25 + $0x138] ss:$12 sps:$4 sm:$0xff]  }
  0x38   : > { %1009 = vmatprep.subr.bf16.mxu0 %v2709_v1  ;;  %2520 = vmatprep.subr.bf16.mxu1 %v2709_v1 }
  0x3b   : > { %1010 = vmatpush1.bf16.msra.mxu0 %v2562_v16  ;;  %2536 = vmatpush1.bf16.msra.mxu1 %v2562_v16  ;;  %v2650_v16 = vld [vmem:[%s2762_s25 + $0x110] ss:$12 sps:$4 sm:$0xff]  }
  0x3c   : > { %1011 = vmatprep.subr.bf16.mxu0 %v2709_v1  ;;  %2521 = vmatprep.subr.bf16.mxu1 %v2709_v1 }
  0x3f   : > { %1012 = vmatpush1.bf16.msra.mxu0 %v2563_v17  ;;  %2537 = vmatpush1.bf16.msra.mxu1 %v2563_v17  ;;  %v2651_v17 = vld [vmem:[%s2762_s25 + $0x154] ss:$12 sps:$4 sm:$0xff]  }
  0x40   : > { %1013 = vmatprep.subr.bf16.mxu0 %v2709_v1  ;;  %2522 = vmatprep.subr.bf16.mxu1 %v2709_v1  ;;  %v2631_v1 = vld [vmem:[%s2762_s25 + $0xf4] ss:$12 sps:$4 sm:$0xff]  }
  0x43   : > { %1014 = vmatpush1.bf16.msra.mxu0 %v2564_v18  ;;  %2538 = vmatpush1.bf16.msra.mxu1 %v2564_v18  ;;  %v2653_v18 = vld [vmem:[%s2762_s25 + $0x128] ss:$12 sps:$4 sm:$0xff]  }
  0x44   : > { %2427 = vmatprep.subr.bf16.mxu1 %v2571_v19 }
  0x46   : > { %1016 = vmatmul.mubr.bf16.vlgmr.msra.gmra.mrb[0].mxu0 %v2565_v20  ;;  %1208 = vmatmul.mubr.bf16.vlgmr.msra.gmra.mrb[0].mxu1 %v2568_v21  ;;  %v2655_v20 = vld [vmem:[%s2762_s25 + $0x140] ss:$12 sps:$4 sm:$0xff]  }
  0x47   : > { %2428 = vmatpush3.bf16.msra.mxu1 %v2571_v19  ;;  %1023 = vmatprep.mubr.bf16.mxu0 %v2572_v22  ;;  %v2654_v19 = vld [vmem:[%s2762_s25 + $0x150] ss:$12 sps:$4 sm:$0xff]   ;;  %v2656_v21 = vld [vmem:[%s2762_s25 + $0x16c] ss:$12 sps:$4 sm:$0xff]  }
  0x48   : > { %1215 = vmatprep.mubr.bf16.mxu1 %v2574_v23  ;;  %2429 = vmatprep.subr.bf16.mxu1 %v2578_v24  ;;  %v2658_v22 = vld [vmem:[%s2762_s25 + $0x158] ss:$12 sps:$4 sm:$0xff]   ;;  %v2659_v23 = vld [vmem:[%s2762_s25 + $0x168] ss:$12 sps:$4 sm:$0xff]  }
  0x4b   : > { %2430 = vmatpush3.bf16.msra.mxu1 %v2578_v24  ;;  %v2660_v24 = vld [vmem:[%s2762_s25 + $0x170] ss:$12 sps:$4 sm:$0xff]  }
  0x4c   : > { %2431 = vmatprep.subr.bf16.mxu1 %v2585_v25 }
  0x4e   : > { %1024 = vmatmul.mubr.bf16.gmra.mrb[4].mxu0 %v2576_v26  ;;  %1216 = vmatmul.mubr.bf16.gmra.mrb[4].mxu1 %v2577_v27  ;;  %v2663_v26 = vld [vmem:[%s2762_s25 + $0x188] ss:$12 sps:$4 sm:$0xff]   ;;  %v2664_v27 = vld [vmem:[%s2762_s25 + $0x180] ss:$12 sps:$4 sm:$0xff]  }
  0x4f   : > { %1031 = vmatprep.mubr.bf16.mxu0 %v2579_v28  ;;  %1223 = vmatprep.mubr.bf16.mxu1 %v2581_v29  ;;  %v2665_v28 = vld [vmem:[%s2762_s25 + $0x1a0] ss:$12 sps:$4 sm:$0xff]   ;;  %v2666_v29 = vld [vmem:[%s2762_s25 + $0x19c] ss:$12 sps:$4 sm:$0xff]  }
  0x50   : > { %2432 = vmatpush3.bf16.msra.mxu1 %v2585_v25  ;;  %v2661_v25 = vld [vmem:[%s2762_s25 + $0x184] ss:$12 sps:$4 sm:$0xff]  }
  0x51   : > { %2433 = vmatprep.subr.bf16.mxu1 %v2592_v30 }
  0x54   : > { %2434 = vmatpush3.bf16.msra.mxu1 %v2592_v30  ;;  %v2668_v30 = vld [vmem:[%s2762_s25 + $0x1b8] ss:$12 sps:$4 sm:$0xff]  }
  0x55   : > { %2435 = vmatprep.subr.bf16.mxu1 %v2599_v32 }
  0x56   : > { %1032 = vmatmul.mubr.bf16.gmra.mrb[8].mxu0 %v2583_v31  ;;  %1224 = vmatmul.mubr.bf16.gmra.mrb[8].mxu1 %v2584_v33  ;;  %v2669_v31 = vld [vmem:[%s2762_s25 + $0x198] ss:$12 sps:$4 sm:$0xff]   ;;  %v2671_v33 = vld [vmem:[%s2762_s25 + $0x1b4] ss:$12 sps:$4 sm:$0xff]  }
  0x57   : > { %1039 = vmatprep.mubr.bf16.mxu0 %v2586_v34  ;;  %1231 = vmatprep.mubr.bf16.mxu1 %v2588_v35  ;;  %v2673_v34 = vld [vmem:[%s2762_s25 + $0x1e8] ss:$12 sps:$4 sm:$0xff]   ;;  %v2674_v35 = vld [vmem:[%s2762_s25 + $0x1b0] ss:$12 sps:$4 sm:$0xff]  }
  0x58   : > { %2436 = vmatpush3.bf16.msra.mxu1 %v2599_v32  ;;  %v2670_v32 = vld [vmem:[%s2762_s25 + $0x1d0] ss:$12 sps:$4 sm:$0xff]  }
  0x59   : > { %2437 = vmatprep.subr.bf16.mxu1 %v2606_v36 }
  0x5c   : > { %2438 = vmatpush3.bf16.msra.mxu1 %v2606_v36  ;;  %v2675_v36 = vld [vmem:[%s2762_s25 + $0x200] ss:$12 sps:$4 sm:$0xff]  }
  0x5d   : > { %2439 = vmatprep.subr.bf16.mxu1 %v2613_v41 }
  0x5e   : > { %1040 = vmatmul.mubr.bf16.gmra.mrb[12].mxu0 %v2590_v37  ;;  %1232 = vmatmul.mubr.bf16.gmra.mrb[12].mxu1 %v2591_v38  ;;  %v2676_v37 = vld [vmem:[%s2762_s25 + $0x1cc] ss:$12 sps:$4 sm:$0xff]  }
  0x5f   : > { %1047 = vmatprep.mubr.bf16.mxu0 %v2593_v39  ;;  %1239 = vmatprep.mubr.bf16.mxu1 %v2595_v40  ;;  %v2678_v38 = vld [vmem:[%s2762_s25 + $0x218] ss:$12 sps:$4 sm:$0xff]   ;;  %v2679_v39 = vld [vmem:[%s2762_s25 + $0x1c8] ss:$12 sps:$4 sm:$0xff]   ;;  %v2680_v40 = vld [vmem:[%s2762_s25 + $0x230] ss:$12 sps:$4 sm:$0xff]  }
  0x60   : > { %2440 = vmatpush3.bf16.msra.mxu1 %v2613_v41  ;;  %v2681_v41 = vld [vmem:[%s2762_s25 + $0x1e4] ss:$12 sps:$4 sm:$0xff]  }
  0x61   : > { %2441 = vmatprep.subr.bf16.mxu1 %v2620_v42 }
  0x64   : > { %2442 = vmatpush3.bf16.msra.mxu1 %v2620_v42  ;;  %v2683_v42 = vld [vmem:[%s2762_s25 + $0x248] ss:$12 sps:$4 sm:$0xff]  }
  0x66   : > { %1048 = vmatmul.mubr.bf16.gmra.mrb[16].mxu0 %v2597_v43  ;;  %1240 = vmatmul.mubr.bf16.gmra.mrb[16].mxu1 %v2598_v44  ;;  %v2684_v43 = vld [vmem:[%s2762_s25 + $0x1e0] ss:$12 sps:$4 sm:$0xff]  }
  0x67   : > { %1055 = vmatprep.mubr.bf16.mxu0 %v2600_v45  ;;  %1247 = vmatprep.mubr.bf16.mxu1 %v2602_v46  ;;  %v2685_v44 = vld [vmem:[%s2762_s25 + $0x260] ss:$12 sps:$4 sm:$0xff]   ;;  %v2686_v45 = vld [vmem:[%s2762_s25 + $0x1fc] ss:$12 sps:$4 sm:$0xff]   ;;  %v2688_v46 = vld [vmem:[%s2762_s25 + $0x278] ss:$12 sps:$4 sm:$0xff]  }
  0x6e   : > { %1056 = vmatmul.mubr.bf16.gmra.mrb[20].mxu0 %v2604_v47  ;;  %1248 = vmatmul.mubr.bf16.gmra.mrb[20].mxu1 %v2605_v48  ;;  %v2689_v47 = vld [vmem:[%s2762_s25 + $0x1f8] ss:$12 sps:$4 sm:$0xff]   ;;  %v2690_v48 = vld [vmem:[%s2762_s25 + $0x290] ss:$12 sps:$4 sm:$0xff]  }
  0x6f   : > { %1063 = vmatprep.mubr.bf16.mxu0 %v2607_v49  ;;  %1255 = vmatprep.mubr.bf16.mxu1 %v2609_v50  ;;  %v2691_v49 = vld [vmem:[%s2762_s25 + $0x214] ss:$12 sps:$4 sm:$0xff]  }
  0x70   : > { %v2693_v50 = vld [vmem:[%s2762_s25 + $0x2a8] ss:$12 sps:$4 sm:$0xff]  }
  0x76   : > { %1064 = vmatmul.mubr.bf16.gmra.mrb[24].mxu0 %v2611_v51  ;;  %1256 = vmatmul.mubr.bf16.gmra.mrb[24].mxu1 %v2612_v52  ;;  %v2694_v51 = vld [vmem:[%s2762_s25 + $0x210] ss:$12 sps:$4 sm:$0xff]   ;;  %v2695_v52 = vld [vmem:[%s2762_s25 + $0x2c0] ss:$12 sps:$4 sm:$0xff]  }
  0x77   : > { %1071 = vmatprep.mubr.bf16.mxu0 %v2614_v53  ;;  %1263 = vmatprep.mubr.bf16.mxu1 %v2616_v54  ;;  %v2696_v53 = vld [vmem:[%s2762_s25 + $0x22c] ss:$12 sps:$4 sm:$0xff]  }
  0x78   : > { %v2698_v54 = vld [vmem:[%s2762_s25 + $0x2d8] ss:$12 sps:$4 sm:$0xff]  }
  0x7e   : > { %1072 = vmatmul.mubr.bf16.gmra.mrb[28].mxu0 %v2618_v55  ;;  %1264 = vmatmul.mubr.bf16.gmra.mrb[28].mxu1 %v2619_v56  ;;  %v2699_v55 = vld [vmem:[%s2762_s25 + $0x228] ss:$12 sps:$4 sm:$0xff]   ;;  %v2700_v56 = vld [vmem:[%s2762_s25 + $0x2f0] ss:$12 sps:$4 sm:$0xff]   ;;  %s1945_s25 = sshll.u32 %s3070_s13, 2 }
  0x7f   : > { %1079 = vmatprep.mubr.bf16.mxu0 %v2621_v57  ;;  %2443 = vmatprep.mubr.bf16.mxu1 %v2623_v58  ;;  %s2998_s15 = scalar_lea.vmem %s3068_s2, %s1945_s25 }
  0x86   : > { %1080 = vmatmul.mubr.bf16.gmra.mrb[32].mxu0 %v2624_v59  ;;  %2444 = vmatmul.mubr.bf16.vlgmr.msra.gmra.mrb[32].mxu1 %v2625_v60 }
  0x87   : > { %1087 = vmatprep.mubr.bf16.mxu0 %v2626_v61  ;;  %2447 = vmatprep.mubr.bf16.mxu1 %v2628_v62 }
  0x8e   : > { %1088 = vmatmul.mubr.bf16.gmra.mrb[36].mxu0 %v2629_v63  ;;  %2448 = vmatmul.mubr.bf16.gmra.mrb[36].mxu1 %v2630_v0 }
  0x8f   : > { %1095 = vmatprep.mubr.bf16.mxu0 %v2631_v1  ;;  %2451 = vmatprep.mubr.bf16.mxu1 %v2633_v2 }
  0x96   : > { %1096 = vmatmul.mubr.bf16.gmra.mrb[40].mxu0 %v2634_v3  ;;  %2452 = vmatmul.mubr.bf16.gmra.mrb[40].mxu1 %v2635_v4 }
  0x97   : > { %1103 = vmatprep.mubr.bf16.mxu0 %v2636_v5  ;;  %2455 = vmatprep.mubr.bf16.mxu1 %v2638_v6 }
  0x9e   : > { %1104 = vmatmul.mubr.bf16.gmra.mrb[44].mxu0 %v2639_v7  ;;  %2456 = vmatmul.mubr.bf16.gmra.mrb[44].mxu1 %v2640_v8 }
  0x9f   : > { %1111 = vmatprep.mubr.bf16.mxu0 %v2641_v9  ;;  %2459 = vmatprep.mubr.bf16.mxu1 %v2643_v10 }
  0xa6   : > { %1112 = vmatmul.mubr.bf16.gmra.mrb[48].mxu0 %v2644_v11  ;;  %2460 = vmatmul.mubr.bf16.gmra.mrb[48].mxu1 %v2645_v12 }
  0xa7   : > { %1119 = vmatprep.mubr.bf16.mxu0 %v2646_v13  ;;  %2463 = vmatprep.mubr.bf16.mxu1 %v2648_v14 }
  0xae   : > { %1120 = vmatmul.mubr.bf16.gmra.mrb[52].mxu0 %v2649_v15  ;;  %2464 = vmatmul.mubr.bf16.gmra.mrb[52].mxu1 %v2650_v16 }
  0xaf   : > { %1127 = vmatprep.mubr.bf16.mxu0 %v2651_v17  ;;  %2467 = vmatprep.mubr.bf16.mxu1 %v2653_v18 }
  0xb6   : > { %1128 = vmatmul.mubr.bf16.gmra.mrb[56].mxu0 %v2654_v19  ;;  %2468 = vmatmul.mubr.bf16.gmra.mrb[56].mxu1 %v2655_v20 }
  0xb7   : > { %1135 = vmatprep.mubr.bf16.mxu0 %v2656_v21  ;;  %2471 = vmatprep.mubr.bf16.mxu1 %v2658_v22 }
  0xbe   : > { %1136 = vmatmul.mubr.bf16.gmra.mrb[60].mxu0 %v2659_v23  ;;  %2472 = vmatmul.mubr.bf16.gmra.mrb[60].mxu1 %v2660_v24 }
  0xbf   : > { %1143 = vmatprep.mubr.bf16.mxu0 %v2661_v25  ;;  %2475 = vmatprep.mubr.bf16.mxu1 %v2663_v26 }
  0xc6   : > { %1144 = vmatmul.mubr.bf16.gmra.mrb[64].mxu0 %v2664_v27  ;;  %2476 = vmatmul.mubr.bf16.gmra.mrb[64].mxu1 %v2665_v28 }
  0xc7   : > { %1151 = vmatprep.mubr.bf16.mxu0 %v2666_v29  ;;  %2479 = vmatprep.mubr.bf16.mxu1 %v2668_v30 }
  0xce   : > { %1152 = vmatmul.mubr.bf16.gmra.mrb[68].mxu0 %v2669_v31  ;;  %2480 = vmatmul.mubr.bf16.gmra.mrb[68].mxu1 %v2670_v32 }
  0xcf   : > { %1159 = vmatprep.mubr.bf16.mxu0 %v2671_v33  ;;  %2483 = vmatprep.mubr.bf16.mxu1 %v2673_v34 }
  0xd6   : > { %1160 = vmatmul.mubr.bf16.gmra.mrb[72].mxu0 %v2674_v35  ;;  %2484 = vmatmul.mubr.bf16.gmra.mrb[72].mxu1 %v2675_v36 }
  0xd7   : > { %1167 = vmatprep.mubr.bf16.mxu0 %v2676_v37  ;;  %2487 = vmatprep.mubr.bf16.mxu1 %v2678_v38 }
  0xde   : > { %1168 = vmatmul.mubr.bf16.gmra.mrb[76].mxu0 %v2679_v39  ;;  %2488 = vmatmul.mubr.bf16.gmra.mrb[76].mxu1 %v2680_v40 }
  0xdf   : > { %1175 = vmatprep.mubr.bf16.mxu0 %v2681_v41  ;;  %2491 = vmatprep.mubr.bf16.mxu1 %v2683_v42 }
  0xe6   : > { %1176 = vmatmul.mubr.bf16.gmra.mrb[80].mxu0 %v2684_v43  ;;  %2492 = vmatmul.mubr.bf16.gmra.mrb[80].mxu1 %v2685_v44 }
  0xe7   : > { %1183 = vmatprep.mubr.bf16.mxu0 %v2686_v45  ;;  %2495 = vmatprep.mubr.bf16.mxu1 %v2688_v46 }
  0xee   : > { %1184 = vmatmul.mubr.bf16.gmra.mrb[84].mxu0 %v2689_v47  ;;  %2496 = vmatmul.mubr.bf16.gmra.mrb[84].mxu1 %v2690_v48 }
  0xef   : > { %1191 = vmatprep.mubr.bf16.mxu0 %v2691_v49  ;;  %2499 = vmatprep.mubr.bf16.mxu1 %v2693_v50 }
  0xf6   : > { %1192 = vmatmul.mubr.bf16.gmra.mrb[88].mxu0 %v2694_v51  ;;  %2500 = vmatmul.mubr.bf16.gmra.mrb[88].mxu1 %v2695_v52 }
  0xf7   : > { %1199 = vmatprep.mubr.bf16.mxu0 %v2696_v53  ;;  %2503 = vmatprep.mubr.bf16.mxu1 %v2698_v54 }
  0xfe   : > { %1200 = vmatmul.mubr.bf16.gmra.mrb[92].mxu0 %v2699_v55  ;;  %2504 = vmatmul.mubr.bf16.gmra.mrb[92].mxu1 %v2700_v56 }
 0x119   : > { %v2941_v57 = vpop.f32.mrb[0].mxu0  ;;  %v2943_v58 = vpop.f32.mrb[0].mxu1 }
 0x11a   : > { %v1019_v59 = vpop.f32.mrb[1].mxu0  ;;  %v1211_v60 = vpop.f32.mrb[1].mxu1 }
 0x11b   : > { %v2945_v61 = vpop.f32.mrb[2].mxu0  ;;  %v2947_v62 = vpop.f32.mrb[2].mxu1 }
 0x11c   : > { %v1022_v63 = vpop.f32.mrb[3].mxu0  ;;  %v1214_v0 = vpop.f32.mrb[3].mxu1 }
 0x121   : > { %v1025_v1 = vpop.f32.mrb[4].mxu0  ;;  %v2949_v2 = vpop.f32.mrb[4].mxu1 }
 0x122   : > { %v1027_v3 = vpop.f32.mrb[5].mxu0  ;;  %v1219_v4 = vpop.f32.mrb[5].mxu1 }
 0x123   : > { %v1028_v5 = vpop.f32.mrb[6].mxu0  ;;  %v2951_v6 = vpop.f32.mrb[6].mxu1 }
 0x124   : > { %v1030_v7 = vpop.f32.mrb[7].mxu0  ;;  %v1222_v8 = vpop.f32.mrb[7].mxu1 }
 0x129   : > { %v2953_v9 = vpop.f32.mrb[8].mxu0  ;;  %v2955_v10 = vpop.f32.mrb[8].mxu1 }
 0x12a   : > { %v1035_v11 = vpop.f32.mrb[9].mxu0  ;;  %v1227_v12 = vpop.f32.mrb[9].mxu1 }
 0x12b   : > { %v2957_v13 = vpop.f32.mrb[10].mxu0  ;;  %v2959_v14 = vpop.f32.mrb[10].mxu1 }
 0x12c   : > { %v1038_v15 = vpop.f32.mrb[11].mxu0  ;;  %v1230_v16 = vpop.f32.mrb[11].mxu1 }
 0x131   : > { %v1041_v17 = vpop.f32.mrb[12].mxu0  ;;  %v2961_v18 = vpop.f32.mrb[12].mxu1 }
 0x132   : > { %v1043_v19 = vpop.f32.mrb[13].mxu0  ;;  %v1235_v20 = vpop.f32.mrb[13].mxu1 }
 0x133   : > { %v1044_v21 = vpop.f32.mrb[14].mxu0  ;;  %v2963_v22 = vpop.f32.mrb[14].mxu1 }
 0x134   : > { %v1046_v23 = vpop.f32.mrb[15].mxu0  ;;  %v1238_v24 = vpop.f32.mrb[15].mxu1 }
 0x139   : > { %v2965_v25 = vpop.f32.mrb[16].mxu0  ;;  %v2967_v26 = vpop.f32.mrb[16].mxu1 }
 0x13a   : > { %v1051_v27 = vpop.f32.mrb[17].mxu0  ;;  %v1243_v28 = vpop.f32.mrb[17].mxu1 }
 0x13b   : > { %v2969_v29 = vpop.f32.mrb[18].mxu0  ;;  %v2971_v30 = vpop.f32.mrb[18].mxu1 }
 0x13c   : > { %v1054_v31 = vpop.f32.mrb[19].mxu0  ;;  %v1246_v32 = vpop.f32.mrb[19].mxu1 }
 0x141   : > { %v1057_v33 = vpop.f32.mrb[20].mxu0  ;;  %v2973_v34 = vpop.f32.mrb[20].mxu1 }
 0x142   : > { %v1059_v35 = vpop.f32.mrb[21].mxu0  ;;  %v1251_v36 = vpop.f32.mrb[21].mxu1 }
 0x143   : > { %v1060_v37 = vpop.f32.mrb[22].mxu0  ;;  %v2975_v38 = vpop.f32.mrb[22].mxu1 }
 0x144   : > { %v1062_v39 = vpop.f32.mrb[23].mxu0  ;;  %v1254_v40 = vpop.f32.mrb[23].mxu1 }
 0x149   : > { %v2977_v41 = vpop.f32.mrb[24].mxu0  ;;  %v2979_v42 = vpop.f32.mrb[24].mxu1 }
 0x14a   : > { %v1067_v43 = vpop.f32.mrb[25].mxu0  ;;  %v1259_v44 = vpop.f32.mrb[25].mxu1 }
 0x14b   : > { %v2981_v45 = vpop.f32.mrb[26].mxu0  ;;  %v2983_v46 = vpop.f32.mrb[26].mxu1 }
 0x14c   : > { %v1070_v47 = vpop.f32.mrb[27].mxu0  ;;  %v1262_v48 = vpop.f32.mrb[27].mxu1 }
 0x151   : > { %v1073_v49 = vpop.f32.mrb[28].mxu0  ;;  %v2985_v50 = vpop.f32.mrb[28].mxu1 }
 0x152   : > { %v1075_v51 = vpop.f32.mrb[29].mxu0  ;;  %v1267_v52 = vpop.f32.mrb[29].mxu1 }
 0x153   : > { %v1076_v53 = vpop.f32.mrb[30].mxu0  ;;  %v2987_v54 = vpop.f32.mrb[30].mxu1 }
 0x154   : > { %v1078_v55 = vpop.f32.mrb[31].mxu0  ;;  %v1270_v56 = vpop.f32.mrb[31].mxu1 }
 0x159   : > { %v2989_v59 = vpop.f32.mrb[32].mxu0  ;;  %v2445_v60 = vpop.f32.mrb[32].mxu1 }
 0x15a   : > { %v1315_v63 = vadd.f32 %v2445_v60, %v1025_v1  ;;  %v1083_v0 = vpop.f32.mrb[33].mxu0  ;;  %v1306_v3 = vpop.f32.mrb[33].mxu1 }
 0x15b   : > { %v1307_v4 = vadd.f32 %v1306_v3, %v2941_v57  ;;  %v2993_v7 = vpop.f32.mrb[34].mxu0  ;;  %v2446_v8 = vpop.f32.mrb[34].mxu1 }
 0x15c   : > { %v1318_v11 = vadd.f32 %v2446_v8, %v1028_v5  ;;  %v1086_v12 = vpop.f32.mrb[35].mxu0  ;;  %v1309_v15 = vpop.f32.mrb[35].mxu1 }
 0x15d   : > { %v1310_v1 = vadd.f32 %v1309_v15, %v2945_v61 }
 0x15e   : > { %v2204_v16 = vpack.c.bf16 %v1318_v11, %v1315_v63 }
 0x15f   : > { %v2199_v19 = vpack.c.bf16 %v1310_v1, %v1307_v4 }
 0x160   : > { %2356 = vst [vmem:[%s2998_s15 + $0x8] sm:$0xff] %v2204_v16  }
 0x161   : > { %2200 = vst [vmem:[%s2998_s15] sm:$0xff] %v2199_v19   ;;  %v1089_v57 = vpop.f32.mrb[36].mxu0  ;;  %v2449_v20 = vpop.f32.mrb[36].mxu1 }
 0x162   : > { %v1331_v5 = vadd.f32 %v2449_v20, %v1041_v17  ;;  %v1091_v23 = vpop.f32.mrb[37].mxu0  ;;  %v1322_v24 = vpop.f32.mrb[37].mxu1 }
 0x163   : > { %v1323_v27 = vadd.f32 %v1322_v24, %v2953_v9  ;;  %v1092_v28 = vpop.f32.mrb[38].mxu0  ;;  %v2450_v31 = vpop.f32.mrb[38].mxu1 }
 0x164   : > { %v1334_v32 = vadd.f32 %v2450_v31, %v1044_v21  ;;  %v1094_v35 = vpop.f32.mrb[39].mxu0  ;;  %v1325_v36 = vpop.f32.mrb[39].mxu1 }
 0x165   : > { %v1326_v61 = vadd.f32 %v1325_v36, %v2957_v13 }
 0x166   : > { %v2214_v39 = vpack.c.bf16 %v1334_v32, %v1331_v5 }
 0x167   : > { %v2209_v40 = vpack.c.bf16 %v1326_v61, %v1323_v27 }
 0x168   : > { %2358 = vst [vmem:[%s2998_s15 + $0x18] sm:$0xff] %v2214_v39  }
 0x169   : > { %2357 = vst [vmem:[%s2998_s15 + $0x10] sm:$0xff] %v2209_v40   ;;  %v1097_v43 = vpop.f32.mrb[40].mxu0  ;;  %v2453_v44 = vpop.f32.mrb[40].mxu1 }
 0x16a   : > { %v1347_v17 = vadd.f32 %v2453_v44, %v1057_v33  ;;  %v1099_v47 = vpop.f32.mrb[41].mxu0  ;;  %v1338_v48 = vpop.f32.mrb[41].mxu1 }
 0x16b   : > { %v1339_v9 = vadd.f32 %v1338_v48, %v2965_v25  ;;  %v1100_v51 = vpop.f32.mrb[42].mxu0  ;;  %v2454_v52 = vpop.f32.mrb[42].mxu1 }
 0x16c   : > { %v1350_v21 = vadd.f32 %v2454_v52, %v1060_v37  ;;  %v1102_v55 = vpop.f32.mrb[43].mxu0  ;;  %v1341_v56 = vpop.f32.mrb[43].mxu1 }
 0x16d   : > { %v1342_v13 = vadd.f32 %v1341_v56, %v2969_v29 }
 0x16e   : > { %v2224_v60 = vpack.c.bf16 %v1350_v21, %v1347_v17 }
 0x16f   : > { %v2219_v63 = vpack.c.bf16 %v1342_v13, %v1339_v9 }
 0x170   : > { %2360 = vst [vmem:[%s2998_s15 + $0x28] sm:$0xff] %v2224_v60  }
 0x171   : > { %2359 = vst [vmem:[%s2998_s15 + $0x20] sm:$0xff] %v2219_v63   ;;  %v1105_v0 = vpop.f32.mrb[44].mxu0  ;;  %v2457_v3 = vpop.f32.mrb[44].mxu1 }
 0x172   : > { %v1363_v33 = vadd.f32 %v2457_v3, %v1073_v49  ;;  %v1107_v4 = vpop.f32.mrb[45].mxu0  ;;  %v1354_v8 = vpop.f32.mrb[45].mxu1 }
 0x173   : > { %v1355_v25 = vadd.f32 %v1354_v8, %v2977_v41  ;;  %v1108_v11 = vpop.f32.mrb[46].mxu0  ;;  %v2458_v12 = vpop.f32.mrb[46].mxu1 }
 0x174   : > { %v1366_v37 = vadd.f32 %v2458_v12, %v1076_v53  ;;  %v1110_v15 = vpop.f32.mrb[47].mxu0  ;;  %v1357_v1 = vpop.f32.mrb[47].mxu1 }
 0x175   : > { %v1358_v29 = vadd.f32 %v1357_v1, %v2981_v45 }
 0x176   : > { %v2234_v16 = vpack.c.bf16 %v1366_v37, %v1363_v33 }
 0x177   : > { %v2229_v19 = vpack.c.bf16 %v1358_v29, %v1355_v25 }
 0x178   : > { %2362 = vst [vmem:[%s2998_s15 + $0x38] sm:$0xff] %v2234_v16  }
 0x179   : > { %2361 = vst [vmem:[%s2998_s15 + $0x30] sm:$0xff] %v2229_v19   ;;  %v1113_v20 = vpop.f32.mrb[48].mxu0  ;;  %v2461_v5 = vpop.f32.mrb[48].mxu1 }
 0x17a   : > { %v1379_v49 = vadd.f32 %v2461_v5, %v1089_v57  ;;  %v1115_v23 = vpop.f32.mrb[49].mxu0  ;;  %v1370_v24 = vpop.f32.mrb[49].mxu1 }
 0x17b   : > { %v1371_v41 = vadd.f32 %v1370_v24, %v2989_v59  ;;  %v1116_v27 = vpop.f32.mrb[50].mxu0  ;;  %v2462_v31 = vpop.f32.mrb[50].mxu1 }
 0x17c   : > { %v1382_v53 = vadd.f32 %v2462_v31, %v1092_v28  ;;  %v1118_v32 = vpop.f32.mrb[51].mxu0  ;;  %v1373_v35 = vpop.f32.mrb[51].mxu1 }
 0x17d   : > { %v1374_v45 = vadd.f32 %v1373_v35, %v2993_v7 }
 0x17e   : > { %v2244_v36 = vpack.c.bf16 %v1382_v53, %v1379_v49 }
 0x17f   : > { %v2239_v61 = vpack.c.bf16 %v1374_v45, %v1371_v41 }
 0x180   : > { %2364 = vst [vmem:[%s2998_s15 + $0x48] sm:$0xff] %v2244_v36  }
 0x181   : > { %2363 = vst [vmem:[%s2998_s15 + $0x40] sm:$0xff] %v2239_v61   ;;  %v1121_v39 = vpop.f32.mrb[52].mxu0  ;;  %v2465_v40 = vpop.f32.mrb[52].mxu1 }
 0x182   : > { %v1395_v57 = vadd.f32 %v2465_v40, %v1105_v0  ;;  %v1123_v44 = vpop.f32.mrb[53].mxu0  ;;  %v1386_v17 = vpop.f32.mrb[53].mxu1 }
 0x183   : > { %v1387_v47 = vadd.f32 %v1386_v17, %v1097_v43  ;;  %v1124_v59 = vpop.f32.mrb[54].mxu0  ;;  %v2466_v48 = vpop.f32.mrb[54].mxu1 }
 0x184   : > { %v1398_v9 = vadd.f32 %v2466_v48, %v1108_v11  ;;  %v1126_v28 = vpop.f32.mrb[55].mxu0  ;;  %v1389_v52 = vpop.f32.mrb[55].mxu1 }
 0x185   : > { %v1390_v21 = vadd.f32 %v1389_v52, %v1100_v51 }
 0x186   : > { %v2254_v55 = vpack.c.bf16 %v1398_v9, %v1395_v57 }
 0x187   : > { %v2249_v7 = vpack.c.bf16 %v1390_v21, %v1387_v47 }
 0x188   : > { %2366 = vst [vmem:[%s2998_s15 + $0x58] sm:$0xff] %v2254_v55  }
 0x189   : > { %2365 = vst [vmem:[%s2998_s15 + $0x50] sm:$0xff] %v2249_v7   ;;  %v1129_v56 = vpop.f32.mrb[56].mxu0  ;;  %v2469_v13 = vpop.f32.mrb[56].mxu1 }
 0x18a   : > { %v1411_v60 = vadd.f32 %v2469_v13, %v1121_v39  ;;  %v1131_v63 = vpop.f32.mrb[57].mxu0  ;;  %v1402_v0 = vpop.f32.mrb[57].mxu1 }
 0x18b   : > { %v1403_v3 = vadd.f32 %v1402_v0, %v1113_v20  ;;  %v1132_v33 = vpop.f32.mrb[58].mxu0  ;;  %v2470_v43 = vpop.f32.mrb[58].mxu1 }
 0x18c   : > { %v1414_v4 = vadd.f32 %v2470_v43, %v1124_v59  ;;  %v1134_v8 = vpop.f32.mrb[59].mxu0  ;;  %v1405_v25 = vpop.f32.mrb[59].mxu1 }
 0x18d   : > { %v1406_v11 = vadd.f32 %v1405_v25, %v1116_v27 }
 0x18e   : > { %v2264_v12 = vpack.c.bf16 %v1414_v4, %v1411_v60 }
 0x18f   : > { %v2259_v51 = vpack.c.bf16 %v1406_v11, %v1403_v3 }
 0x190   : > { %2368 = vst [vmem:[%s2998_s15 + $0x68] sm:$0xff] %v2264_v12  }
 0x191   : > { %2367 = vst [vmem:[%s2998_s15 + $0x60] sm:$0xff] %v2259_v51   ;;  %v1137_v37 = vpop.f32.mrb[60].mxu0  ;;  %v2473_v15 = vpop.f32.mrb[60].mxu1 }
 0x192   : > { %v1427_v1 = vadd.f32 %v2473_v15, %v1137_v37  ;;  %v1139_v29 = vpop.f32.mrb[61].mxu0  ;;  %v1418_v16 = vpop.f32.mrb[61].mxu1 }
 0x193   : > { %v1419_v19 = vadd.f32 %v1418_v16, %v1129_v56  ;;  %v1140_v5 = vpop.f32.mrb[62].mxu0  ;;  %v2474_v20 = vpop.f32.mrb[62].mxu1 }
 0x194   : > { %v1430_v49 = vadd.f32 %v2474_v20, %v1140_v5  ;;  %v1142_v23 = vpop.f32.mrb[63].mxu0  ;;  %v1421_v24 = vpop.f32.mrb[63].mxu1 }
 0x195   : > { %v1422_v41 = vadd.f32 %v1421_v24, %v1132_v33 }
 0x196   : > { %v2274_v27 = vpack.c.bf16 %v1430_v49, %v1427_v1 }
 0x197   : > { %v2269_v31 = vpack.c.bf16 %v1422_v41, %v1419_v19 }
 0x198   : > { %2370 = vst [vmem:[%s2998_s15 + $0x78] sm:$0xff] %v2274_v27  }
 0x199   : > { %2369 = vst [vmem:[%s2998_s15 + $0x70] sm:$0xff] %v2269_v31   ;;  %v1145_v53 = vpop.f32.mrb[64].mxu0  ;;  %v2477_v32 = vpop.f32.mrb[64].mxu1 }
 0x19a   : > { %v1147_v35 = vpop.f32.mrb[65].mxu0  ;;  %v1434_v45 = vpop.f32.mrb[65].mxu1 }
 0x19b   : > { %v1435_v36 = vadd.f32 %v1434_v45, %v1145_v53  ;;  %v1148_v61 = vpop.f32.mrb[66].mxu0  ;;  %v2478_v39 = vpop.f32.mrb[66].mxu1 }
 0x19c   : > { %v1150_v40 = vpop.f32.mrb[67].mxu0  ;;  %v1437_v57 = vpop.f32.mrb[67].mxu1 }
 0x19d   : > { %v1438_v44 = vadd.f32 %v1437_v57, %v1148_v61 }
 0x19f   : > { %v2279_v17 = vpack.c.bf16 %v1438_v44, %v1435_v36 }
 0x1a1   : > { %2371 = vst [vmem:[%s2998_s15 + $0x80] sm:$0xff] %v2279_v17   ;;  %v1153_v47 = vpop.f32.mrb[68].mxu0  ;;  %v2481_v59 = vpop.f32.mrb[68].mxu1 }
 0x1a2   : > { %v1443_v48 = vadd.f32 %v2477_v32, %v1153_v47  ;;  %v1155_v9 = vpop.f32.mrb[69].mxu0  ;;  %v1450_v28 = vpop.f32.mrb[69].mxu1 }
 0x1a3   : > { %v1156_v52 = vpop.f32.mrb[70].mxu0  ;;  %v2482_v21 = vpop.f32.mrb[70].mxu1 }
 0x1a4   : > { %v1446_v55 = vadd.f32 %v2478_v39, %v1156_v52  ;;  %v1158_v7 = vpop.f32.mrb[71].mxu0  ;;  %v1453_v56 = vpop.f32.mrb[71].mxu1 }
 0x1a6   : > { %v2284_v13 = vpack.c.bf16 %v1446_v55, %v1443_v48 }
 0x1a8   : > { %2372 = vst [vmem:[%s2998_s15 + $0x88] sm:$0xff] %v2284_v13  }
 0x1a9   : > { %v1161_v60 = vpop.f32.mrb[72].mxu0  ;;  %v2485_v63 = vpop.f32.mrb[72].mxu1 }
 0x1aa   : > { %v1451_v0 = vadd.f32 %v1450_v28, %v1161_v60  ;;  %v1163_v3 = vpop.f32.mrb[73].mxu0  ;;  %v1466_v33 = vpop.f32.mrb[73].mxu1 }
 0x1ab   : > { %v1164_v43 = vpop.f32.mrb[74].mxu0  ;;  %v2486_v4 = vpop.f32.mrb[74].mxu1 }
 0x1ac   : > { %v1454_v8 = vadd.f32 %v1453_v56, %v1164_v43  ;;  %v1166_v25 = vpop.f32.mrb[75].mxu0  ;;  %v1469_v11 = vpop.f32.mrb[75].mxu1 }
 0x1ae   : > { %v2289_v12 = vpack.c.bf16 %v1454_v8, %v1451_v0 }
 0x1b0   : > { %2373 = vst [vmem:[%s2998_s15 + $0x90] sm:$0xff] %v2289_v12  }
 0x1b1   : > { %v1169_v51 = vpop.f32.mrb[76].mxu0  ;;  %v3028_v37 = vpop.f32.mrb[76].mxu1 }
 0x1b2   : > { %v1459_v15 = vadd.f32 %v2481_v59, %v1169_v51  ;;  %v1171_v1 = vpop.f32.mrb[77].mxu0  ;;  %v1482_v29 = vpop.f32.mrb[77].mxu1 }
 0x1b3   : > { %v1172_v16 = vpop.f32.mrb[78].mxu0  ;;  %v3030_v19 = vpop.f32.mrb[78].mxu1 }
 0x1b4   : > { %v1462_v5 = vadd.f32 %v2482_v21, %v1172_v16  ;;  %v1174_v20 = vpop.f32.mrb[79].mxu0  ;;  %v1485_v49 = vpop.f32.mrb[79].mxu1 }
 0x1b6   : > { %v2294_v23 = vpack.c.bf16 %v1462_v5, %v1459_v15 }
 0x1b8   : > { %2374 = vst [vmem:[%s2998_s15 + $0x98] sm:$0xff] %v2294_v23  }
 0x1b9   : > { %v1177_v24 = vpop.f32.mrb[80].mxu0  ;;  %v2493_v41 = vpop.f32.mrb[80].mxu1 }
 0x1ba   : > { %v1467_v27 = vadd.f32 %v1466_v33, %v1177_v24  ;;  %v1507_v31 = vadd.f32 %v2493_v41, %v2949_v2  ;;  %v1179_v53 = vpop.f32.mrb[81].mxu0  ;;  %v1498_v32 = vpop.f32.mrb[81].mxu1 }
 0x1bb   : > { %v1499_v35 = vadd.f32 %v1498_v32, %v2943_v58  ;;  %v1180_v45 = vpop.f32.mrb[82].mxu0  ;;  %v2494_v36 = vpop.f32.mrb[82].mxu1 }
 0x1bc   : > { %v1470_v61 = vadd.f32 %v1469_v11, %v1180_v45  ;;  %v1510_v39 = vadd.f32 %v2494_v36, %v2951_v6  ;;  %v1182_v40 = vpop.f32.mrb[83].mxu0  ;;  %v1501_v57 = vpop.f32.mrb[83].mxu1 }
 0x1bd   : > { %v1502_v44 = vadd.f32 %v1501_v57, %v2947_v62 }
 0x1be   : > { %v2299_v17 = vpack.c.bf16 %v1470_v61, %v1467_v27  ;;  %v2324_v47 = vpack.c.bf16 %v1510_v39, %v1507_v31 }
 0x1bf   : > { %v2319_v59 = vpack.c.bf16 %v1502_v44, %v1499_v35 }
 0x1c0   : > { %2375 = vst [vmem:[%s2998_s15 + $0xa0] sm:$0xff] %v2299_v17   ;;  %2380 = vst [vmem:[%s2998_s15 + $0xc8] sm:$0xff] %v2324_v47  }
 0x1c1   : > { %2379 = vst [vmem:[%s2998_s15 + $0xc0] sm:$0xff] %v2319_v59   ;;  %v1185_v2 = vpop.f32.mrb[84].mxu0  ;;  %v2497_v48 = vpop.f32.mrb[84].mxu1 }
 0x1c2   : > { %v1475_v9 = vadd.f32 %v2485_v63, %v1185_v2  ;;  %v1523_v58 = vadd.f32 %v2497_v48, %v2961_v18  ;;  %v1187_v28 = vpop.f32.mrb[85].mxu0  ;;  %v1514_v6 = vpop.f32.mrb[85].mxu1 }
 0x1c3   : > { %v1515_v52 = vadd.f32 %v1514_v6, %v2955_v10  ;;  %v1188_v21 = vpop.f32.mrb[86].mxu0  ;;  %v2498_v62 = vpop.f32.mrb[86].mxu1 }
 0x1c4   : > { %v1478_v55 = vadd.f32 %v2486_v4, %v1188_v21  ;;  %v1526_v7 = vadd.f32 %v2498_v62, %v2963_v22  ;;  %v1190_v56 = vpop.f32.mrb[87].mxu0  ;;  %v1517_v13 = vpop.f32.mrb[87].mxu1 }
 0x1c5   : > { %v1518_v60 = vadd.f32 %v1517_v13, %v2959_v14 }
 0x1c6   : > { %v2304_v0 = vpack.c.bf16 %v1478_v55, %v1475_v9  ;;  %v2334_v3 = vpack.c.bf16 %v1526_v7, %v1523_v58 }
 0x1c7   : > { %v2329_v63 = vpack.c.bf16 %v1518_v60, %v1515_v52 }
 0x1c8   : > { %2376 = vst [vmem:[%s2998_s15 + $0xa8] sm:$0xff] %v2304_v0   ;;  %2382 = vst [vmem:[%s2998_s15 + $0xd8] sm:$0xff] %v2334_v3  }
 0x1c9   : > { %2381 = vst [vmem:[%s2998_s15 + $0xd0] sm:$0xff] %v2329_v63   ;;  %v1193_v18 = vpop.f32.mrb[88].mxu0  ;;  %v2501_v33 = vpop.f32.mrb[88].mxu1 }
 0x1ca   : > { %v1483_v43 = vadd.f32 %v1482_v29, %v1193_v18  ;;  %v1539_v10 = vadd.f32 %v2501_v33, %v2973_v34  ;;  %v1195_v4 = vpop.f32.mrb[89].mxu0  ;;  %v1530_v22 = vpop.f32.mrb[89].mxu1 }
 0x1cb   : > { %v1531_v8 = vadd.f32 %v1530_v22, %v2967_v26  ;;  %v1196_v25 = vpop.f32.mrb[90].mxu0  ;;  %v2502_v14 = vpop.f32.mrb[90].mxu1 }
 0x1cc   : > { %v1486_v11 = vadd.f32 %v1485_v49, %v1196_v25  ;;  %v1542_v12 = vadd.f32 %v2502_v14, %v2975_v38  ;;  %v1198_v51 = vpop.f32.mrb[91].mxu0  ;;  %v1533_v15 = vpop.f32.mrb[91].mxu1 }
 0x1cd   : > { %v1534_v1 = vadd.f32 %v1533_v15, %v2971_v30 }
 0x1ce   : > { %v2309_v16 = vpack.c.bf16 %v1486_v11, %v1483_v43  ;;  %v2344_v5 = vpack.c.bf16 %v1542_v12, %v1539_v10 }
 0x1cf   : > { %v2339_v29 = vpack.c.bf16 %v1534_v1, %v1531_v8 }
 0x1d0   : > { %2377 = vst [vmem:[%s2998_s15 + $0xb0] sm:$0xff] %v2309_v16   ;;  %2384 = vst [vmem:[%s2998_s15 + $0xe8] sm:$0xff] %v2344_v5  }
 0x1d1   : > { %2383 = vst [vmem:[%s2998_s15 + $0xe0] sm:$0xff] %v2339_v29   ;;  %v1201_v34 = vpop.f32.mrb[92].mxu0  ;;  %v2505_v20 = vpop.f32.mrb[92].mxu1 }
 0x1d2   : > { %v1491_v26 = vadd.f32 %v3028_v37, %v1201_v34  ;;  %v1555_v49 = vadd.f32 %v2505_v20, %v2985_v50  ;;  %v1203_v38 = vpop.f32.mrb[93].mxu0  ;;  %v1546_v23 = vpop.f32.mrb[93].mxu1 }
 0x1d3   : > { %v1547_v24 = vadd.f32 %v1546_v23, %v2979_v42  ;;  %v1204_v30 = vpop.f32.mrb[94].mxu0  ;;  %v2506_v41 = vpop.f32.mrb[94].mxu1 }
 0x1d4   : > { %v1494_v27 = vadd.f32 %v3030_v19, %v1204_v30  ;;  %v1558_v31 = vadd.f32 %v2506_v41, %v2987_v54  ;;  %v1206_v53 = vpop.f32.mrb[95].mxu0  ;;  %v1549_v32 = vpop.f32.mrb[95].mxu1 }
 0x1d5   : > { %v1550_v35 = vadd.f32 %v1549_v32, %v2983_v46 }
 0x1d6   : > { %v2314_v45 = vpack.c.bf16 %v1494_v27, %v1491_v26  ;;  %v2354_v37 = vpack.c.bf16 %v1558_v31, %v1555_v49 }
 0x1d7   : > { %v2349_v36 = vpack.c.bf16 %v1550_v35, %v1547_v24 }
 0x1d8   : > { %2378 = vst [vmem:[%s2998_s15 + $0xb8] sm:$0xff] %v2314_v45   ;;  %2386 = vst [vmem:[%s2998_s15 + $0xf8] sm:$0xff] %v2354_v37  }
 0x1d9   : > { %2385 = vst [vmem:[%s2998_s15 + $0xf0] sm:$0xff] %v2349_v36  }
 0x1da PF: > { %s12_s9 = sadd.s32 1, %s2707_s9  }
 0x1db   : > { %p9_p4 = scmp.ge.s32.totalorder %s12_s9, 6  }
 0x1dd   :  { %11 = sbr.rel (!%p9_p4) target bundleno = 1 (0x1), region = 58 }

// kernel: sst_emotion_net_forward.25
= control target key start
LH: loop header
LB: loop body
LE: loop exit
PB: predicated region body
PF: predicated region fallthrough
CT: control target
= control target key end

     0   :  { %s2114_s12 = smov 0   ;;  %s2530_s0 = inlined_call_operand.vmem [shape: bf16[2048,256], index: 0, kind: input, shape index: {}]   ;;  %s2531_s1 = inlined_call_operand.vmem [shape: bf16[256,128], index: 1, kind: input, shape index: {}]   ;;  %s2532_s2 = inlined_call_operand.vmem [shape: bf16[2,256], index: 2, kind: input, shape index: {}]   ;;  %s2533_s3 = inlined_call_operand.vmem [shape: bf16[2048,128], index: 3, kind: output, shape index: {}]  }
   0x1 LB: > { %s1611_s13 = sadd.s32 4294967295, %s2090_s12   ;;  %p1615_p0 = scmp.ge.s32.totalorder %s2090_s12, 1  ;;  %s2090_s12 = sphi %s2114_s12, %s13_s12  }
   0x2   : > { %p139_p1 = scmp.lt.s32.totalorder %s2090_s12, 5 }
   0x4   : > { %p140_p2 = pnand %p1615_p0, %p139_p1 }
   0x5   : > { %v2068_v0 = vld [vmem:[%s2531_s1] sm:$0xff] (!%p140_p2)   ;;  %v2092_v1 = vmov (!%p140_p2), 0   ;;  %v2069_v2 = vld [vmem:[%s2531_s1 + $0x8] sm:$0xff] (!%p140_p2)   ;;  %v2070_v3 = vld [vmem:[%s2531_s1 + $0x10] sm:$0xff] (!%p140_p2)   ;;  %s1616_s22 = sshll.u32 (!%p140_p2), %s1611_s13, 6  ;;  %v255_v6 = vlaneseq (!%p140_p2) }
   0x6   : > { %143 = sbr.rel (%p140_p2) target bundleno = 407 (0x197), region = 32  ;;  %946 = vmatprep.subr.bf16.mxu0 (!%p140_p2), %v2092_v1  ;;  %2026 = vmatprep.subr.bf16.mxu1 (!%p140_p2), %v2092_v1  ;;  %v2071_v4 = vld [vmem:[%s2531_s1 + $0x18] sm:$0xff] (!%p140_p2)   ;;  %v2072_v5 = vld [vmem:[%s2531_s1 + $0x20] sm:$0xff] (!%p140_p2)   ;;  %p165_p3 = scmp.lt.s32.totalorder (!%p140_p2), %s1616_s22, 255  ;;  %v2073_v8 = vld [vmem:[%s2531_s1 + $0x28] sm:$0xff] (!%p140_p2)  }
   0x7   : > { %947 = vmatpush1.bf16.msra.mxu0 (!%p140_p2), %v2068_v0  ;;  %2042 = vmatpush1.bf16.msra.mxu1 (!%p140_p2), %v2068_v0  ;;  %v1621_v7 = vld.sshfl [vmem:[%s2532_s2] sm:$0x11 pattern:$0x75316420] (!%p140_p2)  ;;  %v2093_v9 = vmov (!%p140_p2), 1966171168  }
   0x8   : > { %948 = vmatprep.subr.bf16.mxu0 (!%p140_p2), %v2092_v1  ;;  %2027 = vmatprep.subr.bf16.mxu1 (!%p140_p2), %v2092_v1  ;;  %v253_v10 = vunpack.c.l.s4 (!%p140_p2), %v2093_v9  ;;  %v256_v11 = vshrl.u32 (!%p140_p2), %v255_v6, 7  ;;  %v251_v12 = vcombine.high (!%p140_p2), %v1621_v7, %v1621_v7  ;;  %v2074_v14 = vld [vmem:[%s2531_s1 + $0x30] sm:$0xff] (!%p140_p2)   ;;  %v2075_v19 = vld [vmem:[%s2531_s1 + $0x38] sm:$0xff] (!%p140_p2)   ;;  %v2076_v31 = vld [vmem:[%s2531_s1 + $0x40] sm:$0xff] (!%p140_p2)  }
   0x9   : > { %v2077_v41 = vld [vmem:[%s2531_s1 + $0x48] sm:$0xff] (!%p140_p2)   ;;  %v2078_v50 = vld [vmem:[%s2531_s1 + $0x50] sm:$0xff] (!%p140_p2)   ;;  %v2079_v53 = vld [vmem:[%s2531_s1 + $0x58] sm:$0xff] (!%p140_p2)  }
   0xa   : > { %v254_v13 = vunpack.c.0.s8 (!%p140_p2), %v253_v10  ;;  %v271_v18 = vsub.s32 (!%p140_p2), 0, %v256_v11  ;;  %v2080_v55 = vld [vmem:[%s2531_s1 + $0x60] sm:$0xff] (!%p140_p2)   ;;  %v2081_v62 = vld [vmem:[%s2531_s1 + $0x68] sm:$0xff] (!%p140_p2)  }
   0xb   : > { %949 = vmatpush1.bf16.msra.mxu0 (!%p140_p2), %v2069_v2  ;;  %2043 = vmatpush1.bf16.msra.mxu1 (!%p140_p2), %v2069_v2 }
   0xc   : > { %950 = vmatprep.subr.bf16.mxu0 (!%p140_p2), %v2092_v1  ;;  %2028 = vmatprep.subr.bf16.mxu1 (!%p140_p2), %v2092_v1  ;;  %v257_v15 = vsub.s32 (!%p140_p2), %v254_v13, %v256_v11 }
   0xd   : > { %s2535_s22 = smov (!%p165_p3, %s1616_s22), 255 }
   0xe   : > { %s1770_s4 = sshll.u32 %s2535_s22, 3  ;;  %v258_v16 = vrot.slane %v1621_v7, %v257_v15  ;;  %v265_v17 = vrot.slane %v251_v12, %v257_v15  ;;  %v2083_v15 = vld [vmem:[%s2531_s1 + $0x78] sm:$0xff]   ;;  %s1620_s28 = sshll.u32 %s2535_s22, 2 }
   0xf   : > { %951 = vmatpush1.bf16.msra.mxu0 %v2070_v3  ;;  %2044 = vmatpush1.bf16.msra.mxu1 %v2070_v3  ;;  %s2169_s9 = scalar_lea.vmem %s2530_s0, %s1770_s4  ;;  %s2493_s4 = scalar_lea.vmem %s2533_s3, %s1620_s28 }
  0x10   : > { %952 = vmatprep.subr.bf16.mxu0 %v2092_v1  ;;  %2029 = vmatprep.subr.bf16.mxu1 %v2092_v1  ;;  %v267_v20 = vpack.i.b16 %v258_v16, %v258_v16  ;;  %v274_v21 = vpack.i.b16 %v265_v17, %v265_v17  ;;  %v350_v22 = vshrl.u32 %v258_v16, 16  ;;  %v357_v23 = vshrl.u32 %v265_v17, 16  ;;  %v178_v28 = vld [vmem:[%s2169_s9] sm:$0xff]  ;;  %v179_v29 = vld [vmem:[%s2169_s9 + $0x8] sm:$0xff]  ;;  %v180_v54 = vld [vmem:[%s2169_s9 + $0x10] sm:$0xff] }
  0x11   : > { %v210_v30 = vld [vmem:[%s2169_s9 + $0x100] sm:$0xff]  ;;  %v211_v35 = vld [vmem:[%s2169_s9 + $0x108] sm:$0xff]  ;;  %v181_v56 = vld [vmem:[%s2169_s9 + $0x18] sm:$0xff] }
  0x12   : > { %v272_v24 = vrot.slane %v267_v20, %v271_v18  ;;  %v279_v25 = vrot.slane %v274_v21, %v271_v18  ;;  %v351_v26 = vpack.i.b16 %v350_v22, %v350_v22  ;;  %v358_v27 = vpack.i.b16 %v357_v23, %v357_v23  ;;  %v212_v57 = vld [vmem:[%s2169_s9 + $0x110] sm:$0xff]  ;;  %v213_v58 = vld [vmem:[%s2169_s9 + $0x118] sm:$0xff]  ;;  %v182_v6 = vld [vmem:[%s2169_s9 + $0x20] sm:$0xff] }
  0x13   : > { %953 = vmatpush1.bf16.msra.mxu0 %v2071_v4  ;;  %2045 = vmatpush1.bf16.msra.mxu1 %v2071_v4  ;;  %v2082_v4 = vld [vmem:[%s2531_s1 + $0x70] sm:$0xff]   ;;  %v183_v7 = vld [vmem:[%s2169_s9 + $0x28] sm:$0xff] }
  0x14   : > { %954 = vmatprep.subr.bf16.mxu0 %v2092_v1  ;;  %2030 = vmatprep.subr.bf16.mxu1 %v2092_v1  ;;  %v2179_v32 = vcombine.low %v272_v24, %v279_v25  ;;  %v356_v33 = vrot.slane %v351_v26, %v271_v18  ;;  %v363_v34 = vrot.slane %v358_v27, %v271_v18  ;;  %v215_v9 = vld [vmem:[%s2169_s9 + $0x128] sm:$0xff]  ;;  %v184_v24 = vld [vmem:[%s2169_s9 + $0x30] sm:$0xff]  ;;  %v185_v25 = vld [vmem:[%s2169_s9 + $0x38] sm:$0xff] }
  0x16   : > { %v286_v36 = vmul.bf16 %v2179_v32, %v178_v28  ;;  %v287_v37 = vmul.bf16 %v2179_v32, %v179_v29  ;;  %v2186_v38 = vcombine.low %v356_v33, %v363_v34  ;;  %v318_v39 = vmul.bf16 %v2179_v32, %v210_v30  ;;  %v216_v29 = vld [vmem:[%s2169_s9 + $0x130] sm:$0xff]  ;;  %v217_v30 = vld [vmem:[%s2169_s9 + $0x138] sm:$0xff] }
  0x17   : > { %955 = vmatpush1.bf16.msra.mxu0 %v2072_v5  ;;  %2046 = vmatpush1.bf16.msra.mxu1 %v2072_v5  ;;  %v319_v40 = vmul.bf16 %v2179_v32, %v211_v35  ;;  %v288_v59 = vmul.bf16 %v2179_v32, %v180_v54  ;;  %v289_v60 = vmul.bf16 %v2179_v32, %v181_v56 }
  0x18   : > { %956 = vmatprep.subr.bf16.mxu0 %v2092_v1  ;;  %2031 = vmatprep.subr.bf16.mxu1 %v2092_v1  ;;  %v370_v42 = vadd.bf16 %v2186_v38, %v286_v36  ;;  %v371_v43 = vadd.bf16 %v2186_v38, %v287_v37  ;;  %v402_v44 = vadd.bf16 %v2186_v38, %v318_v39 }
  0x19   : > { %v403_v45 = vadd.bf16 %v2186_v38, %v319_v40  ;;  %v320_v61 = vmul.bf16 %v2179_v32, %v212_v57  ;;  %v321_v63 = vmul.bf16 %v2179_v32, %v213_v58  ;;  %v372_v0 = vadd.bf16 %v2186_v38, %v288_v59 }
  0x1a   : > { %v2200_v46 = vmax.bf16 %v2092_v1, %v370_v42  ;;  %v2203_v47 = vmax.bf16 %v2092_v1, %v371_v43  ;;  %v2206_v48 = vmax.bf16 %v2092_v1, %v402_v44  ;;  %v373_v2 = vadd.bf16 %v2186_v38, %v289_v60 }
  0x1b   : > { %957 = vmatpush1.bf16.msra.mxu0 %v2073_v8  ;;  %2047 = vmatpush1.bf16.msra.mxu1 %v2073_v8  ;;  %v2209_v49 = vmax.bf16 %v2092_v1, %v403_v45  ;;  %v404_v3 = vadd.bf16 %v2186_v38, %v320_v61  ;;  %v405_v5 = vadd.bf16 %v2186_v38, %v321_v63  ;;  %v214_v8 = vld [vmem:[%s2169_s9 + $0x120] sm:$0xff] }
  0x1c   : > { %958 = vmatprep.subr.bf16.mxu0 %v2092_v1  ;;  %2032 = vmatprep.subr.bf16.mxu1 %v2092_v1  ;;  %v1625_v51 = vcombine.high %v2200_v46, %v2203_v47  ;;  %v436_v10 = vmax.bf16 %v2092_v1, %v372_v0  ;;  %v437_v11 = vmax.bf16 %v2092_v1, %v373_v2 }
  0x1d   : > { %v1657_v52 = vcombine.high %v2206_v48, %v2209_v49  ;;  %v468_v12 = vmax.bf16 %v2092_v1, %v404_v3  ;;  %v290_v13 = vmul.bf16 %v2179_v32, %v182_v6  ;;  %v469_v16 = vmax.bf16 %v2092_v1, %v405_v5  ;;  %v188_v3 = vld [vmem:[%s2169_s9 + $0x50] sm:$0xff] }
  0x1e   : > { %978 = vmatprep.mubr.bf16.mxu0 %v1625_v51  ;;  %v322_v17 = vmul.bf16 %v2179_v32, %v214_v8  ;;  %v323_v18 = vmul.bf16 %v2179_v32, %v215_v9  ;;  %v1656_v20 = vcombine.low %v2206_v48, %v2209_v49  ;;  %v1627_v21 = vcombine.high %v436_v10, %v437_v11  ;;  %v186_v49 = vld [vmem:[%s2169_s9 + $0x40] sm:$0xff]  ;;  %v220_v8 = vld [vmem:[%s2169_s9 + $0x150] sm:$0xff]  ;;  %v221_v9 = vld [vmem:[%s2169_s9 + $0x158] sm:$0xff] }
  0x1f   : > { %959 = vmatpush1.bf16.msra.mxu0 %v2074_v14  ;;  %2048 = vmatpush1.bf16.msra.mxu1 %v2074_v14  ;;  %v291_v14 = vmul.bf16 %v2179_v32, %v183_v7  ;;  %v374_v22 = vadd.bf16 %v2186_v38, %v290_v13  ;;  %v1659_v26 = vcombine.high %v468_v12, %v469_v16  ;;  %v218_v51 = vld [vmem:[%s2169_s9 + $0x140] sm:$0xff] }
  0x20   : > { %960 = vmatprep.subr.bf16.mxu0 %v2092_v1  ;;  %2033 = vmatprep.subr.bf16.mxu1 %v2092_v1  ;;  %v406_v27 = vadd.bf16 %v2186_v38, %v322_v17  ;;  %v407_v28 = vadd.bf16 %v2186_v38, %v323_v18  ;;  %v293_v33 = vmul.bf16 %v2179_v32, %v185_v25 }
  0x21   : > { %1106 = vmatprep.mubr.bf16.mxu1 %v1657_v52  ;;  %v375_v23 = vadd.bf16 %v2186_v38, %v291_v14  ;;  %v438_v34 = vmax.bf16 %v2092_v1, %v374_v22  ;;  %v324_v36 = vmul.bf16 %v2179_v32, %v216_v29  ;;  %v325_v40 = vmul.bf16 %v2179_v32, %v217_v30  ;;  %v219_v52 = vld [vmem:[%s2169_s9 + $0x148] sm:$0xff] }
  0x22   : > { %v470_v37 = vmax.bf16 %v2092_v1, %v406_v27  ;;  %v471_v39 = vmax.bf16 %v2092_v1, %v407_v28  ;;  %v377_v42 = vadd.bf16 %v2186_v38, %v293_v33  ;;  %v1626_v43 = vcombine.low %v436_v10, %v437_v11  ;;  %v191_v27 = vld [vmem:[%s2169_s9 + $0x68] sm:$0xff]  ;;  %v222_v28 = vld [vmem:[%s2169_s9 + $0x160] sm:$0xff] }
  0x23   : > { %961 = vmatpush1.bf16.msra.mxu0 %v2075_v19  ;;  %2049 = vmatpush1.bf16.msra.mxu1 %v2075_v19  ;;  %v1624_v19 = vcombine.low %v2200_v46, %v2203_v47  ;;  %v439_v35 = vmax.bf16 %v2092_v1, %v375_v23  ;;  %v1658_v44 = vcombine.low %v468_v12, %v469_v16  ;;  %v223_v29 = vld [vmem:[%s2169_s9 + $0x168] sm:$0xff] }
  0x24   : > { %962 = vmatprep.subr.bf16.mxu0 %v2092_v1  ;;  %2034 = vmatprep.subr.bf16.mxu1 %v2092_v1  ;;  %v1661_v46 = vcombine.high %v470_v37, %v471_v39  ;;  %v408_v47 = vadd.bf16 %v2186_v38, %v324_v36  ;;  %v409_v48 = vadd.bf16 %v2186_v38, %v325_v40 }
  0x25   : > { %v1629_v45 = vcombine.high %v438_v34, %v439_v35  ;;  %v441_v54 = vmax.bf16 %v2092_v1, %v377_v42  ;;  %v326_v57 = vmul.bf16 %v2179_v32, %v218_v51  ;;  %v327_v60 = vmul.bf16 %v2179_v32, %v219_v52  ;;  %v225_v51 = vld [vmem:[%s2169_s9 + $0x178] sm:$0xff] }
  0x26   : > { %v472_v58 = vmax.bf16 %v2092_v1, %v408_v47  ;;  %v473_v59 = vmax.bf16 %v2092_v1, %v409_v48  ;;  %v1628_v61 = vcombine.low %v438_v34, %v439_v35  ;;  %v296_v10 = vmul.bf16 %v2179_v32, %v188_v3 }
  0x27   : > { %963 = vmatpush1.bf16.msra.mxu0 %v2076_v31  ;;  %2050 = vmatpush1.bf16.msra.mxu1 %v2076_v31  ;;  %v292_v31 = vmul.bf16 %v2179_v32, %v184_v24  ;;  %v410_v2 = vadd.bf16 %v2186_v38, %v326_v57  ;;  %v411_v7 = vadd.bf16 %v2186_v38, %v327_v60 }
  0x28   : > { %964 = vmatprep.subr.bf16.mxu0 %v2092_v1  ;;  %2035 = vmatprep.subr.bf16.mxu1 %v2092_v1  ;;  %v1663_v6 = vcombine.high %v472_v58, %v473_v59  ;;  %v328_v16 = vmul.bf16 %v2179_v32, %v220_v8  ;;  %v329_v17 = vmul.bf16 %v2179_v32, %v221_v9  ;;  %v227_v8 = vld [vmem:[%s2169_s9 + $0x188] sm:$0xff] }
  0x29   : > { %v474_v14 = vmax.bf16 %v2092_v1, %v410_v2  ;;  %v380_v18 = vadd.bf16 %v2186_v38, %v296_v10  ;;  %v299_v34 = vmul.bf16 %v2179_v32, %v191_v27  ;;  %v330_v35 = vmul.bf16 %v2179_v32, %v222_v28  ;;  %v194_v2 = vld [vmem:[%s2169_s9 + $0x80] sm:$0xff]  ;;  %v228_v27 = vld [vmem:[%s2169_s9 + $0x190] sm:$0xff]  ;;  %v229_v28 = vld [vmem:[%s2169_s9 + $0x198] sm:$0xff] }
  0x2a   : > { %v412_v24 = vadd.bf16 %v2186_v38, %v328_v16  ;;  %v413_v25 = vadd.bf16 %v2186_v38, %v329_v17  ;;  %v302_v10 = vmul.bf16 %v2179_v32, %v194_v2  ;;  %v335_v16 = vmul.bf16 %v2179_v32, %v227_v8  ;;  %v201_v2 = vld [vmem:[%s2169_s9 + $0xb8] sm:$0xff] }
  0x2b   : > { %965 = vmatpush1.bf16.msra.mxu0 %v2077_v41  ;;  %2051 = vmatpush1.bf16.msra.mxu1 %v2077_v41  ;;  %v376_v41 = vadd.bf16 %v2186_v38, %v292_v31  ;;  %v444_v30 = vmax.bf16 %v2092_v1, %v380_v18  ;;  %v414_v48 = vadd.bf16 %v2186_v38, %v330_v35 }
  0x2c   : > { %966 = vmatprep.subr.bf16.mxu0 %v2092_v1  ;;  %2036 = vmatprep.subr.bf16.mxu1 %v2092_v1  ;;  %v476_v36 = vmax.bf16 %v2092_v1, %v412_v24 }
  0x2d   : > { %v478_v57 = vmax.bf16 %v2092_v1, %v414_v48  ;;  %v199_v48 = vld [vmem:[%s2169_s9 + $0xa8] sm:$0xff] }
  0x2f   : > { %967 = vmatpush1.bf16.msra.mxu0 %v2078_v50  ;;  %2052 = vmatpush1.bf16.msra.mxu1 %v2078_v50  ;;  %v187_v50 = vld [vmem:[%s2169_s9 + $0x48] sm:$0xff] }
  0x30   : > { %968 = vmatprep.subr.bf16.mxu0 %v2092_v1  ;;  %2037 = vmatprep.subr.bf16.mxu1 %v2092_v1  ;;  %v295_v56 = vmul.bf16 %v2179_v32, %v187_v50  ;;  %v224_v50 = vld [vmem:[%s2169_s9 + $0x170] sm:$0xff] }
  0x32   : > { %v379_v0 = vadd.bf16 %v2186_v38, %v295_v56  ;;  %v332_v56 = vmul.bf16 %v2179_v32, %v224_v50  ;;  %v231_v50 = vld [vmem:[%s2169_s9 + $0x1a8] sm:$0xff] }
  0x33   : > { %969 = vmatpush1.bf16.msra.mxu0 %v2079_v53  ;;  %2053 = vmatpush1.bf16.msra.mxu1 %v2079_v53  ;;  %v440_v53 = vmax.bf16 %v2092_v1, %v376_v41 }
  0x34   : > { %970 = vmatprep.subr.bf16.mxu0 %v2092_v1  ;;  %2038 = vmatprep.subr.bf16.mxu1 %v2092_v1  ;;  %v443_v13 = vmax.bf16 %v2092_v1, %v379_v0  ;;  %v416_v0 = vadd.bf16 %v2186_v38, %v332_v56 }
  0x35   : > { %v1631_v5 = vcombine.high %v440_v53, %v441_v54 }
  0x37   : > { %971 = vmatpush1.bf16.msra.mxu0 %v2080_v55  ;;  %2054 = vmatpush1.bf16.msra.mxu1 %v2080_v55  ;;  %v294_v55 = vmul.bf16 %v2179_v32, %v186_v49 }
  0x38   : > { %972 = vmatprep.subr.bf16.mxu0 %v2092_v1  ;;  %2039 = vmatprep.subr.bf16.mxu1 %v2092_v1 }
  0x39   : > { %v378_v63 = vadd.bf16 %v2186_v38, %v294_v55 }
  0x3b   : > { %973 = vmatpush1.bf16.msra.mxu0 %v2081_v62  ;;  %2055 = vmatpush1.bf16.msra.mxu1 %v2081_v62  ;;  %v1660_v62 = vcombine.low %v470_v37, %v471_v39  ;;  %v442_v12 = vmax.bf16 %v2092_v1, %v378_v63  ;;  %v477_v37 = vmax.bf16 %v2092_v1, %v413_v25 }
  0x3c   : > { %974 = vmatprep.subr.bf16.mxu0 %v2092_v1  ;;  %2040 = vmatprep.subr.bf16.mxu1 %v2092_v1  ;;  %v331_v39 = vmul.bf16 %v2179_v32, %v223_v29 }
  0x3d   : > { %v1633_v22 = vcombine.high %v442_v12, %v443_v13  ;;  %v1632_v40 = vcombine.low %v442_v12, %v443_v13  ;;  %v1667_v47 = vcombine.high %v476_v36, %v477_v37  ;;  %v480_v12 = vmax.bf16 %v2092_v1, %v416_v0  ;;  %v200_v0 = vld [vmem:[%s2169_s9 + $0xb0] sm:$0xff] }
  0x3e   : > { %v415_v49 = vadd.bf16 %v2186_v38, %v331_v39  ;;  %v308_v8 = vmul.bf16 %v2179_v32, %v200_v0 }
  0x3f   : > { %975 = vmatpush1.bf16.msra.mxu0 %v2082_v4  ;;  %2056 = vmatpush1.bf16.msra.mxu1 %v2082_v4  ;;  %v189_v4 = vld [vmem:[%s2169_s9 + $0x58] sm:$0xff] }
  0x40   : > { %976 = vmatprep.subr.bf16.mxu0 %v2092_v1  ;;  %2041 = vmatprep.subr.bf16.mxu1 %v2092_v1  ;;  %v297_v11 = vmul.bf16 %v2179_v32, %v189_v4 }
  0x43   : > { %977 = vmatpush1.bf16.msra.mxu0 %v2083_v15  ;;  %2057 = vmatpush1.bf16.msra.mxu1 %v2083_v15  ;;  %v475_v15 = vmax.bf16 %v2092_v1, %v411_v7  ;;  %v226_v7 = vld [vmem:[%s2169_s9 + $0x180] sm:$0xff] }
  0x45   : > { %v1665_v23 = vcombine.high %v474_v14, %v475_v15  ;;  %v1664_v41 = vcombine.low %v474_v14, %v475_v15  ;;  %v334_v15 = vmul.bf16 %v2179_v32, %v226_v7  ;;  %v233_v7 = vld [vmem:[%s2169_s9 + $0x1b8] sm:$0xff] }
  0x46   : > { %979 = vmatmul.mubr.bf16.vlgmr.msra.gmra.mrb[0].mxu0 %v1624_v19  ;;  %1107 = vmatmul.mubr.bf16.vlgmr.msra.gmra.mrb[0].mxu1 %v1656_v20  ;;  %v381_v19 = vadd.bf16 %v2186_v38, %v297_v11  ;;  %v1630_v20 = vcombine.low %v440_v53, %v441_v54 }
  0x47   : > { %986 = vmatprep.mubr.bf16.mxu0 %v1627_v21  ;;  %1114 = vmatprep.mubr.bf16.mxu1 %v1659_v26  ;;  %v1662_v21 = vcombine.low %v472_v58, %v473_v59  ;;  %v190_v26 = vld [vmem:[%s2169_s9 + $0x60] sm:$0xff]  ;;  %v479_v58 = vmax.bf16 %v2092_v1, %v415_v49  ;;  %v333_v59 = vmul.bf16 %v2179_v32, %v225_v51 }
  0x48   : > { %v445_v31 = vmax.bf16 %v2092_v1, %v381_v19  ;;  %v298_v33 = vmul.bf16 %v2179_v32, %v190_v26  ;;  %v386_v19 = vadd.bf16 %v2186_v38, %v302_v10  ;;  %v418_v25 = vadd.bf16 %v2186_v38, %v334_v15  ;;  %v230_v49 = vld [vmem:[%s2169_s9 + $0x1a0] sm:$0xff] }
  0x49   : > { %v1669_v4 = vcombine.high %v478_v57, %v479_v58  ;;  %v1668_v18 = vcombine.low %v478_v57, %v479_v58  ;;  %v419_v26 = vadd.bf16 %v2186_v38, %v335_v16  ;;  %v339_v58 = vmul.bf16 %v2179_v32, %v231_v50 }
  0x4a   : > { %v382_v42 = vadd.bf16 %v2186_v38, %v298_v33  ;;  %v482_v35 = vmax.bf16 %v2092_v1, %v418_v25  ;;  %v341_v15 = vmul.bf16 %v2179_v32, %v233_v7  ;;  %v392_v16 = vadd.bf16 %v2186_v38, %v308_v8  ;;  %v203_v25 = vld [vmem:[%s2169_s9 + $0xc8] sm:$0xff] }
  0x4c   : > { %v446_v54 = vmax.bf16 %v2092_v1, %v382_v42 }
  0x4e   : > { %987 = vmatmul.mubr.bf16.gmra.mrb[4].mxu0 %v1626_v43  ;;  %1115 = vmatmul.mubr.bf16.gmra.mrb[4].mxu1 %v1658_v44  ;;  %v383_v43 = vadd.bf16 %v2186_v38, %v299_v34  ;;  %v192_v44 = vld [vmem:[%s2169_s9 + $0x70] sm:$0xff]  ;;  %v336_v34 = vmul.bf16 %v2179_v32, %v228_v27  ;;  %v235_v27 = vld [vmem:[%s2169_s9 + $0x1c8] sm:$0xff] }
  0x4f   : > { %994 = vmatprep.mubr.bf16.mxu0 %v1629_v45  ;;  %1122 = vmatprep.mubr.bf16.mxu1 %v1661_v46  ;;  %v193_v45 = vld [vmem:[%s2169_s9 + $0x78] sm:$0xff]  ;;  %v1635_v46 = vcombine.high %v444_v30, %v445_v31  ;;  %v300_v52 = vmul.bf16 %v2179_v32, %v192_v44 }
  0x50   : > { %v301_v53 = vmul.bf16 %v2179_v32, %v193_v45  ;;  %v447_v55 = vmax.bf16 %v2092_v1, %v383_v43  ;;  %v420_v45 = vadd.bf16 %v2186_v38, %v336_v34 }
  0x51   : > { %v384_v60 = vadd.bf16 %v2186_v38, %v300_v52 }
  0x52   : > { %v385_v63 = vadd.bf16 %v2186_v38, %v301_v53  ;;  %v1637_v3 = vcombine.high %v446_v54, %v447_v55  ;;  %v1636_v17 = vcombine.low %v446_v54, %v447_v55  ;;  %v307_v54 = vmul.bf16 %v2179_v32, %v199_v48  ;;  %v236_v48 = vld [vmem:[%s2169_s9 + $0x1d0] sm:$0xff] }
  0x53   : > { %v448_v9 = vmax.bf16 %v2092_v1, %v384_v60  ;;  %v338_v55 = vmul.bf16 %v2179_v32, %v230_v49  ;;  %v484_v56 = vmax.bf16 %v2092_v1, %v420_v45  ;;  %v237_v49 = vld [vmem:[%s2169_s9 + $0x1d8] sm:$0xff] }
  0x54   : > { %v449_v11 = vmax.bf16 %v2092_v1, %v385_v63 }
  0x55   : > { %v422_v63 = vadd.bf16 %v2186_v38, %v338_v55 }
  0x56   : > { %995 = vmatmul.mubr.bf16.gmra.mrb[8].mxu0 %v1628_v61  ;;  %1123 = vmatmul.mubr.bf16.gmra.mrb[8].mxu1 %v1660_v62  ;;  %v1634_v61 = vcombine.low %v444_v30, %v445_v31  ;;  %v1666_v62 = vcombine.low %v476_v36, %v477_v37  ;;  %v450_v31 = vmax.bf16 %v2092_v1, %v386_v19 }
  0x57   : > { %1002 = vmatprep.mubr.bf16.mxu0 %v1631_v5  ;;  %1130 = vmatprep.mubr.bf16.mxu1 %v1663_v6  ;;  %v417_v5 = vadd.bf16 %v2186_v38, %v333_v59  ;;  %v195_v6 = vld [vmem:[%s2169_s9 + $0x88] sm:$0xff]  ;;  %v483_v36 = vmax.bf16 %v2092_v1, %v419_v26  ;;  %v337_v37 = vmul.bf16 %v2179_v32, %v229_v28  ;;  %v234_v26 = vld [vmem:[%s2169_s9 + $0x1c0] sm:$0xff] }
  0x58   : > { %v303_v13 = vmul.bf16 %v2179_v32, %v195_v6  ;;  %v232_v6 = vld [vmem:[%s2169_s9 + $0x1b0] sm:$0xff]  ;;  %v456_v28 = vmax.bf16 %v2092_v1, %v392_v16 }
  0x59   : > { %v481_v14 = vmax.bf16 %v2092_v1, %v417_v5  ;;  %v1673_v44 = vcombine.high %v482_v35, %v483_v36  ;;  %v1672_v60 = vcombine.low %v482_v35, %v483_v36  ;;  %v423_v5 = vadd.bf16 %v2186_v38, %v339_v58 }
  0x5a   : > { %v343_v36 = vmul.bf16 %v2179_v32, %v235_v27 }
  0x5b   : > { %v1671_v24 = vcombine.high %v480_v12, %v481_v14  ;;  %v1670_v42 = vcombine.low %v480_v12, %v481_v14  ;;  %v486_v12 = vmax.bf16 %v2092_v1, %v422_v63  ;;  %v340_v14 = vmul.bf16 %v2179_v32, %v232_v6  ;;  %v239_v6 = vld [vmem:[%s2169_s9 + $0x1e8] sm:$0xff] }
  0x5e   : > { %1003 = vmatmul.mubr.bf16.gmra.mrb[12].mxu0 %v1630_v20  ;;  %1131 = vmatmul.mubr.bf16.gmra.mrb[12].mxu1 %v1662_v21  ;;  %v387_v20 = vadd.bf16 %v2186_v38, %v303_v13  ;;  %v196_v21 = vld [vmem:[%s2169_s9 + $0x90] sm:$0xff]  ;;  %v487_v13 = vmax.bf16 %v2092_v1, %v423_v5  ;;  %v238_v5 = vld [vmem:[%s2169_s9 + $0x1e0] sm:$0xff] }
  0x5f   : > { %1010 = vmatprep.mubr.bf16.mxu0 %v1633_v22  ;;  %1138 = vmatprep.mubr.bf16.mxu1 %v1665_v23  ;;  %v197_v22 = vld [vmem:[%s2169_s9 + $0x98] sm:$0xff]  ;;  %v1639_v23 = vcombine.high %v448_v9, %v449_v11  ;;  %v304_v29 = vmul.bf16 %v2179_v32, %v196_v21 }
  0x60   : > { %v305_v30 = vmul.bf16 %v2179_v32, %v197_v22  ;;  %v451_v33 = vmax.bf16 %v2092_v1, %v387_v20  ;;  %v1677_v21 = vcombine.high %v486_v12, %v487_v13  ;;  %v424_v22 = vadd.bf16 %v2186_v38, %v340_v14 }
  0x61   : > { %v388_v39 = vadd.bf16 %v2186_v38, %v304_v29  ;;  %v347_v14 = vmul.bf16 %v2179_v32, %v239_v6 }
  0x62   : > { %v1641_v43 = vcombine.high %v450_v31, %v451_v33  ;;  %v1640_v59 = vcombine.low %v450_v31, %v451_v33  ;;  %v311_v31 = vmul.bf16 %v2179_v32, %v203_v25  ;;  %v342_v33 = vmul.bf16 %v2179_v32, %v234_v26  ;;  %v240_v25 = vld [vmem:[%s2169_s9 + $0x1f0] sm:$0xff]  ;;  %v241_v26 = vld [vmem:[%s2169_s9 + $0x1f8] sm:$0xff] }
  0x63   : > { %v452_v51 = vmax.bf16 %v2092_v1, %v388_v39  ;;  %v488_v34 = vmax.bf16 %v2092_v1, %v424_v22  ;;  %v1676_v39 = vcombine.low %v486_v12, %v487_v13 }
  0x66   : > { %1011 = vmatmul.mubr.bf16.gmra.mrb[16].mxu0 %v1632_v40  ;;  %1139 = vmatmul.mubr.bf16.gmra.mrb[16].mxu1 %v1664_v41  ;;  %v389_v40 = vadd.bf16 %v2186_v38, %v305_v30  ;;  %v1638_v41 = vcombine.low %v448_v9, %v449_v11  ;;  %v309_v9 = vmul.bf16 %v2179_v32, %v201_v2 }
  0x67   : > { %1018 = vmatprep.mubr.bf16.mxu0 %v1635_v46  ;;  %1146 = vmatprep.mubr.bf16.mxu1 %v1667_v47  ;;  %v421_v46 = vadd.bf16 %v2186_v38, %v337_v37  ;;  %v198_v47 = vld [vmem:[%s2169_s9 + $0xa0] sm:$0xff] }
  0x68   : > { %v453_v52 = vmax.bf16 %v2092_v1, %v389_v40  ;;  %v306_v53 = vmul.bf16 %v2179_v32, %v198_v47  ;;  %v427_v47 = vadd.bf16 %v2186_v38, %v343_v36 }
  0x69   : > { %v485_v57 = vmax.bf16 %v2092_v1, %v421_v46  ;;  %v426_v46 = vadd.bf16 %v2186_v38, %v342_v33 }
  0x6b   : > { %v1674_v19 = vcombine.low %v484_v56, %v485_v57  ;;  %v490_v55 = vmax.bf16 %v2092_v1, %v426_v46 }
  0x6e   : > { %1019 = vmatmul.mubr.bf16.gmra.mrb[20].mxu0 %v1634_v61  ;;  %1147 = vmatmul.mubr.bf16.gmra.mrb[20].mxu1 %v1666_v62  ;;  %v390_v61 = vadd.bf16 %v2186_v38, %v306_v53  ;;  %v391_v62 = vadd.bf16 %v2186_v38, %v307_v54  ;;  %v344_v54 = vmul.bf16 %v2179_v32, %v236_v48 }
  0x6f   : > { %1026 = vmatprep.mubr.bf16.mxu0 %v1637_v3  ;;  %1154 = vmatprep.mubr.bf16.mxu1 %v1669_v4  ;;  %v1643_v3 = vcombine.high %v452_v51, %v453_v52  ;;  %v1675_v4 = vcombine.high %v484_v56, %v485_v57  ;;  %v491_v56 = vmax.bf16 %v2092_v1, %v427_v47 }
  0x70   : > { %v454_v10 = vmax.bf16 %v2092_v1, %v390_v61  ;;  %v455_v11 = vmax.bf16 %v2092_v1, %v391_v62  ;;  %v345_v57 = vmul.bf16 %v2179_v32, %v237_v49  ;;  %v428_v0 = vadd.bf16 %v2186_v38, %v344_v54 }
  0x71   : > { %v1681_v63 = vcombine.high %v490_v55, %v491_v56  ;;  %v1680_v16 = vcombine.low %v490_v55, %v491_v56 }
  0x72   : > { %v1645_v20 = vcombine.high %v454_v10, %v455_v11  ;;  %v1644_v37 = vcombine.low %v454_v10, %v455_v11  ;;  %v429_v2 = vadd.bf16 %v2186_v38, %v345_v57  ;;  %v346_v11 = vmul.bf16 %v2179_v32, %v238_v5 }
  0x73   : > { %v492_v12 = vmax.bf16 %v2092_v1, %v428_v0 }
  0x74   : > { %v493_v13 = vmax.bf16 %v2092_v1, %v429_v2 }
  0x76   : > { %1027 = vmatmul.mubr.bf16.gmra.mrb[24].mxu0 %v1636_v17  ;;  %1155 = vmatmul.mubr.bf16.gmra.mrb[24].mxu1 %v1668_v18  ;;  %v393_v17 = vadd.bf16 %v2186_v38, %v309_v9  ;;  %v1642_v18 = vcombine.low %v452_v51, %v453_v52 }
  0x77   : > { %1034 = vmatprep.mubr.bf16.mxu0 %v1639_v23  ;;  %1162 = vmatprep.mubr.bf16.mxu1 %v1671_v24  ;;  %v425_v23 = vadd.bf16 %v2186_v38, %v341_v15  ;;  %v202_v24 = vld [vmem:[%s2169_s9 + $0xc0] sm:$0xff] }
  0x78   : > { %v457_v29 = vmax.bf16 %v2092_v1, %v393_v17  ;;  %v310_v30 = vmul.bf16 %v2179_v32, %v202_v24  ;;  %v431_v24 = vadd.bf16 %v2186_v38, %v347_v14 }
  0x79   : > { %v489_v35 = vmax.bf16 %v2092_v1, %v425_v23  ;;  %v1683_v23 = vcombine.high %v492_v12, %v493_v13 }
  0x7a   : > { %v394_v40 = vadd.bf16 %v2186_v38, %v310_v30  ;;  %v495_v33 = vmax.bf16 %v2092_v1, %v431_v24 }
  0x7b   : > { %v1679_v45 = vcombine.high %v488_v34, %v489_v35  ;;  %v1678_v61 = vcombine.low %v488_v34, %v489_v35  ;;  %v348_v34 = vmul.bf16 %v2179_v32, %v240_v25  ;;  %v349_v35 = vmul.bf16 %v2179_v32, %v241_v26 }
  0x7c   : > { %v458_v52 = vmax.bf16 %v2092_v1, %v394_v40 }
  0x7e   : > { %1035 = vmatmul.mubr.bf16.gmra.mrb[28].mxu0 %v1638_v41  ;;  %1163 = vmatmul.mubr.bf16.gmra.mrb[28].mxu1 %v1670_v42  ;;  %v395_v41 = vadd.bf16 %v2186_v38, %v311_v31  ;;  %v204_v42 = vld [vmem:[%s2169_s9 + $0xd0] sm:$0xff] }
  0x7f   : > { %1042 = vmatprep.mubr.bf16.mxu0 %v1641_v43  ;;  %1170 = vmatprep.mubr.bf16.mxu1 %v1673_v44  ;;  %v205_v43 = vld [vmem:[%s2169_s9 + $0xd8] sm:$0xff]  ;;  %v1647_v44 = vcombine.high %v456_v28, %v457_v29  ;;  %v312_v50 = vmul.bf16 %v2179_v32, %v204_v42 }
  0x80   : > { %v313_v51 = vmul.bf16 %v2179_v32, %v205_v43  ;;  %v459_v53 = vmax.bf16 %v2092_v1, %v395_v41  ;;  %v432_v43 = vadd.bf16 %v2186_v38, %v348_v34 }
  0x81   : > { %v396_v58 = vadd.bf16 %v2186_v38, %v312_v50 }
  0x82   : > { %v1649_v62 = vcombine.high %v458_v52, %v459_v53  ;;  %v1648_v15 = vcombine.low %v458_v52, %v459_v53  ;;  %v496_v46 = vmax.bf16 %v2092_v1, %v432_v43 }
  0x83   : > { %v460_v7 = vmax.bf16 %v2092_v1, %v396_v58 }
  0x86   : > { %1043 = vmatmul.mubr.bf16.gmra.mrb[32].mxu0 %v1640_v59  ;;  %1171 = vmatmul.mubr.bf16.gmra.mrb[32].mxu1 %v1672_v60  ;;  %v397_v59 = vadd.bf16 %v2186_v38, %v313_v51  ;;  %v1646_v60 = vcombine.low %v456_v28, %v457_v29 }
  0x87   : > { %1050 = vmatprep.mubr.bf16.mxu0 %v1643_v3  ;;  %1178 = vmatprep.mubr.bf16.mxu1 %v1675_v4  ;;  %v206_v3 = vld [vmem:[%s2169_s9 + $0xe0] sm:$0xff]  ;;  %v207_v4 = vld [vmem:[%s2169_s9 + $0xe8] sm:$0xff] }
  0x88   : > { %v461_v8 = vmax.bf16 %v2092_v1, %v397_v59  ;;  %v314_v9 = vmul.bf16 %v2179_v32, %v206_v3  ;;  %v315_v10 = vmul.bf16 %v2179_v32, %v207_v4 }
  0x8a   : > { %v398_v17 = vadd.bf16 %v2186_v38, %v314_v9  ;;  %v1651_v22 = vcombine.high %v460_v7, %v461_v8  ;;  %v1650_v36 = vcombine.low %v460_v7, %v461_v8 }
  0x8c   : > { %v462_v29 = vmax.bf16 %v2092_v1, %v398_v17 }
  0x8e   : > { %1051 = vmatmul.mubr.bf16.gmra.mrb[36].mxu0 %v1642_v18  ;;  %1179 = vmatmul.mubr.bf16.gmra.mrb[36].mxu1 %v1674_v19  ;;  %v399_v18 = vadd.bf16 %v2186_v38, %v315_v10  ;;  %v430_v19 = vadd.bf16 %v2186_v38, %v346_v11 }
  0x8f   : > { %1058 = vmatprep.mubr.bf16.mxu0 %v1645_v20  ;;  %1186 = vmatprep.mubr.bf16.mxu1 %v1677_v21  ;;  %v208_v20 = vld [vmem:[%s2169_s9 + $0xf0] sm:$0xff]  ;;  %v209_v21 = vld [vmem:[%s2169_s9 + $0xf8] sm:$0xff] }
  0x90   : > { %v316_v27 = vmul.bf16 %v2179_v32, %v208_v20  ;;  %v317_v28 = vmul.bf16 %v2179_v32, %v209_v21  ;;  %v463_v30 = vmax.bf16 %v2092_v1, %v399_v18  ;;  %v494_v31 = vmax.bf16 %v2092_v1, %v430_v19 }
  0x92   : > { %v400_v40 = vadd.bf16 %v2186_v38, %v316_v27  ;;  %v1685_v41 = vcombine.high %v494_v31, %v495_v33  ;;  %v401_v42 = vadd.bf16 %v2186_v38, %v317_v28  ;;  %v1652_v48 = vcombine.low %v462_v29, %v463_v30 }
  0x93   : > { %v1684_v49 = vcombine.low %v494_v31, %v495_v33 }
  0x94   : > { %v465_v32 = vmax.bf16 %v2092_v1, %v401_v42 }
  0x96   : > { %1059 = vmatmul.mubr.bf16.gmra.mrb[40].mxu0 %v1644_v37  ;;  %1187 = vmatmul.mubr.bf16.gmra.mrb[40].mxu1 %v1676_v39  ;;  %v1682_v37 = vcombine.low %v492_v12, %v493_v13  ;;  %v1653_v39 = vcombine.high %v462_v29, %v463_v30 }
  0x97   : > { %1066 = vmatprep.mubr.bf16.mxu0 %v1647_v44  ;;  %1194 = vmatprep.mubr.bf16.mxu1 %v1679_v45  ;;  %v433_v44 = vadd.bf16 %v2186_v38, %v349_v35  ;;  %v464_v45 = vmax.bf16 %v2092_v1, %v400_v40 }
  0x99   : > { %v497_v47 = vmax.bf16 %v2092_v1, %v433_v44  ;;  %v1655_v50 = vcombine.high %v464_v45, %v465_v32  ;;  %v1654_v38 = vcombine.low %v464_v45, %v465_v32 }
  0x9b   : > { %v1687_v51 = vcombine.high %v496_v46, %v497_v47  ;;  %v1686_v52 = vcombine.low %v496_v46, %v497_v47 }
  0x9e   : > { %1067 = vmatmul.mubr.bf16.gmra.mrb[44].mxu0 %v1646_v60  ;;  %1195 = vmatmul.mubr.bf16.gmra.mrb[44].mxu1 %v1678_v61 }
  0x9f   : > { %1074 = vmatprep.mubr.bf16.mxu0 %v1649_v62  ;;  %1202 = vmatprep.mubr.bf16.mxu1 %v1681_v63 }
  0xa6   : > { %1075 = vmatmul.mubr.bf16.gmra.mrb[48].mxu0 %v1648_v15  ;;  %1203 = vmatmul.mubr.bf16.gmra.mrb[48].mxu1 %v1680_v16 }
  0xa7   : > { %1082 = vmatprep.mubr.bf16.mxu0 %v1651_v22  ;;  %1210 = vmatprep.mubr.bf16.mxu1 %v1683_v23 }
  0xae   : > { %1083 = vmatmul.mubr.bf16.gmra.mrb[52].mxu0 %v1650_v36  ;;  %1211 = vmatmul.mubr.bf16.gmra.mrb[52].mxu1 %v1682_v37 }
  0xaf   : > { %1090 = vmatprep.mubr.bf16.mxu0 %v1653_v39  ;;  %1218 = vmatprep.mubr.bf16.mxu1 %v1685_v41 }
  0xb6   : > { %1091 = vmatmul.mubr.bf16.gmra.mrb[56].mxu0 %v1652_v48  ;;  %1219 = vmatmul.mubr.bf16.gmra.mrb[56].mxu1 %v1684_v49 }
  0xb7   : > { %1098 = vmatprep.mubr.bf16.mxu0 %v1655_v50  ;;  %1226 = vmatprep.mubr.bf16.mxu1 %v1687_v51 }
  0xbe   : > { %1099 = vmatmul.mubr.bf16.gmra.mrb[60].mxu0 %v1654_v38  ;;  %1227 = vmatmul.mubr.bf16.gmra.mrb[60].mxu1 %v1686_v52 }
 0x119   : > { %v980_v53 = vpop.f32.mrb[0].mxu0  ;;  %v1108_v54 = vpop.f32.mrb[0].mxu1 }
 0x11a   : > { %v982_v55 = vpop.f32.mrb[1].mxu0  ;;  %v1110_v56 = vpop.f32.mrb[1].mxu1 }
 0x11b   : > { %v983_v1 = vpop.f32.mrb[2].mxu0  ;;  %v1111_v57 = vpop.f32.mrb[2].mxu1 }
 0x11c   : > { %v1838_v58 = vpack.c.bf16 %v983_v1, %v980_v53  ;;  %v1918_v59 = vpack.c.bf16 %v1111_v57, %v1108_v54  ;;  %v985_v60 = vpop.f32.mrb[3].mxu0  ;;  %v1113_v61 = vpop.f32.mrb[3].mxu1 }
 0x11e   : > { %1839 = vst [vmem:[%s2493_s4] sm:$0xff] %v1838_v58   ;;  %2010 = vst [vmem:[%s2493_s4 + $0x80] sm:$0xff] %v1918_v59  }
 0x121   : > { %v988_v62 = vpop.f32.mrb[4].mxu0  ;;  %v1116_v63 = vpop.f32.mrb[4].mxu1 }
 0x122   : > { %v990_v0 = vpop.f32.mrb[5].mxu0  ;;  %v1118_v2 = vpop.f32.mrb[5].mxu1 }
 0x123   : > { %v991_v3 = vpop.f32.mrb[6].mxu0  ;;  %v1119_v4 = vpop.f32.mrb[6].mxu1 }
 0x124   : > { %v1843_v5 = vpack.c.bf16 %v991_v3, %v988_v62  ;;  %v1923_v6 = vpack.c.bf16 %v1119_v4, %v1116_v63  ;;  %v993_v7 = vpop.f32.mrb[7].mxu0  ;;  %v1121_v8 = vpop.f32.mrb[7].mxu1 }
 0x126   : > { %1995 = vst [vmem:[%s2493_s4 + $0x8] sm:$0xff] %v1843_v5   ;;  %2011 = vst [vmem:[%s2493_s4 + $0x88] sm:$0xff] %v1923_v6  }
 0x129   : > { %v996_v9 = vpop.f32.mrb[8].mxu0  ;;  %v1124_v10 = vpop.f32.mrb[8].mxu1 }
 0x12a   : > { %v998_v11 = vpop.f32.mrb[9].mxu0  ;;  %v1126_v12 = vpop.f32.mrb[9].mxu1 }
 0x12b   : > { %v999_v13 = vpop.f32.mrb[10].mxu0  ;;  %v1127_v14 = vpop.f32.mrb[10].mxu1 }
 0x12c   : > { %v1848_v15 = vpack.c.bf16 %v999_v13, %v996_v9  ;;  %v1928_v16 = vpack.c.bf16 %v1127_v14, %v1124_v10  ;;  %v1001_v17 = vpop.f32.mrb[11].mxu0  ;;  %v1129_v18 = vpop.f32.mrb[11].mxu1 }
 0x12e   : > { %1996 = vst [vmem:[%s2493_s4 + $0x10] sm:$0xff] %v1848_v15   ;;  %2012 = vst [vmem:[%s2493_s4 + $0x90] sm:$0xff] %v1928_v16  }
 0x131   : > { %v1004_v19 = vpop.f32.mrb[12].mxu0  ;;  %v1132_v20 = vpop.f32.mrb[12].mxu1 }
 0x132   : > { %v1006_v21 = vpop.f32.mrb[13].mxu0  ;;  %v1134_v22 = vpop.f32.mrb[13].mxu1 }
 0x133   : > { %v1007_v23 = vpop.f32.mrb[14].mxu0  ;;  %v1135_v24 = vpop.f32.mrb[14].mxu1 }
 0x134   : > { %v1853_v25 = vpack.c.bf16 %v1007_v23, %v1004_v19  ;;  %v1933_v26 = vpack.c.bf16 %v1135_v24, %v1132_v20  ;;  %v1009_v27 = vpop.f32.mrb[15].mxu0  ;;  %v1137_v28 = vpop.f32.mrb[15].mxu1 }
 0x136   : > { %1997 = vst [vmem:[%s2493_s4 + $0x18] sm:$0xff] %v1853_v25   ;;  %2013 = vst [vmem:[%s2493_s4 + $0x98] sm:$0xff] %v1933_v26  }
 0x139   : > { %v1012_v29 = vpop.f32.mrb[16].mxu0  ;;  %v1140_v30 = vpop.f32.mrb[16].mxu1 }
 0x13a   : > { %v1014_v31 = vpop.f32.mrb[17].mxu0  ;;  %v1142_v33 = vpop.f32.mrb[17].mxu1 }
 0x13b   : > { %v1015_v34 = vpop.f32.mrb[18].mxu0  ;;  %v1143_v35 = vpop.f32.mrb[18].mxu1 }
 0x13c   : > { %v1858_v36 = vpack.c.bf16 %v1015_v34, %v1012_v29  ;;  %v1938_v37 = vpack.c.bf16 %v1143_v35, %v1140_v30  ;;  %v1017_v39 = vpop.f32.mrb[19].mxu0  ;;  %v1145_v40 = vpop.f32.mrb[19].mxu1 }
 0x13e   : > { %1998 = vst [vmem:[%s2493_s4 + $0x20] sm:$0xff] %v1858_v36   ;;  %2014 = vst [vmem:[%s2493_s4 + $0xa0] sm:$0xff] %v1938_v37  }
 0x141   : > { %v1020_v41 = vpop.f32.mrb[20].mxu0  ;;  %v1148_v42 = vpop.f32.mrb[20].mxu1 }
 0x142   : > { %v1022_v43 = vpop.f32.mrb[21].mxu0  ;;  %v1150_v44 = vpop.f32.mrb[21].mxu1 }
 0x143   : > { %v1023_v45 = vpop.f32.mrb[22].mxu0  ;;  %v1151_v32 = vpop.f32.mrb[22].mxu1 }
 0x144   : > { %v1863_v46 = vpack.c.bf16 %v1023_v45, %v1020_v41  ;;  %v1943_v47 = vpack.c.bf16 %v1151_v32, %v1148_v42  ;;  %v1025_v48 = vpop.f32.mrb[23].mxu0  ;;  %v1153_v49 = vpop.f32.mrb[23].mxu1 }
 0x146   : > { %1999 = vst [vmem:[%s2493_s4 + $0x28] sm:$0xff] %v1863_v46   ;;  %2015 = vst [vmem:[%s2493_s4 + $0xa8] sm:$0xff] %v1943_v47  }
 0x149   : > { %v1028_v50 = vpop.f32.mrb[24].mxu0  ;;  %v1156_v51 = vpop.f32.mrb[24].mxu1 }
 0x14a   : > { %v1030_v38 = vpop.f32.mrb[25].mxu0  ;;  %v1158_v52 = vpop.f32.mrb[25].mxu1 }
 0x14b   : > { %v1031_v53 = vpop.f32.mrb[26].mxu0  ;;  %v1159_v54 = vpop.f32.mrb[26].mxu1 }
 0x14c   : > { %v1868_v55 = vpack.c.bf16 %v1031_v53, %v1028_v50  ;;  %v1948_v56 = vpack.c.bf16 %v1159_v54, %v1156_v51  ;;  %v1033_v1 = vpop.f32.mrb[27].mxu0  ;;  %v1161_v57 = vpop.f32.mrb[27].mxu1 }
 0x14e   : > { %2000 = vst [vmem:[%s2493_s4 + $0x30] sm:$0xff] %v1868_v55   ;;  %2016 = vst [vmem:[%s2493_s4 + $0xb0] sm:$0xff] %v1948_v56  }
 0x151   : > { %v1036_v58 = vpop.f32.mrb[28].mxu0  ;;  %v1164_v59 = vpop.f32.mrb[28].mxu1 }
 0x152   : > { %v1038_v60 = vpop.f32.mrb[29].mxu0  ;;  %v1166_v61 = vpop.f32.mrb[29].mxu1 }
 0x153   : > { %v1039_v62 = vpop.f32.mrb[30].mxu0  ;;  %v1167_v63 = vpop.f32.mrb[30].mxu1 }
 0x154   : > { %v1873_v0 = vpack.c.bf16 %v1039_v62, %v1036_v58  ;;  %v1953_v2 = vpack.c.bf16 %v1167_v63, %v1164_v59  ;;  %v1041_v3 = vpop.f32.mrb[31].mxu0  ;;  %v1169_v4 = vpop.f32.mrb[31].mxu1 }
 0x156   : > { %2001 = vst [vmem:[%s2493_s4 + $0x38] sm:$0xff] %v1873_v0   ;;  %2017 = vst [vmem:[%s2493_s4 + $0xb8] sm:$0xff] %v1953_v2  }
 0x159   : > { %v1044_v5 = vpop.f32.mrb[32].mxu0  ;;  %v1172_v6 = vpop.f32.mrb[32].mxu1 }
 0x15a   : > { %v1046_v7 = vpop.f32.mrb[33].mxu0  ;;  %v1174_v8 = vpop.f32.mrb[33].mxu1 }
 0x15b   : > { %v1047_v9 = vpop.f32.mrb[34].mxu0  ;;  %v1175_v10 = vpop.f32.mrb[34].mxu1 }
 0x15c   : > { %v1878_v11 = vpack.c.bf16 %v1047_v9, %v1044_v5  ;;  %v1958_v12 = vpack.c.bf16 %v1175_v10, %v1172_v6  ;;  %v1049_v13 = vpop.f32.mrb[35].mxu0  ;;  %v1177_v14 = vpop.f32.mrb[35].mxu1 }
 0x15e   : > { %2002 = vst [vmem:[%s2493_s4 + $0x40] sm:$0xff] %v1878_v11   ;;  %2018 = vst [vmem:[%s2493_s4 + $0xc0] sm:$0xff] %v1958_v12  }
 0x161   : > { %v1052_v15 = vpop.f32.mrb[36].mxu0  ;;  %v1180_v16 = vpop.f32.mrb[36].mxu1 }
 0x162   : > { %v1054_v17 = vpop.f32.mrb[37].mxu0  ;;  %v1182_v18 = vpop.f32.mrb[37].mxu1 }
 0x163   : > { %v1055_v19 = vpop.f32.mrb[38].mxu0  ;;  %v1183_v20 = vpop.f32.mrb[38].mxu1 }
 0x164   : > { %v1883_v21 = vpack.c.bf16 %v1055_v19, %v1052_v15  ;;  %v1963_v22 = vpack.c.bf16 %v1183_v20, %v1180_v16  ;;  %v1057_v23 = vpop.f32.mrb[39].mxu0  ;;  %v1185_v24 = vpop.f32.mrb[39].mxu1 }
 0x166   : > { %2003 = vst [vmem:[%s2493_s4 + $0x48] sm:$0xff] %v1883_v21   ;;  %2019 = vst [vmem:[%s2493_s4 + $0xc8] sm:$0xff] %v1963_v22  }
 0x169   : > { %v1060_v25 = vpop.f32.mrb[40].mxu0  ;;  %v1188_v26 = vpop.f32.mrb[40].mxu1 }
 0x16a   : > { %v1062_v27 = vpop.f32.mrb[41].mxu0  ;;  %v1190_v28 = vpop.f32.mrb[41].mxu1 }
 0x16b   : > { %v1063_v29 = vpop.f32.mrb[42].mxu0  ;;  %v1191_v30 = vpop.f32.mrb[42].mxu1 }
 0x16c   : > { %v1888_v31 = vpack.c.bf16 %v1063_v29, %v1060_v25  ;;  %v1968_v33 = vpack.c.bf16 %v1191_v30, %v1188_v26  ;;  %v1065_v34 = vpop.f32.mrb[43].mxu0  ;;  %v1193_v35 = vpop.f32.mrb[43].mxu1 }
 0x16e   : > { %2004 = vst [vmem:[%s2493_s4 + $0x50] sm:$0xff] %v1888_v31   ;;  %2020 = vst [vmem:[%s2493_s4 + $0xd0] sm:$0xff] %v1968_v33  }
 0x171   : > { %v1068_v36 = vpop.f32.mrb[44].mxu0  ;;  %v1196_v37 = vpop.f32.mrb[44].mxu1 }
 0x172   : > { %v1070_v39 = vpop.f32.mrb[45].mxu0  ;;  %v1198_v40 = vpop.f32.mrb[45].mxu1 }
 0x173   : > { %v1071_v41 = vpop.f32.mrb[46].mxu0  ;;  %v1199_v42 = vpop.f32.mrb[46].mxu1 }
 0x174   : > { %v1893_v43 = vpack.c.bf16 %v1071_v41, %v1068_v36  ;;  %v1973_v44 = vpack.c.bf16 %v1199_v42, %v1196_v37  ;;  %v1073_v45 = vpop.f32.mrb[47].mxu0  ;;  %v1201_v32 = vpop.f32.mrb[47].mxu1 }
 0x176   : > { %2005 = vst [vmem:[%s2493_s4 + $0x58] sm:$0xff] %v1893_v43   ;;  %2021 = vst [vmem:[%s2493_s4 + $0xd8] sm:$0xff] %v1973_v44  }
 0x179   : > { %v1076_v46 = vpop.f32.mrb[48].mxu0  ;;  %v1204_v47 = vpop.f32.mrb[48].mxu1 }
 0x17a   : > { %v1078_v48 = vpop.f32.mrb[49].mxu0  ;;  %v1206_v49 = vpop.f32.mrb[49].mxu1 }
 0x17b   : > { %v1079_v50 = vpop.f32.mrb[50].mxu0  ;;  %v1207_v51 = vpop.f32.mrb[50].mxu1 }
 0x17c   : > { %v1898_v38 = vpack.c.bf16 %v1079_v50, %v1076_v46  ;;  %v1978_v52 = vpack.c.bf16 %v1207_v51, %v1204_v47  ;;  %v1081_v53 = vpop.f32.mrb[51].mxu0  ;;  %v1209_v54 = vpop.f32.mrb[51].mxu1 }
 0x17e   : > { %2006 = vst [vmem:[%s2493_s4 + $0x60] sm:$0xff] %v1898_v38   ;;  %2022 = vst [vmem:[%s2493_s4 + $0xe0] sm:$0xff] %v1978_v52  }
 0x181   : > { %v1084_v55 = vpop.f32.mrb[52].mxu0  ;;  %v1212_v56 = vpop.f32.mrb[52].mxu1 }
 0x182   : > { %v1086_v1 = vpop.f32.mrb[53].mxu0  ;;  %v1214_v57 = vpop.f32.mrb[53].mxu1 }
 0x183   : > { %v1087_v58 = vpop.f32.mrb[54].mxu0  ;;  %v1215_v59 = vpop.f32.mrb[54].mxu1 }
 0x184   : > { %v1903_v60 = vpack.c.bf16 %v1087_v58, %v1084_v55  ;;  %v1983_v61 = vpack.c.bf16 %v1215_v59, %v1212_v56  ;;  %v1089_v62 = vpop.f32.mrb[55].mxu0  ;;  %v1217_v63 = vpop.f32.mrb[55].mxu1 }
 0x186   : > { %2007 = vst [vmem:[%s2493_s4 + $0x68] sm:$0xff] %v1903_v60   ;;  %2023 = vst [vmem:[%s2493_s4 + $0xe8] sm:$0xff] %v1983_v61  }
 0x189   : > { %v1092_v0 = vpop.f32.mrb[56].mxu0  ;;  %v1220_v2 = vpop.f32.mrb[56].mxu1 }
 0x18a   : > { %v1094_v3 = vpop.f32.mrb[57].mxu0  ;;  %v1222_v4 = vpop.f32.mrb[57].mxu1 }
 0x18b   : > { %v1095_v5 = vpop.f32.mrb[58].mxu0  ;;  %v1223_v6 = vpop.f32.mrb[58].mxu1 }
 0x18c   : > { %v1908_v7 = vpack.c.bf16 %v1095_v5, %v1092_v0  ;;  %v1988_v8 = vpack.c.bf16 %v1223_v6, %v1220_v2  ;;  %v1097_v9 = vpop.f32.mrb[59].mxu0  ;;  %v1225_v10 = vpop.f32.mrb[59].mxu1 }
 0x18e   : > { %2008 = vst [vmem:[%s2493_s4 + $0x70] sm:$0xff] %v1908_v7   ;;  %2024 = vst [vmem:[%s2493_s4 + $0xf0] sm:$0xff] %v1988_v8  }
 0x191   : > { %v1100_v11 = vpop.f32.mrb[60].mxu0  ;;  %v1228_v12 = vpop.f32.mrb[60].mxu1 }
 0x192   : > { %v1102_v13 = vpop.f32.mrb[61].mxu0  ;;  %v1230_v14 = vpop.f32.mrb[61].mxu1 }
 0x193   : > { %v1103_v15 = vpop.f32.mrb[62].mxu0  ;;  %v1231_v16 = vpop.f32.mrb[62].mxu1 }
 0x194   : > { %v1913_v17 = vpack.c.bf16 %v1103_v15, %v1100_v11  ;;  %v1993_v18 = vpack.c.bf16 %v1231_v16, %v1228_v12  ;;  %v1105_v19 = vpop.f32.mrb[63].mxu0  ;;  %v1233_v20 = vpop.f32.mrb[63].mxu1 }
 0x196   : > { %2009 = vst [vmem:[%s2493_s4 + $0x78] sm:$0xff] %v1913_v17   ;;  %2025 = vst [vmem:[%s2493_s4 + $0xf8] sm:$0xff] %v1993_v18  }
 0x197 PF: > { %s13_s12 = sadd.s32 1, %s2090_s12  }
 0x198   : > { %p10_p4 = scmp.ge.s32.totalorder %s13_s12, 6  }
 0x19a   :  { %12 = sbr.rel (!%p10_p4) target bundleno = 1 (0x1), region = 62 }

// kernel: sst_emotion_net_forward.26
= control target key start
LH: loop header
LB: loop body
LE: loop exit
PB: predicated region body
PF: predicated region fallthrough
CT: control target
= control target key end

     0   :  { %s914_s15 = smov 0   ;;  %s1075_s0 = inlined_call_operand.vmem [shape: bf16[256,128], index: 0, kind: input, shape index: {}]   ;;  %s1076_s1 = inlined_call_operand.vmem [shape: bf16[128,128], index: 1, kind: input, shape index: {}]   ;;  %s1077_s2 = inlined_call_operand.vmem [shape: bf16[2,128], index: 2, kind: input, shape index: {}]   ;;  %s1078_s3 = inlined_call_operand.vmem [shape: f32[2,128], index: 3, kind: input, shape index: {}]   ;;  %s1079_s4 = inlined_call_operand.vmem [shape: bf16[256,128], index: 4, kind: output, shape index: {}]  }
   0x1 LB: > { %s691_s16 = sadd.s32 4294967295, %s886_s15   ;;  %p695_p0 = scmp.ge.s32.totalorder %s886_s15, 1  ;;  %s886_s15 = sphi %s914_s15, %s14_s15  }
   0x2   : > { %p163_p1 = scmp.lt.s32.totalorder %s886_s15, 3 }
   0x4   : > { %p164_p2 = pnand %p695_p0, %p163_p1 }
   0x5   : > { %v872_v0 = vld [vmem:[%s1076_s1] sm:$0xff] (!%p164_p2)   ;;  %s696_s19 = sshll.u32 (!%p164_p2), %s691_s16, 4  ;;  %v222_v1 = vlaneseq (!%p164_p2)  ;;  %v873_v2 = vld [vmem:[%s1076_s1 + $0x8] sm:$0xff] (!%p164_p2)   ;;  %v874_v4 = vld [vmem:[%s1076_s1 + $0x10] sm:$0xff] (!%p164_p2)   ;;  %v888_v38 = vmov (!%p164_p2), 0  }
   0x6   : > { %167 = sbr.rel (%p164_p2) target bundleno = 271 (0x10f), region = 36  ;;  %p190_p3 = scmp.lt.s32.totalorder (!%p164_p2), %s696_s19, 31  ;;  %815 = vmatprep.subr.bf16.mxu0 (!%p164_p2), %v872_v0  ;;  %847 = vmatprep.subr.bf16.mxu1 (!%p164_p2), %v872_v0  ;;  %v875_v6 = vld [vmem:[%s1076_s1 + $0x18] sm:$0xff] (!%p164_p2)   ;;  %v218_v7 = vld [vmem:[%s1077_s2] sm:$0x1] (!%p164_p2)  ;;  %v877_v26 = vld [vmem:[%s1076_s1 + $0x28] sm:$0xff] (!%p164_p2)  }
   0x7   : > { %816 = vmatpush3.bf16.msra.mxu0 (!%p164_p2), %v872_v0  ;;  %855 = vmatpush3.bf16.msra.mxu1 (!%p164_p2), %v872_v0  ;;  %v930_v3 = vshrl.u32 (!%p164_p2), %v222_v1, 7  ;;  %v220_v8 = vpack.i.b16 (!%p164_p2), %v218_v7, %v218_v7  ;;  %v246_v9 = vshrl.u32 (!%p164_p2), %v218_v7, 16  ;;  %v876_v12 = vld [vmem:[%s1076_s1 + $0x20] sm:$0xff] (!%p164_p2)   ;;  %v878_v45 = vld [vmem:[%s1076_s1 + $0x30] sm:$0xff] (!%p164_p2)   ;;  %v879_v60 = vld [vmem:[%s1076_s1 + $0x38] sm:$0xff] (!%p164_p2)  }
   0x8   : > { %817 = vmatprep.subr.bf16.mxu0 (!%p164_p2), %v873_v2  ;;  %848 = vmatprep.subr.bf16.mxu1 (!%p164_p2), %v873_v2 }
   0x9   : > { %v937_v5 = vsub.s32 (!%p164_p2), 0, %v930_v3  ;;  %v247_v11 = vpack.i.b16 (!%p164_p2), %v246_v9, %v246_v9 }
   0xb   : > { %818 = vmatpush3.bf16.msra.mxu0 (!%p164_p2), %v873_v2  ;;  %856 = vmatpush3.bf16.msra.mxu1 (!%p164_p2), %v873_v2  ;;  %v225_v10 = vrot.slane (!%p164_p2), %v220_v8, %v937_v5  ;;  %v252_v16 = vrot.slane (!%p164_p2), %v247_v11, %v937_v5 }
   0xc   : > { %819 = vmatprep.subr.bf16.mxu0 (!%p164_p2), %v874_v4  ;;  %849 = vmatprep.subr.bf16.mxu1 (!%p164_p2), %v874_v4 }
   0xd   : > { %s1081_s19 = smov (!%p190_p3, %s696_s19), 31  ;;  %v958_v15 = vcombine.low %v225_v10, %v225_v10  ;;  %v968_v24 = vcombine.low %v252_v16, %v252_v16 }
   0xe   : > { %s697_s24 = sshll.u32 %s1081_s19, 2 }
   0xf   : > { %s950_s5 = scalar_lea.vmem %s1075_s0, %s697_s24  ;;  %820 = vmatpush3.bf16.msra.mxu0 %v874_v4  ;;  %857 = vmatpush3.bf16.msra.mxu1 %v874_v4  ;;  %s1054_s20 = scalar_lea.vmem %s1079_s4, %s697_s24 }
  0x10   : > { %821 = vmatprep.subr.bf16.mxu0 %v875_v6  ;;  %850 = vmatprep.subr.bf16.mxu1 %v875_v6  ;;  %v202_v13 = vld [vmem:[%s950_s5] sm:$0xf]  ;;  %v203_v14 = vld [vmem:[%s950_s5 + $0x4] sm:$0xf]  ;;  %v204_v19 = vld [vmem:[%s950_s5 + $0x8] sm:$0xf] }
  0x11   : > { %v210_v17 = vld [vmem:[%s950_s5 + $0x20] sm:$0xf]  ;;  %v211_v18 = vld [vmem:[%s950_s5 + $0x24] sm:$0xf]  ;;  %v205_v20 = vld [vmem:[%s950_s5 + $0xc] sm:$0xf]  ;;  %v230_v22 = vmul.bf16 %v958_v15, %v202_v13  ;;  %v231_v23 = vmul.bf16 %v958_v15, %v203_v14  ;;  %v232_v29 = vmul.bf16 %v958_v15, %v204_v19 }
  0x12   : > { %v212_v21 = vld [vmem:[%s950_s5 + $0x28] sm:$0xf]  ;;  %v213_v25 = vld [vmem:[%s950_s5 + $0x2c] sm:$0xf]  ;;  %v238_v27 = vmul.bf16 %v958_v15, %v210_v17  ;;  %v239_v28 = vmul.bf16 %v958_v15, %v211_v18  ;;  %v233_v32 = vmul.bf16 %v958_v15, %v205_v20  ;;  %v206_v42 = vld [vmem:[%s950_s5 + $0x10] sm:$0xf] }
  0x13   : > { %822 = vmatpush3.bf16.msra.mxu0 %v875_v6  ;;  %858 = vmatpush3.bf16.msra.mxu1 %v875_v6  ;;  %v257_v30 = vadd.bf16 %v968_v24, %v230_v22  ;;  %v258_v31 = vadd.bf16 %v968_v24, %v231_v23  ;;  %v240_v33 = vmul.bf16 %v958_v15, %v212_v21  ;;  %v207_v43 = vld [vmem:[%s950_s5 + $0x14] sm:$0xf]  ;;  %v214_v44 = vld [vmem:[%s950_s5 + $0x30] sm:$0xf]  ;;  %v208_v56 = vld [vmem:[%s950_s5 + $0x18] sm:$0xf] }
  0x14   : > { %823 = vmatprep.subr.bf16.mxu0 %v876_v12  ;;  %851 = vmatprep.subr.bf16.mxu1 %v876_v12  ;;  %v265_v34 = vadd.bf16 %v968_v24, %v238_v27  ;;  %v266_v35 = vadd.bf16 %v968_v24, %v239_v28  ;;  %v259_v36 = vadd.bf16 %v968_v24, %v232_v29  ;;  %v215_v51 = vld [vmem:[%s950_s5 + $0x34] sm:$0xf]  ;;  %v209_v59 = vld [vmem:[%s950_s5 + $0x1c] sm:$0xf]  ;;  %v216_v0 = vld [vmem:[%s950_s5 + $0x38] sm:$0xf] }
  0x15   : > { %v241_v37 = vmul.bf16 %v958_v15, %v213_v25  ;;  %v273_v39 = vmax.bf16 %v888_v38, %v257_v30  ;;  %v274_v40 = vmax.bf16 %v888_v38, %v258_v31  ;;  %v260_v41 = vadd.bf16 %v968_v24, %v233_v32  ;;  %v217_v10 = vld [vmem:[%s950_s5 + $0x3c] sm:$0xf] }
  0x16   : > { %v281_v46 = vmax.bf16 %v888_v38, %v265_v34  ;;  %v282_v47 = vmax.bf16 %v888_v38, %v266_v35  ;;  %v267_v49 = vadd.bf16 %v968_v24, %v240_v33  ;;  %v234_v53 = vmul.bf16 %v958_v15, %v206_v42 }
  0x17   : > { %824 = vmatpush3.bf16.msra.mxu0 %v876_v12  ;;  %859 = vmatpush3.bf16.msra.mxu1 %v876_v12  ;;  %v702_v48 = vcombine.low %v273_v39, %v274_v40  ;;  %v268_v50 = vadd.bf16 %v968_v24, %v241_v37  ;;  %v235_v54 = vmul.bf16 %v958_v15, %v207_v43  ;;  %v521_v31 = vsub.s32 1, %v930_v3 }
  0x18   : > { %825 = vmatprep.subr.bf16.mxu0 %v877_v26  ;;  %852 = vmatprep.subr.bf16.mxu1 %v877_v26  ;;  %v706_v52 = vcombine.low %v281_v46, %v282_v47  ;;  %v242_v55 = vmul.bf16 %v958_v15, %v214_v44  ;;  %v275_v57 = vmax.bf16 %v888_v38, %v259_v36 }
  0x19   : > { %v276_v58 = vmax.bf16 %v888_v38, %v260_v41  ;;  %v261_v61 = vadd.bf16 %v968_v24, %v234_v53  ;;  %v262_v62 = vadd.bf16 %v968_v24, %v235_v54  ;;  %v243_v63 = vmul.bf16 %v958_v15, %v215_v51  ;;  %831 = vmatprep.mubr.bf16.mxu0 %v702_v48 }
  0x1a   : > { %839 = vmatprep.mubr.bf16.mxu1 %v706_v52  ;;  %v283_v1 = vmax.bf16 %v888_v38, %v267_v49  ;;  %v269_v2 = vadd.bf16 %v968_v24, %v242_v55  ;;  %v236_v4 = vmul.bf16 %v958_v15, %v208_v56  ;;  %v284_v6 = vmax.bf16 %v888_v38, %v268_v50 }
  0x1b   : > { %826 = vmatpush3.bf16.msra.mxu0 %v877_v26  ;;  %860 = vmatpush3.bf16.msra.mxu1 %v877_v26  ;;  %v277_v7 = vmax.bf16 %v888_v38, %v261_v61  ;;  %v270_v8 = vadd.bf16 %v968_v24, %v243_v63  ;;  %v237_v9 = vmul.bf16 %v958_v15, %v209_v59 }
  0x1c   : > { %827 = vmatprep.subr.bf16.mxu0 %v878_v45  ;;  %853 = vmatprep.subr.bf16.mxu1 %v878_v45  ;;  %v278_v11 = vmax.bf16 %v888_v38, %v262_v62  ;;  %v285_v12 = vmax.bf16 %v888_v38, %v269_v2  ;;  %v244_v13 = vmul.bf16 %v958_v15, %v216_v0 }
  0x1d   : > { %v286_v14 = vmax.bf16 %v888_v38, %v270_v8  ;;  %v263_v16 = vadd.bf16 %v968_v24, %v236_v4  ;;  %v245_v17 = vmul.bf16 %v958_v15, %v217_v10  ;;  %v703_v18 = vcombine.low %v275_v57, %v276_v58 }
  0x1e   : > { %v707_v19 = vcombine.low %v283_v1, %v284_v6  ;;  %v264_v20 = vadd.bf16 %v968_v24, %v237_v9  ;;  %v271_v21 = vadd.bf16 %v968_v24, %v244_v13  ;;  %v704_v22 = vcombine.low %v277_v7, %v278_v11 }
  0x1f   : > { %828 = vmatpush3.bf16.msra.mxu0 %v878_v45  ;;  %861 = vmatpush3.bf16.msra.mxu1 %v878_v45  ;;  %v708_v23 = vcombine.low %v285_v12, %v286_v14  ;;  %v272_v25 = vadd.bf16 %v968_v24, %v245_v17  ;;  %v279_v26 = vmax.bf16 %v888_v38, %v263_v16  ;;  %v498_v24 = vld [vmem:[%s1078_s3] sm:$0x3] }
  0x20   : > { %829 = vmatprep.subr.bf16.mxu0 %v879_v60  ;;  %854 = vmatprep.subr.bf16.mxu1 %v879_v60  ;;  %v280_v27 = vmax.bf16 %v888_v38, %v264_v20  ;;  %v287_v15 = vmax.bf16 %v888_v38, %v271_v21  ;;  %v502_v32 = vrot.slane %v498_v24, %v937_v5 }
  0x21   : > { %v288_v28 = vmax.bf16 %v888_v38, %v272_v25  ;;  %v1039_v33 = vrot.slane %v498_v24, %v521_v31 }
  0x22   : > { %v705_v29 = vcombine.low %v279_v26, %v280_v27 }
  0x23   : > { %830 = vmatpush3.bf16.msra.mxu0 %v879_v60  ;;  %862 = vmatpush3.bf16.msra.mxu1 %v879_v60  ;;  %v709_v30 = vcombine.low %v287_v15, %v288_v28 }
  0x26   : > { %832 = vmatmul.mubr.bf16.vlgmr.msra.gmra.mrb[0].mxu0 %v703_v18  ;;  %840 = vmatmul.mubr.bf16.vlgmr.msra.gmra.mrb[0].mxu1 %v707_v19 }
  0x27   : > { %835 = vmatprep.mubr.bf16.mxu0 %v704_v22  ;;  %843 = vmatprep.mubr.bf16.mxu1 %v708_v23 }
  0x2e   : > { %836 = vmatmul.mubr.bf16.gmra.mrb[4].mxu0 %v705_v29  ;;  %844 = vmatmul.mubr.bf16.gmra.mrb[4].mxu1 %v709_v30 }
  0xf9   : > { %v833_v34 = vpop.f32.mrb[0].mxu0  ;;  %v841_v35 = vpop.f32.mrb[0].mxu1 }
  0xfa   : > { %v505_v36 = vmul.f32 %v833_v34, %v502_v32  ;;  %v513_v37 = vmul.f32 %v841_v35, %v502_v32  ;;  %v435_v38 = vpop.f32.mrb[1].mxu0  ;;  %v467_v39 = vpop.f32.mrb[1].mxu1 }
  0xfb   : > { %v503_v40 = vmul.f32 %v502_v32, %v435_v38  ;;  %v511_v41 = vmul.f32 %v502_v32, %v467_v39  ;;  %v834_v42 = vpop.f32.mrb[2].mxu0  ;;  %v842_v43 = vpop.f32.mrb[2].mxu1 }
  0xfc   : > { %v525_v44 = vadd.f32 %v1039_v33, %v505_v36  ;;  %v533_v45 = vadd.f32 %v1039_v33, %v513_v37  ;;  %v506_v46 = vmul.f32 %v834_v42, %v502_v32  ;;  %v514_v3 = vmul.f32 %v842_v43, %v502_v32  ;;  %v438_v47 = vpop.f32.mrb[3].mxu0  ;;  %v470_v5 = vpop.f32.mrb[3].mxu1 }
  0xfd   : > { %v523_v48 = vadd.f32 %v1039_v33, %v503_v40  ;;  %v531_v49 = vadd.f32 %v1039_v33, %v511_v41  ;;  %v504_v50 = vmul.f32 %v502_v32, %v438_v47  ;;  %v512_v51 = vmul.f32 %v502_v32, %v470_v5 }
  0xfe   : > { %v526_v52 = vadd.f32 %v1039_v33, %v506_v46  ;;  %v534_v53 = vadd.f32 %v1039_v33, %v514_v3  ;;  %v541_v56 = vmax.f32 %v525_v44, 0.0  ;;  %v549_v57 = vmax.f32 %v533_v45, 0.0 }
  0xff   : > { %v524_v54 = vadd.f32 %v1039_v33, %v504_v50  ;;  %v532_v55 = vadd.f32 %v1039_v33, %v512_v51  ;;  %v539_v60 = vmax.f32 %v523_v48, 0.0  ;;  %v547_v61 = vmax.f32 %v531_v49, 0.0 }
 0x100   : > { %v542_v58 = vmax.f32 %v526_v52, 0.0  ;;  %v550_v59 = vmax.f32 %v534_v53, 0.0 }
 0x101   : > { %v540_v62 = vmax.f32 %v524_v54, 0.0  ;;  %v548_v63 = vmax.f32 %v532_v55, 0.0  ;;  %v837_v0 = vpop.f32.mrb[4].mxu0  ;;  %v845_v1 = vpop.f32.mrb[4].mxu1 }
 0x102   : > { %v760_v2 = vpack.c.bf16 %v542_v58, %v541_v56  ;;  %v780_v4 = vpack.c.bf16 %v550_v59, %v549_v57  ;;  %v509_v6 = vmul.f32 %v837_v0, %v502_v32  ;;  %v517_v7 = vmul.f32 %v845_v1, %v502_v32  ;;  %v451_v8 = vpop.f32.mrb[5].mxu0  ;;  %v483_v9 = vpop.f32.mrb[5].mxu1 }
 0x103   : > { %v755_v10 = vpack.c.bf16 %v540_v62, %v539_v60  ;;  %v775_v11 = vpack.c.bf16 %v548_v63, %v547_v61  ;;  %v507_v12 = vmul.f32 %v502_v32, %v451_v8  ;;  %v515_v13 = vmul.f32 %v502_v32, %v483_v9  ;;  %v838_v14 = vpop.f32.mrb[6].mxu0  ;;  %v846_v16 = vpop.f32.mrb[6].mxu1 }
 0x104   : > { %792 = vst [vmem:[%s1054_s20 + $0x8] sm:$0xff] %v760_v2   ;;  %796 = vst [vmem:[%s1054_s20 + $0x28] sm:$0xff] %v780_v4   ;;  %v529_v17 = vadd.f32 %v1039_v33, %v509_v6  ;;  %v537_v18 = vadd.f32 %v1039_v33, %v517_v7  ;;  %v510_v19 = vmul.f32 %v838_v14, %v502_v32  ;;  %v454_v21 = vpop.f32.mrb[7].mxu0  ;;  %v486_v22 = vpop.f32.mrb[7].mxu1 }
 0x105   : > { %v518_v20 = vmul.f32 %v846_v16, %v502_v32  ;;  %756 = vst [vmem:[%s1054_s20] sm:$0xff] %v755_v10   ;;  %795 = vst [vmem:[%s1054_s20 + $0x20] sm:$0xff] %v775_v11   ;;  %v527_v23 = vadd.f32 %v1039_v33, %v507_v12  ;;  %v535_v25 = vadd.f32 %v1039_v33, %v515_v13 }
 0x106   : > { %v508_v26 = vmul.f32 %v502_v32, %v454_v21  ;;  %v516_v27 = vmul.f32 %v502_v32, %v486_v22  ;;  %v530_v15 = vadd.f32 %v1039_v33, %v510_v19  ;;  %v545_v24 = vmax.f32 %v529_v17, 0.0 }
 0x107   : > { %v538_v28 = vadd.f32 %v1039_v33, %v518_v20  ;;  %v553_v31 = vmax.f32 %v537_v18, 0.0  ;;  %v543_v36 = vmax.f32 %v527_v23, 0.0  ;;  %v551_v37 = vmax.f32 %v535_v25, 0.0 }
 0x108   : > { %v528_v29 = vadd.f32 %v1039_v33, %v508_v26  ;;  %v536_v30 = vadd.f32 %v1039_v33, %v516_v27  ;;  %v546_v34 = vmax.f32 %v530_v15, 0.0 }
 0x109   : > { %v554_v35 = vmax.f32 %v538_v28, 0.0 }
 0x10a   : > { %v544_v38 = vmax.f32 %v528_v29, 0.0  ;;  %v552_v32 = vmax.f32 %v536_v30, 0.0  ;;  %v770_v39 = vpack.c.bf16 %v546_v34, %v545_v24 }
 0x10b   : > { %v790_v40 = vpack.c.bf16 %v554_v35, %v553_v31 }
 0x10c   : > { %v765_v41 = vpack.c.bf16 %v544_v38, %v543_v36  ;;  %v785_v42 = vpack.c.bf16 %v552_v32, %v551_v37  ;;  %794 = vst [vmem:[%s1054_s20 + $0x18] sm:$0xff] %v770_v39  }
 0x10d   : > { %798 = vst [vmem:[%s1054_s20 + $0x38] sm:$0xff] %v790_v40  }
 0x10e   : > { %793 = vst [vmem:[%s1054_s20 + $0x10] sm:$0xff] %v765_v41   ;;  %797 = vst [vmem:[%s1054_s20 + $0x30] sm:$0xff] %v785_v42  }
 0x10f PF: > { %s14_s15 = sadd.s32 1, %s886_s15  }
 0x110   : > { %p11_p4 = scmp.ge.s32.totalorder %s14_s15, 4  }
 0x112   :  { %13 = sbr.rel (!%p11_p4) target bundleno = 1 (0x1), region = 66 }

// kernel: sst_emotion_net_forward.27
= control target key start
LH: loop header
LB: loop body
LE: loop exit
PB: predicated region body
PF: predicated region fallthrough
CT: control target
= control target key end

     0   :  { %s2558_s9 = smov 0   ;;  %s2956_s0 = inlined_call_operand.vmem [shape: bf16[256,1152], index: 0, kind: input, shape index: {}]   ;;  %s2957_s1 = inlined_call_operand.vmem [shape: bf16[1152,128], index: 1, kind: input, shape index: {}]   ;;  %s2958_s2 = inlined_call_operand.vmem [shape: bf16[256,128], index: 2, kind: output, shape index: {}]  }
   0x1 LB: > { %s1796_s10 = sadd.s32 4294967295, %s2541_s9   ;;  %p1800_p0 = scmp.ge.s32.totalorder %s2541_s9, 1  ;;  %s2541_s9 = sphi %s2558_s9, %s12_s9  }
   0x2   : > { %p114_p1 = scmp.lt.s32.totalorder %s2541_s9, 3 }
   0x4   : > { %p115_p2 = pnand %p1800_p0, %p114_p1 }
   0x5   : > { %v2359_v0 = vld [vmem:[%s2957_s1 + $0x40] sm:$0xff] (!%p115_p2)   ;;  %v2363_v4 = vld [vmem:[%s2957_s1 + $0x48] sm:$0xff] (!%p115_p2)   ;;  %v2367_v8 = vld [vmem:[%s2957_s1 + $0x50] sm:$0xff] (!%p115_p2)   ;;  %s1801_s15 = sshll.u32 (!%p115_p2), %s1796_s10, 4 }
   0x6   : > { %118 = sbr.rel (%p115_p2) target bundleno = 396 (0x18c), region = 28  ;;  %v2360_v1 = vld [vmem:[%s2957_s1 + $0xc0] sm:$0xff] (!%p115_p2)   ;;  %2030 = vmatprep.subr.bf16.mxu0 (!%p115_p2), %v2359_v0  ;;  %v2364_v5 = vld [vmem:[%s2957_s1 + $0xc8] sm:$0xff] (!%p115_p2)   ;;  %v2368_v9 = vld [vmem:[%s2957_s1 + $0xd0] sm:$0xff] (!%p115_p2)   ;;  %p138_p3 = scmp.lt.s32.totalorder (!%p115_p2), %s1801_s15, 31 }
   0x7   : > { %v2361_v2 = vld [vmem:[%s2957_s1] sm:$0xff] (!%p115_p2)   ;;  %2094 = vmatprep.subr.bf16.mxu1 (!%p115_p2), %v2360_v1  ;;  %v2365_v6 = vld [vmem:[%s2957_s1 + $0x8] sm:$0xff] (!%p115_p2)   ;;  %v2369_v10 = vld [vmem:[%s2957_s1 + $0x10] sm:$0xff] (!%p115_p2)  }
   0x8   : > { %v2362_v3 = vld [vmem:[%s2957_s1 + $0x80] sm:$0xff] (!%p115_p2)   ;;  %2031 = vmatpush3.bf16.msra.mxu0 (!%p115_p2), %v2361_v2  ;;  %v2366_v7 = vld [vmem:[%s2957_s1 + $0x88] sm:$0xff] (!%p115_p2)   ;;  %v2370_v11 = vld [vmem:[%s2957_s1 + $0x90] sm:$0xff] (!%p115_p2)  }
   0x9   : > { %2095 = vmatpush3.bf16.msra.mxu1 (!%p115_p2), %v2362_v3  ;;  %2032 = vmatprep.subr.bf16.mxu0 (!%p115_p2), %v2363_v4  ;;  %v2371_v12 = vld [vmem:[%s2957_s1 + $0x58] sm:$0xff] (!%p115_p2)   ;;  %v2375_v16 = vld [vmem:[%s2957_s1 + $0x60] sm:$0xff] (!%p115_p2)   ;;  %v2379_v20 = vld [vmem:[%s2957_s1 + $0x68] sm:$0xff] (!%p115_p2)  }
   0xa   : > { %2096 = vmatprep.subr.bf16.mxu1 (!%p115_p2), %v2364_v5  ;;  %v2372_v13 = vld [vmem:[%s2957_s1 + $0xd8] sm:$0xff] (!%p115_p2)   ;;  %v2376_v17 = vld [vmem:[%s2957_s1 + $0xe0] sm:$0xff] (!%p115_p2)   ;;  %v2380_v21 = vld [vmem:[%s2957_s1 + $0xe8] sm:$0xff] (!%p115_p2)  }
   0xb   : > { %v2373_v14 = vld [vmem:[%s2957_s1 + $0x18] sm:$0xff] (!%p115_p2)   ;;  %v2377_v18 = vld [vmem:[%s2957_s1 + $0x20] sm:$0xff] (!%p115_p2)   ;;  %v2381_v22 = vld [vmem:[%s2957_s1 + $0x28] sm:$0xff] (!%p115_p2)  }
   0xc   : > { %2033 = vmatpush3.bf16.msra.mxu0 (!%p115_p2), %v2365_v6  ;;  %v2374_v15 = vld [vmem:[%s2957_s1 + $0x98] sm:$0xff] (!%p115_p2)   ;;  %v2378_v19 = vld [vmem:[%s2957_s1 + $0xa0] sm:$0xff] (!%p115_p2)   ;;  %v2382_v23 = vld [vmem:[%s2957_s1 + $0xa8] sm:$0xff] (!%p115_p2)  }
   0xd   : > { %2097 = vmatpush3.bf16.msra.mxu1 %v2366_v7  ;;  %2034 = vmatprep.subr.bf16.mxu0 %v2367_v8  ;;  %s2960_s15 = smov (!%p138_p3, %s1801_s15), 31  ;;  %v2383_v24 = vld [vmem:[%s2957_s1 + $0x70] sm:$0xff]   ;;  %v2387_v28 = vld [vmem:[%s2957_s1 + $0x78] sm:$0xff]   ;;  %v2397_v36 = vld [vmem:[%s2957_s1 + $0x140] sm:$0xff]  }
   0xe   : > { %2098 = vmatprep.subr.bf16.mxu1 %v2368_v9  ;;  %v2384_v25 = vld [vmem:[%s2957_s1 + $0xf0] sm:$0xff]   ;;  %s2350_s11 = smul.u32 36, %s2960_s15  ;;  %v2388_v29 = vld [vmem:[%s2957_s1 + $0xf8] sm:$0xff]   ;;  %v2398_v37 = vld [vmem:[%s2957_s1 + $0x1c0] sm:$0xff]  }
   0xf   : > { %v2385_v26 = vld [vmem:[%s2957_s1 + $0x30] sm:$0xff]   ;;  %v2389_v30 = vld [vmem:[%s2957_s1 + $0x38] sm:$0xff]   ;;  %v2399_v38 = vld [vmem:[%s2957_s1 + $0x100] sm:$0xff]  }
  0x10   : > { %2035 = vmatpush3.bf16.msra.mxu0 %v2369_v10  ;;  %v2386_v27 = vld [vmem:[%s2957_s1 + $0xb0] sm:$0xff]   ;;  %s2664_s23 = scalar_lea.vmem %s2956_s0, %s2350_s11  ;;  %v2390_v31 = vld [vmem:[%s2957_s1 + $0xb8] sm:$0xff]   ;;  %v2400_v39 = vld [vmem:[%s2957_s1 + $0x180] sm:$0xff]  }
  0x11   : > { %2099 = vmatpush3.bf16.msra.mxu1 %v2370_v11  ;;  %2036 = vmatprep.subr.bf16.mxu0 %v2371_v12  ;;  %v2391_v32 = vld [vmem:[%s2664_s23] ss:$36 sps:$4 sm:$0xff]   ;;  %v2394_v34 = vld [vmem:[%s2664_s23 + $0x8] ss:$36 sps:$4 sm:$0xff]   ;;  %v2403_v41 = vld [vmem:[%s2664_s23 + $0x54] ss:$36 sps:$4 sm:$0xff]  }
  0x12   : > { %2100 = vmatprep.subr.bf16.mxu1 %v2372_v13  ;;  %v2393_v33 = vld [vmem:[%s2664_s23 + $0x4] ss:$36 sps:$4 sm:$0xff]   ;;  %v2396_v35 = vld [vmem:[%s2664_s23 + $0xc] ss:$36 sps:$4 sm:$0xff]   ;;  %v2411_v48 = vld [vmem:[%s2664_s23 + $0x94] ss:$36 sps:$4 sm:$0xff]  }
  0x13   : > { %1207 = vmatprep.mubr.bf16.mxu0 %v2393_v33  ;;  %1304 = vmatprep.mubr.bf16.mxu1 %v2396_v35  ;;  %v2401_v40 = vld [vmem:[%s2664_s23 + $0x4c] ss:$36 sps:$4 sm:$0xff]   ;;  %v2413_v49 = vld [vmem:[%s2664_s23 + $0x9c] ss:$36 sps:$4 sm:$0xff]   ;;  %v2423_v57 = vld [vmem:[%s2664_s23 + $0xe4] ss:$36 sps:$4 sm:$0xff]  }
  0x14   : > { %2037 = vmatpush3.bf16.msra.mxu0 %v2373_v14  ;;  %v2405_v42 = vld [vmem:[%s2664_s23 + $0x48] ss:$36 sps:$4 sm:$0xff]   ;;  %v2406_v43 = vld [vmem:[%s2664_s23 + $0x50] ss:$36 sps:$4 sm:$0xff]   ;;  %v2416_v51 = vld [vmem:[%s2664_s23 + $0x98] ss:$36 sps:$4 sm:$0xff]  }
  0x15   : > { %2101 = vmatpush3.bf16.msra.mxu1 %v2374_v15  ;;  %2038 = vmatprep.subr.bf16.mxu0 %v2375_v16  ;;  %v2407_v44 = vld [vmem:[%s2957_s1 + $0x148] sm:$0xff]   ;;  %v2415_v50 = vld [vmem:[%s2664_s23 + $0x90] ss:$36 sps:$4 sm:$0xff]   ;;  %v2421_v56 = vld [vmem:[%s2664_s23 + $0xdc] ss:$36 sps:$4 sm:$0xff]  }
  0x16   : > { %2102 = vmatprep.subr.bf16.mxu1 %v2376_v17  ;;  %v2408_v45 = vld [vmem:[%s2957_s1 + $0x1c8] sm:$0xff]   ;;  %v2417_v52 = vld [vmem:[%s2957_s1 + $0x150] sm:$0xff]   ;;  %v2425_v58 = vld [vmem:[%s2664_s23 + $0xd8] ss:$36 sps:$4 sm:$0xff]  }
  0x17   : > { %v2409_v46 = vld [vmem:[%s2957_s1 + $0x108] sm:$0xff]   ;;  %v2418_v53 = vld [vmem:[%s2957_s1 + $0x1d0] sm:$0xff]   ;;  %v2426_v59 = vld [vmem:[%s2664_s23 + $0xe0] ss:$36 sps:$4 sm:$0xff]  }
  0x18   : > { %2039 = vmatpush3.bf16.msra.mxu0 %v2377_v18  ;;  %v2410_v47 = vld [vmem:[%s2957_s1 + $0x188] sm:$0xff]   ;;  %v2419_v54 = vld [vmem:[%s2957_s1 + $0x110] sm:$0xff]   ;;  %v2427_v60 = vld [vmem:[%s2957_s1 + $0x158] sm:$0xff]  }
  0x19   : > { %2103 = vmatpush3.bf16.msra.mxu1 %v2378_v19  ;;  %2040 = vmatprep.subr.bf16.mxu0 %v2379_v20  ;;  %v2420_v55 = vld [vmem:[%s2957_s1 + $0x190] sm:$0xff]   ;;  %v2428_v61 = vld [vmem:[%s2957_s1 + $0x1d8] sm:$0xff]   ;;  %v2431_v0 = vld [vmem:[%s2664_s23 + $0x124] ss:$36 sps:$4 sm:$0xff]  }
  0x1a   : > { %2104 = vmatprep.subr.bf16.mxu1 %v2380_v21  ;;  %v2429_v62 = vld [vmem:[%s2957_s1 + $0x118] sm:$0xff]   ;;  %v2433_v1 = vld [vmem:[%s2664_s23 + $0x12c] ss:$36 sps:$4 sm:$0xff]   ;;  %v2435_v2 = vld [vmem:[%s2664_s23 + $0x120] ss:$36 sps:$4 sm:$0xff]  }
  0x1b   : > { %v2430_v63 = vld [vmem:[%s2957_s1 + $0x198] sm:$0xff]   ;;  %v2437_v3 = vld [vmem:[%s2957_s1 + $0x160] sm:$0xff]   ;;  %v2436_v4 = vld [vmem:[%s2664_s23 + $0x128] ss:$36 sps:$4 sm:$0xff]  }
  0x1c   : > { %2041 = vmatpush3.bf16.msra.mxu0 %v2381_v22  ;;  %v2438_v5 = vld [vmem:[%s2957_s1 + $0x1e0] sm:$0xff]   ;;  %v2441_v8 = vld [vmem:[%s2664_s23 + $0x16c] ss:$36 sps:$4 sm:$0xff]   ;;  %v2443_v9 = vld [vmem:[%s2664_s23 + $0x174] ss:$36 sps:$4 sm:$0xff]  }
  0x1d   : > { %2105 = vmatpush3.bf16.msra.mxu1 %v2382_v23  ;;  %2042 = vmatprep.subr.bf16.mxu0 %v2383_v24  ;;  %v2439_v6 = vld [vmem:[%s2957_s1 + $0x120] sm:$0xff]   ;;  %v2447_v10 = vld [vmem:[%s2957_s1 + $0x168] sm:$0xff]   ;;  %v2446_v15 = vld [vmem:[%s2664_s23 + $0x170] ss:$36 sps:$4 sm:$0xff]  }
  0x1e   : > { %2106 = vmatprep.subr.bf16.mxu1 %v2384_v25  ;;  %v2440_v7 = vld [vmem:[%s2957_s1 + $0x1a0] sm:$0xff]   ;;  %v2448_v11 = vld [vmem:[%s2957_s1 + $0x1e8] sm:$0xff]   ;;  %v2451_v16 = vld [vmem:[%s2664_s23 + $0x1b4] ss:$36 sps:$4 sm:$0xff]  }
  0x1f   : > { %v2445_v12 = vld [vmem:[%s2664_s23 + $0x168] ss:$36 sps:$4 sm:$0xff]   ;;  %v2453_v17 = vld [vmem:[%s2664_s23 + $0x1bc] ss:$36 sps:$4 sm:$0xff]   ;;  %v2457_v18 = vld [vmem:[%s2957_s1 + $0x170] sm:$0xff]  }
  0x20   : > { %2043 = vmatpush3.bf16.msra.mxu0 %v2385_v26  ;;  %v2449_v13 = vld [vmem:[%s2957_s1 + $0x128] sm:$0xff]   ;;  %v2458_v19 = vld [vmem:[%s2957_s1 + $0x1f0] sm:$0xff]   ;;  %v2456_v23 = vld [vmem:[%s2664_s23 + $0x1b8] ss:$36 sps:$4 sm:$0xff]  }
  0x21   : > { %2107 = vmatpush3.bf16.msra.mxu1 %v2386_v27  ;;  %2044 = vmatprep.subr.bf16.mxu0 %v2387_v28  ;;  %v2450_v14 = vld [vmem:[%s2957_s1 + $0x1a8] sm:$0xff]   ;;  %v2459_v20 = vld [vmem:[%s2957_s1 + $0x130] sm:$0xff]   ;;  %v2461_v24 = vld [vmem:[%s2664_s23 + $0x1fc] ss:$36 sps:$4 sm:$0xff]  }
  0x22   : > { %2108 = vmatprep.subr.bf16.mxu1 %v2388_v29  ;;  %v2460_v21 = vld [vmem:[%s2957_s1 + $0x1b0] sm:$0xff]   ;;  %v2463_v25 = vld [vmem:[%s2664_s23 + $0x204] ss:$36 sps:$4 sm:$0xff]   ;;  %v2467_v26 = vld [vmem:[%s2957_s1 + $0x178] sm:$0xff]  }
  0x23   : > { %v2455_v22 = vld [vmem:[%s2664_s23 + $0x1b0] ss:$36 sps:$4 sm:$0xff]   ;;  %v2468_v27 = vld [vmem:[%s2957_s1 + $0x1f8] sm:$0xff]  }
  0x24   : > { %2045 = vmatpush3.bf16.msra.mxu0 %v2389_v30  ;;  %v2469_v28 = vld [vmem:[%s2957_s1 + $0x138] sm:$0xff]   ;;  %v2471_v35 = vld [vmem:[%s2664_s23 + $0x10] ss:$36 sps:$4 sm:$0xff]  }
  0x25   : > { %2109 = vmatpush3.bf16.msra.mxu1 %v2390_v31  ;;  %2158 = vmatprep.subr.bf16.mxu0 %v2397_v36  ;;  %v2470_v29 = vld [vmem:[%s2957_s1 + $0x1b8] sm:$0xff]   ;;  %v2466_v31 = vld [vmem:[%s2664_s23 + $0x200] ss:$36 sps:$4 sm:$0xff]  }
  0x26   : > { %2222 = vmatprep.subr.bf16.mxu1 %v2398_v37  ;;  %v2465_v30 = vld [vmem:[%s2664_s23 + $0x1f8] ss:$36 sps:$4 sm:$0xff]  }
  0x27   : > { %1208 = vmatmul.mubr.bf16.vlgmr.msra.gmra.mrb[0].mxu0 %v2391_v32  ;;  %v2477_v32 = vld [vmem:[%s2957_s1 + $0x200] sm:$0xff]   ;;  %v2473_v33 = vld [vmem:[%s2664_s23 + $0x14] ss:$36 sps:$4 sm:$0xff]  }
  0x28   : > { %1305 = vmatmul.mubr.bf16.vlgmr.msra.gmra.mrb[0].mxu1 %v2394_v34  ;;  %2159 = vmatpush3.bf16.msra.mxu0 %v2399_v38  ;;  %v2476_v34 = vld [vmem:[%s2664_s23 + $0x1c] ss:$36 sps:$4 sm:$0xff]   ;;  %v2480_v38 = vld [vmem:[%s2664_s23 + $0x64] ss:$36 sps:$4 sm:$0xff]  }
  0x29   : > { %2223 = vmatpush3.bf16.msra.mxu1 %v2400_v39  ;;  %1215 = vmatprep.mubr.bf16.mxu0 %v2401_v40  ;;  %v2474_v36 = vld [vmem:[%s2664_s23 + $0x18] ss:$36 sps:$4 sm:$0xff]   ;;  %v2484_v39 = vld [vmem:[%s2957_s1 + $0x208] sm:$0xff]   ;;  %v2491_v40 = vld [vmem:[%s2957_s1 + $0x210] sm:$0xff]  }
  0x2a   : > { %1312 = vmatprep.mubr.bf16.mxu1 %v2403_v41  ;;  %2160 = vmatprep.subr.bf16.mxu0 %v2407_v44  ;;  %v2478_v37 = vld [vmem:[%s2664_s23 + $0x5c] ss:$36 sps:$4 sm:$0xff]   ;;  %v2487_v44 = vld [vmem:[%s2664_s23 + $0xac] ss:$36 sps:$4 sm:$0xff]  }
  0x2b   : > { %2224 = vmatprep.subr.bf16.mxu1 %v2408_v45  ;;  %v2482_v41 = vld [vmem:[%s2664_s23 + $0x58] ss:$36 sps:$4 sm:$0xff]  }
  0x2c   : > { %2161 = vmatpush3.bf16.msra.mxu0 %v2409_v46  ;;  %v2498_v45 = vld [vmem:[%s2957_s1 + $0x218] sm:$0xff]   ;;  %v2505_v46 = vld [vmem:[%s2957_s1 + $0x220] sm:$0xff]  }
  0x2d   : > { %2225 = vmatpush3.bf16.msra.mxu1 %v2410_v47  ;;  %2162 = vmatprep.subr.bf16.mxu0 %v2417_v52  ;;  %v2489_v47 = vld [vmem:[%s2664_s23 + $0xa0] ss:$36 sps:$4 sm:$0xff]   ;;  %v2496_v52 = vld [vmem:[%s2664_s23 + $0xe8] ss:$36 sps:$4 sm:$0xff]  }
  0x2e   : > { %2226 = vmatprep.subr.bf16.mxu1 %v2418_v53  ;;  %v2519_v53 = vld [vmem:[%s2957_s1 + $0x230] sm:$0xff]  }
  0x2f   : > { %1216 = vmatmul.mubr.bf16.gmra.mrb[4].mxu0 %v2405_v42  ;;  %v2483_v42 = vld [vmem:[%s2664_s23 + $0x60] ss:$36 sps:$4 sm:$0xff]  }
  0x30   : > { %1313 = vmatmul.mubr.bf16.gmra.mrb[4].mxu1 %v2406_v43  ;;  %1223 = vmatprep.mubr.bf16.mxu0 %v2411_v48  ;;  %v2485_v43 = vld [vmem:[%s2664_s23 + $0xa4] ss:$36 sps:$4 sm:$0xff]  }
  0x31   : > { %1320 = vmatprep.mubr.bf16.mxu1 %v2413_v49  ;;  %2163 = vmatpush3.bf16.msra.mxu0 %v2419_v54  ;;  %v2490_v48 = vld [vmem:[%s2664_s23 + $0xa8] ss:$36 sps:$4 sm:$0xff]   ;;  %v2497_v54 = vld [vmem:[%s2664_s23 + $0xf0] ss:$36 sps:$4 sm:$0xff]  }
  0x32   : > { %2227 = vmatpush3.bf16.msra.mxu1 %v2420_v55  ;;  %2164 = vmatprep.subr.bf16.mxu0 %v2427_v60  ;;  %v2492_v49 = vld [vmem:[%s2664_s23 + $0xec] ss:$36 sps:$4 sm:$0xff]   ;;  %v2499_v55 = vld [vmem:[%s2664_s23 + $0x134] ss:$36 sps:$4 sm:$0xff]   ;;  %v2506_v60 = vld [vmem:[%s2664_s23 + $0x17c] ss:$36 sps:$4 sm:$0xff]  }
  0x33   : > { %2228 = vmatprep.subr.bf16.mxu1 %v2428_v61  ;;  %v2508_v61 = vld [vmem:[%s2664_s23 + $0x184] ss:$36 sps:$4 sm:$0xff]  }
  0x35   : > { %2165 = vmatpush3.bf16.msra.mxu0 %v2429_v62  ;;  %v2510_v62 = vld [vmem:[%s2664_s23 + $0x178] ss:$36 sps:$4 sm:$0xff]  }
  0x36   : > { %2229 = vmatpush3.bf16.msra.mxu1 %v2430_v63  ;;  %2166 = vmatprep.subr.bf16.mxu0 %v2437_v3  ;;  %v2511_v63 = vld [vmem:[%s2664_s23 + $0x180] ss:$36 sps:$4 sm:$0xff]   ;;  %v2518_v3 = vld [vmem:[%s2664_s23 + $0x1c8] ss:$36 sps:$4 sm:$0xff]  }
  0x37   : > { %1224 = vmatmul.mubr.bf16.gmra.mrb[8].mxu0 %v2415_v50  ;;  %2230 = vmatprep.subr.bf16.mxu1 %v2438_v5  ;;  %v2494_v50 = vld [vmem:[%s2664_s23 + $0xf4] ss:$36 sps:$4 sm:$0xff]  }
  0x38   : > { %1321 = vmatmul.mubr.bf16.gmra.mrb[8].mxu1 %v2416_v51  ;;  %1231 = vmatprep.mubr.bf16.mxu0 %v2421_v56  ;;  %v2512_v51 = vld [vmem:[%s2957_s1 + $0x228] sm:$0xff]   ;;  %v2501_v56 = vld [vmem:[%s2664_s23 + $0x13c] ss:$36 sps:$4 sm:$0xff]   ;;  %v2522_v5 = vld [vmem:[%s2664_s23 + $0x214] ss:$36 sps:$4 sm:$0xff]  }
  0x39   : > { %1328 = vmatprep.mubr.bf16.mxu1 %v2423_v57  ;;  %2167 = vmatpush3.bf16.msra.mxu0 %v2439_v6  ;;  %v2526_v57 = vld [vmem:[%s2957_s1 + $0x238] sm:$0xff]   ;;  %v2524_v6 = vld [vmem:[%s2664_s23 + $0x208] ss:$36 sps:$4 sm:$0xff]  }
  0x3a   : > { %2231 = vmatpush3.bf16.msra.mxu1 %v2440_v7  ;;  %2168 = vmatprep.subr.bf16.mxu0 %v2447_v10  ;;  %v2525_v7 = vld [vmem:[%s2664_s23 + $0x210] ss:$36 sps:$4 sm:$0xff]   ;;  %v2529_v10 = vld [vmem:[%s2664_s23 + $0x68] ss:$36 sps:$4 sm:$0xff]  }
  0x3b   : > { %2232 = vmatprep.subr.bf16.mxu1 %v2448_v11  ;;  %v2530_v11 = vld [vmem:[%s2664_s23 + $0x188] ss:$36 sps:$4 sm:$0xff]  }
  0x3d   : > { %2169 = vmatpush3.bf16.msra.mxu0 %v2449_v13  ;;  %v2532_v13 = vld [vmem:[%s2664_s23 + $0x1d0] ss:$36 sps:$4 sm:$0xff]  }
  0x3e   : > { %2233 = vmatpush3.bf16.msra.mxu1 %v2450_v14  ;;  %2170 = vmatprep.subr.bf16.mxu0 %v2457_v18  ;;  %v2533_v14 = vld [vmem:[%s2664_s23 + $0xf8] ss:$36 sps:$4 sm:$0xff]  }
  0x3f   : > { %1232 = vmatmul.mubr.bf16.gmra.mrb[12].mxu0 %v2425_v58  ;;  %2234 = vmatprep.subr.bf16.mxu1 %v2458_v19  ;;  %v2503_v58 = vld [vmem:[%s2664_s23 + $0x130] ss:$36 sps:$4 sm:$0xff]  }
  0x40   : > { %1329 = vmatmul.mubr.bf16.gmra.mrb[12].mxu1 %v2426_v59  ;;  %1239 = vmatprep.mubr.bf16.mxu0 %v2431_v0  ;;  %v2504_v59 = vld [vmem:[%s2664_s23 + $0x138] ss:$36 sps:$4 sm:$0xff]   ;;  %v2513_v0 = vld [vmem:[%s2664_s23 + $0x1c4] ss:$36 sps:$4 sm:$0xff]  }
  0x41   : > { %1336 = vmatprep.mubr.bf16.mxu1 %v2433_v1  ;;  %2171 = vmatpush3.bf16.msra.mxu0 %v2459_v20  ;;  %v2515_v1 = vld [vmem:[%s2664_s23 + $0x1cc] ss:$36 sps:$4 sm:$0xff]  }
  0x42   : > { %2235 = vmatpush3.bf16.msra.mxu1 %v2460_v21  ;;  %2172 = vmatprep.subr.bf16.mxu0 %v2467_v26 }
  0x43   : > { %2236 = vmatprep.subr.bf16.mxu1 %v2468_v27 }
  0x45   : > { %2173 = vmatpush3.bf16.msra.mxu0 %v2469_v28 }
  0x46   : > { %2237 = vmatpush3.bf16.msra.mxu1 %v2470_v29  ;;  %2302 = vmatprep.subr.bf16.mxu0 %v2477_v32 }
  0x47   : > { %1240 = vmatmul.mubr.bf16.gmra.mrb[16].mxu0 %v2435_v2  ;;  %2334 = vmatprep.subr.bf16.mxu1 %v2477_v32  ;;  %v2517_v2 = vld [vmem:[%s2664_s23 + $0x1c0] ss:$36 sps:$4 sm:$0xff]  }
  0x48   : > { %1337 = vmatmul.mubr.bf16.gmra.mrb[16].mxu1 %v2436_v4  ;;  %1247 = vmatprep.mubr.bf16.mxu0 %v2441_v8  ;;  %v2520_v4 = vld [vmem:[%s2664_s23 + $0x20c] ss:$36 sps:$4 sm:$0xff]   ;;  %v2527_v8 = vld [vmem:[%s2664_s23 + $0x20] ss:$36 sps:$4 sm:$0xff]  }
  0x49   : > { %1344 = vmatprep.mubr.bf16.mxu1 %v2443_v9  ;;  %v2528_v9 = vld [vmem:[%s2664_s23 + $0x140] ss:$36 sps:$4 sm:$0xff]  }
  0x4f   : > { %1248 = vmatmul.mubr.bf16.gmra.mrb[20].mxu0 %v2445_v12  ;;  %v2531_v12 = vld [vmem:[%s2664_s23 + $0xb0] ss:$36 sps:$4 sm:$0xff]  }
  0x50   : > { %1345 = vmatmul.mubr.bf16.gmra.mrb[20].mxu1 %v2446_v15  ;;  %1255 = vmatprep.mubr.bf16.mxu0 %v2451_v16  ;;  %v2534_v15 = vld [vmem:[%s2664_s23 + $0x218] ss:$36 sps:$4 sm:$0xff]   ;;  %s1804_s23 = sshll.u32 %s2960_s15, 2 }
  0x51   : > { %1352 = vmatprep.mubr.bf16.mxu1 %v2453_v17  ;;  %s2937_s6 = scalar_lea.vmem %s2958_s2, %s1804_s23 }
  0x57   : > { %1256 = vmatmul.mubr.bf16.gmra.mrb[24].mxu0 %v2455_v22 }
  0x58   : > { %1353 = vmatmul.mubr.bf16.gmra.mrb[24].mxu1 %v2456_v23  ;;  %1263 = vmatprep.mubr.bf16.mxu0 %v2461_v24 }
  0x59   : > { %1360 = vmatprep.mubr.bf16.mxu1 %v2463_v25 }
  0x5f   : > { %1264 = vmatmul.mubr.bf16.gmra.mrb[28].mxu0 %v2465_v30 }
  0x60   : > { %1361 = vmatmul.mubr.bf16.gmra.mrb[28].mxu1 %v2466_v31  ;;  %1401 = vmatprep.mubr.bf16.mxu0 %v2473_v33 }
  0x61   : > { %1498 = vmatprep.mubr.bf16.mxu1 %v2476_v34 }
  0x67   : > { %1402 = vmatmul.mubr.bf16.vlgmr.msra.gmra.mrb[32].mxu0 %v2471_v35 }
  0x68   : > { %1499 = vmatmul.mubr.bf16.vlgmr.msra.gmra.mrb[32].mxu1 %v2474_v36  ;;  %2303 = vmatpush3.bf16.msra.mxu0 %v2477_v32 }
  0x69   : > { %2342 = vmatpush3.bf16.msra.mxu1 %v2477_v32  ;;  %1409 = vmatprep.mubr.bf16.mxu0 %v2478_v37 }
  0x6a   : > { %1506 = vmatprep.mubr.bf16.mxu1 %v2480_v38  ;;  %2304 = vmatprep.subr.bf16.mxu0 %v2484_v39 }
  0x6b   : > { %2335 = vmatprep.subr.bf16.mxu1 %v2484_v39 }
  0x6c   : > { %2305 = vmatpush3.bf16.msra.mxu0 %v2484_v39 }
  0x6d   : > { %2343 = vmatpush3.bf16.msra.mxu1 %v2484_v39  ;;  %2306 = vmatprep.subr.bf16.mxu0 %v2491_v40 }
  0x6e   : > { %2336 = vmatprep.subr.bf16.mxu1 %v2491_v40 }
  0x6f   : > { %1410 = vmatmul.mubr.bf16.gmra.mrb[36].mxu0 %v2482_v41 }
  0x70   : > { %1507 = vmatmul.mubr.bf16.gmra.mrb[36].mxu1 %v2483_v42  ;;  %1417 = vmatprep.mubr.bf16.mxu0 %v2485_v43 }
  0x71   : > { %1514 = vmatprep.mubr.bf16.mxu1 %v2487_v44  ;;  %2307 = vmatpush3.bf16.msra.mxu0 %v2491_v40 }
  0x72   : > { %2344 = vmatpush3.bf16.msra.mxu1 %v2491_v40  ;;  %2308 = vmatprep.subr.bf16.mxu0 %v2498_v45 }
  0x73   : > { %2337 = vmatprep.subr.bf16.mxu1 %v2498_v45 }
  0x75   : > { %2309 = vmatpush3.bf16.msra.mxu0 %v2498_v45 }
  0x76   : > { %2345 = vmatpush3.bf16.msra.mxu1 %v2498_v45  ;;  %2310 = vmatprep.subr.bf16.mxu0 %v2505_v46 }
  0x77   : > { %1418 = vmatmul.mubr.bf16.gmra.mrb[40].mxu0 %v2489_v47  ;;  %2338 = vmatprep.subr.bf16.mxu1 %v2505_v46 }
  0x78   : > { %1515 = vmatmul.mubr.bf16.gmra.mrb[40].mxu1 %v2490_v48  ;;  %1425 = vmatprep.mubr.bf16.mxu0 %v2492_v49 }
  0x79   : > { %1522 = vmatprep.mubr.bf16.mxu1 %v2494_v50  ;;  %2311 = vmatpush3.bf16.msra.mxu0 %v2505_v46 }
  0x7a   : > { %2346 = vmatpush3.bf16.msra.mxu1 %v2505_v46  ;;  %2312 = vmatprep.subr.bf16.mxu0 %v2512_v51 }
  0x7b   : > { %2339 = vmatprep.subr.bf16.mxu1 %v2512_v51 }
  0x7d   : > { %2313 = vmatpush3.bf16.msra.mxu0 %v2512_v51 }
  0x7e   : > { %2347 = vmatpush3.bf16.msra.mxu1 %v2512_v51  ;;  %2314 = vmatprep.subr.bf16.mxu0 %v2519_v53 }
  0x7f   : > { %1426 = vmatmul.mubr.bf16.gmra.mrb[44].mxu0 %v2496_v52  ;;  %2340 = vmatprep.subr.bf16.mxu1 %v2519_v53 }
  0x80   : > { %1523 = vmatmul.mubr.bf16.gmra.mrb[44].mxu1 %v2497_v54  ;;  %1433 = vmatprep.mubr.bf16.mxu0 %v2499_v55 }
  0x81   : > { %1530 = vmatprep.mubr.bf16.mxu1 %v2501_v56  ;;  %2315 = vmatpush3.bf16.msra.mxu0 %v2519_v53 }
  0x82   : > { %2348 = vmatpush3.bf16.msra.mxu1 %v2519_v53  ;;  %2316 = vmatprep.subr.bf16.mxu0 %v2526_v57 }
  0x83   : > { %2341 = vmatprep.subr.bf16.mxu1 %v2526_v57 }
  0x85   : > { %2317 = vmatpush3.bf16.msra.mxu0 %v2526_v57 }
  0x86   : > { %2349 = vmatpush3.bf16.msra.mxu1 %v2526_v57 }
  0x87   : > { %1434 = vmatmul.mubr.bf16.gmra.mrb[48].mxu0 %v2503_v58 }
  0x88   : > { %1531 = vmatmul.mubr.bf16.gmra.mrb[48].mxu1 %v2504_v59  ;;  %1441 = vmatprep.mubr.bf16.mxu0 %v2506_v60 }
  0x89   : > { %1538 = vmatprep.mubr.bf16.mxu1 %v2508_v61 }
  0x8f   : > { %1442 = vmatmul.mubr.bf16.gmra.mrb[52].mxu0 %v2510_v62 }
  0x90   : > { %1539 = vmatmul.mubr.bf16.gmra.mrb[52].mxu1 %v2511_v63  ;;  %1449 = vmatprep.mubr.bf16.mxu0 %v2513_v0 }
  0x91   : > { %1546 = vmatprep.mubr.bf16.mxu1 %v2515_v1 }
  0x97   : > { %1450 = vmatmul.mubr.bf16.gmra.mrb[56].mxu0 %v2517_v2 }
  0x98   : > { %1547 = vmatmul.mubr.bf16.gmra.mrb[56].mxu1 %v2518_v3  ;;  %1457 = vmatprep.mubr.bf16.mxu0 %v2520_v4 }
  0x99   : > { %1554 = vmatprep.mubr.bf16.mxu1 %v2522_v5 }
  0x9f   : > { %1458 = vmatmul.mubr.bf16.gmra.mrb[60].mxu0 %v2524_v6 }
  0xa0   : > { %1555 = vmatmul.mubr.bf16.gmra.mrb[60].mxu1 %v2525_v7  ;;  %2318 = vmatprep.mubr.bf16.mxu0 %v2527_v8 }
  0xa1   : > { %2326 = vmatprep.mubr.bf16.mxu1 %v2528_v9 }
  0xa7   : > { %2319 = vmatmul.mubr.bf16.vlgmr.msra.gmra.mrb[64].mxu0 %v2529_v10 }
  0xa8   : > { %2327 = vmatmul.mubr.bf16.vlgmr.msra.gmra.mrb[64].mxu1 %v2530_v11  ;;  %2322 = vmatprep.mubr.bf16.mxu0 %v2531_v12 }
  0xa9   : > { %2330 = vmatprep.mubr.bf16.mxu1 %v2532_v13 }
  0xaf   : > { %2323 = vmatmul.mubr.bf16.gmra.mrb[68].mxu0 %v2533_v14 }
  0xb0   : > { %2331 = vmatmul.mubr.bf16.gmra.mrb[68].mxu1 %v2534_v15 }
  0xfa   : > { %v2046_v16 = vpop.f32.mrb[0].mxu0 }
  0xfb   : > { %v2110_v17 = vpop.f32.mrb[0].mxu1  ;;  %v2047_v18 = vpop.f32.mrb[1].mxu0 }
  0xfc   : > { %v2048_v19 = vadd.f32 %v2047_v18, %v2046_v16  ;;  %v2111_v20 = vpop.f32.mrb[1].mxu1  ;;  %v2049_v21 = vpop.f32.mrb[2].mxu0 }
  0xfd   : > { %v2112_v22 = vadd.f32 %v2111_v20, %v2110_v17  ;;  %v2113_v23 = vpop.f32.mrb[2].mxu1  ;;  %v2050_v24 = vpop.f32.mrb[3].mxu0 }
  0xfe   : > { %v2051_v25 = vadd.f32 %v2050_v24, %v2049_v21  ;;  %v2114_v26 = vpop.f32.mrb[3].mxu1 }
  0xff   : > { %v2864_v27 = vadd.f32 %v2112_v22, %v2048_v19  ;;  %v2115_v28 = vadd.f32 %v2114_v26, %v2113_v23 }
 0x101   : > { %v2866_v29 = vadd.f32 %v2115_v28, %v2051_v25 }
 0x102   : > { %v2052_v30 = vpop.f32.mrb[4].mxu0 }
 0x103   : > { %v2116_v31 = vpop.f32.mrb[4].mxu1  ;;  %v2053_v32 = vpop.f32.mrb[5].mxu0 }
 0x104   : > { %v2054_v33 = vadd.f32 %v2053_v32, %v2052_v30  ;;  %v2117_v34 = vpop.f32.mrb[5].mxu1  ;;  %v2055_v35 = vpop.f32.mrb[6].mxu0 }
 0x105   : > { %v2118_v36 = vadd.f32 %v2117_v34, %v2116_v31  ;;  %v2119_v37 = vpop.f32.mrb[6].mxu1  ;;  %v2056_v38 = vpop.f32.mrb[7].mxu0 }
 0x106   : > { %v2057_v39 = vadd.f32 %v2056_v38, %v2055_v35  ;;  %v2120_v40 = vpop.f32.mrb[7].mxu1 }
 0x107   : > { %v2868_v41 = vadd.f32 %v2118_v36, %v2054_v33  ;;  %v2121_v42 = vadd.f32 %v2120_v40, %v2119_v37 }
 0x109   : > { %v2870_v43 = vadd.f32 %v2121_v42, %v2057_v39 }
 0x10a   : > { %v2058_v44 = vpop.f32.mrb[8].mxu0 }
 0x10b   : > { %v2122_v45 = vpop.f32.mrb[8].mxu1  ;;  %v2059_v46 = vpop.f32.mrb[9].mxu0 }
 0x10c   : > { %v2060_v47 = vadd.f32 %v2059_v46, %v2058_v44  ;;  %v2123_v48 = vpop.f32.mrb[9].mxu1  ;;  %v2061_v49 = vpop.f32.mrb[10].mxu0 }
 0x10d   : > { %v2124_v50 = vadd.f32 %v2123_v48, %v2122_v45  ;;  %v2125_v51 = vpop.f32.mrb[10].mxu1  ;;  %v2062_v52 = vpop.f32.mrb[11].mxu0 }
 0x10e   : > { %v2063_v53 = vadd.f32 %v2062_v52, %v2061_v49  ;;  %v2126_v54 = vpop.f32.mrb[11].mxu1 }
 0x10f   : > { %v2872_v55 = vadd.f32 %v2124_v50, %v2060_v47  ;;  %v2127_v56 = vadd.f32 %v2126_v54, %v2125_v51 }
 0x111   : > { %v2874_v57 = vadd.f32 %v2127_v56, %v2063_v53 }
 0x112   : > { %v2064_v58 = vpop.f32.mrb[12].mxu0 }
 0x113   : > { %v2128_v59 = vpop.f32.mrb[12].mxu1  ;;  %v2065_v60 = vpop.f32.mrb[13].mxu0 }
 0x114   : > { %v2066_v61 = vadd.f32 %v2065_v60, %v2064_v58  ;;  %v2129_v62 = vpop.f32.mrb[13].mxu1  ;;  %v2067_v63 = vpop.f32.mrb[14].mxu0 }
 0x115   : > { %v2130_v0 = vadd.f32 %v2129_v62, %v2128_v59  ;;  %v2131_v1 = vpop.f32.mrb[14].mxu1  ;;  %v2068_v2 = vpop.f32.mrb[15].mxu0 }
 0x116   : > { %v2069_v3 = vadd.f32 %v2068_v2, %v2067_v63  ;;  %v2132_v4 = vpop.f32.mrb[15].mxu1 }
 0x117   : > { %v2876_v5 = vadd.f32 %v2130_v0, %v2066_v61  ;;  %v2133_v6 = vadd.f32 %v2132_v4, %v2131_v1 }
 0x119   : > { %v2878_v7 = vadd.f32 %v2133_v6, %v2069_v3 }
 0x11a   : > { %v2070_v8 = vpop.f32.mrb[16].mxu0 }
 0x11b   : > { %v2134_v9 = vpop.f32.mrb[16].mxu1  ;;  %v2071_v10 = vpop.f32.mrb[17].mxu0 }
 0x11c   : > { %v2072_v11 = vadd.f32 %v2071_v10, %v2070_v8  ;;  %v2135_v12 = vpop.f32.mrb[17].mxu1  ;;  %v2073_v13 = vpop.f32.mrb[18].mxu0 }
 0x11d   : > { %v2136_v14 = vadd.f32 %v2135_v12, %v2134_v9  ;;  %v2137_v15 = vpop.f32.mrb[18].mxu1  ;;  %v2074_v16 = vpop.f32.mrb[19].mxu0 }
 0x11e   : > { %v2075_v17 = vadd.f32 %v2074_v16, %v2073_v13  ;;  %v2138_v18 = vpop.f32.mrb[19].mxu1 }
 0x11f   : > { %v2880_v19 = vadd.f32 %v2136_v14, %v2072_v11  ;;  %v2139_v20 = vadd.f32 %v2138_v18, %v2137_v15 }
 0x121   : > { %v2882_v21 = vadd.f32 %v2139_v20, %v2075_v17 }
 0x122   : > { %v2076_v22 = vpop.f32.mrb[20].mxu0 }
 0x123   : > { %v2140_v23 = vpop.f32.mrb[20].mxu1  ;;  %v2077_v24 = vpop.f32.mrb[21].mxu0 }
 0x124   : > { %v2078_v25 = vadd.f32 %v2077_v24, %v2076_v22  ;;  %v2141_v26 = vpop.f32.mrb[21].mxu1  ;;  %v2079_v28 = vpop.f32.mrb[22].mxu0 }
 0x125   : > { %v2142_v30 = vadd.f32 %v2141_v26, %v2140_v23  ;;  %v2143_v31 = vpop.f32.mrb[22].mxu1  ;;  %v2080_v32 = vpop.f32.mrb[23].mxu0 }
 0x126   : > { %v2081_v33 = vadd.f32 %v2080_v32, %v2079_v28  ;;  %v2144_v34 = vpop.f32.mrb[23].mxu1 }
 0x127   : > { %v2884_v35 = vadd.f32 %v2142_v30, %v2078_v25  ;;  %v2145_v36 = vadd.f32 %v2144_v34, %v2143_v31 }
 0x129   : > { %v2886_v37 = vadd.f32 %v2145_v36, %v2081_v33 }
 0x12a   : > { %v2082_v38 = vpop.f32.mrb[24].mxu0 }
 0x12b   : > { %v2146_v39 = vpop.f32.mrb[24].mxu1  ;;  %v2083_v40 = vpop.f32.mrb[25].mxu0 }
 0x12c   : > { %v2084_v42 = vadd.f32 %v2083_v40, %v2082_v38  ;;  %v2147_v44 = vpop.f32.mrb[25].mxu1  ;;  %v2085_v45 = vpop.f32.mrb[26].mxu0 }
 0x12d   : > { %v2148_v46 = vadd.f32 %v2147_v44, %v2146_v39  ;;  %v2149_v47 = vpop.f32.mrb[26].mxu1  ;;  %v2086_v48 = vpop.f32.mrb[27].mxu0 }
 0x12e   : > { %v2087_v49 = vadd.f32 %v2086_v48, %v2085_v45  ;;  %v2150_v50 = vpop.f32.mrb[27].mxu1 }
 0x12f   : > { %v2888_v51 = vadd.f32 %v2148_v46, %v2084_v42  ;;  %v2151_v52 = vadd.f32 %v2150_v50, %v2149_v47 }
 0x131   : > { %v2890_v53 = vadd.f32 %v2151_v52, %v2087_v49 }
 0x132   : > { %v2088_v54 = vpop.f32.mrb[28].mxu0 }
 0x133   : > { %v2152_v56 = vpop.f32.mrb[28].mxu1  ;;  %v2089_v58 = vpop.f32.mrb[29].mxu0 }
 0x134   : > { %v2090_v59 = vadd.f32 %v2089_v58, %v2088_v54  ;;  %v2153_v60 = vpop.f32.mrb[29].mxu1  ;;  %v2091_v61 = vpop.f32.mrb[30].mxu0 }
 0x135   : > { %v2154_v62 = vadd.f32 %v2153_v60, %v2152_v56  ;;  %v2155_v63 = vpop.f32.mrb[30].mxu1  ;;  %v2092_v0 = vpop.f32.mrb[31].mxu0 }
 0x136   : > { %v2093_v1 = vadd.f32 %v2092_v0, %v2091_v61  ;;  %v2156_v2 = vpop.f32.mrb[31].mxu1 }
 0x137   : > { %v2892_v3 = vadd.f32 %v2154_v62, %v2090_v59  ;;  %v2157_v4 = vadd.f32 %v2156_v2, %v2155_v63 }
 0x139   : > { %v2894_v6 = vadd.f32 %v2157_v4, %v2093_v1 }
 0x13a   : > { %v2174_v8 = vpop.f32.mrb[32].mxu0 }
 0x13b   : > { %v2238_v9 = vpop.f32.mrb[32].mxu1  ;;  %v2175_v10 = vpop.f32.mrb[33].mxu0 }
 0x13c   : > { %v2176_v11 = vadd.f32 %v2175_v10, %v2174_v8  ;;  %v2239_v12 = vpop.f32.mrb[33].mxu1  ;;  %v2177_v13 = vpop.f32.mrb[34].mxu0 }
 0x13d   : > { %v2240_v14 = vadd.f32 %v2239_v12, %v2238_v9  ;;  %v2241_v15 = vpop.f32.mrb[34].mxu1  ;;  %v2178_v16 = vpop.f32.mrb[35].mxu0 }
 0x13e   : > { %v1404_v17 = vadd.f32 %v2176_v11, %v2864_v27  ;;  %v2179_v18 = vadd.f32 %v2178_v16, %v2177_v13  ;;  %v2242_v20 = vpop.f32.mrb[35].mxu1 }
 0x13f   : > { %v2243_v22 = vadd.f32 %v2242_v20, %v2241_v15 }
 0x140   : > { %v1407_v23 = vadd.f32 %v2179_v18, %v2866_v29  ;;  %v2898_v24 = vadd.f32 %v2240_v14, %v1404_v17 }
 0x142   : > { %v2180_v25 = vpop.f32.mrb[36].mxu0  ;;  %v2900_v26 = vadd.f32 %v2243_v22, %v1407_v23 }
 0x143   : > { %v2244_v28 = vpop.f32.mrb[36].mxu1  ;;  %v2181_v30 = vpop.f32.mrb[37].mxu0 }
 0x144   : > { %v2182_v31 = vadd.f32 %v2181_v30, %v2180_v25  ;;  %v2245_v32 = vpop.f32.mrb[37].mxu1  ;;  %v2183_v33 = vpop.f32.mrb[38].mxu0 }
 0x145   : > { %v2246_v34 = vadd.f32 %v2245_v32, %v2244_v28  ;;  %v2247_v36 = vpop.f32.mrb[38].mxu1  ;;  %v2184_v38 = vpop.f32.mrb[39].mxu0 }
 0x146   : > { %v1412_v27 = vadd.f32 %v2182_v31, %v2868_v41  ;;  %v2185_v39 = vadd.f32 %v2184_v38, %v2183_v33  ;;  %v2248_v40 = vpop.f32.mrb[39].mxu1 }
 0x147   : > { %v2249_v42 = vadd.f32 %v2248_v40, %v2247_v36 }
 0x148   : > { %v1415_v29 = vadd.f32 %v2185_v39, %v2870_v43  ;;  %v2904_v44 = vadd.f32 %v2246_v34, %v1412_v27 }
 0x14a   : > { %v2186_v45 = vpop.f32.mrb[40].mxu0  ;;  %v2906_v46 = vadd.f32 %v2249_v42, %v1415_v29 }
 0x14b   : > { %v2250_v47 = vpop.f32.mrb[40].mxu1  ;;  %v2187_v48 = vpop.f32.mrb[41].mxu0 }
 0x14c   : > { %v2188_v49 = vadd.f32 %v2187_v48, %v2186_v45  ;;  %v2251_v50 = vpop.f32.mrb[41].mxu1  ;;  %v2189_v52 = vpop.f32.mrb[42].mxu0 }
 0x14d   : > { %v2252_v54 = vadd.f32 %v2251_v50, %v2250_v47  ;;  %v2253_v56 = vpop.f32.mrb[42].mxu1  ;;  %v2190_v58 = vpop.f32.mrb[43].mxu0 }
 0x14e   : > { %v1420_v41 = vadd.f32 %v2188_v49, %v2872_v55  ;;  %v2191_v59 = vadd.f32 %v2190_v58, %v2189_v52  ;;  %v2254_v60 = vpop.f32.mrb[43].mxu1 }
 0x14f   : > { %v2255_v61 = vadd.f32 %v2254_v60, %v2253_v56 }
 0x150   : > { %v1423_v43 = vadd.f32 %v2191_v59, %v2874_v57  ;;  %v2910_v62 = vadd.f32 %v2252_v54, %v1420_v41 }
 0x152   : > { %v2192_v63 = vpop.f32.mrb[44].mxu0  ;;  %v2912_v0 = vadd.f32 %v2255_v61, %v1423_v43 }
 0x153   : > { %v2256_v1 = vpop.f32.mrb[44].mxu1  ;;  %v2193_v2 = vpop.f32.mrb[45].mxu0 }
 0x154   : > { %v2194_v4 = vadd.f32 %v2193_v2, %v2192_v63  ;;  %v2257_v8 = vpop.f32.mrb[45].mxu1  ;;  %v2195_v9 = vpop.f32.mrb[46].mxu0 }
 0x155   : > { %v2258_v10 = vadd.f32 %v2257_v8, %v2256_v1  ;;  %v2259_v11 = vpop.f32.mrb[46].mxu1  ;;  %v2196_v12 = vpop.f32.mrb[47].mxu0 }
 0x156   : > { %v1428_v55 = vadd.f32 %v2194_v4, %v2876_v5  ;;  %v2197_v13 = vadd.f32 %v2196_v12, %v2195_v9  ;;  %v2260_v14 = vpop.f32.mrb[47].mxu1 }
 0x157   : > { %v2261_v15 = vadd.f32 %v2260_v14, %v2259_v11 }
 0x158   : > { %v1431_v57 = vadd.f32 %v2197_v13, %v2878_v7  ;;  %v2916_v16 = vadd.f32 %v2258_v10, %v1428_v55 }
 0x15a   : > { %v2198_v17 = vpop.f32.mrb[48].mxu0  ;;  %v2918_v18 = vadd.f32 %v2261_v15, %v1431_v57 }
 0x15b   : > { %v2262_v20 = vpop.f32.mrb[48].mxu1  ;;  %v2199_v22 = vpop.f32.mrb[49].mxu0 }
 0x15c   : > { %v2200_v23 = vadd.f32 %v2199_v22, %v2198_v17  ;;  %v2263_v25 = vpop.f32.mrb[49].mxu1  ;;  %v2201_v28 = vpop.f32.mrb[50].mxu0 }
 0x15d   : > { %v2264_v30 = vadd.f32 %v2263_v25, %v2262_v20  ;;  %v2265_v31 = vpop.f32.mrb[50].mxu1  ;;  %v2202_v32 = vpop.f32.mrb[51].mxu0 }
 0x15e   : > { %v1436_v5 = vadd.f32 %v2200_v23, %v2880_v19  ;;  %v2203_v33 = vadd.f32 %v2202_v32, %v2201_v28  ;;  %v2266_v34 = vpop.f32.mrb[51].mxu1 }
 0x15f   : > { %v2267_v36 = vadd.f32 %v2266_v34, %v2265_v31 }
 0x160   : > { %v1439_v7 = vadd.f32 %v2203_v33, %v2882_v21  ;;  %v1533_v38 = vadd.f32 %v2264_v30, %v1436_v5 }
 0x162   : > { %v2204_v27 = vpop.f32.mrb[52].mxu0  ;;  %v2922_v39 = vadd.f32 %v2267_v36, %v1439_v7 }
 0x163   : > { %v2268_v40 = vpop.f32.mrb[52].mxu1  ;;  %v2205_v42 = vpop.f32.mrb[53].mxu0 }
 0x164   : > { %v2206_v29 = vadd.f32 %v2205_v42, %v2204_v27  ;;  %v2269_v45 = vpop.f32.mrb[53].mxu1  ;;  %v2207_v47 = vpop.f32.mrb[54].mxu0 }
 0x165   : > { %v2270_v48 = vadd.f32 %v2269_v45, %v2268_v40  ;;  %v2271_v49 = vpop.f32.mrb[54].mxu1  ;;  %v2208_v50 = vpop.f32.mrb[55].mxu0 }
 0x166   : > { %v1444_v52 = vadd.f32 %v2206_v29, %v2884_v35  ;;  %v2209_v19 = vadd.f32 %v2208_v50, %v2207_v47  ;;  %v2272_v54 = vpop.f32.mrb[55].mxu1 }
 0x167   : > { %v2273_v56 = vadd.f32 %v2272_v54, %v2271_v49 }
 0x168   : > { %v1447_v58 = vadd.f32 %v2209_v19, %v2886_v37  ;;  %v1541_v21 = vadd.f32 %v2270_v48, %v1444_v52 }
 0x16a   : > { %v2210_v41 = vpop.f32.mrb[56].mxu0  ;;  %v1544_v59 = vadd.f32 %v2273_v56, %v1447_v58 }
 0x16b   : > { %v2274_v60 = vpop.f32.mrb[56].mxu1  ;;  %v2211_v61 = vpop.f32.mrb[57].mxu0 }
 0x16c   : > { %v2212_v43 = vadd.f32 %v2211_v61, %v2210_v41  ;;  %v2275_v63 = vpop.f32.mrb[57].mxu1  ;;  %v2213_v1 = vpop.f32.mrb[58].mxu0 }
 0x16d   : > { %v2276_v2 = vadd.f32 %v2275_v63, %v2274_v60  ;;  %v2277_v4 = vpop.f32.mrb[58].mxu1  ;;  %v2214_v8 = vpop.f32.mrb[59].mxu0 }
 0x16e   : > { %v1452_v9 = vadd.f32 %v2212_v43, %v2888_v51  ;;  %v2215_v10 = vadd.f32 %v2214_v8, %v2213_v1  ;;  %v2278_v35 = vpop.f32.mrb[59].mxu1 }
 0x16f   : > { %v2279_v11 = vadd.f32 %v2278_v35, %v2277_v4 }
 0x170   : > { %v1455_v12 = vadd.f32 %v2215_v10, %v2890_v53  ;;  %v1549_v55 = vadd.f32 %v2276_v2, %v1452_v9 }
 0x172   : > { %v2216_v37 = vpop.f32.mrb[60].mxu0  ;;  %v1552_v13 = vadd.f32 %v2279_v11, %v1455_v12 }
 0x173   : > { %v2280_v14 = vpop.f32.mrb[60].mxu1  ;;  %v2217_v15 = vpop.f32.mrb[61].mxu0 }
 0x174   : > { %v2218_v57 = vadd.f32 %v2217_v15, %v2216_v37  ;;  %v2281_v17 = vpop.f32.mrb[61].mxu1  ;;  %v2219_v20 = vpop.f32.mrb[62].mxu0 }
 0x175   : > { %v2282_v22 = vadd.f32 %v2281_v17, %v2280_v14  ;;  %v2283_v23 = vpop.f32.mrb[62].mxu1  ;;  %v2220_v25 = vpop.f32.mrb[63].mxu0 }
 0x176   : > { %v1460_v28 = vadd.f32 %v2218_v57, %v2892_v3  ;;  %v2221_v51 = vadd.f32 %v2220_v25, %v2219_v20  ;;  %v2284_v30 = vpop.f32.mrb[63].mxu1 }
 0x177   : > { %v2285_v31 = vadd.f32 %v2284_v30, %v2283_v23 }
 0x178   : > { %v1463_v32 = vadd.f32 %v2221_v51, %v2894_v6  ;;  %v1557_v53 = vadd.f32 %v2282_v22, %v1460_v28 }
 0x17a   : > { %v2320_v5 = vpop.f32.mrb[64].mxu0  ;;  %v1560_v33 = vadd.f32 %v2285_v31, %v1463_v32 }
 0x17b   : > { %v1606_v34 = vadd.f32 %v2320_v5, %v2904_v44  ;;  %v2328_v36 = vpop.f32.mrb[64].mxu1  ;;  %v1597_v7 = vpop.f32.mrb[65].mxu0 }
 0x17c   : > { %v1638_v27 = vadd.f32 %v2328_v36, %v1541_v21  ;;  %v1598_v40 = vadd.f32 %v1597_v7, %v2898_v24  ;;  %v1629_v42 = vpop.f32.mrb[65].mxu1  ;;  %v2321_v29 = vpop.f32.mrb[66].mxu0 }
 0x17d   : > { %v1630_v45 = vadd.f32 %v1629_v42, %v1533_v38  ;;  %v1609_v3 = vadd.f32 %v2321_v29, %v2906_v46  ;;  %v2329_v47 = vpop.f32.mrb[66].mxu1  ;;  %v1600_v48 = vpop.f32.mrb[67].mxu0 }
 0x17e   : > { %v1641_v6 = vadd.f32 %v2329_v47, %v1544_v59  ;;  %v1601_v44 = vadd.f32 %v1600_v48, %v2900_v26  ;;  %v1632_v24 = vpop.f32.mrb[67].mxu1 }
 0x17f   : > { %v1991_v49 = vpack.c.bf16 %v1609_v3, %v1606_v34  ;;  %v1633_v38 = vadd.f32 %v1632_v24, %v2922_v39 }
 0x180   : > { %v2011_v50 = vpack.c.bf16 %v1641_v6, %v1638_v27  ;;  %v1986_v46 = vpack.c.bf16 %v1601_v44, %v1598_v40 }
 0x181   : > { %2023 = vst [vmem:[%s2937_s6 + $0x8] sm:$0xff] %v1991_v49   ;;  %v2006_v52 = vpack.c.bf16 %v1633_v38, %v1630_v45 }
 0x182   : > { %2027 = vst [vmem:[%s2937_s6 + $0x28] sm:$0xff] %v2011_v50   ;;  %1987 = vst [vmem:[%s2937_s6] sm:$0xff] %v1986_v46   ;;  %v2324_v19 = vpop.f32.mrb[68].mxu0 }
 0x183   : > { %2026 = vst [vmem:[%s2937_s6 + $0x20] sm:$0xff] %v2006_v52   ;;  %v1622_v54 = vadd.f32 %v2324_v19, %v2916_v16  ;;  %v2332_v56 = vpop.f32.mrb[68].mxu1  ;;  %v1613_v58 = vpop.f32.mrb[69].mxu0 }
 0x184   : > { %v1654_v21 = vadd.f32 %v2332_v56, %v1557_v53  ;;  %v1614_v26 = vadd.f32 %v1613_v58, %v2910_v62  ;;  %v1645_v41 = vpop.f32.mrb[69].mxu1  ;;  %v2325_v39 = vpop.f32.mrb[70].mxu0 }
 0x185   : > { %v1646_v59 = vadd.f32 %v1645_v41, %v1549_v55  ;;  %v1625_v60 = vadd.f32 %v2325_v39, %v2918_v18  ;;  %v2333_v61 = vpop.f32.mrb[70].mxu1  ;;  %v1616_v43 = vpop.f32.mrb[71].mxu0 }
 0x186   : > { %v1657_v63 = vadd.f32 %v2333_v61, %v1560_v33  ;;  %v1617_v1 = vadd.f32 %v1616_v43, %v2912_v0  ;;  %v1648_v16 = vpop.f32.mrb[71].mxu1 }
 0x187   : > { %v2001_v2 = vpack.c.bf16 %v1625_v60, %v1622_v54  ;;  %v1649_v4 = vadd.f32 %v1648_v16, %v1552_v13 }
 0x188   : > { %v2021_v8 = vpack.c.bf16 %v1657_v63, %v1654_v21  ;;  %v1996_v9 = vpack.c.bf16 %v1617_v1, %v1614_v26 }
 0x189   : > { %2025 = vst [vmem:[%s2937_s6 + $0x18] sm:$0xff] %v2001_v2   ;;  %v2016_v62 = vpack.c.bf16 %v1649_v4, %v1646_v59 }
 0x18a   : > { %2029 = vst [vmem:[%s2937_s6 + $0x38] sm:$0xff] %v2021_v8   ;;  %2024 = vst [vmem:[%s2937_s6 + $0x10] sm:$0xff] %v1996_v9  }
 0x18b   : > { %2028 = vst [vmem:[%s2937_s6 + $0x30] sm:$0xff] %v2016_v62  }
 0x18c PF: > { %s12_s9 = sadd.s32 1, %s2541_s9  }
 0x18d   : > { %p9_p4 = scmp.ge.s32.totalorder %s12_s9, 4  }
 0x18f   :  { %11 = sbr.rel (!%p9_p4) target bundleno = 1 (0x1), region = 58 }

// kernel: sst_emotion_net_forward.28
= control target key start
LH: loop header
LB: loop body
LE: loop exit
PB: predicated region body
PF: predicated region fallthrough
CT: control target
= control target key end

     0   :  { %s1171_s9 = smov 0   ;;  %s1300_s0 = inlined_call_operand.vmem [shape: bf16[256,384], index: 0, kind: input, shape index: {}]   ;;  %s1301_s1 = inlined_call_operand.vmem [shape: bf16[384,128], index: 1, kind: input, shape index: {}]   ;;  %s1302_s2 = inlined_call_operand.vmem [shape: bf16[256,128], index: 2, kind: output, shape index: {}]  }
   0x1 LB: > { %s833_s10 = sadd.s32 4294967295, %s1154_s9   ;;  %p837_p0 = scmp.ge.s32.totalorder %s1154_s9, 1  ;;  %s1154_s9 = sphi %s1171_s9, %s12_s9  }
   0x2   : > { %p114_p1 = scmp.lt.s32.totalorder %s1154_s9, 3 }
   0x4   : > { %p115_p2 = pnand %p837_p0, %p114_p1 }
   0x5   : > { %v1092_v0 = vld [vmem:[%s1301_s1 + $0x40] sm:$0xff] (!%p115_p2)   ;;  %v1095_v3 = vld [vmem:[%s1301_s1 + $0x48] sm:$0xff] (!%p115_p2)   ;;  %v1098_v6 = vld [vmem:[%s1301_s1 + $0x50] sm:$0xff] (!%p115_p2)   ;;  %s838_s27 = sshll.u32 (!%p115_p2), %s833_s10, 4 }
   0x6   : > { %118 = sbr.rel (%p115_p2) target bundleno = 316 (0x13c), region = 28  ;;  %v1093_v1 = vld [vmem:[%s1301_s1] sm:$0xff] (!%p115_p2)   ;;  %971 = vmatprep.subr.bf16.mxu0 (!%p115_p2), %v1092_v0  ;;  %v1096_v4 = vld [vmem:[%s1301_s1 + $0x8] sm:$0xff] (!%p115_p2)   ;;  %v1099_v7 = vld [vmem:[%s1301_s1 + $0x10] sm:$0xff] (!%p115_p2)   ;;  %p138_p3 = scmp.lt.s32.totalorder (!%p115_p2), %s838_s27, 31 }
   0x7   : > { %v1094_v2 = vld [vmem:[%s1301_s1 + $0x80] sm:$0xff] (!%p115_p2)   ;;  %972 = vmatpush3.bf16.msra.mxu0 (!%p115_p2), %v1093_v1  ;;  %v1097_v5 = vld [vmem:[%s1301_s1 + $0x88] sm:$0xff] (!%p115_p2)   ;;  %v1100_v8 = vld [vmem:[%s1301_s1 + $0x90] sm:$0xff] (!%p115_p2)  }
   0x8   : > { %1051 = vmatprep.subr.bf16.mxu1 (!%p115_p2), %v1094_v2  ;;  %973 = vmatprep.subr.bf16.mxu0 (!%p115_p2), %v1095_v3  ;;  %v1101_v9 = vld [vmem:[%s1301_s1 + $0x58] sm:$0xff] (!%p115_p2)   ;;  %v1104_v12 = vld [vmem:[%s1301_s1 + $0x60] sm:$0xff] (!%p115_p2)   ;;  %v1107_v15 = vld [vmem:[%s1301_s1 + $0x68] sm:$0xff] (!%p115_p2)  }
   0x9   : > { %1052 = vmatpush3.bf16.msra.mxu1 (!%p115_p2), %v1094_v2  ;;  %v1102_v10 = vld [vmem:[%s1301_s1 + $0x18] sm:$0xff] (!%p115_p2)   ;;  %v1106_v13 = vld [vmem:[%s1301_s1 + $0xa0] sm:$0xff] (!%p115_p2)   ;;  %v1109_v16 = vld [vmem:[%s1301_s1 + $0xa8] sm:$0xff] (!%p115_p2)  }
   0xa   : > { %1053 = vmatprep.subr.bf16.mxu1 (!%p115_p2), %v1097_v5  ;;  %v1103_v11 = vld [vmem:[%s1301_s1 + $0x98] sm:$0xff] (!%p115_p2)   ;;  %v1105_v14 = vld [vmem:[%s1301_s1 + $0x20] sm:$0xff] (!%p115_p2)   ;;  %v1108_v17 = vld [vmem:[%s1301_s1 + $0x28] sm:$0xff] (!%p115_p2)  }
   0xb   : > { %974 = vmatpush3.bf16.msra.mxu0 (!%p115_p2), %v1096_v4  ;;  %v1110_v18 = vld [vmem:[%s1301_s1 + $0x70] sm:$0xff] (!%p115_p2)   ;;  %v1113_v21 = vld [vmem:[%s1301_s1 + $0x78] sm:$0xff] (!%p115_p2)  }
   0xc   : > { %975 = vmatprep.subr.bf16.mxu0 (!%p115_p2), %v1098_v6  ;;  %v1111_v19 = vld [vmem:[%s1301_s1 + $0x30] sm:$0xff] (!%p115_p2)   ;;  %v1115_v22 = vld [vmem:[%s1301_s1 + $0xb8] sm:$0xff] (!%p115_p2)  }
   0xd   : > { %1054 = vmatpush3.bf16.msra.mxu1 %v1097_v5  ;;  %s1304_s27 = smov (!%p138_p3, %s838_s27), 31  ;;  %v1112_v20 = vld [vmem:[%s1301_s1 + $0xb0] sm:$0xff]   ;;  %v1114_v25 = vld [vmem:[%s1301_s1 + $0x38] sm:$0xff]  }
   0xe   : > { %1055 = vmatprep.subr.bf16.mxu1 %v1100_v8  ;;  %s1083_s19 = smul.u32 12, %s1304_s27  ;;  %s841_s11 = sshll.u32 %s1304_s27, 2 }
   0xf   : > { %976 = vmatpush3.bf16.msra.mxu0 %v1099_v7  ;;  %s1287_s14 = scalar_lea.vmem %s1302_s2, %s841_s11 }
  0x10   : > { %977 = vmatprep.subr.bf16.mxu0 %v1101_v9  ;;  %s1248_s3 = scalar_lea.vmem %s1300_s0, %s1083_s19 }
  0x11   : > { %1056 = vmatpush3.bf16.msra.mxu1 %v1100_v8  ;;  %v1118_v23 = vld [vmem:[%s1248_s3 + $0x4] ss:$12 sps:$4 sm:$0xff]   ;;  %v1119_v24 = vld [vmem:[%s1248_s3 + $0x8] ss:$12 sps:$4 sm:$0xff]   ;;  %v1116_v26 = vld [vmem:[%s1248_s3] ss:$12 sps:$4 sm:$0xff]  }
  0x12   : > { %1057 = vmatprep.subr.bf16.mxu1 %v1103_v11  ;;  %535 = vmatprep.mubr.bf16.mxu0 %v1118_v23  ;;  %v1121_v27 = vld [vmem:[%s1248_s3 + $0x1c] ss:$12 sps:$4 sm:$0xff]   ;;  %v1120_v28 = vld [vmem:[%s1248_s3 + $0x20] ss:$12 sps:$4 sm:$0xff]   ;;  %v1127_v29 = vld [vmem:[%s1248_s3 + $0x38] ss:$12 sps:$4 sm:$0xff]  }
  0x13   : > { %978 = vmatpush3.bf16.msra.mxu0 %v1102_v10  ;;  %1067 = vmatprep.mubr.bf16.mxu1 %v1119_v24  ;;  %v1123_v30 = vld [vmem:[%s1248_s3 + $0x18] ss:$12 sps:$4 sm:$0xff]   ;;  %v1124_v31 = vld [vmem:[%s1248_s3 + $0x34] ss:$12 sps:$4 sm:$0xff]   ;;  %v1128_v32 = vld [vmem:[%s1248_s3 + $0x50] ss:$12 sps:$4 sm:$0xff]  }
  0x14   : > { %979 = vmatprep.subr.bf16.mxu0 %v1104_v12  ;;  %v1135_v33 = vld [vmem:[%s1248_s3 + $0x68] ss:$12 sps:$4 sm:$0xff]   ;;  %v1126_v34 = vld [vmem:[%s1248_s3 + $0x30] ss:$12 sps:$4 sm:$0xff]   ;;  %v1129_v35 = vld [vmem:[%s1248_s3 + $0x4c] ss:$12 sps:$4 sm:$0xff]  }
  0x15   : > { %1058 = vmatpush3.bf16.msra.mxu1 %v1103_v11  ;;  %v1136_v36 = vld [vmem:[%s1248_s3 + $0x80] ss:$12 sps:$4 sm:$0xff]   ;;  %v1143_v37 = vld [vmem:[%s1248_s3 + $0x98] ss:$12 sps:$4 sm:$0xff]   ;;  %v1131_v38 = vld [vmem:[%s1248_s3 + $0x48] ss:$12 sps:$4 sm:$0xff]  }
  0x16   : > { %1059 = vmatprep.subr.bf16.mxu1 %v1106_v13  ;;  %v1132_v39 = vld [vmem:[%s1248_s3 + $0x64] ss:$12 sps:$4 sm:$0xff]   ;;  %v1134_v41 = vld [vmem:[%s1248_s3 + $0x60] ss:$12 sps:$4 sm:$0xff]   ;;  %v1137_v42 = vld [vmem:[%s1248_s3 + $0x7c] ss:$12 sps:$4 sm:$0xff]  }
  0x17   : > { %980 = vmatpush3.bf16.msra.mxu0 %v1105_v14  ;;  %v1144_v40 = vld [vmem:[%s1248_s3 + $0xb0] ss:$12 sps:$4 sm:$0xff]   ;;  %v1139_v43 = vld [vmem:[%s1248_s3 + $0x78] ss:$12 sps:$4 sm:$0xff]   ;;  %v1140_v44 = vld [vmem:[%s1248_s3 + $0x94] ss:$12 sps:$4 sm:$0xff]  }
  0x18   : > { %981 = vmatprep.subr.bf16.mxu0 %v1107_v15  ;;  %v1142_v45 = vld [vmem:[%s1248_s3 + $0x90] ss:$12 sps:$4 sm:$0xff]   ;;  %v1145_v46 = vld [vmem:[%s1248_s3 + $0xac] ss:$12 sps:$4 sm:$0xff]   ;;  %v1147_v47 = vld [vmem:[%s1248_s3 + $0xa8] ss:$12 sps:$4 sm:$0xff]  }
  0x19   : > { %1060 = vmatpush3.bf16.msra.mxu1 %v1106_v13 }
  0x1a   : > { %1061 = vmatprep.subr.bf16.mxu1 %v1109_v16 }
  0x1b   : > { %982 = vmatpush3.bf16.msra.mxu0 %v1108_v17 }
  0x1c   : > { %983 = vmatprep.subr.bf16.mxu0 %v1110_v18 }
  0x1d   : > { %1062 = vmatpush3.bf16.msra.mxu1 %v1109_v16 }
  0x1e   : > { %1063 = vmatprep.subr.bf16.mxu1 %v1112_v20 }
  0x1f   : > { %984 = vmatpush3.bf16.msra.mxu0 %v1111_v19 }
  0x20   : > { %985 = vmatprep.subr.bf16.mxu0 %v1113_v21 }
  0x21   : > { %1064 = vmatpush3.bf16.msra.mxu1 %v1112_v20 }
  0x22   : > { %1065 = vmatprep.subr.bf16.mxu1 %v1115_v22 }
  0x23   : > { %986 = vmatpush3.bf16.msra.mxu0 %v1114_v25 }
  0x25   : > { %1066 = vmatpush3.bf16.msra.mxu1 %v1115_v22 }
  0x26   : > { %536 = vmatmul.mubr.bf16.vlgmr.msra.gmra.mrb[0].mxu0 %v1116_v26 }
  0x27   : > { %543 = vmatprep.mubr.bf16.mxu0 %v1121_v27 }
  0x28   : > { %1068 = vmatmul.mubr.bf16.vlgmr.msra.gmra.mrb[0].mxu1 %v1120_v28 }
  0x29   : > { %1071 = vmatprep.mubr.bf16.mxu1 %v1127_v29 }
  0x2e   : > { %544 = vmatmul.mubr.bf16.gmra.mrb[4].mxu0 %v1123_v30 }
  0x2f   : > { %551 = vmatprep.mubr.bf16.mxu0 %v1124_v31 }
  0x30   : > { %1072 = vmatmul.mubr.bf16.gmra.mrb[4].mxu1 %v1128_v32 }
  0x31   : > { %1075 = vmatprep.mubr.bf16.mxu1 %v1135_v33 }
  0x36   : > { %552 = vmatmul.mubr.bf16.gmra.mrb[8].mxu0 %v1126_v34 }
  0x37   : > { %559 = vmatprep.mubr.bf16.mxu0 %v1129_v35 }
  0x38   : > { %1076 = vmatmul.mubr.bf16.gmra.mrb[8].mxu1 %v1136_v36 }
  0x39   : > { %1079 = vmatprep.mubr.bf16.mxu1 %v1143_v37 }
  0x3e   : > { %560 = vmatmul.mubr.bf16.gmra.mrb[12].mxu0 %v1131_v38 }
  0x3f   : > { %567 = vmatprep.mubr.bf16.mxu0 %v1132_v39 }
  0x40   : > { %1080 = vmatmul.mubr.bf16.gmra.mrb[12].mxu1 %v1144_v40 }
  0x46   : > { %568 = vmatmul.mubr.bf16.gmra.mrb[16].mxu0 %v1134_v41 }
  0x47   : > { %575 = vmatprep.mubr.bf16.mxu0 %v1137_v42 }
  0x4e   : > { %576 = vmatmul.mubr.bf16.gmra.mrb[20].mxu0 %v1139_v43 }
  0x4f   : > { %583 = vmatprep.mubr.bf16.mxu0 %v1140_v44 }
  0x56   : > { %584 = vmatmul.mubr.bf16.gmra.mrb[24].mxu0 %v1142_v45 }
  0x57   : > { %591 = vmatprep.mubr.bf16.mxu0 %v1145_v46 }
  0x5e   : > { %592 = vmatmul.mubr.bf16.gmra.mrb[28].mxu0 %v1147_v47 }
  0xf9   : > { %v987_v48 = vpop.f32.mrb[0].mxu0 }
  0xfa   : > { %v988_v49 = vpop.f32.mrb[1].mxu0 }
  0xfb   : > { %v989_v50 = vadd.f32 %v988_v49, %v987_v48  ;;  %v990_v51 = vpop.f32.mrb[2].mxu0  ;;  %v1069_v52 = vpop.f32.mrb[0].mxu1 }
  0xfc   : > { %v991_v53 = vpop.f32.mrb[3].mxu0  ;;  %v634_v54 = vpop.f32.mrb[1].mxu1 }
  0xfd   : > { %v992_v55 = vadd.f32 %v991_v53, %v990_v51  ;;  %v635_v56 = vadd.f32 %v989_v50, %v634_v54  ;;  %v1070_v57 = vpop.f32.mrb[2].mxu1 }
  0xfe   : > { %v637_v58 = vpop.f32.mrb[3].mxu1 }
  0xff   : > { %v638_v59 = vadd.f32 %v992_v55, %v637_v58 }
 0x101   : > { %v927_v60 = vpack.c.bf16 %v638_v59, %v635_v56  ;;  %v993_v61 = vpop.f32.mrb[4].mxu0 }
 0x102   : > { %v994_v62 = vpop.f32.mrb[5].mxu0 }
 0x103   : > { %928 = vst [vmem:[%s1287_s14] sm:$0xff] %v927_v60   ;;  %v995_v63 = vadd.f32 %v994_v62, %v993_v61  ;;  %v996_v0 = vpop.f32.mrb[6].mxu0  ;;  %v1073_v1 = vpop.f32.mrb[4].mxu1 }
 0x104   : > { %v997_v2 = vpop.f32.mrb[7].mxu0  ;;  %v650_v3 = vpop.f32.mrb[5].mxu1 }
 0x105   : > { %v643_v4 = vadd.f32 %v1069_v52, %v995_v63  ;;  %v998_v5 = vadd.f32 %v997_v2, %v996_v0  ;;  %v1074_v6 = vpop.f32.mrb[6].mxu1 }
 0x106   : > { %v653_v7 = vpop.f32.mrb[7].mxu1 }
 0x107   : > { %v646_v8 = vadd.f32 %v1070_v57, %v998_v5 }
 0x109   : > { %v932_v9 = vpack.c.bf16 %v646_v8, %v643_v4  ;;  %v999_v10 = vpop.f32.mrb[8].mxu0 }
 0x10a   : > { %v1000_v11 = vpop.f32.mrb[9].mxu0 }
 0x10b   : > { %964 = vst [vmem:[%s1287_s14 + $0x8] sm:$0xff] %v932_v9   ;;  %v1001_v12 = vadd.f32 %v1000_v11, %v999_v10  ;;  %v1002_v13 = vpop.f32.mrb[10].mxu0  ;;  %v1077_v14 = vpop.f32.mrb[8].mxu1 }
 0x10c   : > { %v1003_v15 = vpop.f32.mrb[11].mxu0  ;;  %v666_v16 = vpop.f32.mrb[9].mxu1 }
 0x10d   : > { %v1004_v17 = vadd.f32 %v1003_v15, %v1002_v13  ;;  %v651_v18 = vadd.f32 %v1001_v12, %v650_v3  ;;  %v1078_v19 = vpop.f32.mrb[10].mxu1 }
 0x10e   : > { %v669_v20 = vpop.f32.mrb[11].mxu1 }
 0x10f   : > { %v654_v21 = vadd.f32 %v1004_v17, %v653_v7 }
 0x111   : > { %v937_v22 = vpack.c.bf16 %v654_v21, %v651_v18  ;;  %v1005_v23 = vpop.f32.mrb[12].mxu0 }
 0x112   : > { %v1006_v24 = vpop.f32.mrb[13].mxu0 }
 0x113   : > { %965 = vst [vmem:[%s1287_s14 + $0x10] sm:$0xff] %v937_v22   ;;  %v1007_v25 = vadd.f32 %v1006_v24, %v1005_v23  ;;  %v1008_v26 = vpop.f32.mrb[14].mxu0  ;;  %v1081_v27 = vpop.f32.mrb[12].mxu1 }
 0x114   : > { %v1009_v28 = vpop.f32.mrb[15].mxu0  ;;  %v682_v29 = vpop.f32.mrb[13].mxu1 }
 0x115   : > { %v659_v30 = vadd.f32 %v1073_v1, %v1007_v25  ;;  %v1010_v31 = vadd.f32 %v1009_v28, %v1008_v26  ;;  %v1082_v32 = vpop.f32.mrb[14].mxu1 }
 0x116   : > { %v685_v33 = vpop.f32.mrb[15].mxu1 }
 0x117   : > { %v662_v34 = vadd.f32 %v1074_v6, %v1010_v31 }
 0x119   : > { %v942_v35 = vpack.c.bf16 %v662_v34, %v659_v30  ;;  %v1011_v36 = vpop.f32.mrb[16].mxu0 }
 0x11a   : > { %v1012_v37 = vpop.f32.mrb[17].mxu0 }
 0x11b   : > { %966 = vst [vmem:[%s1287_s14 + $0x18] sm:$0xff] %v942_v35   ;;  %v1013_v38 = vadd.f32 %v1012_v37, %v1011_v36  ;;  %v1014_v39 = vpop.f32.mrb[18].mxu0 }
 0x11c   : > { %v1015_v40 = vpop.f32.mrb[19].mxu0 }
 0x11d   : > { %v1016_v41 = vadd.f32 %v1015_v40, %v1014_v39  ;;  %v667_v42 = vadd.f32 %v1013_v38, %v666_v16 }
 0x11f   : > { %v670_v43 = vadd.f32 %v1016_v41, %v669_v20 }
 0x121   : > { %v947_v44 = vpack.c.bf16 %v670_v43, %v667_v42  ;;  %v1017_v45 = vpop.f32.mrb[20].mxu0 }
 0x122   : > { %v1018_v46 = vpop.f32.mrb[21].mxu0 }
 0x123   : > { %967 = vst [vmem:[%s1287_s14 + $0x20] sm:$0xff] %v947_v44   ;;  %v1019_v47 = vadd.f32 %v1018_v46, %v1017_v45  ;;  %v1020_v48 = vpop.f32.mrb[22].mxu0 }
 0x124   : > { %v1021_v49 = vpop.f32.mrb[23].mxu0 }
 0x125   : > { %v675_v50 = vadd.f32 %v1077_v14, %v1019_v47  ;;  %v1022_v51 = vadd.f32 %v1021_v49, %v1020_v48 }
 0x127   : > { %v678_v52 = vadd.f32 %v1078_v19, %v1022_v51 }
 0x129   : > { %v952_v53 = vpack.c.bf16 %v678_v52, %v675_v50  ;;  %v1023_v54 = vpop.f32.mrb[24].mxu0 }
 0x12a   : > { %v1024_v55 = vpop.f32.mrb[25].mxu0 }
 0x12b   : > { %968 = vst [vmem:[%s1287_s14 + $0x28] sm:$0xff] %v952_v53   ;;  %v1025_v56 = vadd.f32 %v1024_v55, %v1023_v54  ;;  %v1026_v57 = vpop.f32.mrb[26].mxu0 }
 0x12c   : > { %v1027_v58 = vpop.f32.mrb[27].mxu0 }
 0x12d   : > { %v1028_v59 = vadd.f32 %v1027_v58, %v1026_v57  ;;  %v683_v60 = vadd.f32 %v1025_v56, %v682_v29 }
 0x12f   : > { %v686_v61 = vadd.f32 %v1028_v59, %v685_v33 }
 0x131   : > { %v957_v62 = vpack.c.bf16 %v686_v61, %v683_v60  ;;  %v1029_v63 = vpop.f32.mrb[28].mxu0 }
 0x132   : > { %v1030_v0 = vpop.f32.mrb[29].mxu0 }
 0x133   : > { %969 = vst [vmem:[%s1287_s14 + $0x30] sm:$0xff] %v957_v62   ;;  %v1031_v1 = vadd.f32 %v1030_v0, %v1029_v63  ;;  %v1032_v2 = vpop.f32.mrb[30].mxu0 }
 0x134   : > { %v1033_v3 = vpop.f32.mrb[31].mxu0 }
 0x135   : > { %v691_v4 = vadd.f32 %v1081_v27, %v1031_v1  ;;  %v1034_v5 = vadd.f32 %v1033_v3, %v1032_v2 }
 0x137   : > { %v694_v6 = vadd.f32 %v1082_v32, %v1034_v5 }
 0x139   : > { %v962_v7 = vpack.c.bf16 %v694_v6, %v691_v4 }
 0x13b   : > { %970 = vst [vmem:[%s1287_s14 + $0x38] sm:$0xff] %v962_v7  }
 0x13c PF: > { %s12_s9 = sadd.s32 1, %s1154_s9  }
 0x13d   : > { %p9_p4 = scmp.ge.s32.totalorder %s12_s9, 4  }
 0x13f   :  { %11 = sbr.rel (!%p9_p4) target bundleno = 1 (0x1), region = 58 }

// kernel: sst_emotion_net_forward.29
= control target key start
LH: loop header
LB: loop body
LE: loop exit
PB: predicated region body
PF: predicated region fallthrough
CT: control target
= control target key end

     0   :  { %s1010_s12 = smov 0   ;;  %s1128_s0 = inlined_call_operand.vmem [shape: bf16[256,256], index: 0, kind: input, shape index: {}]   ;;  %s1129_s1 = inlined_call_operand.vmem [shape: bf16[256,128], index: 1, kind: input, shape index: {}]   ;;  %s1130_s2 = inlined_call_operand.vmem [shape: bf16[2,256], index: 2, kind: input, shape index: {}]   ;;  %s1131_s3 = inlined_call_operand.vmem [shape: bf16[256,128], index: 3, kind: output, shape index: {}]  }
   0x1 LB: > { %s747_s13 = sadd.s32 4294967295, %s986_s12   ;;  %p751_p0 = scmp.ge.s32.totalorder %s986_s12, 1  ;;  %s986_s12 = sphi %s1010_s12, %s13_s12  }
   0x2   : > { %p139_p1 = scmp.lt.s32.totalorder %s986_s12, 3 }
   0x4   : > { %p140_p2 = pnand %p751_p0, %p139_p1 }
   0x5   : > { %v964_v0 = vld [vmem:[%s1129_s1 + $0x40] sm:$0xff] (!%p140_p2)   ;;  %v966_v2 = vld [vmem:[%s1129_s1 + $0x48] sm:$0xff] (!%p140_p2)   ;;  %v968_v4 = vld [vmem:[%s1129_s1 + $0x50] sm:$0xff] (!%p140_p2)   ;;  %s752_s30 = sshll.u32 (!%p140_p2), %s747_s13, 4  ;;  %v207_v9 = vlaneseq (!%p140_p2)  ;;  %v988_v13 = vmov (!%p140_p2), 1966171168  }
   0x6   : > { %143 = sbr.rel (%p140_p2) target bundleno = 282 (0x11a), region = 32  ;;  %v965_v1 = vld [vmem:[%s1129_s1] sm:$0xff] (!%p140_p2)   ;;  %874 = vmatprep.subr.bf16.mxu0 (!%p140_p2), %v964_v0  ;;  %938 = vmatprep.subr.bf16.mxu1 (!%p140_p2), %v964_v0  ;;  %v967_v3 = vld [vmem:[%s1129_s1 + $0x8] sm:$0xff] (!%p140_p2)   ;;  %v969_v5 = vld [vmem:[%s1129_s1 + $0x10] sm:$0xff] (!%p140_p2)   ;;  %p165_p3 = scmp.lt.s32.totalorder (!%p140_p2), %s752_s30, 31  ;;  %v205_v14 = vunpack.c.l.s4 (!%p140_p2), %v988_v13 }
   0x7   : > { %875 = vmatpush3.bf16.msra.mxu0 (!%p140_p2), %v965_v1  ;;  %946 = vmatpush3.bf16.msra.mxu1 (!%p140_p2), %v965_v1  ;;  %v970_v6 = vld [vmem:[%s1129_s1 + $0x58] sm:$0xff] (!%p140_p2)   ;;  %v972_v8 = vld [vmem:[%s1129_s1 + $0x60] sm:$0xff] (!%p140_p2)   ;;  %v974_v11 = vld [vmem:[%s1129_s1 + $0x68] sm:$0xff] (!%p140_p2)   ;;  %v208_v15 = vshrl.u32 (!%p140_p2), %v207_v9, 7 }
   0x8   : > { %876 = vmatprep.subr.bf16.mxu0 (!%p140_p2), %v966_v2  ;;  %939 = vmatprep.subr.bf16.mxu1 (!%p140_p2), %v966_v2  ;;  %v971_v7 = vld [vmem:[%s1129_s1 + $0x18] sm:$0xff] (!%p140_p2)   ;;  %v973_v10 = vld [vmem:[%s1129_s1 + $0x20] sm:$0xff] (!%p140_p2)   ;;  %v975_v16 = vld [vmem:[%s1129_s1 + $0x28] sm:$0xff] (!%p140_p2)   ;;  %v206_v19 = vunpack.c.0.s8 (!%p140_p2), %v205_v14 }
   0x9   : > { %v757_v12 = vld.sshfl [vmem:[%s1130_s2] sm:$0x11 pattern:$0x75316420] (!%p140_p2)  ;;  %v976_v17 = vld [vmem:[%s1129_s1 + $0x70] sm:$0xff] (!%p140_p2)   ;;  %v978_v22 = vld [vmem:[%s1129_s1 + $0x78] sm:$0xff] (!%p140_p2)  }
   0xa   : > { %v203_v18 = vcombine.high (!%p140_p2), %v757_v12, %v757_v12  ;;  %v209_v20 = vsub.s32 (!%p140_p2), %v206_v19, %v208_v15  ;;  %v977_v21 = vld [vmem:[%s1129_s1 + $0x30] sm:$0xff] (!%p140_p2)   ;;  %v223_v25 = vsub.s32 (!%p140_p2), 0, %v208_v15  ;;  %v979_v30 = vld [vmem:[%s1129_s1 + $0x38] sm:$0xff] (!%p140_p2)  }
   0xb   : > { %877 = vmatpush3.bf16.msra.mxu0 (!%p140_p2), %v967_v3  ;;  %947 = vmatpush3.bf16.msra.mxu1 (!%p140_p2), %v967_v3 }
   0xc   : > { %878 = vmatprep.subr.bf16.mxu0 (!%p140_p2), %v968_v4  ;;  %940 = vmatprep.subr.bf16.mxu1 (!%p140_p2), %v968_v4  ;;  %v210_v23 = vrot.slane (!%p140_p2), %v757_v12, %v209_v20  ;;  %v217_v24 = vrot.slane (!%p140_p2), %v203_v18, %v209_v20 }
   0xd   : > { %s1133_s30 = smov (!%p165_p3, %s752_s30), 31 }
   0xe   : > { %s810_s17 = sshll.u32 %s1133_s30, 3  ;;  %v219_v26 = vpack.i.b16 %v210_v23, %v210_v23  ;;  %v226_v27 = vpack.i.b16 %v217_v24, %v217_v24  ;;  %v254_v28 = vshrl.u32 %v210_v23, 16  ;;  %v261_v29 = vshrl.u32 %v217_v24, 16  ;;  %s756_s27 = sshll.u32 %s1133_s30, 2 }
   0xf   : > { %879 = vmatpush3.bf16.msra.mxu0 %v969_v5  ;;  %948 = vmatpush3.bf16.msra.mxu1 %v969_v5  ;;  %s1072_s24 = scalar_lea.vmem %s1128_s0, %s810_s17  ;;  %v989_v5 = vmov 0   ;;  %s1115_s4 = scalar_lea.vmem %s1131_s3, %s756_s27 }
  0x10   : > { %880 = vmatprep.subr.bf16.mxu0 %v970_v6  ;;  %941 = vmatprep.subr.bf16.mxu1 %v970_v6  ;;  %v178_v31 = vld [vmem:[%s1072_s24] sm:$0xff]  ;;  %v179_v32 = vld [vmem:[%s1072_s24 + $0x8] sm:$0xff]  ;;  %v224_v33 = vrot.slane %v219_v26, %v223_v25  ;;  %v231_v34 = vrot.slane %v226_v27, %v223_v25  ;;  %v255_v35 = vpack.i.b16 %v254_v28, %v254_v28  ;;  %v180_v39 = vld [vmem:[%s1072_s24 + $0x10] sm:$0xff] }
  0x11   : > { %v262_v36 = vpack.i.b16 %v261_v29, %v261_v29  ;;  %v186_v37 = vld [vmem:[%s1072_s24 + $0x40] sm:$0xff]  ;;  %v187_v38 = vld [vmem:[%s1072_s24 + $0x48] sm:$0xff]  ;;  %v181_v42 = vld [vmem:[%s1072_s24 + $0x18] sm:$0xff] }
  0x12   : > { %v1082_v40 = vcombine.low %v224_v33, %v231_v34  ;;  %v260_v41 = vrot.slane %v255_v35, %v223_v25  ;;  %v188_v43 = vld [vmem:[%s1072_s24 + $0x50] sm:$0xff]  ;;  %v189_v44 = vld [vmem:[%s1072_s24 + $0x58] sm:$0xff]  ;;  %v182_v46 = vld [vmem:[%s1072_s24 + $0x20] sm:$0xff] }
  0x13   : > { %881 = vmatpush3.bf16.msra.mxu0 %v971_v7  ;;  %949 = vmatpush3.bf16.msra.mxu1 %v971_v7  ;;  %v267_v45 = vrot.slane %v262_v36, %v223_v25  ;;  %v183_v47 = vld [vmem:[%s1072_s24 + $0x28] sm:$0xff]  ;;  %v190_v48 = vld [vmem:[%s1072_s24 + $0x60] sm:$0xff]  ;;  %v184_v19 = vld [vmem:[%s1072_s24 + $0x30] sm:$0xff] }
  0x14   : > { %882 = vmatprep.subr.bf16.mxu0 %v972_v8  ;;  %942 = vmatprep.subr.bf16.mxu1 %v972_v8  ;;  %v238_v49 = vmul.bf16 %v1082_v40, %v178_v31  ;;  %v239_v50 = vmul.bf16 %v1082_v40, %v179_v32  ;;  %v246_v51 = vmul.bf16 %v1082_v40, %v186_v37  ;;  %v191_v14 = vld [vmem:[%s1072_s24 + $0x68] sm:$0xff]  ;;  %v185_v20 = vld [vmem:[%s1072_s24 + $0x38] sm:$0xff]  ;;  %v192_v26 = vld [vmem:[%s1072_s24 + $0x70] sm:$0xff] }
  0x15   : > { %v247_v52 = vmul.bf16 %v1082_v40, %v187_v38  ;;  %v759_v53 = vcombine.low %v260_v41, %v267_v45  ;;  %v240_v54 = vmul.bf16 %v1082_v40, %v180_v39  ;;  %v241_v55 = vmul.bf16 %v1082_v40, %v181_v42 }
  0x16   : > { %v248_v56 = vmul.bf16 %v1082_v40, %v188_v43  ;;  %v249_v57 = vmul.bf16 %v1082_v40, %v189_v44  ;;  %v242_v58 = vmul.bf16 %v1082_v40, %v182_v46  ;;  %v243_v59 = vmul.bf16 %v1082_v40, %v183_v47 }
  0x17   : > { %883 = vmatpush3.bf16.msra.mxu0 %v973_v10  ;;  %950 = vmatpush3.bf16.msra.mxu1 %v973_v10  ;;  %v250_v60 = vmul.bf16 %v1082_v40, %v190_v48  ;;  %v274_v61 = vadd.bf16 %v759_v53, %v238_v49  ;;  %v275_v62 = vadd.bf16 %v759_v53, %v239_v50 }
  0x18   : > { %884 = vmatprep.subr.bf16.mxu0 %v974_v11  ;;  %943 = vmatprep.subr.bf16.mxu1 %v974_v11  ;;  %v282_v63 = vadd.bf16 %v759_v53, %v246_v51  ;;  %v283_v0 = vadd.bf16 %v759_v53, %v247_v52  ;;  %v276_v1 = vadd.bf16 %v759_v53, %v240_v54 }
  0x19   : > { %v277_v2 = vadd.bf16 %v759_v53, %v241_v55  ;;  %v284_v3 = vadd.bf16 %v759_v53, %v248_v56  ;;  %v285_v4 = vadd.bf16 %v759_v53, %v249_v57  ;;  %v290_v6 = vmax.bf16 %v989_v5, %v274_v61 }
  0x1a   : > { %v291_v7 = vmax.bf16 %v989_v5, %v275_v62  ;;  %v298_v8 = vmax.bf16 %v989_v5, %v282_v63  ;;  %v299_v9 = vmax.bf16 %v989_v5, %v283_v0  ;;  %v292_v10 = vmax.bf16 %v989_v5, %v276_v1 }
  0x1b   : > { %885 = vmatpush3.bf16.msra.mxu0 %v975_v16  ;;  %951 = vmatpush3.bf16.msra.mxu1 %v975_v16  ;;  %v293_v11 = vmax.bf16 %v989_v5, %v277_v2  ;;  %v300_v12 = vmax.bf16 %v989_v5, %v284_v3  ;;  %v301_v13 = vmax.bf16 %v989_v5, %v285_v4 }
  0x1c   : > { %886 = vmatprep.subr.bf16.mxu0 %v976_v17  ;;  %944 = vmatprep.subr.bf16.mxu1 %v976_v17  ;;  %v761_v15 = vcombine.high %v290_v6, %v291_v7  ;;  %v769_v16 = vcombine.high %v298_v8, %v299_v9  ;;  %v760_v17 = vcombine.low %v290_v6, %v291_v7 }
  0x1d   : > { %v768_v18 = vcombine.low %v298_v8, %v299_v9  ;;  %v278_v23 = vadd.bf16 %v759_v53, %v242_v58  ;;  %v279_v24 = vadd.bf16 %v759_v53, %v243_v59  ;;  %v251_v25 = vmul.bf16 %v1082_v40, %v191_v14 }
  0x1e   : > { %546 = vmatprep.mubr.bf16.mxu0 %v761_v15  ;;  %578 = vmatprep.mubr.bf16.mxu1 %v769_v16  ;;  %v286_v27 = vadd.bf16 %v759_v53, %v250_v60  ;;  %v244_v28 = vmul.bf16 %v1082_v40, %v184_v19  ;;  %v245_v29 = vmul.bf16 %v1082_v40, %v185_v20 }
  0x1f   : > { %887 = vmatpush3.bf16.msra.mxu0 %v977_v21  ;;  %952 = vmatpush3.bf16.msra.mxu1 %v977_v21  ;;  %v763_v21 = vcombine.high %v292_v10, %v293_v11  ;;  %v294_v31 = vmax.bf16 %v989_v5, %v278_v23  ;;  %v295_v32 = vmax.bf16 %v989_v5, %v279_v24 }
  0x20   : > { %888 = vmatprep.subr.bf16.mxu0 %v978_v22  ;;  %945 = vmatprep.subr.bf16.mxu1 %v978_v22  ;;  %v771_v22 = vcombine.high %v300_v12, %v301_v13  ;;  %v287_v33 = vadd.bf16 %v759_v53, %v251_v25  ;;  %v302_v34 = vmax.bf16 %v989_v5, %v286_v27 }
  0x21   : > { %v252_v35 = vmul.bf16 %v1082_v40, %v192_v26  ;;  %v762_v38 = vcombine.low %v292_v10, %v293_v11  ;;  %v770_v39 = vcombine.low %v300_v12, %v301_v13  ;;  %v280_v41 = vadd.bf16 %v759_v53, %v244_v28 }
  0x22   : > { %v303_v36 = vmax.bf16 %v989_v5, %v287_v33  ;;  %v281_v42 = vadd.bf16 %v759_v53, %v245_v29  ;;  %v765_v43 = vcombine.high %v294_v31, %v295_v32  ;;  %v764_v51 = vcombine.low %v294_v31, %v295_v32 }
  0x23   : > { %889 = vmatpush3.bf16.msra.mxu0 %v979_v30  ;;  %953 = vmatpush3.bf16.msra.mxu1 %v979_v30  ;;  %v193_v30 = vld [vmem:[%s1072_s24 + $0x78] sm:$0xff]  ;;  %v288_v45 = vadd.bf16 %v759_v53, %v252_v35  ;;  %v296_v47 = vmax.bf16 %v989_v5, %v280_v41 }
  0x24   : > { %v253_v37 = vmul.bf16 %v1082_v40, %v193_v30  ;;  %v773_v44 = vcombine.high %v302_v34, %v303_v36  ;;  %v297_v48 = vmax.bf16 %v989_v5, %v281_v42  ;;  %v772_v52 = vcombine.low %v302_v34, %v303_v36 }
  0x25   : > { %v304_v49 = vmax.bf16 %v989_v5, %v288_v45 }
  0x26   : > { %547 = vmatmul.mubr.bf16.vlgmr.msra.gmra.mrb[0].mxu0 %v760_v17  ;;  %579 = vmatmul.mubr.bf16.vlgmr.msra.gmra.mrb[0].mxu1 %v768_v18  ;;  %v289_v46 = vadd.bf16 %v759_v53, %v253_v37  ;;  %v767_v54 = vcombine.high %v296_v47, %v297_v48  ;;  %v766_v55 = vcombine.low %v296_v47, %v297_v48 }
  0x27   : > { %554 = vmatprep.mubr.bf16.mxu0 %v763_v21  ;;  %586 = vmatprep.mubr.bf16.mxu1 %v771_v22 }
  0x28   : > { %v305_v50 = vmax.bf16 %v989_v5, %v289_v46 }
  0x2a   : > { %v775_v40 = vcombine.high %v304_v49, %v305_v50  ;;  %v774_v56 = vcombine.low %v304_v49, %v305_v50 }
  0x2e   : > { %555 = vmatmul.mubr.bf16.gmra.mrb[4].mxu0 %v762_v38  ;;  %587 = vmatmul.mubr.bf16.gmra.mrb[4].mxu1 %v770_v39 }
  0x2f   : > { %562 = vmatprep.mubr.bf16.mxu0 %v765_v43  ;;  %594 = vmatprep.mubr.bf16.mxu1 %v773_v44 }
  0x36   : > { %563 = vmatmul.mubr.bf16.gmra.mrb[8].mxu0 %v764_v51  ;;  %595 = vmatmul.mubr.bf16.gmra.mrb[8].mxu1 %v772_v52 }
  0x37   : > { %570 = vmatprep.mubr.bf16.mxu0 %v767_v54  ;;  %602 = vmatprep.mubr.bf16.mxu1 %v775_v40 }
  0x3e   : > { %571 = vmatmul.mubr.bf16.gmra.mrb[12].mxu0 %v766_v55  ;;  %603 = vmatmul.mubr.bf16.gmra.mrb[12].mxu1 %v774_v56 }
  0xf9   : > { %v890_v53 = vpop.f32.mrb[0].mxu0  ;;  %v914_v57 = vpop.f32.mrb[0].mxu1 }
  0xfa   : > { %v891_v58 = vpop.f32.mrb[1].mxu0  ;;  %v915_v59 = vpop.f32.mrb[1].mxu1 }
  0xfb   : > { %v892_v60 = vadd.f32 %v891_v58, %v890_v53  ;;  %v916_v61 = vadd.f32 %v915_v59, %v914_v57  ;;  %v893_v62 = vpop.f32.mrb[2].mxu0  ;;  %v917_v63 = vpop.f32.mrb[2].mxu1 }
  0xfc   : > { %v894_v0 = vpop.f32.mrb[3].mxu0  ;;  %v918_v1 = vpop.f32.mrb[3].mxu1 }
  0xfd   : > { %v895_v2 = vadd.f32 %v894_v0, %v893_v62  ;;  %v919_v3 = vadd.f32 %v918_v1, %v917_v63 }
  0xff   : > { %v830_v4 = vpack.c.bf16 %v895_v2, %v892_v60  ;;  %v850_v5 = vpack.c.bf16 %v919_v3, %v916_v61 }
 0x101   : > { %831 = vst [vmem:[%s1115_s4] sm:$0xff] %v830_v4   ;;  %870 = vst [vmem:[%s1115_s4 + $0x20] sm:$0xff] %v850_v5   ;;  %v896_v6 = vpop.f32.mrb[4].mxu0  ;;  %v920_v7 = vpop.f32.mrb[4].mxu1 }
 0x102   : > { %v897_v8 = vpop.f32.mrb[5].mxu0  ;;  %v921_v9 = vpop.f32.mrb[5].mxu1 }
 0x103   : > { %v898_v10 = vadd.f32 %v897_v8, %v896_v6  ;;  %v922_v11 = vadd.f32 %v921_v9, %v920_v7  ;;  %v899_v12 = vpop.f32.mrb[6].mxu0  ;;  %v923_v13 = vpop.f32.mrb[6].mxu1 }
 0x104   : > { %v900_v14 = vpop.f32.mrb[7].mxu0  ;;  %v924_v15 = vpop.f32.mrb[7].mxu1 }
 0x105   : > { %v901_v16 = vadd.f32 %v900_v14, %v899_v12  ;;  %v925_v17 = vadd.f32 %v924_v15, %v923_v13 }
 0x107   : > { %v835_v18 = vpack.c.bf16 %v901_v16, %v898_v10  ;;  %v855_v19 = vpack.c.bf16 %v925_v17, %v922_v11 }
 0x109   : > { %867 = vst [vmem:[%s1115_s4 + $0x8] sm:$0xff] %v835_v18   ;;  %871 = vst [vmem:[%s1115_s4 + $0x28] sm:$0xff] %v855_v19   ;;  %v902_v20 = vpop.f32.mrb[8].mxu0  ;;  %v926_v21 = vpop.f32.mrb[8].mxu1 }
 0x10a   : > { %v903_v22 = vpop.f32.mrb[9].mxu0  ;;  %v927_v23 = vpop.f32.mrb[9].mxu1 }
 0x10b   : > { %v904_v24 = vadd.f32 %v903_v22, %v902_v20  ;;  %v928_v25 = vadd.f32 %v927_v23, %v926_v21  ;;  %v905_v26 = vpop.f32.mrb[10].mxu0  ;;  %v929_v27 = vpop.f32.mrb[10].mxu1 }
 0x10c   : > { %v906_v28 = vpop.f32.mrb[11].mxu0  ;;  %v930_v29 = vpop.f32.mrb[11].mxu1 }
 0x10d   : > { %v907_v30 = vadd.f32 %v906_v28, %v905_v26  ;;  %v931_v31 = vadd.f32 %v930_v29, %v929_v27 }
 0x10f   : > { %v840_v32 = vpack.c.bf16 %v907_v30, %v904_v24  ;;  %v860_v33 = vpack.c.bf16 %v931_v31, %v928_v25 }
 0x111   : > { %868 = vst [vmem:[%s1115_s4 + $0x10] sm:$0xff] %v840_v32   ;;  %872 = vst [vmem:[%s1115_s4 + $0x30] sm:$0xff] %v860_v33   ;;  %v908_v34 = vpop.f32.mrb[12].mxu0  ;;  %v932_v35 = vpop.f32.mrb[12].mxu1 }
 0x112   : > { %v909_v36 = vpop.f32.mrb[13].mxu0  ;;  %v933_v37 = vpop.f32.mrb[13].mxu1 }
 0x113   : > { %v910_v38 = vadd.f32 %v909_v36, %v908_v34  ;;  %v934_v39 = vadd.f32 %v933_v37, %v932_v35  ;;  %v911_v41 = vpop.f32.mrb[14].mxu0  ;;  %v935_v42 = vpop.f32.mrb[14].mxu1 }
 0x114   : > { %v912_v43 = vpop.f32.mrb[15].mxu0  ;;  %v936_v44 = vpop.f32.mrb[15].mxu1 }
 0x115   : > { %v913_v45 = vadd.f32 %v912_v43, %v911_v41  ;;  %v937_v46 = vadd.f32 %v936_v44, %v935_v42 }
 0x117   : > { %v845_v47 = vpack.c.bf16 %v913_v45, %v910_v38  ;;  %v865_v48 = vpack.c.bf16 %v937_v46, %v934_v39 }
 0x119   : > { %869 = vst [vmem:[%s1115_s4 + $0x18] sm:$0xff] %v845_v47   ;;  %873 = vst [vmem:[%s1115_s4 + $0x38] sm:$0xff] %v865_v48  }
 0x11a PF: > { %s13_s12 = sadd.s32 1, %s986_s12  }
 0x11b   : > { %p10_p4 = scmp.ge.s32.totalorder %s13_s12, 4  }
 0x11d   :  { %12 = sbr.rel (!%p10_p4) target bundleno = 1 (0x1), region = 62 }

// kernel: sst_emotion_net_forward.30
= control target key start
LH: loop header
LB: loop body
LE: loop exit
PB: predicated region body
PF: predicated region fallthrough
CT: control target
= control target key end

     0   :  { %v26_v0 = vlaneseq  ;;  %v297_v27 = vmov 0   ;;  %s371_s1 = inlined_call_operand.vmem [shape: bf16[128,128], index: 1, kind: input, shape index: {}]   ;;  %s372_s2 = inlined_call_operand.vmem [shape: bf16[2,128], index: 2, kind: input, shape index: {}]   ;;  %s373_s0 = inlined_call_operand.vmem [shape: bf16[32,128], index: 0, kind: input, shape index: {}]   ;;  %s374_s3 = inlined_call_operand.vmem [shape: f32[2,128], index: 3, kind: input, shape index: {}]   ;;  %s375_s4 = inlined_call_operand.vmem [shape: bf16[32,128], index: 4, kind: output, shape index: {}]  }
   0x1   :  { %v289_v1 = vld [vmem:[%s371_s1] sm:$0xff]   ;;  %v290_v2 = vld [vmem:[%s371_s1 + $0x8] sm:$0xff]   ;;  %v291_v4 = vld [vmem:[%s371_s1 + $0x10] sm:$0xff]  }
   0x2   :  { %268 = vmatprep.subr.bf16.mxu0 %v289_v1  ;;  %v27_v3 = vshrl.u32 %v26_v0, 7  ;;  %v292_v6 = vld [vmem:[%s371_s1 + $0x18] sm:$0xff]   ;;  %v22_v7 = vld [vmem:[%s372_s2] sm:$0x1]  ;;  %v19_v14 = vld [vmem:[%s373_s0 + $0x4] sm:$0xf] }
   0x3   :  { %269 = vmatpush3.bf16.msra.mxu0 %v289_v1  ;;  %v24_v8 = vpack.i.b16 %v22_v7, %v22_v7  ;;  %v38_v9 = vshrl.u32 %v22_v7, 16  ;;  %v293_v12 = vld [vmem:[%s371_s1 + $0x20] sm:$0xff]   ;;  %v20_v20 = vld [vmem:[%s373_s0 + $0x8] sm:$0xf]  ;;  %v21_v21 = vld [vmem:[%s373_s0 + $0xc] sm:$0xf] }
   0x4   :  { %270 = vmatprep.subr.bf16.mxu0 %v290_v2  ;;  %v28_v5 = vsub.s32 0, %v27_v3  ;;  %v18_v13 = vld [vmem:[%s373_s0] sm:$0xf]  ;;  %v294_v22 = vld [vmem:[%s371_s1 + $0x28] sm:$0xff]   ;;  %v295_v30 = vld [vmem:[%s371_s1 + $0x30] sm:$0xff]   ;;  %v193_v39 = vsub.s32 1, %v27_v3 }
   0x5   :  { %v39_v11 = vpack.i.b16 %v38_v9, %v38_v9  ;;  %v296_v34 = vld [vmem:[%s371_s1 + $0x38] sm:$0xff]   ;;  %v182_v38 = vld [vmem:[%s374_s3] sm:$0x3] }
   0x6   :  { %v29_v10 = vrot.slane %v24_v8, %v28_v5  ;;  %v186_v40 = vrot.slane %v182_v38, %v28_v5  ;;  %v194_v41 = vrot.slane %v182_v38, %v193_v39 }
   0x7   :  { %271 = vmatpush3.bf16.msra.mxu0 %v290_v2  ;;  %v44_v16 = vrot.slane %v39_v11, %v28_v5 }
   0x8   :  { %272 = vmatprep.subr.bf16.mxu0 %v291_v4  ;;  %v227_v15 = vcombine.low %v29_v10, %v29_v10 }
   0x9   :  { %v228_v19 = vcombine.low %v44_v16, %v44_v16 }
   0xa   :  { %v34_v17 = vmul.bf16 %v227_v15, %v18_v13  ;;  %v35_v18 = vmul.bf16 %v227_v15, %v19_v14  ;;  %v36_v25 = vmul.bf16 %v227_v15, %v20_v20  ;;  %v37_v26 = vmul.bf16 %v227_v15, %v21_v21 }
   0xb   :  { %273 = vmatpush3.bf16.msra.mxu0 %v291_v4 }
   0xc   :  { %274 = vmatprep.subr.bf16.mxu0 %v292_v6  ;;  %v49_v23 = vadd.bf16 %v228_v19, %v34_v17  ;;  %v50_v24 = vadd.bf16 %v228_v19, %v35_v18  ;;  %v51_v32 = vadd.bf16 %v228_v19, %v36_v25  ;;  %v52_v33 = vadd.bf16 %v228_v19, %v37_v26 }
   0xe   :  { %v53_v28 = vmax.bf16 %v297_v27, %v49_v23  ;;  %v54_v29 = vmax.bf16 %v297_v27, %v50_v24  ;;  %v55_v35 = vmax.bf16 %v297_v27, %v51_v32  ;;  %v56_v36 = vmax.bf16 %v297_v27, %v52_v33 }
   0xf   :  { %275 = vmatpush3.bf16.msra.mxu0 %v292_v6 }
  0x10   :  { %276 = vmatprep.subr.bf16.mxu0 %v293_v12  ;;  %v229_v31 = vcombine.low %v53_v28, %v54_v29  ;;  %v230_v37 = vcombine.low %v55_v35, %v56_v36 }
  0x12   :  { %284 = vmatprep.mubr.bf16.mxu0 %v229_v31 }
  0x13   :  { %277 = vmatpush3.bf16.msra.mxu0 %v293_v12 }
  0x14   :  { %278 = vmatprep.subr.bf16.mxu0 %v294_v22 }
  0x17   :  { %279 = vmatpush3.bf16.msra.mxu0 %v294_v22 }
  0x18   :  { %280 = vmatprep.subr.bf16.mxu0 %v295_v30 }
  0x1b   :  { %281 = vmatpush3.bf16.msra.mxu0 %v295_v30 }
  0x1c   :  { %282 = vmatprep.subr.bf16.mxu0 %v296_v34 }
  0x1f   :  { %283 = vmatpush3.bf16.msra.mxu0 %v296_v34 }
  0x22   :  { %285 = vmatmul.mubr.bf16.vlgmr.msra.gmra.mrb[0].mxu0 %v230_v37 }
  0xf5   :  { %v286_v42 = vpop.f32.mrb[0].mxu0 }
  0xf6   :  { %v189_v43 = vmul.f32 %v286_v42, %v186_v40  ;;  %v167_v44 = vpop.f32.mrb[1].mxu0 }
  0xf7   :  { %v187_v45 = vmul.f32 %v186_v40, %v167_v44  ;;  %v287_v46 = vpop.f32.mrb[2].mxu0 }
  0xf8   :  { %v197_v47 = vadd.f32 %v194_v41, %v189_v43  ;;  %v190_v48 = vmul.f32 %v287_v46, %v186_v40  ;;  %v170_v49 = vpop.f32.mrb[3].mxu0 }
  0xf9   :  { %v195_v50 = vadd.f32 %v194_v41, %v187_v45  ;;  %v188_v51 = vmul.f32 %v186_v40, %v170_v49 }
  0xfa   :  { %v198_v52 = vadd.f32 %v194_v41, %v190_v48  ;;  %v201_v54 = vmax.f32 %v197_v47, 0.0 }
  0xfb   :  { %v196_v53 = vadd.f32 %v194_v41, %v188_v51  ;;  %v199_v56 = vmax.f32 %v195_v50, 0.0 }
  0xfc   :  { %v202_v55 = vmax.f32 %v198_v52, 0.0 }
  0xfd   :  { %v200_v57 = vmax.f32 %v196_v53, 0.0 }
  0xfe   :  { %v255_v58 = vpack.c.bf16 %v202_v55, %v201_v54 }
  0xff   :  { %v250_v59 = vpack.c.bf16 %v200_v57, %v199_v56 }
 0x100   :  { %257 = vst [vmem:[%s375_s4 + $0x8] sm:$0xff] %v255_v58  }
 0x101   :  { %251 = vst [vmem:[%s375_s4] sm:$0xff] %v250_v59  }

// kernel: sst_emotion_net_forward.31
= control target key start
LH: loop header
LB: loop body
LE: loop exit
PB: predicated region body
PF: predicated region fallthrough
CT: control target
= control target key end

     0   :  { %s1609_s1 = inlined_call_operand.vmem [shape: bf16[1152,128], index: 1, kind: input, shape index: {}]   ;;  %s1610_s0 = inlined_call_operand.vmem [shape: bf16[32,1152], index: 0, kind: input, shape index: {}]   ;;  %s1611_s2 = inlined_call_operand.vmem [shape: bf16[32,128], index: 2, kind: output, shape index: {}]  }
   0x1   :  { %v1220_v0 = vld [vmem:[%s1609_s1 + $0x40] sm:$0xff]   ;;  %v1224_v4 = vld [vmem:[%s1609_s1 + $0x48] sm:$0xff]   ;;  %v1228_v8 = vld [vmem:[%s1609_s1 + $0x50] sm:$0xff]  }
   0x2   :  { %v1221_v1 = vld [vmem:[%s1609_s1 + $0xc0] sm:$0xff]   ;;  %1078 = vmatprep.subr.bf16.mxu0 %v1220_v0  ;;  %v1225_v5 = vld [vmem:[%s1609_s1 + $0xc8] sm:$0xff]   ;;  %v1229_v9 = vld [vmem:[%s1609_s1 + $0xd0] sm:$0xff]  }
   0x3   :  { %v1222_v2 = vld [vmem:[%s1609_s1] sm:$0xff]   ;;  %1106 = vmatprep.subr.bf16.mxu1 %v1221_v1  ;;  %v1226_v6 = vld [vmem:[%s1609_s1 + $0x8] sm:$0xff]   ;;  %v1230_v10 = vld [vmem:[%s1609_s1 + $0x10] sm:$0xff]  }
   0x4   :  { %v1223_v3 = vld [vmem:[%s1609_s1 + $0x80] sm:$0xff]   ;;  %1079 = vmatpush3.bf16.msra.mxu0 %v1222_v2  ;;  %v1227_v7 = vld [vmem:[%s1609_s1 + $0x88] sm:$0xff]   ;;  %v1231_v11 = vld [vmem:[%s1609_s1 + $0x90] sm:$0xff]  }
   0x5   :  { %1107 = vmatpush3.bf16.msra.mxu1 %v1223_v3  ;;  %1080 = vmatprep.subr.bf16.mxu0 %v1224_v4  ;;  %v1232_v12 = vld [vmem:[%s1609_s1 + $0x58] sm:$0xff]   ;;  %v1236_v16 = vld [vmem:[%s1609_s1 + $0x60] sm:$0xff]   ;;  %v1240_v20 = vld [vmem:[%s1609_s1 + $0x68] sm:$0xff]  }
   0x6   :  { %1108 = vmatprep.subr.bf16.mxu1 %v1225_v5  ;;  %v1233_v13 = vld [vmem:[%s1609_s1 + $0xd8] sm:$0xff]   ;;  %v1237_v17 = vld [vmem:[%s1609_s1 + $0xe0] sm:$0xff]   ;;  %v1241_v21 = vld [vmem:[%s1609_s1 + $0xe8] sm:$0xff]  }
   0x7   :  { %v1234_v14 = vld [vmem:[%s1609_s1 + $0x18] sm:$0xff]   ;;  %v1238_v18 = vld [vmem:[%s1609_s1 + $0x20] sm:$0xff]   ;;  %v1242_v22 = vld [vmem:[%s1609_s1 + $0x28] sm:$0xff]  }
   0x8   :  { %1081 = vmatpush3.bf16.msra.mxu0 %v1226_v6  ;;  %v1235_v15 = vld [vmem:[%s1609_s1 + $0x98] sm:$0xff]   ;;  %v1239_v19 = vld [vmem:[%s1609_s1 + $0xa0] sm:$0xff]   ;;  %v1243_v23 = vld [vmem:[%s1609_s1 + $0xa8] sm:$0xff]  }
   0x9   :  { %1109 = vmatpush3.bf16.msra.mxu1 %v1227_v7  ;;  %1082 = vmatprep.subr.bf16.mxu0 %v1228_v8  ;;  %v1244_v24 = vld [vmem:[%s1609_s1 + $0x70] sm:$0xff]   ;;  %v1248_v28 = vld [vmem:[%s1609_s1 + $0x78] sm:$0xff]   ;;  %v1252_v32 = vld [vmem:[%s1610_s0] ss:$36 sps:$4 sm:$0xff]  }
   0xa   :  { %1110 = vmatprep.subr.bf16.mxu1 %v1229_v9  ;;  %v1245_v25 = vld [vmem:[%s1609_s1 + $0xf0] sm:$0xff]   ;;  %v1249_v29 = vld [vmem:[%s1609_s1 + $0xf8] sm:$0xff]   ;;  %v1254_v33 = vld [vmem:[%s1610_s0 + $0x4] ss:$36 sps:$4 sm:$0xff]  }
   0xb   :  { %v1246_v26 = vld [vmem:[%s1609_s1 + $0x30] sm:$0xff]   ;;  %v1250_v30 = vld [vmem:[%s1609_s1 + $0x38] sm:$0xff]   ;;  %v1255_v34 = vld [vmem:[%s1610_s0 + $0x8] ss:$36 sps:$4 sm:$0xff]   ;;  %732 = vmatprep.mubr.bf16.mxu0 %v1254_v33 }
   0xc   :  { %1083 = vmatpush3.bf16.msra.mxu0 %v1230_v10  ;;  %v1247_v27 = vld [vmem:[%s1609_s1 + $0xb0] sm:$0xff]   ;;  %v1251_v31 = vld [vmem:[%s1609_s1 + $0xb8] sm:$0xff]   ;;  %v1258_v36 = vld [vmem:[%s1609_s1 + $0x140] sm:$0xff]  }
   0xd   :  { %1111 = vmatpush3.bf16.msra.mxu1 %v1231_v11  ;;  %1084 = vmatprep.subr.bf16.mxu0 %v1232_v12  ;;  %v1257_v35 = vld [vmem:[%s1610_s0 + $0xc] ss:$36 sps:$4 sm:$0xff]   ;;  %v1259_v37 = vld [vmem:[%s1609_s1 + $0x100] sm:$0xff]   ;;  %v1270_v48 = vld [vmem:[%s1609_s1 + $0x158] sm:$0xff]  }
   0xe   :  { %1112 = vmatprep.subr.bf16.mxu1 %v1233_v13  ;;  %781 = vmatprep.mubr.bf16.mxu1 %v1257_v35  ;;  %v1260_v38 = vld [vmem:[%s1609_s1 + $0x1c0] sm:$0xff]   ;;  %v1262_v40 = vld [vmem:[%s1609_s1 + $0x148] sm:$0xff]   ;;  %v1266_v44 = vld [vmem:[%s1609_s1 + $0x150] sm:$0xff]  }
   0xf   :  { %v1261_v39 = vld [vmem:[%s1609_s1 + $0x180] sm:$0xff]   ;;  %v1263_v41 = vld [vmem:[%s1609_s1 + $0x108] sm:$0xff]   ;;  %v1267_v45 = vld [vmem:[%s1609_s1 + $0x110] sm:$0xff]  }
  0x10   :  { %1085 = vmatpush3.bf16.msra.mxu0 %v1234_v14  ;;  %v1264_v42 = vld [vmem:[%s1609_s1 + $0x1c8] sm:$0xff]   ;;  %v1268_v46 = vld [vmem:[%s1609_s1 + $0x1d0] sm:$0xff]   ;;  %v1271_v49 = vld [vmem:[%s1609_s1 + $0x118] sm:$0xff]  }
  0x11   :  { %1113 = vmatpush3.bf16.msra.mxu1 %v1235_v15  ;;  %1086 = vmatprep.subr.bf16.mxu0 %v1236_v16  ;;  %v1265_v43 = vld [vmem:[%s1609_s1 + $0x188] sm:$0xff]   ;;  %v1269_v47 = vld [vmem:[%s1609_s1 + $0x190] sm:$0xff]   ;;  %v1272_v50 = vld [vmem:[%s1609_s1 + $0x1d8] sm:$0xff]  }
  0x12   :  { %1114 = vmatprep.subr.bf16.mxu1 %v1237_v17  ;;  %v1273_v51 = vld [vmem:[%s1609_s1 + $0x198] sm:$0xff]   ;;  %v1274_v52 = vld [vmem:[%s1609_s1 + $0x160] sm:$0xff]   ;;  %v1278_v56 = vld [vmem:[%s1609_s1 + $0x168] sm:$0xff]  }
  0x13   :  { %v1275_v53 = vld [vmem:[%s1609_s1 + $0x120] sm:$0xff]   ;;  %v1279_v57 = vld [vmem:[%s1610_s0 + $0x4c] ss:$36 sps:$4 sm:$0xff]   ;;  %v1281_v58 = vld [vmem:[%s1610_s0 + $0x54] ss:$36 sps:$4 sm:$0xff]  }
  0x14   :  { %1087 = vmatpush3.bf16.msra.mxu0 %v1238_v18  ;;  %v1276_v54 = vld [vmem:[%s1609_s1 + $0x1e0] sm:$0xff]   ;;  %v1283_v59 = vld [vmem:[%s1609_s1 + $0x128] sm:$0xff]   ;;  %v1285_v61 = vld [vmem:[%s1610_s0 + $0x50] ss:$36 sps:$4 sm:$0xff]  }
  0x15   :  { %1115 = vmatpush3.bf16.msra.mxu1 %v1239_v19  ;;  %1088 = vmatprep.subr.bf16.mxu0 %v1240_v20  ;;  %v1277_v55 = vld [vmem:[%s1609_s1 + $0x1a0] sm:$0xff]   ;;  %v1284_v60 = vld [vmem:[%s1610_s0 + $0x48] ss:$36 sps:$4 sm:$0xff]   ;;  %v1288_v0 = vld [vmem:[%s1609_s1 + $0x170] sm:$0xff]  }
  0x16   :  { %1116 = vmatprep.subr.bf16.mxu1 %v1241_v21  ;;  %v1286_v62 = vld [vmem:[%s1609_s1 + $0x1e8] sm:$0xff]   ;;  %v1289_v1 = vld [vmem:[%s1609_s1 + $0x130] sm:$0xff]   ;;  %v1292_v4 = vld [vmem:[%s1609_s1 + $0x178] sm:$0xff]  }
  0x17   :  { %v1287_v63 = vld [vmem:[%s1609_s1 + $0x1a8] sm:$0xff]   ;;  %v1290_v2 = vld [vmem:[%s1609_s1 + $0x1f0] sm:$0xff]   ;;  %v1293_v5 = vld [vmem:[%s1609_s1 + $0x138] sm:$0xff]  }
  0x18   :  { %1089 = vmatpush3.bf16.msra.mxu0 %v1242_v22  ;;  %v1291_v3 = vld [vmem:[%s1609_s1 + $0x1b0] sm:$0xff]   ;;  %v1294_v6 = vld [vmem:[%s1609_s1 + $0x1f8] sm:$0xff]   ;;  %v1299_v10 = vld [vmem:[%s1609_s1 + $0x200] sm:$0xff]  }
  0x19   :  { %1117 = vmatpush3.bf16.msra.mxu1 %v1243_v23  ;;  %1090 = vmatprep.subr.bf16.mxu0 %v1244_v24  ;;  %v1295_v7 = vld [vmem:[%s1610_s0 + $0x10] ss:$36 sps:$4 sm:$0xff]   ;;  %v1298_v9 = vld [vmem:[%s1609_s1 + $0x1b8] sm:$0xff]   ;;  %v1303_v13 = vld [vmem:[%s1609_s1 + $0x208] sm:$0xff]  }
  0x1a   :  { %1118 = vmatprep.subr.bf16.mxu1 %v1245_v25  ;;  %v1297_v8 = vld [vmem:[%s1610_s0 + $0x14] ss:$36 sps:$4 sm:$0xff]   ;;  %v1302_v12 = vld [vmem:[%s1610_s0 + $0x1c] ss:$36 sps:$4 sm:$0xff]   ;;  %v1308_v17 = vld [vmem:[%s1610_s0 + $0x64] ss:$36 sps:$4 sm:$0xff]  }
  0x1b   :  { %v1300_v11 = vld [vmem:[%s1610_s0 + $0x18] ss:$36 sps:$4 sm:$0xff]   ;;  %v1307_v16 = vld [vmem:[%s1609_s1 + $0x210] sm:$0xff]   ;;  %v1310_v18 = vld [vmem:[%s1610_s0 + $0x60] ss:$36 sps:$4 sm:$0xff]  }
  0x1c   :  { %1091 = vmatpush3.bf16.msra.mxu0 %v1246_v26  ;;  %v1304_v14 = vld [vmem:[%s1610_s0 + $0x5c] ss:$36 sps:$4 sm:$0xff]   ;;  %v1313_v22 = vld [vmem:[%s1609_s1 + $0x228] sm:$0xff]   ;;  %v1314_v23 = vld [vmem:[%s1609_s1 + $0x230] sm:$0xff]  }
  0x1d   :  { %1119 = vmatpush3.bf16.msra.mxu1 %v1247_v27  ;;  %1092 = vmatprep.subr.bf16.mxu0 %v1248_v28  ;;  %v1306_v15 = vld [vmem:[%s1610_s0 + $0x58] ss:$36 sps:$4 sm:$0xff]   ;;  %v1312_v20 = vld [vmem:[%s1609_s1 + $0x220] sm:$0xff]   ;;  %v1317_v25 = vld [vmem:[%s1610_s0 + $0x68] ss:$36 sps:$4 sm:$0xff]  }
  0x1e   :  { %1120 = vmatprep.subr.bf16.mxu1 %v1249_v29  ;;  %v1311_v19 = vld [vmem:[%s1609_s1 + $0x218] sm:$0xff]   ;;  %v1316_v21 = vld [vmem:[%s1610_s0 + $0x20] ss:$36 sps:$4 sm:$0xff]  }
  0x1f   :  { %v1315_v24 = vld [vmem:[%s1609_s1 + $0x238] sm:$0xff]  }
  0x20   :  { %1093 = vmatpush3.bf16.msra.mxu0 %v1250_v30 }
  0x21   :  { %1121 = vmatpush3.bf16.msra.mxu1 %v1251_v31  ;;  %1134 = vmatprep.subr.bf16.mxu0 %v1258_v36 }
  0x22   :  { %1162 = vmatprep.subr.bf16.mxu1 %v1260_v38 }
  0x23   :  { %733 = vmatmul.mubr.bf16.vlgmr.msra.gmra.mrb[0].mxu0 %v1252_v32 }
  0x24   :  { %782 = vmatmul.mubr.bf16.vlgmr.msra.gmra.mrb[0].mxu1 %v1255_v34  ;;  %1135 = vmatpush3.bf16.msra.mxu0 %v1259_v37 }
  0x25   :  { %1163 = vmatpush3.bf16.msra.mxu1 %v1261_v39  ;;  %1136 = vmatprep.subr.bf16.mxu0 %v1262_v40 }
  0x26   :  { %1164 = vmatprep.subr.bf16.mxu1 %v1264_v42  ;;  %740 = vmatprep.mubr.bf16.mxu0 %v1279_v57 }
  0x27   :  { %789 = vmatprep.mubr.bf16.mxu1 %v1281_v58 }
  0x28   :  { %1137 = vmatpush3.bf16.msra.mxu0 %v1263_v41 }
  0x29   :  { %1165 = vmatpush3.bf16.msra.mxu1 %v1265_v43  ;;  %1138 = vmatprep.subr.bf16.mxu0 %v1266_v44 }
  0x2a   :  { %1166 = vmatprep.subr.bf16.mxu1 %v1268_v46 }
  0x2b   :  { %741 = vmatmul.mubr.bf16.gmra.mrb[4].mxu0 %v1284_v60 }
  0x2c   :  { %1139 = vmatpush3.bf16.msra.mxu0 %v1267_v45  ;;  %790 = vmatmul.mubr.bf16.gmra.mrb[4].mxu1 %v1285_v61 }
  0x2d   :  { %1167 = vmatpush3.bf16.msra.mxu1 %v1269_v47  ;;  %1140 = vmatprep.subr.bf16.mxu0 %v1270_v48 }
  0x2e   :  { %1168 = vmatprep.subr.bf16.mxu1 %v1272_v50  ;;  %830 = vmatprep.mubr.bf16.mxu0 %v1297_v8 }
  0x2f   :  { %879 = vmatprep.mubr.bf16.mxu1 %v1302_v12 }
  0x30   :  { %1141 = vmatpush3.bf16.msra.mxu0 %v1271_v49 }
  0x31   :  { %1169 = vmatpush3.bf16.msra.mxu1 %v1273_v51  ;;  %1142 = vmatprep.subr.bf16.mxu0 %v1274_v52 }
  0x32   :  { %1170 = vmatprep.subr.bf16.mxu1 %v1276_v54 }
  0x34   :  { %1143 = vmatpush3.bf16.msra.mxu0 %v1275_v53 }
  0x35   :  { %1171 = vmatpush3.bf16.msra.mxu1 %v1277_v55  ;;  %1144 = vmatprep.subr.bf16.mxu0 %v1278_v56 }
  0x36   :  { %1172 = vmatprep.subr.bf16.mxu1 %v1286_v62 }
  0x38   :  { %1145 = vmatpush3.bf16.msra.mxu0 %v1283_v59 }
  0x39   :  { %1173 = vmatpush3.bf16.msra.mxu1 %v1287_v63  ;;  %1146 = vmatprep.subr.bf16.mxu0 %v1288_v0 }
  0x3a   :  { %1174 = vmatprep.subr.bf16.mxu1 %v1290_v2 }
  0x3c   :  { %1147 = vmatpush3.bf16.msra.mxu0 %v1289_v1 }
  0x3d   :  { %1175 = vmatpush3.bf16.msra.mxu1 %v1291_v3  ;;  %1148 = vmatprep.subr.bf16.mxu0 %v1292_v4 }
  0x3e   :  { %1176 = vmatprep.subr.bf16.mxu1 %v1294_v6 }
  0x40   :  { %1149 = vmatpush3.bf16.msra.mxu0 %v1293_v5 }
  0x41   :  { %1177 = vmatpush3.bf16.msra.mxu1 %v1298_v9  ;;  %1200 = vmatprep.subr.bf16.mxu0 %v1299_v10 }
  0x43   :  { %831 = vmatmul.mubr.bf16.vlgmr.msra.gmra.mrb[8].mxu0 %v1295_v7 }
  0x44   :  { %1201 = vmatpush3.bf16.msra.mxu0 %v1299_v10  ;;  %880 = vmatmul.mubr.bf16.vlgmr.msra.gmra.mrb[8].mxu1 %v1300_v11 }
  0x45   :  { %1202 = vmatprep.subr.bf16.mxu0 %v1303_v13  ;;  %838 = vmatprep.mubr.bf16.mxu0 %v1304_v14 }
  0x46   :  { %887 = vmatprep.mubr.bf16.mxu1 %v1308_v17 }
  0x48   :  { %1203 = vmatpush3.bf16.msra.mxu0 %v1303_v13 }
  0x49   :  { %1204 = vmatprep.subr.bf16.mxu0 %v1307_v16 }
  0x4b   :  { %839 = vmatmul.mubr.bf16.gmra.mrb[12].mxu0 %v1306_v15 }
  0x4c   :  { %1205 = vmatpush3.bf16.msra.mxu0 %v1307_v16  ;;  %888 = vmatmul.mubr.bf16.gmra.mrb[12].mxu1 %v1310_v18 }
  0x4d   :  { %1206 = vmatprep.subr.bf16.mxu0 %v1311_v19  ;;  %1216 = vmatprep.mubr.bf16.mxu0 %v1316_v21 }
  0x50   :  { %1207 = vmatpush3.bf16.msra.mxu0 %v1311_v19 }
  0x51   :  { %1208 = vmatprep.subr.bf16.mxu0 %v1312_v20 }
  0x54   :  { %1209 = vmatpush3.bf16.msra.mxu0 %v1312_v20 }
  0x55   :  { %1210 = vmatprep.subr.bf16.mxu0 %v1313_v22 }
  0x58   :  { %1211 = vmatpush3.bf16.msra.mxu0 %v1313_v22 }
  0x59   :  { %1212 = vmatprep.subr.bf16.mxu0 %v1314_v23 }
  0x5c   :  { %1213 = vmatpush3.bf16.msra.mxu0 %v1314_v23 }
  0x5d   :  { %1214 = vmatprep.subr.bf16.mxu0 %v1315_v24 }
  0x60   :  { %1215 = vmatpush3.bf16.msra.mxu0 %v1315_v24 }
  0x63   :  { %1217 = vmatmul.mubr.bf16.vlgmr.msra.gmra.mrb[16].mxu0 %v1317_v25 }
  0xf6   :  { %v1094_v26 = vpop.f32.mrb[0].mxu0 }
  0xf7   :  { %v1122_v27 = vpop.f32.mrb[0].mxu1  ;;  %v1095_v28 = vpop.f32.mrb[1].mxu0 }
  0xf8   :  { %v1096_v29 = vadd.f32 %v1095_v28, %v1094_v26  ;;  %v1123_v30 = vpop.f32.mrb[1].mxu1  ;;  %v1097_v31 = vpop.f32.mrb[2].mxu0 }
  0xf9   :  { %v1124_v32 = vadd.f32 %v1123_v30, %v1122_v27  ;;  %v1125_v33 = vpop.f32.mrb[2].mxu1  ;;  %v1098_v34 = vpop.f32.mrb[3].mxu0 }
  0xfa   :  { %v1099_v35 = vadd.f32 %v1098_v34, %v1097_v31  ;;  %v1126_v36 = vpop.f32.mrb[3].mxu1 }
  0xfb   :  { %v784_v37 = vadd.f32 %v1124_v32, %v1096_v29  ;;  %v1127_v38 = vadd.f32 %v1126_v36, %v1125_v33 }
  0xfd   :  { %v787_v39 = vadd.f32 %v1127_v38, %v1099_v35 }
  0xfe   :  { %v1100_v40 = vpop.f32.mrb[4].mxu0 }
  0xff   :  { %v1128_v41 = vpop.f32.mrb[4].mxu1  ;;  %v1101_v42 = vpop.f32.mrb[5].mxu0 }
 0x100   :  { %v1129_v43 = vpop.f32.mrb[5].mxu1  ;;  %v1102_v44 = vadd.f32 %v1101_v42, %v1100_v40  ;;  %v1103_v46 = vpop.f32.mrb[6].mxu0 }
 0x101   :  { %v1130_v45 = vadd.f32 %v1129_v43, %v1128_v41  ;;  %v1131_v47 = vpop.f32.mrb[6].mxu1  ;;  %v1104_v48 = vpop.f32.mrb[7].mxu0 }
 0x102   :  { %v1132_v49 = vpop.f32.mrb[7].mxu1  ;;  %v1105_v51 = vadd.f32 %v1104_v48, %v1103_v46 }
 0x103   :  { %v792_v50 = vadd.f32 %v1130_v45, %v1102_v44  ;;  %v1133_v52 = vadd.f32 %v1132_v49, %v1131_v47 }
 0x105   :  { %v795_v53 = vadd.f32 %v1133_v52, %v1105_v51 }
 0x116   :  { %v1150_v54 = vpop.f32.mrb[8].mxu0 }
 0x117   :  { %v1151_v55 = vpop.f32.mrb[9].mxu0  ;;  %v1178_v58 = vpop.f32.mrb[8].mxu1 }
 0x118   :  { %v1152_v56 = vadd.f32 %v1151_v55, %v1150_v54  ;;  %v1153_v57 = vpop.f32.mrb[10].mxu0  ;;  %v1179_v62 = vpop.f32.mrb[9].mxu1 }
 0x119   :  { %v1154_v59 = vpop.f32.mrb[11].mxu0  ;;  %v1180_v63 = vadd.f32 %v1179_v62, %v1178_v58  ;;  %v1181_v0 = vpop.f32.mrb[10].mxu1 }
 0x11a   :  { %v833_v60 = vadd.f32 %v1152_v56, %v784_v37  ;;  %v1155_v61 = vadd.f32 %v1154_v59, %v1153_v57  ;;  %v1182_v2 = vpop.f32.mrb[11].mxu1 }
 0x11b   :  { %v1183_v3 = vadd.f32 %v1182_v2, %v1181_v0 }
 0x11c   :  { %v836_v1 = vadd.f32 %v1155_v61, %v787_v39  ;;  %v882_v4 = vadd.f32 %v1180_v63, %v833_v60 }
 0x11e   :  { %v1156_v5 = vpop.f32.mrb[12].mxu0  ;;  %v885_v7 = vadd.f32 %v1183_v3, %v836_v1 }
 0x11f   :  { %v1157_v6 = vpop.f32.mrb[13].mxu0  ;;  %v1184_v10 = vpop.f32.mrb[12].mxu1 }
 0x120   :  { %v1158_v8 = vadd.f32 %v1157_v6, %v1156_v5  ;;  %v1159_v9 = vpop.f32.mrb[14].mxu0  ;;  %v1185_v14 = vpop.f32.mrb[13].mxu1 }
 0x121   :  { %v1160_v11 = vpop.f32.mrb[15].mxu0  ;;  %v1186_v15 = vadd.f32 %v1185_v14, %v1184_v10  ;;  %v1187_v16 = vpop.f32.mrb[14].mxu1 }
 0x122   :  { %v841_v12 = vadd.f32 %v1158_v8, %v792_v50  ;;  %v1161_v13 = vadd.f32 %v1160_v11, %v1159_v9  ;;  %v1188_v18 = vpop.f32.mrb[15].mxu1 }
 0x123   :  { %v1189_v19 = vadd.f32 %v1188_v18, %v1187_v16 }
 0x124   :  { %v844_v17 = vadd.f32 %v1161_v13, %v795_v53  ;;  %v890_v20 = vadd.f32 %v1186_v15, %v841_v12 }
 0x126   :  { %v893_v21 = vadd.f32 %v1189_v19, %v844_v17 }
 0x136   :  { %v1218_v22 = vpop.f32.mrb[16].mxu0 }
 0x137   :  { %v939_v23 = vadd.f32 %v1218_v22, %v890_v20  ;;  %v930_v24 = vpop.f32.mrb[17].mxu0 }
 0x138   :  { %v931_v25 = vadd.f32 %v930_v24, %v882_v4  ;;  %v1219_v26 = vpop.f32.mrb[18].mxu0 }
 0x139   :  { %v942_v27 = vadd.f32 %v1219_v26, %v893_v21  ;;  %v933_v28 = vpop.f32.mrb[19].mxu0 }
 0x13a   :  { %v934_v29 = vadd.f32 %v933_v28, %v885_v7 }
 0x13b   :  { %v1075_v30 = vpack.c.bf16 %v942_v27, %v939_v23 }
 0x13c   :  { %v1070_v31 = vpack.c.bf16 %v934_v29, %v931_v25 }
 0x13d   :  { %1077 = vst [vmem:[%s1611_s2 + $0x8] sm:$0xff] %v1075_v30  }
 0x13e   :  { %1071 = vst [vmem:[%s1611_s2] sm:$0xff] %v1070_v31  }

// kernel: sst_emotion_net_forward.32
= control target key start
LH: loop header
LB: loop body
LE: loop exit
PB: predicated region body
PF: predicated region fallthrough
CT: control target
= control target key end

     0   :  { %s616_s1 = inlined_call_operand.vmem [shape: bf16[384,128], index: 1, kind: input, shape index: {}]   ;;  %s617_s0 = inlined_call_operand.vmem [shape: bf16[32,384], index: 0, kind: input, shape index: {}]   ;;  %s618_s2 = inlined_call_operand.vmem [shape: bf16[32,128], index: 2, kind: output, shape index: {}]  }
   0x1   :  { %v473_v0 = vld [vmem:[%s616_s1 + $0x40] sm:$0xff]   ;;  %v476_v3 = vld [vmem:[%s616_s1 + $0x48] sm:$0xff]   ;;  %v479_v6 = vld [vmem:[%s616_s1 + $0x50] sm:$0xff]  }
   0x2   :  { %v474_v1 = vld [vmem:[%s616_s1] sm:$0xff]   ;;  %415 = vmatprep.subr.bf16.mxu0 %v473_v0  ;;  %v477_v4 = vld [vmem:[%s616_s1 + $0x8] sm:$0xff]   ;;  %v480_v7 = vld [vmem:[%s616_s1 + $0x10] sm:$0xff]  }
   0x3   :  { %v475_v2 = vld [vmem:[%s616_s1 + $0x80] sm:$0xff]   ;;  %416 = vmatpush3.bf16.msra.mxu0 %v474_v1  ;;  %v478_v5 = vld [vmem:[%s616_s1 + $0x88] sm:$0xff]   ;;  %v481_v8 = vld [vmem:[%s616_s1 + $0x90] sm:$0xff]  }
   0x4   :  { %453 = vmatprep.subr.bf16.mxu1 %v475_v2  ;;  %417 = vmatprep.subr.bf16.mxu0 %v476_v3  ;;  %v482_v9 = vld [vmem:[%s616_s1 + $0x58] sm:$0xff]   ;;  %v485_v12 = vld [vmem:[%s616_s1 + $0x60] sm:$0xff]   ;;  %v488_v15 = vld [vmem:[%s616_s1 + $0x68] sm:$0xff]  }
   0x5   :  { %454 = vmatpush3.bf16.msra.mxu1 %v475_v2  ;;  %v483_v10 = vld [vmem:[%s616_s1 + $0x18] sm:$0xff]   ;;  %v487_v13 = vld [vmem:[%s616_s1 + $0xa0] sm:$0xff]   ;;  %v490_v16 = vld [vmem:[%s616_s1 + $0xa8] sm:$0xff]  }
   0x6   :  { %455 = vmatprep.subr.bf16.mxu1 %v478_v5  ;;  %v484_v11 = vld [vmem:[%s616_s1 + $0x98] sm:$0xff]   ;;  %v486_v14 = vld [vmem:[%s616_s1 + $0x20] sm:$0xff]   ;;  %v489_v17 = vld [vmem:[%s616_s1 + $0x28] sm:$0xff]  }
   0x7   :  { %418 = vmatpush3.bf16.msra.mxu0 %v477_v4  ;;  %v491_v18 = vld [vmem:[%s616_s1 + $0x70] sm:$0xff]   ;;  %v494_v21 = vld [vmem:[%s616_s1 + $0x78] sm:$0xff]   ;;  %v497_v26 = vld [vmem:[%s617_s0] ss:$12 sps:$4 sm:$0xff]  }
   0x8   :  { %419 = vmatprep.subr.bf16.mxu0 %v479_v6  ;;  %v492_v19 = vld [vmem:[%s616_s1 + $0x30] sm:$0xff]   ;;  %v496_v22 = vld [vmem:[%s616_s1 + $0xb8] sm:$0xff]   ;;  %v501_v28 = vld [vmem:[%s617_s0 + $0x20] ss:$12 sps:$4 sm:$0xff]  }
   0x9   :  { %456 = vmatpush3.bf16.msra.mxu1 %v478_v5  ;;  %v493_v20 = vld [vmem:[%s616_s1 + $0xb0] sm:$0xff]   ;;  %v495_v25 = vld [vmem:[%s616_s1 + $0x38] sm:$0xff]  }
   0xa   :  { %457 = vmatprep.subr.bf16.mxu1 %v481_v8  ;;  %v499_v23 = vld [vmem:[%s617_s0 + $0x4] ss:$12 sps:$4 sm:$0xff]   ;;  %v500_v24 = vld [vmem:[%s617_s0 + $0x8] ss:$12 sps:$4 sm:$0xff]  }
   0xb   :  { %420 = vmatpush3.bf16.msra.mxu0 %v480_v7  ;;  %276 = vmatprep.mubr.bf16.mxu0 %v499_v23  ;;  %v502_v27 = vld [vmem:[%s617_s0 + $0x1c] ss:$12 sps:$4 sm:$0xff]   ;;  %v504_v29 = vld [vmem:[%s617_s0 + $0x18] ss:$12 sps:$4 sm:$0xff]  }
   0xc   :  { %421 = vmatprep.subr.bf16.mxu0 %v482_v9  ;;  %469 = vmatprep.mubr.bf16.mxu1 %v500_v24 }
   0xd   :  { %458 = vmatpush3.bf16.msra.mxu1 %v481_v8 }
   0xe   :  { %459 = vmatprep.subr.bf16.mxu1 %v484_v11 }
   0xf   :  { %422 = vmatpush3.bf16.msra.mxu0 %v483_v10 }
  0x10   :  { %423 = vmatprep.subr.bf16.mxu0 %v485_v12 }
  0x11   :  { %460 = vmatpush3.bf16.msra.mxu1 %v484_v11 }
  0x12   :  { %461 = vmatprep.subr.bf16.mxu1 %v487_v13 }
  0x13   :  { %424 = vmatpush3.bf16.msra.mxu0 %v486_v14 }
  0x14   :  { %425 = vmatprep.subr.bf16.mxu0 %v488_v15 }
  0x15   :  { %462 = vmatpush3.bf16.msra.mxu1 %v487_v13 }
  0x16   :  { %463 = vmatprep.subr.bf16.mxu1 %v490_v16 }
  0x17   :  { %426 = vmatpush3.bf16.msra.mxu0 %v489_v17 }
  0x18   :  { %427 = vmatprep.subr.bf16.mxu0 %v491_v18 }
  0x19   :  { %464 = vmatpush3.bf16.msra.mxu1 %v490_v16 }
  0x1a   :  { %465 = vmatprep.subr.bf16.mxu1 %v493_v20 }
  0x1b   :  { %428 = vmatpush3.bf16.msra.mxu0 %v492_v19 }
  0x1c   :  { %429 = vmatprep.subr.bf16.mxu0 %v494_v21 }
  0x1d   :  { %466 = vmatpush3.bf16.msra.mxu1 %v493_v20 }
  0x1e   :  { %467 = vmatprep.subr.bf16.mxu1 %v496_v22 }
  0x1f   :  { %430 = vmatpush3.bf16.msra.mxu0 %v495_v25 }
  0x21   :  { %468 = vmatpush3.bf16.msra.mxu1 %v496_v22 }
  0x22   :  { %277 = vmatmul.mubr.bf16.vlgmr.msra.gmra.mrb[0].mxu0 %v497_v26 }
  0x23   :  { %284 = vmatprep.mubr.bf16.mxu0 %v502_v27 }
  0x24   :  { %470 = vmatmul.mubr.bf16.vlgmr.msra.gmra.mrb[0].mxu1 %v501_v28 }
  0x2a   :  { %285 = vmatmul.mubr.bf16.gmra.mrb[4].mxu0 %v504_v29 }
  0xf5   :  { %v431_v30 = vpop.f32.mrb[0].mxu0 }
  0xf6   :  { %v432_v31 = vpop.f32.mrb[1].mxu0 }
  0xf7   :  { %v433_v32 = vadd.f32 %v432_v31, %v431_v30  ;;  %v434_v33 = vpop.f32.mrb[2].mxu0  ;;  %v471_v34 = vpop.f32.mrb[0].mxu1 }
  0xf8   :  { %v435_v35 = vpop.f32.mrb[3].mxu0  ;;  %v327_v36 = vpop.f32.mrb[1].mxu1 }
  0xf9   :  { %v436_v37 = vadd.f32 %v435_v35, %v434_v33  ;;  %v328_v38 = vadd.f32 %v433_v32, %v327_v36  ;;  %v472_v39 = vpop.f32.mrb[2].mxu1 }
  0xfa   :  { %v330_v40 = vpop.f32.mrb[3].mxu1 }
  0xfb   :  { %v331_v41 = vadd.f32 %v436_v37, %v330_v40 }
  0xfd   :  { %v407_v42 = vpack.c.bf16 %v331_v41, %v328_v38  ;;  %v437_v43 = vpop.f32.mrb[4].mxu0 }
  0xfe   :  { %v438_v44 = vpop.f32.mrb[5].mxu0 }
  0xff   :  { %408 = vst [vmem:[%s618_s2] sm:$0xff] %v407_v42   ;;  %v439_v45 = vadd.f32 %v438_v44, %v437_v43  ;;  %v440_v46 = vpop.f32.mrb[6].mxu0 }
 0x100   :  { %v441_v47 = vpop.f32.mrb[7].mxu0 }
 0x101   :  { %v336_v48 = vadd.f32 %v471_v34, %v439_v45  ;;  %v442_v49 = vadd.f32 %v441_v47, %v440_v46 }
 0x103   :  { %v339_v50 = vadd.f32 %v472_v39, %v442_v49 }
 0x105   :  { %v412_v51 = vpack.c.bf16 %v339_v50, %v336_v48 }
 0x107   :  { %414 = vst [vmem:[%s618_s2 + $0x8] sm:$0xff] %v412_v51  }

// kernel: sst_emotion_net_forward.33
= control target key start
LH: loop header
LB: loop body
LE: loop exit
PB: predicated region body
PF: predicated region fallthrough
CT: control target
= control target key end

     0   :  { %s1995_s12 = smov 0   ;;  %s2269_s0 = inlined_call_operand.vmem [shape: bf16[1024,80], index: 0, kind: input, shape index: {}]   ;;  %s2270_s1 = inlined_call_operand.vmem [shape: bf16[80,128], index: 1, kind: input, shape index: {}]   ;;  %s2271_s2 = inlined_call_operand.vmem [shape: f32[2,128], index: 2, kind: input, shape index: {}]   ;;  %s2272_s3 = inlined_call_operand.vmem [shape: bf16[1024,128], index: 3, kind: output, shape index: {}]  }
   0x1 LB: > { %s1402_s13 = sadd.s32 4294967295, %s1973_s12   ;;  %p1406_p0 = scmp.ge.s32.totalorder %s1973_s12, 1  ;;  %s1973_s12 = sphi %s1995_s12, %s13_s12  }
   0x2   : > { %p138_p1 = scmp.lt.s32.totalorder %s1973_s12, 3 }
   0x4   : > { %p139_p2 = pnand %p1406_p0, %p138_p1 }
   0x5   : > { %v1930_v0 = vld [vmem:[%s2270_s1] sm:$0xff] (!%p139_p2)   ;;  %s1407_s16 = sshll.u32 (!%p139_p2), %s1402_s13, 6  ;;  %v1931_v1 = vld [vmem:[%s2270_s1 + $0x8] sm:$0xff] (!%p139_p2)   ;;  %v1932_v2 = vld [vmem:[%s2270_s1 + $0x10] sm:$0xff] (!%p139_p2)   ;;  %vm439_vm0 = vcmask (!%p139_p2), 654336   ;;  %v826_v37 = vlaneseq (!%p139_p2) }
   0x6   : > { %142 = sbr.rel (%p139_p2) target bundleno = 307 (0x133), region = 32  ;;  %p163_p3 = scmp.lt.s32.totalorder (!%p139_p2), %s1407_s16, 127  ;;  %1838 = vmatprep.subr.bf16.mxu0 (!%p139_p2), %v1930_v0  ;;  %1912 = vmatprep.subr.bf16.mxu1 (!%p139_p2), %v1930_v0  ;;  %v1933_v3 = vld [vmem:[%s2270_s1 + $0x18] sm:$0xff] (!%p139_p2)   ;;  %v1934_v6 = vld [vmem:[%s2270_s1 + $0x20] sm:$0xff] (!%p139_p2)  }
   0x7   : > { %1839 = vmatpush3.bf16.msra.mxu0 (!%p139_p2), %v1930_v0  ;;  %1917 = vmatpush3.bf16.msra.mxu1 (!%p139_p2), %v1930_v0  ;;  %v827_v38 = vshrl.u32 (!%p139_p2), %v826_v37, 7  ;;  %v825_v40 = vld [vmem:[%s2271_s2] sm:$0x3] (!%p139_p2) }
   0x8   : > { %1840 = vmatprep.subr.bf16.mxu0 (!%p139_p2), %v1931_v1  ;;  %1913 = vmatprep.subr.bf16.mxu1 (!%p139_p2), %v1931_v1 }
   0x9   : > { %v828_v39 = vsub.s32 (!%p139_p2), 0, %v827_v38  ;;  %v896_v41 = vsub.s32 (!%p139_p2), 1, %v827_v38 }
   0xb   : > { %1841 = vmatpush3.bf16.msra.mxu0 (!%p139_p2), %v1931_v1  ;;  %1918 = vmatpush3.bf16.msra.mxu1 (!%p139_p2), %v1931_v1  ;;  %v2095_v42 = vrot.slane (!%p139_p2), %v825_v40, %v828_v39  ;;  %v2097_v43 = vrot.slane (!%p139_p2), %v825_v40, %v896_v41 }
   0xc   : > { %1842 = vmatprep.subr.bf16.mxu0 (!%p139_p2), %v1932_v2  ;;  %1914 = vmatprep.subr.bf16.mxu1 (!%p139_p2), %v1932_v2 }
   0xd   : > { %s2274_s16 = smov (!%p163_p3, %s1407_s16), 127 }
   0xe   : > { %s1408_s21 = sshll.u32 %s2274_s16, 2 }
   0xf   : > { %s2023_s26 = scalar_lea.vmem %s2269_s0, %s1408_s21  ;;  %1843 = vmatpush3.bf16.msra.mxu0 %v1932_v2  ;;  %1919 = vmatpush3.bf16.msra.mxu1 %v1932_v2  ;;  %s2120_s6 = scalar_lea.vmem %s2272_s3, %s1408_s21 }
  0x10   : > { %v1935_v4 = vld [vmem:[%s2023_s26] sm:$0xff]   ;;  %1844 = vmatprep.subr.bf16.mxu0 %v1933_v3  ;;  %1915 = vmatprep.subr.bf16.mxu1 %v1933_v3  ;;  %v1937_v7 = vld [vmem:[%s2023_s26 + $0x8] sm:$0xff]   ;;  %v1939_v9 = vld [vmem:[%s2023_s26 + $0x10] sm:$0xff]  }
  0x11   : > { %v1936_v5 = vld [vmem:[%s2023_s26 + $0x80] sm:$0xff]   ;;  %1848 = vmatprep.mubr.msk.bf16.mxu0 %vm439_vm0, %v1935_v4  ;;  %v1938_v8 = vld [vmem:[%s2023_s26 + $0x88] sm:$0xff]   ;;  %v1940_v10 = vld [vmem:[%s2023_s26 + $0x90] sm:$0xff]  }
  0x12   : > { %1880 = vmatprep.mubr.msk.bf16.mxu1 %vm439_vm0, %v1936_v5  ;;  %v1941_v11 = vld [vmem:[%s2023_s26 + $0x18] sm:$0xff]   ;;  %v1943_v13 = vld [vmem:[%s2023_s26 + $0x20] sm:$0xff]   ;;  %v1945_v15 = vld [vmem:[%s2023_s26 + $0x28] sm:$0xff]  }
  0x13   : > { %1845 = vmatpush3.bf16.msra.mxu0 %v1933_v3  ;;  %1920 = vmatpush3.bf16.msra.mxu1 %v1933_v3  ;;  %v1942_v12 = vld [vmem:[%s2023_s26 + $0x98] sm:$0xff]   ;;  %v1944_v14 = vld [vmem:[%s2023_s26 + $0xa0] sm:$0xff]   ;;  %v1946_v16 = vld [vmem:[%s2023_s26 + $0xa8] sm:$0xff]  }
  0x14   : > { %1846 = vmatprep.subr.bf16.mxu0 %v1934_v6  ;;  %1916 = vmatprep.subr.bf16.mxu1 %v1934_v6  ;;  %v1947_v17 = vld [vmem:[%s2023_s26 + $0x30] sm:$0xff]   ;;  %v1949_v19 = vld [vmem:[%s2023_s26 + $0x38] sm:$0xff]   ;;  %v1951_v21 = vld [vmem:[%s2023_s26 + $0x40] sm:$0xff]  }
  0x15   : > { %v1948_v18 = vld [vmem:[%s2023_s26 + $0xb0] sm:$0xff]   ;;  %v1950_v20 = vld [vmem:[%s2023_s26 + $0xb8] sm:$0xff]   ;;  %v1952_v22 = vld [vmem:[%s2023_s26 + $0xc0] sm:$0xff]  }
  0x16   : > { %v1953_v23 = vld [vmem:[%s2023_s26 + $0x48] sm:$0xff]   ;;  %v1955_v25 = vld [vmem:[%s2023_s26 + $0x50] sm:$0xff]   ;;  %v1957_v27 = vld [vmem:[%s2023_s26 + $0x58] sm:$0xff]  }
  0x17   : > { %1847 = vmatpush3.bf16.msra.mxu0 %v1934_v6  ;;  %1921 = vmatpush3.bf16.msra.mxu1 %v1934_v6  ;;  %v1954_v24 = vld [vmem:[%s2023_s26 + $0xc8] sm:$0xff]   ;;  %v1956_v26 = vld [vmem:[%s2023_s26 + $0xd0] sm:$0xff]   ;;  %v1958_v28 = vld [vmem:[%s2023_s26 + $0xd8] sm:$0xff]  }
  0x18   : > { %v1959_v29 = vld [vmem:[%s2023_s26 + $0x60] sm:$0xff]   ;;  %v1961_v31 = vld [vmem:[%s2023_s26 + $0x68] sm:$0xff]   ;;  %v1963_v33 = vld [vmem:[%s2023_s26 + $0x70] sm:$0xff]  }
  0x19   : > { %v1960_v30 = vld [vmem:[%s2023_s26 + $0xe0] sm:$0xff]   ;;  %v1962_v32 = vld [vmem:[%s2023_s26 + $0xe8] sm:$0xff]   ;;  %v1964_v34 = vld [vmem:[%s2023_s26 + $0xf0] sm:$0xff]  }
  0x1a   : > { %1849 = vmatmul.mubr.msk.bf16.vlgmr.msra.gmra.mrb[0].mxu0 %vm439_vm0, %v1937_v7  ;;  %1881 = vmatmul.mubr.msk.bf16.vlgmr.msra.gmra.mrb[0].mxu1 %vm439_vm0, %v1938_v8  ;;  %v1965_v35 = vld [vmem:[%s2023_s26 + $0x78] sm:$0xff]  }
  0x1b   : > { %1852 = vmatprep.mubr.msk.bf16.mxu0 %vm439_vm0, %v1939_v9  ;;  %1884 = vmatprep.mubr.msk.bf16.mxu1 %vm439_vm0, %v1940_v10  ;;  %v1966_v36 = vld [vmem:[%s2023_s26 + $0xf8] sm:$0xff]  }
  0x22   : > { %1853 = vmatmul.mubr.msk.bf16.gmra.mrb[4].mxu0 %vm439_vm0, %v1941_v11  ;;  %1885 = vmatmul.mubr.msk.bf16.gmra.mrb[4].mxu1 %vm439_vm0, %v1942_v12 }
  0x23   : > { %1856 = vmatprep.mubr.msk.bf16.mxu0 %vm439_vm0, %v1943_v13  ;;  %1888 = vmatprep.mubr.msk.bf16.mxu1 %vm439_vm0, %v1944_v14 }
  0x2a   : > { %1857 = vmatmul.mubr.msk.bf16.gmra.mrb[8].mxu0 %vm439_vm0, %v1945_v15  ;;  %1889 = vmatmul.mubr.msk.bf16.gmra.mrb[8].mxu1 %vm439_vm0, %v1946_v16 }
  0x2b   : > { %1860 = vmatprep.mubr.msk.bf16.mxu0 %vm439_vm0, %v1947_v17  ;;  %1892 = vmatprep.mubr.msk.bf16.mxu1 %vm439_vm0, %v1948_v18 }
  0x32   : > { %1861 = vmatmul.mubr.msk.bf16.gmra.mrb[12].mxu0 %vm439_vm0, %v1949_v19  ;;  %1893 = vmatmul.mubr.msk.bf16.gmra.mrb[12].mxu1 %vm439_vm0, %v1950_v20 }
  0x33   : > { %1864 = vmatprep.mubr.msk.bf16.mxu0 %vm439_vm0, %v1951_v21  ;;  %1896 = vmatprep.mubr.msk.bf16.mxu1 %vm439_vm0, %v1952_v22 }
  0x3a   : > { %1865 = vmatmul.mubr.msk.bf16.gmra.mrb[16].mxu0 %vm439_vm0, %v1953_v23  ;;  %1897 = vmatmul.mubr.msk.bf16.gmra.mrb[16].mxu1 %vm439_vm0, %v1954_v24 }
  0x3b   : > { %1868 = vmatprep.mubr.msk.bf16.mxu0 %vm439_vm0, %v1955_v25  ;;  %1900 = vmatprep.mubr.msk.bf16.mxu1 %vm439_vm0, %v1956_v26 }
  0x42   : > { %1869 = vmatmul.mubr.msk.bf16.gmra.mrb[20].mxu0 %vm439_vm0, %v1957_v27  ;;  %1901 = vmatmul.mubr.msk.bf16.gmra.mrb[20].mxu1 %vm439_vm0, %v1958_v28 }
  0x43   : > { %1872 = vmatprep.mubr.msk.bf16.mxu0 %vm439_vm0, %v1959_v29  ;;  %1904 = vmatprep.mubr.msk.bf16.mxu1 %vm439_vm0, %v1960_v30 }
  0x4a   : > { %1873 = vmatmul.mubr.msk.bf16.gmra.mrb[24].mxu0 %vm439_vm0, %v1961_v31  ;;  %1905 = vmatmul.mubr.msk.bf16.gmra.mrb[24].mxu1 %vm439_vm0, %v1962_v32 }
  0x4b   : > { %1876 = vmatprep.mubr.msk.bf16.mxu0 %vm439_vm0, %v1963_v33  ;;  %1908 = vmatprep.mubr.msk.bf16.mxu1 %vm439_vm0, %v1964_v34 }
  0x52   : > { %1877 = vmatmul.mubr.msk.bf16.gmra.mrb[28].mxu0 %vm439_vm0, %v1965_v35  ;;  %1909 = vmatmul.mubr.msk.bf16.gmra.mrb[28].mxu1 %vm439_vm0, %v1966_v36 }
  0xed   : > { %v1850_v44 = vpop.f32.mrb[0].mxu0  ;;  %v1882_v45 = vpop.f32.mrb[0].mxu1 }
  0xee   : > { %v832_v46 = vmul.f32 %v1850_v44, %v2095_v42  ;;  %v864_v47 = vmul.f32 %v1882_v45, %v2095_v42  ;;  %v570_v48 = vpop.f32.mrb[1].mxu0  ;;  %v698_v49 = vpop.f32.mrb[1].mxu1 }
  0xef   : > { %v830_v50 = vmul.f32 %v2095_v42, %v570_v48  ;;  %v862_v51 = vmul.f32 %v2095_v42, %v698_v49  ;;  %v1851_v52 = vpop.f32.mrb[2].mxu0  ;;  %v1883_v53 = vpop.f32.mrb[2].mxu1 }
  0xf0   : > { %v900_v54 = vadd.f32 %v2097_v43, %v832_v46  ;;  %v932_v55 = vadd.f32 %v2097_v43, %v864_v47  ;;  %v833_v56 = vmul.f32 %v1851_v52, %v2095_v42  ;;  %v865_v57 = vmul.f32 %v1883_v53, %v2095_v42  ;;  %v573_v58 = vpop.f32.mrb[3].mxu0  ;;  %v701_v59 = vpop.f32.mrb[3].mxu1 }
  0xf1   : > { %v898_v60 = vadd.f32 %v2097_v43, %v830_v50  ;;  %v930_v61 = vadd.f32 %v2097_v43, %v862_v51  ;;  %v831_v62 = vmul.f32 %v2095_v42, %v573_v58  ;;  %v863_v63 = vmul.f32 %v2095_v42, %v701_v59 }
  0xf2   : > { %v901_v0 = vadd.f32 %v2097_v43, %v833_v56  ;;  %v933_v1 = vadd.f32 %v2097_v43, %v865_v57  ;;  %v964_v4 = vmax.f32 %v900_v54, 0.0  ;;  %v996_v5 = vmax.f32 %v932_v55, 0.0 }
  0xf3   : > { %v899_v2 = vadd.f32 %v2097_v43, %v831_v62  ;;  %v931_v3 = vadd.f32 %v2097_v43, %v863_v63  ;;  %v962_v8 = vmax.f32 %v898_v60, 0.0  ;;  %v994_v9 = vmax.f32 %v930_v61, 0.0 }
  0xf4   : > { %v965_v6 = vmax.f32 %v901_v0, 0.0  ;;  %v997_v7 = vmax.f32 %v933_v1, 0.0 }
  0xf5   : > { %v963_v10 = vmax.f32 %v899_v2, 0.0  ;;  %v995_v11 = vmax.f32 %v931_v3, 0.0  ;;  %v1854_v12 = vpop.f32.mrb[4].mxu0  ;;  %v1886_v13 = vpop.f32.mrb[4].mxu1 }
  0xf6   : > { %v1618_v14 = vpack.c.bf16 %v965_v6, %v964_v4  ;;  %v1698_v15 = vpack.c.bf16 %v997_v7, %v996_v5  ;;  %v836_v16 = vmul.f32 %v1854_v12, %v2095_v42  ;;  %v868_v17 = vmul.f32 %v1886_v13, %v2095_v42  ;;  %v586_v18 = vpop.f32.mrb[5].mxu0  ;;  %v714_v19 = vpop.f32.mrb[5].mxu1 }
  0xf7   : > { %v1613_v20 = vpack.c.bf16 %v963_v10, %v962_v8  ;;  %v1693_v21 = vpack.c.bf16 %v995_v11, %v994_v9  ;;  %v834_v22 = vmul.f32 %v2095_v42, %v586_v18  ;;  %v866_v23 = vmul.f32 %v2095_v42, %v714_v19  ;;  %v1855_v24 = vpop.f32.mrb[6].mxu0  ;;  %v1887_v25 = vpop.f32.mrb[6].mxu1 }
  0xf8   : > { %1770 = vst [vmem:[%s2120_s6 + $0x8] sm:$0xff] %v1618_v14   ;;  %1786 = vst [vmem:[%s2120_s6 + $0x88] sm:$0xff] %v1698_v15   ;;  %v904_v26 = vadd.f32 %v2097_v43, %v836_v16  ;;  %v936_v27 = vadd.f32 %v2097_v43, %v868_v17  ;;  %v837_v28 = vmul.f32 %v1855_v24, %v2095_v42  ;;  %v589_v30 = vpop.f32.mrb[7].mxu0  ;;  %v717_v31 = vpop.f32.mrb[7].mxu1 }
  0xf9   : > { %v869_v29 = vmul.f32 %v1887_v25, %v2095_v42  ;;  %1614 = vst [vmem:[%s2120_s6] sm:$0xff] %v1613_v20   ;;  %1785 = vst [vmem:[%s2120_s6 + $0x80] sm:$0xff] %v1693_v21   ;;  %v902_v32 = vadd.f32 %v2097_v43, %v834_v22  ;;  %v934_v33 = vadd.f32 %v2097_v43, %v866_v23 }
  0xfa   : > { %v835_v34 = vmul.f32 %v2095_v42, %v589_v30  ;;  %v867_v35 = vmul.f32 %v2095_v42, %v717_v31  ;;  %v905_v36 = vadd.f32 %v2097_v43, %v837_v28  ;;  %v968_v40 = vmax.f32 %v904_v26, 0.0 }
  0xfb   : > { %v937_v37 = vadd.f32 %v2097_v43, %v869_v29  ;;  %v1000_v41 = vmax.f32 %v936_v27, 0.0  ;;  %v966_v46 = vmax.f32 %v902_v32, 0.0  ;;  %v998_v47 = vmax.f32 %v934_v33, 0.0 }
  0xfc   : > { %v903_v38 = vadd.f32 %v2097_v43, %v835_v34  ;;  %v935_v39 = vadd.f32 %v2097_v43, %v867_v35  ;;  %v969_v44 = vmax.f32 %v905_v36, 0.0 }
  0xfd   : > { %v1001_v45 = vmax.f32 %v937_v37, 0.0  ;;  %v1858_v50 = vpop.f32.mrb[8].mxu0  ;;  %v1890_v51 = vpop.f32.mrb[8].mxu1 }
  0xfe   : > { %v967_v48 = vmax.f32 %v903_v38, 0.0  ;;  %v999_v49 = vmax.f32 %v935_v39, 0.0  ;;  %v1628_v52 = vpack.c.bf16 %v969_v44, %v968_v40  ;;  %v840_v54 = vmul.f32 %v1858_v50, %v2095_v42  ;;  %v602_v56 = vpop.f32.mrb[9].mxu0  ;;  %v730_v57 = vpop.f32.mrb[9].mxu1 }
  0xff   : > { %v1708_v53 = vpack.c.bf16 %v1001_v45, %v1000_v41  ;;  %v872_v55 = vmul.f32 %v1890_v51, %v2095_v42  ;;  %v838_v60 = vmul.f32 %v2095_v42, %v602_v56  ;;  %v870_v61 = vmul.f32 %v2095_v42, %v730_v57  ;;  %v1859_v62 = vpop.f32.mrb[10].mxu0  ;;  %v1891_v63 = vpop.f32.mrb[10].mxu1 }
 0x100   : > { %v1623_v58 = vpack.c.bf16 %v967_v48, %v966_v46  ;;  %v1703_v59 = vpack.c.bf16 %v999_v49, %v998_v47  ;;  %1772 = vst [vmem:[%s2120_s6 + $0x18] sm:$0xff] %v1628_v52   ;;  %v908_v0 = vadd.f32 %v2097_v43, %v840_v54  ;;  %v841_v2 = vmul.f32 %v1859_v62, %v2095_v42  ;;  %v605_v4 = vpop.f32.mrb[11].mxu0  ;;  %v733_v5 = vpop.f32.mrb[11].mxu1 }
 0x101   : > { %1788 = vst [vmem:[%s2120_s6 + $0x98] sm:$0xff] %v1708_v53   ;;  %v940_v1 = vadd.f32 %v2097_v43, %v872_v55  ;;  %v873_v3 = vmul.f32 %v1891_v63, %v2095_v42  ;;  %v906_v6 = vadd.f32 %v2097_v43, %v838_v60  ;;  %v938_v7 = vadd.f32 %v2097_v43, %v870_v61 }
 0x102   : > { %1771 = vst [vmem:[%s2120_s6 + $0x10] sm:$0xff] %v1623_v58   ;;  %1787 = vst [vmem:[%s2120_s6 + $0x90] sm:$0xff] %v1703_v59   ;;  %v839_v8 = vmul.f32 %v2095_v42, %v605_v4  ;;  %v871_v9 = vmul.f32 %v2095_v42, %v733_v5  ;;  %v909_v10 = vadd.f32 %v2097_v43, %v841_v2  ;;  %v972_v14 = vmax.f32 %v908_v0, 0.0 }
 0x103   : > { %v941_v11 = vadd.f32 %v2097_v43, %v873_v3  ;;  %v1004_v15 = vmax.f32 %v940_v1, 0.0  ;;  %v970_v18 = vmax.f32 %v906_v6, 0.0  ;;  %v1002_v19 = vmax.f32 %v938_v7, 0.0 }
 0x104   : > { %v907_v12 = vadd.f32 %v2097_v43, %v839_v8  ;;  %v939_v13 = vadd.f32 %v2097_v43, %v871_v9  ;;  %v973_v16 = vmax.f32 %v909_v10, 0.0 }
 0x105   : > { %v1005_v17 = vmax.f32 %v941_v11, 0.0  ;;  %v1862_v22 = vpop.f32.mrb[12].mxu0  ;;  %v1894_v23 = vpop.f32.mrb[12].mxu1 }
 0x106   : > { %v971_v20 = vmax.f32 %v907_v12, 0.0  ;;  %v1003_v21 = vmax.f32 %v939_v13, 0.0  ;;  %v1638_v24 = vpack.c.bf16 %v973_v16, %v972_v14  ;;  %v844_v26 = vmul.f32 %v1862_v22, %v2095_v42  ;;  %v618_v28 = vpop.f32.mrb[13].mxu0  ;;  %v746_v29 = vpop.f32.mrb[13].mxu1 }
 0x107   : > { %v1718_v25 = vpack.c.bf16 %v1005_v17, %v1004_v15  ;;  %v876_v27 = vmul.f32 %v1894_v23, %v2095_v42  ;;  %v842_v32 = vmul.f32 %v2095_v42, %v618_v28  ;;  %v874_v33 = vmul.f32 %v2095_v42, %v746_v29  ;;  %v1863_v34 = vpop.f32.mrb[14].mxu0  ;;  %v1895_v35 = vpop.f32.mrb[14].mxu1 }
 0x108   : > { %v1633_v30 = vpack.c.bf16 %v971_v20, %v970_v18  ;;  %v1713_v31 = vpack.c.bf16 %v1003_v21, %v1002_v19  ;;  %1774 = vst [vmem:[%s2120_s6 + $0x28] sm:$0xff] %v1638_v24   ;;  %v912_v36 = vadd.f32 %v2097_v43, %v844_v26  ;;  %v845_v38 = vmul.f32 %v1863_v34, %v2095_v42  ;;  %v621_v40 = vpop.f32.mrb[15].mxu0  ;;  %v749_v41 = vpop.f32.mrb[15].mxu1 }
 0x109   : > { %1790 = vst [vmem:[%s2120_s6 + $0xa8] sm:$0xff] %v1718_v25   ;;  %v944_v37 = vadd.f32 %v2097_v43, %v876_v27  ;;  %v877_v39 = vmul.f32 %v1895_v35, %v2095_v42  ;;  %v910_v44 = vadd.f32 %v2097_v43, %v842_v32  ;;  %v942_v45 = vadd.f32 %v2097_v43, %v874_v33 }
 0x10a   : > { %1773 = vst [vmem:[%s2120_s6 + $0x20] sm:$0xff] %v1633_v30   ;;  %1789 = vst [vmem:[%s2120_s6 + $0xa0] sm:$0xff] %v1713_v31   ;;  %v843_v46 = vmul.f32 %v2095_v42, %v621_v40  ;;  %v875_v47 = vmul.f32 %v2095_v42, %v749_v41  ;;  %v913_v48 = vadd.f32 %v2097_v43, %v845_v38  ;;  %v976_v52 = vmax.f32 %v912_v36, 0.0 }
 0x10b   : > { %v945_v49 = vadd.f32 %v2097_v43, %v877_v39  ;;  %v1008_v53 = vmax.f32 %v944_v37, 0.0  ;;  %v974_v56 = vmax.f32 %v910_v44, 0.0  ;;  %v1006_v57 = vmax.f32 %v942_v45, 0.0 }
 0x10c   : > { %v911_v50 = vadd.f32 %v2097_v43, %v843_v46  ;;  %v943_v51 = vadd.f32 %v2097_v43, %v875_v47  ;;  %v977_v54 = vmax.f32 %v913_v48, 0.0 }
 0x10d   : > { %v1009_v55 = vmax.f32 %v945_v49, 0.0  ;;  %v1866_v60 = vpop.f32.mrb[16].mxu0  ;;  %v1898_v61 = vpop.f32.mrb[16].mxu1 }
 0x10e   : > { %v975_v58 = vmax.f32 %v911_v50, 0.0  ;;  %v1007_v59 = vmax.f32 %v943_v51, 0.0  ;;  %v1648_v62 = vpack.c.bf16 %v977_v54, %v976_v52  ;;  %v848_v0 = vmul.f32 %v1866_v60, %v2095_v42  ;;  %v634_v2 = vpop.f32.mrb[17].mxu0  ;;  %v762_v3 = vpop.f32.mrb[17].mxu1 }
 0x10f   : > { %v1728_v63 = vpack.c.bf16 %v1009_v55, %v1008_v53  ;;  %v880_v1 = vmul.f32 %v1898_v61, %v2095_v42  ;;  %v846_v6 = vmul.f32 %v2095_v42, %v634_v2  ;;  %v878_v7 = vmul.f32 %v2095_v42, %v762_v3  ;;  %v1867_v8 = vpop.f32.mrb[18].mxu0  ;;  %v1899_v9 = vpop.f32.mrb[18].mxu1 }
 0x110   : > { %v1643_v4 = vpack.c.bf16 %v975_v58, %v974_v56  ;;  %v1723_v5 = vpack.c.bf16 %v1007_v59, %v1006_v57  ;;  %1776 = vst [vmem:[%s2120_s6 + $0x38] sm:$0xff] %v1648_v62   ;;  %v916_v10 = vadd.f32 %v2097_v43, %v848_v0  ;;  %v849_v12 = vmul.f32 %v1867_v8, %v2095_v42  ;;  %v637_v14 = vpop.f32.mrb[19].mxu0  ;;  %v765_v15 = vpop.f32.mrb[19].mxu1 }
 0x111   : > { %1792 = vst [vmem:[%s2120_s6 + $0xb8] sm:$0xff] %v1728_v63   ;;  %v948_v11 = vadd.f32 %v2097_v43, %v880_v1  ;;  %v881_v13 = vmul.f32 %v1899_v9, %v2095_v42  ;;  %v914_v16 = vadd.f32 %v2097_v43, %v846_v6  ;;  %v946_v17 = vadd.f32 %v2097_v43, %v878_v7 }
 0x112   : > { %1775 = vst [vmem:[%s2120_s6 + $0x30] sm:$0xff] %v1643_v4   ;;  %1791 = vst [vmem:[%s2120_s6 + $0xb0] sm:$0xff] %v1723_v5   ;;  %v847_v18 = vmul.f32 %v2095_v42, %v637_v14  ;;  %v879_v19 = vmul.f32 %v2095_v42, %v765_v15  ;;  %v917_v20 = vadd.f32 %v2097_v43, %v849_v12  ;;  %v980_v24 = vmax.f32 %v916_v10, 0.0 }
 0x113   : > { %v949_v21 = vadd.f32 %v2097_v43, %v881_v13  ;;  %v1012_v25 = vmax.f32 %v948_v11, 0.0  ;;  %v978_v28 = vmax.f32 %v914_v16, 0.0  ;;  %v1010_v29 = vmax.f32 %v946_v17, 0.0 }
 0x114   : > { %v915_v22 = vadd.f32 %v2097_v43, %v847_v18  ;;  %v947_v23 = vadd.f32 %v2097_v43, %v879_v19  ;;  %v981_v26 = vmax.f32 %v917_v20, 0.0 }
 0x115   : > { %v1013_v27 = vmax.f32 %v949_v21, 0.0  ;;  %v1870_v32 = vpop.f32.mrb[20].mxu0  ;;  %v1902_v33 = vpop.f32.mrb[20].mxu1 }
 0x116   : > { %v979_v30 = vmax.f32 %v915_v22, 0.0  ;;  %v1011_v31 = vmax.f32 %v947_v23, 0.0  ;;  %v1658_v34 = vpack.c.bf16 %v981_v26, %v980_v24  ;;  %v852_v36 = vmul.f32 %v1870_v32, %v2095_v42  ;;  %v650_v38 = vpop.f32.mrb[21].mxu0  ;;  %v778_v39 = vpop.f32.mrb[21].mxu1 }
 0x117   : > { %v1738_v35 = vpack.c.bf16 %v1013_v27, %v1012_v25  ;;  %v884_v37 = vmul.f32 %v1902_v33, %v2095_v42  ;;  %v850_v44 = vmul.f32 %v2095_v42, %v650_v38  ;;  %v882_v45 = vmul.f32 %v2095_v42, %v778_v39  ;;  %v1871_v46 = vpop.f32.mrb[22].mxu0  ;;  %v1903_v47 = vpop.f32.mrb[22].mxu1 }
 0x118   : > { %v1653_v40 = vpack.c.bf16 %v979_v30, %v978_v28  ;;  %v1733_v41 = vpack.c.bf16 %v1011_v31, %v1010_v29  ;;  %1778 = vst [vmem:[%s2120_s6 + $0x48] sm:$0xff] %v1658_v34   ;;  %v920_v48 = vadd.f32 %v2097_v43, %v852_v36  ;;  %v853_v50 = vmul.f32 %v1871_v46, %v2095_v42  ;;  %v653_v52 = vpop.f32.mrb[23].mxu0  ;;  %v781_v53 = vpop.f32.mrb[23].mxu1 }
 0x119   : > { %1794 = vst [vmem:[%s2120_s6 + $0xc8] sm:$0xff] %v1738_v35   ;;  %v952_v49 = vadd.f32 %v2097_v43, %v884_v37  ;;  %v885_v51 = vmul.f32 %v1903_v47, %v2095_v42  ;;  %v918_v54 = vadd.f32 %v2097_v43, %v850_v44  ;;  %v950_v55 = vadd.f32 %v2097_v43, %v882_v45 }
 0x11a   : > { %1777 = vst [vmem:[%s2120_s6 + $0x40] sm:$0xff] %v1653_v40   ;;  %1793 = vst [vmem:[%s2120_s6 + $0xc0] sm:$0xff] %v1733_v41   ;;  %v851_v56 = vmul.f32 %v2095_v42, %v653_v52  ;;  %v883_v57 = vmul.f32 %v2095_v42, %v781_v53  ;;  %v921_v58 = vadd.f32 %v2097_v43, %v853_v50  ;;  %v984_v62 = vmax.f32 %v920_v48, 0.0 }
 0x11b   : > { %v953_v59 = vadd.f32 %v2097_v43, %v885_v51  ;;  %v1016_v63 = vmax.f32 %v952_v49, 0.0  ;;  %v982_v2 = vmax.f32 %v918_v54, 0.0  ;;  %v1014_v3 = vmax.f32 %v950_v55, 0.0 }
 0x11c   : > { %v919_v60 = vadd.f32 %v2097_v43, %v851_v56  ;;  %v951_v61 = vadd.f32 %v2097_v43, %v883_v57  ;;  %v985_v0 = vmax.f32 %v921_v58, 0.0 }
 0x11d   : > { %v1017_v1 = vmax.f32 %v953_v59, 0.0  ;;  %v1874_v6 = vpop.f32.mrb[24].mxu0  ;;  %v1906_v7 = vpop.f32.mrb[24].mxu1 }
 0x11e   : > { %v983_v4 = vmax.f32 %v919_v60, 0.0  ;;  %v1015_v5 = vmax.f32 %v951_v61, 0.0  ;;  %v1668_v8 = vpack.c.bf16 %v985_v0, %v984_v62  ;;  %v856_v10 = vmul.f32 %v1874_v6, %v2095_v42  ;;  %v666_v12 = vpop.f32.mrb[25].mxu0  ;;  %v794_v13 = vpop.f32.mrb[25].mxu1 }
 0x11f   : > { %v1748_v9 = vpack.c.bf16 %v1017_v1, %v1016_v63  ;;  %v888_v11 = vmul.f32 %v1906_v7, %v2095_v42  ;;  %v854_v16 = vmul.f32 %v2095_v42, %v666_v12  ;;  %v886_v17 = vmul.f32 %v2095_v42, %v794_v13  ;;  %v1875_v18 = vpop.f32.mrb[26].mxu0  ;;  %v1907_v19 = vpop.f32.mrb[26].mxu1 }
 0x120   : > { %v1663_v14 = vpack.c.bf16 %v983_v4, %v982_v2  ;;  %v1743_v15 = vpack.c.bf16 %v1015_v5, %v1014_v3  ;;  %1780 = vst [vmem:[%s2120_s6 + $0x58] sm:$0xff] %v1668_v8   ;;  %v924_v20 = vadd.f32 %v2097_v43, %v856_v10  ;;  %v857_v22 = vmul.f32 %v1875_v18, %v2095_v42  ;;  %v669_v24 = vpop.f32.mrb[27].mxu0  ;;  %v797_v25 = vpop.f32.mrb[27].mxu1 }
 0x121   : > { %1796 = vst [vmem:[%s2120_s6 + $0xd8] sm:$0xff] %v1748_v9   ;;  %v956_v21 = vadd.f32 %v2097_v43, %v888_v11  ;;  %v889_v23 = vmul.f32 %v1907_v19, %v2095_v42  ;;  %v922_v26 = vadd.f32 %v2097_v43, %v854_v16  ;;  %v954_v27 = vadd.f32 %v2097_v43, %v886_v17 }
 0x122   : > { %1779 = vst [vmem:[%s2120_s6 + $0x50] sm:$0xff] %v1663_v14   ;;  %1795 = vst [vmem:[%s2120_s6 + $0xd0] sm:$0xff] %v1743_v15   ;;  %v855_v28 = vmul.f32 %v2095_v42, %v669_v24  ;;  %v887_v29 = vmul.f32 %v2095_v42, %v797_v25  ;;  %v925_v30 = vadd.f32 %v2097_v43, %v857_v22  ;;  %v988_v34 = vmax.f32 %v924_v20, 0.0 }
 0x123   : > { %v957_v31 = vadd.f32 %v2097_v43, %v889_v23  ;;  %v1020_v35 = vmax.f32 %v956_v21, 0.0  ;;  %v986_v38 = vmax.f32 %v922_v26, 0.0  ;;  %v1018_v39 = vmax.f32 %v954_v27, 0.0 }
 0x124   : > { %v923_v32 = vadd.f32 %v2097_v43, %v855_v28  ;;  %v955_v33 = vadd.f32 %v2097_v43, %v887_v29  ;;  %v989_v36 = vmax.f32 %v925_v30, 0.0 }
 0x125   : > { %v1021_v37 = vmax.f32 %v957_v31, 0.0  ;;  %v1878_v44 = vpop.f32.mrb[28].mxu0  ;;  %v1910_v45 = vpop.f32.mrb[28].mxu1 }
 0x126   : > { %v987_v40 = vmax.f32 %v923_v32, 0.0  ;;  %v1019_v41 = vmax.f32 %v955_v33, 0.0  ;;  %v1678_v46 = vpack.c.bf16 %v989_v36, %v988_v34  ;;  %v860_v48 = vmul.f32 %v1878_v44, %v2095_v42  ;;  %v682_v50 = vpop.f32.mrb[29].mxu0  ;;  %v810_v51 = vpop.f32.mrb[29].mxu1 }
 0x127   : > { %v1758_v47 = vpack.c.bf16 %v1021_v37, %v1020_v35  ;;  %v892_v49 = vmul.f32 %v1910_v45, %v2095_v42  ;;  %v858_v54 = vmul.f32 %v2095_v42, %v682_v50  ;;  %v890_v55 = vmul.f32 %v2095_v42, %v810_v51  ;;  %v1879_v56 = vpop.f32.mrb[30].mxu0  ;;  %v1911_v57 = vpop.f32.mrb[30].mxu1 }
 0x128   : > { %v1673_v52 = vpack.c.bf16 %v987_v40, %v986_v38  ;;  %v1753_v53 = vpack.c.bf16 %v1019_v41, %v1018_v39  ;;  %1782 = vst [vmem:[%s2120_s6 + $0x68] sm:$0xff] %v1678_v46   ;;  %v928_v58 = vadd.f32 %v2097_v43, %v860_v48  ;;  %v861_v60 = vmul.f32 %v1879_v56, %v2095_v42  ;;  %v685_v62 = vpop.f32.mrb[31].mxu0  ;;  %v813_v63 = vpop.f32.mrb[31].mxu1 }
 0x129   : > { %1798 = vst [vmem:[%s2120_s6 + $0xe8] sm:$0xff] %v1758_v47   ;;  %v960_v59 = vadd.f32 %v2097_v43, %v892_v49  ;;  %v893_v61 = vmul.f32 %v1911_v57, %v2095_v42  ;;  %v926_v0 = vadd.f32 %v2097_v43, %v858_v54  ;;  %v958_v1 = vadd.f32 %v2097_v43, %v890_v55 }
 0x12a   : > { %1781 = vst [vmem:[%s2120_s6 + $0x60] sm:$0xff] %v1673_v52   ;;  %1797 = vst [vmem:[%s2120_s6 + $0xe0] sm:$0xff] %v1753_v53   ;;  %v859_v2 = vmul.f32 %v2095_v42, %v685_v62  ;;  %v891_v3 = vmul.f32 %v2095_v42, %v813_v63  ;;  %v929_v4 = vadd.f32 %v2097_v43, %v861_v60  ;;  %v992_v8 = vmax.f32 %v928_v58, 0.0 }
 0x12b   : > { %v961_v5 = vadd.f32 %v2097_v43, %v893_v61  ;;  %v1024_v9 = vmax.f32 %v960_v59, 0.0  ;;  %v990_v12 = vmax.f32 %v926_v0, 0.0  ;;  %v1022_v13 = vmax.f32 %v958_v1, 0.0 }
 0x12c   : > { %v927_v6 = vadd.f32 %v2097_v43, %v859_v2  ;;  %v959_v7 = vadd.f32 %v2097_v43, %v891_v3  ;;  %v993_v10 = vmax.f32 %v929_v4, 0.0 }
 0x12d   : > { %v1025_v11 = vmax.f32 %v961_v5, 0.0 }
 0x12e   : > { %v991_v14 = vmax.f32 %v927_v6, 0.0  ;;  %v1023_v42 = vmax.f32 %v959_v7, 0.0  ;;  %v1688_v15 = vpack.c.bf16 %v993_v10, %v992_v8 }
 0x12f   : > { %v1768_v16 = vpack.c.bf16 %v1025_v11, %v1024_v9 }
 0x130   : > { %v1683_v17 = vpack.c.bf16 %v991_v14, %v990_v12  ;;  %v1763_v18 = vpack.c.bf16 %v1023_v42, %v1022_v13  ;;  %1784 = vst [vmem:[%s2120_s6 + $0x78] sm:$0xff] %v1688_v15  }
 0x131   : > { %1800 = vst [vmem:[%s2120_s6 + $0xf8] sm:$0xff] %v1768_v16  }
 0x132   : > { %1783 = vst [vmem:[%s2120_s6 + $0x70] sm:$0xff] %v1683_v17   ;;  %1799 = vst [vmem:[%s2120_s6 + $0xf0] sm:$0xff] %v1763_v18  }
 0x133 PF: > { %s13_s12 = sadd.s32 1, %s1973_s12  }
 0x134   : > { %p10_p4 = scmp.ge.s32.totalorder %s13_s12, 4  }
 0x136   :  { %12 = sbr.rel (!%p10_p4) target bundleno = 1 (0x1), region = 62 }

// kernel: sst_emotion_net_forward.38
= control target key start
LH: loop header
LB: loop body
LE: loop exit
PB: predicated region body
PF: predicated region fallthrough
CT: control target
= control target key end

     0   :  { %v24_v0 = vlaneseq  ;;  %v249_v1 = vmov 0.0   ;;  %vm250_vm0 = vmmov 0   ;;  %v251_v25 = vmov 0   ;;  %s316_s1 = inlined_call_operand.vmem [shape: bf16[128,128], index: 1, kind: input, shape index: {}]   ;;  %s317_s2 = inlined_call_operand.vmem [shape: bf16[2,128], index: 2, kind: input, shape index: {}]   ;;  %s318_s0 = inlined_call_operand.vmem [shape: bf16[16,128], index: 0, kind: input, shape index: {}]   ;;  %s319_s3 = inlined_call_operand.vmem [shape: f32[2,128], index: 3, kind: input, shape index: {}]   ;;  %s320_s4 = inlined_call_operand.vmem [shape: bf16[16,128], index: 4, kind: output, shape index: {}]  }
   0x1   :  { %218 = vmatprep.subr.bf16.mxu0 %v249_v1  ;;  %v241_v2 = vld [vmem:[%s316_s1] sm:$0xff]   ;;  %234 = vmatprep.mubr.msk.bf16.mxu0 %vm250_vm0, %v249_v1  ;;  %v242_v3 = vld [vmem:[%s316_s1 + $0x8] sm:$0xff]   ;;  %v243_v5 = vld [vmem:[%s316_s1 + $0x10] sm:$0xff]  }
   0x2   :  { %219 = vmatpush3.bf16.msra.mxu0 %v241_v2  ;;  %v25_v4 = vshrl.u32 %v24_v0, 7  ;;  %v20_v7 = vld [vmem:[%s317_s2] sm:$0x1]  ;;  %v244_v10 = vld [vmem:[%s316_s1 + $0x18] sm:$0xff]   ;;  %v19_v17 = vld [vmem:[%s318_s0 + $0x4] sm:$0xf] }
   0x3   :  { %220 = vmatprep.subr.bf16.mxu0 %v249_v1  ;;  %v22_v8 = vpack.i.b16 %v20_v7, %v20_v7  ;;  %v34_v9 = vshrl.u32 %v20_v7, 16  ;;  %v245_v15 = vld [vmem:[%s316_s1 + $0x20] sm:$0xff]   ;;  %v246_v21 = vld [vmem:[%s316_s1 + $0x28] sm:$0xff]   ;;  %v247_v24 = vld [vmem:[%s316_s1 + $0x30] sm:$0xff]  }
   0x4   :  { %v26_v6 = vsub.s32 0, %v25_v4  ;;  %v18_v16 = vld [vmem:[%s318_s0] sm:$0xf]  ;;  %v248_v28 = vld [vmem:[%s316_s1 + $0x38] sm:$0xff]   ;;  %v169_v31 = vsub.s32 1, %v25_v4 }
   0x5   :  { %v35_v12 = vpack.i.b16 %v34_v9, %v34_v9  ;;  %v160_v30 = vld [vmem:[%s319_s3] sm:$0x3] }
   0x6   :  { %221 = vmatpush3.bf16.msra.mxu0 %v242_v3  ;;  %v27_v11 = vrot.slane %v22_v8, %v26_v6  ;;  %v164_v32 = vrot.slane %v160_v30, %v26_v6  ;;  %v170_v33 = vrot.slane %v160_v30, %v169_v31 }
   0x7   :  { %222 = vmatprep.subr.bf16.mxu0 %v249_v1  ;;  %v40_v14 = vrot.slane %v35_v12, %v26_v6 }
   0x8   :  { %v189_v13 = vcombine.low %v27_v11, %v27_v11 }
   0x9   :  { %v190_v20 = vcombine.low %v40_v14, %v40_v14 }
   0xa   :  { %223 = vmatpush3.bf16.msra.mxu0 %v243_v5  ;;  %v32_v18 = vmul.bf16 %v189_v13, %v18_v16  ;;  %v33_v19 = vmul.bf16 %v189_v13, %v19_v17 }
   0xb   :  { %224 = vmatprep.subr.bf16.mxu0 %v249_v1 }
   0xc   :  { %v45_v22 = vadd.bf16 %v190_v20, %v32_v18  ;;  %v46_v23 = vadd.bf16 %v190_v20, %v33_v19 }
   0xe   :  { %225 = vmatpush3.bf16.msra.mxu0 %v244_v10  ;;  %v47_v26 = vmax.bf16 %v251_v25, %v45_v22  ;;  %v48_v27 = vmax.bf16 %v251_v25, %v46_v23 }
   0xf   :  { %226 = vmatprep.subr.bf16.mxu0 %v249_v1 }
  0x10   :  { %v191_v29 = vcombine.low %v47_v26, %v48_v27 }
  0x12   :  { %227 = vmatpush3.bf16.msra.mxu0 %v245_v15 }
  0x13   :  { %228 = vmatprep.subr.bf16.mxu0 %v249_v1 }
  0x16   :  { %229 = vmatpush3.bf16.msra.mxu0 %v246_v21 }
  0x17   :  { %230 = vmatprep.subr.bf16.mxu0 %v249_v1 }
  0x1a   :  { %231 = vmatpush3.bf16.msra.mxu0 %v247_v24 }
  0x1b   :  { %232 = vmatprep.subr.bf16.mxu0 %v249_v1 }
  0x1e   :  { %233 = vmatpush3.bf16.msra.mxu0 %v248_v28 }
  0x21   :  { %235 = vmatmul.mubr.bf16.vlgmr.msra.gmra.mrb[0].mxu0 %v191_v29 }
  0xf4   :  { %v153_v34 = vpop.f32.mrb[0].mxu0 }
  0xf5   :  { %v165_v35 = vmul.f32 %v164_v32, %v153_v34  ;;  %v236_v36 = vpop.f32.mrb[1].mxu0 }
  0xf6   :  { %v156_v37 = vpop.f32.mrb[2].mxu0 }
  0xf7   :  { %v171_v38 = vadd.f32 %v170_v33, %v165_v35  ;;  %v166_v39 = vmul.f32 %v164_v32, %v156_v37  ;;  %v237_v40 = vpop.f32.mrb[3].mxu0 }
  0xf9   :  { %v172_v41 = vadd.f32 %v170_v33, %v166_v39  ;;  %v173_v42 = vmax.f32 %v171_v38, 0.0 }
  0xfb   :  { %v174_v43 = vmax.f32 %v172_v41, 0.0 }
  0xfd   :  { %v207_v44 = vpack.c.bf16 %v174_v43, %v173_v42 }
  0xff   :  { %208 = vst [vmem:[%s320_s4] sm:$0xff] %v207_v44  }

// kernel: sst_emotion_net_forward.39
= control target key start
LH: loop header
LB: loop body
LE: loop exit
PB: predicated region body
PF: predicated region fallthrough
CT: control target
= control target key end

     0   :  { %vm1158_vm0 = vmmov 0   ;;  %s1420_s1 = inlined_call_operand.vmem [shape: bf16[1152,128], index: 1, kind: input, shape index: {}]   ;;  %s1421_s0 = inlined_call_operand.vmem [shape: bf16[16,1152], index: 0, kind: input, shape index: {}]   ;;  %s1422_s2 = inlined_call_operand.vmem [shape: bf16[16,128], index: 2, kind: output, shape index: {}]  }
   0x1   :  { %v1072_v0 = vld [vmem:[%s1420_s1 + $0x40] sm:$0xff]   ;;  %v1076_v4 = vld [vmem:[%s1420_s1 + $0x48] sm:$0xff]   ;;  %v1080_v8 = vld [vmem:[%s1420_s1 + $0x50] sm:$0xff]  }
   0x2   :  { %v1073_v1 = vld [vmem:[%s1420_s1 + $0xc0] sm:$0xff]   ;;  %953 = vmatprep.subr.bf16.mxu0 %v1072_v0  ;;  %v1077_v5 = vld [vmem:[%s1420_s1 + $0xc8] sm:$0xff]   ;;  %v1081_v9 = vld [vmem:[%s1420_s1 + $0xd0] sm:$0xff]  }
   0x3   :  { %v1074_v2 = vld [vmem:[%s1420_s1] sm:$0xff]   ;;  %975 = vmatprep.subr.bf16.mxu1 %v1073_v1  ;;  %v1078_v6 = vld [vmem:[%s1420_s1 + $0x8] sm:$0xff]   ;;  %v1082_v10 = vld [vmem:[%s1420_s1 + $0x10] sm:$0xff]  }
   0x4   :  { %v1075_v3 = vld [vmem:[%s1420_s1 + $0x80] sm:$0xff]   ;;  %954 = vmatpush3.bf16.msra.mxu0 %v1074_v2  ;;  %v1079_v7 = vld [vmem:[%s1420_s1 + $0x88] sm:$0xff]   ;;  %v1083_v11 = vld [vmem:[%s1420_s1 + $0x90] sm:$0xff]  }
   0x5   :  { %976 = vmatpush3.bf16.msra.mxu1 %v1075_v3  ;;  %955 = vmatprep.subr.bf16.mxu0 %v1076_v4  ;;  %v1084_v12 = vld [vmem:[%s1420_s1 + $0x58] sm:$0xff]   ;;  %v1088_v16 = vld [vmem:[%s1420_s1 + $0x60] sm:$0xff]   ;;  %v1092_v20 = vld [vmem:[%s1420_s1 + $0x68] sm:$0xff]  }
   0x6   :  { %977 = vmatprep.subr.bf16.mxu1 %v1077_v5  ;;  %v1085_v13 = vld [vmem:[%s1420_s1 + $0xd8] sm:$0xff]   ;;  %v1089_v17 = vld [vmem:[%s1420_s1 + $0xe0] sm:$0xff]   ;;  %v1093_v21 = vld [vmem:[%s1420_s1 + $0xe8] sm:$0xff]  }
   0x7   :  { %v1086_v14 = vld [vmem:[%s1420_s1 + $0x18] sm:$0xff]   ;;  %v1090_v18 = vld [vmem:[%s1420_s1 + $0x20] sm:$0xff]   ;;  %v1094_v22 = vld [vmem:[%s1420_s1 + $0x28] sm:$0xff]  }
   0x8   :  { %956 = vmatpush3.bf16.msra.mxu0 %v1078_v6  ;;  %v1087_v15 = vld [vmem:[%s1420_s1 + $0x98] sm:$0xff]   ;;  %v1091_v19 = vld [vmem:[%s1420_s1 + $0xa0] sm:$0xff]   ;;  %v1095_v23 = vld [vmem:[%s1420_s1 + $0xa8] sm:$0xff]   ;;  %v1157_v6 = vmov 0.0  }
   0x9   :  { %978 = vmatpush3.bf16.msra.mxu1 %v1079_v7  ;;  %957 = vmatprep.subr.bf16.mxu0 %v1080_v8  ;;  %v1096_v24 = vld [vmem:[%s1420_s1 + $0x70] sm:$0xff]   ;;  %v1100_v28 = vld [vmem:[%s1420_s1 + $0x78] sm:$0xff]   ;;  %v1104_v32 = vld [vmem:[%s1421_s0] ss:$36 sps:$4 sm:$0xff]  }
   0xa   :  { %979 = vmatprep.subr.bf16.mxu1 %v1081_v9  ;;  %v1097_v25 = vld [vmem:[%s1420_s1 + $0xf0] sm:$0xff]   ;;  %v1101_v29 = vld [vmem:[%s1420_s1 + $0xf8] sm:$0xff]   ;;  %v1106_v33 = vld [vmem:[%s1421_s0 + $0x4] ss:$36 sps:$4 sm:$0xff]  }
   0xb   :  { %v1098_v26 = vld [vmem:[%s1420_s1 + $0x30] sm:$0xff]   ;;  %v1102_v30 = vld [vmem:[%s1420_s1 + $0x38] sm:$0xff]   ;;  %v1107_v34 = vld [vmem:[%s1421_s0 + $0x8] ss:$36 sps:$4 sm:$0xff]   ;;  %676 = vmatprep.mubr.bf16.mxu0 %v1106_v33 }
   0xc   :  { %958 = vmatpush3.bf16.msra.mxu0 %v1082_v10  ;;  %v1099_v27 = vld [vmem:[%s1420_s1 + $0xb0] sm:$0xff]   ;;  %v1103_v31 = vld [vmem:[%s1420_s1 + $0xb8] sm:$0xff]   ;;  %v1110_v36 = vld [vmem:[%s1420_s1 + $0x140] sm:$0xff]  }
   0xd   :  { %980 = vmatpush3.bf16.msra.mxu1 %v1083_v11  ;;  %959 = vmatprep.subr.bf16.mxu0 %v1084_v12  ;;  %v1109_v35 = vld [vmem:[%s1421_s0 + $0xc] ss:$36 sps:$4 sm:$0xff]   ;;  %v1111_v37 = vld [vmem:[%s1420_s1 + $0x100] sm:$0xff]   ;;  %v1122_v48 = vld [vmem:[%s1420_s1 + $0x158] sm:$0xff]  }
   0xe   :  { %981 = vmatprep.subr.bf16.mxu1 %v1085_v13  ;;  %717 = vmatprep.mubr.bf16.mxu1 %v1109_v35  ;;  %v1112_v38 = vld [vmem:[%s1420_s1 + $0x1c0] sm:$0xff]   ;;  %v1114_v40 = vld [vmem:[%s1420_s1 + $0x148] sm:$0xff]   ;;  %v1118_v44 = vld [vmem:[%s1420_s1 + $0x150] sm:$0xff]  }
   0xf   :  { %v1113_v39 = vld [vmem:[%s1420_s1 + $0x180] sm:$0xff]   ;;  %v1115_v41 = vld [vmem:[%s1420_s1 + $0x108] sm:$0xff]   ;;  %v1119_v45 = vld [vmem:[%s1420_s1 + $0x110] sm:$0xff]  }
  0x10   :  { %960 = vmatpush3.bf16.msra.mxu0 %v1086_v14  ;;  %v1116_v42 = vld [vmem:[%s1420_s1 + $0x1c8] sm:$0xff]   ;;  %v1120_v46 = vld [vmem:[%s1420_s1 + $0x1d0] sm:$0xff]   ;;  %v1123_v49 = vld [vmem:[%s1420_s1 + $0x118] sm:$0xff]  }
  0x11   :  { %982 = vmatpush3.bf16.msra.mxu1 %v1087_v15  ;;  %961 = vmatprep.subr.bf16.mxu0 %v1088_v16  ;;  %v1117_v43 = vld [vmem:[%s1420_s1 + $0x188] sm:$0xff]   ;;  %v1121_v47 = vld [vmem:[%s1420_s1 + $0x190] sm:$0xff]   ;;  %v1124_v50 = vld [vmem:[%s1420_s1 + $0x1d8] sm:$0xff]  }
  0x12   :  { %983 = vmatprep.subr.bf16.mxu1 %v1089_v17  ;;  %v1125_v51 = vld [vmem:[%s1420_s1 + $0x198] sm:$0xff]   ;;  %v1126_v52 = vld [vmem:[%s1420_s1 + $0x160] sm:$0xff]   ;;  %v1130_v56 = vld [vmem:[%s1420_s1 + $0x168] sm:$0xff]  }
  0x13   :  { %v1127_v53 = vld [vmem:[%s1420_s1 + $0x120] sm:$0xff]   ;;  %v1131_v57 = vld [vmem:[%s1420_s1 + $0x128] sm:$0xff]   ;;  %v1134_v60 = vld [vmem:[%s1420_s1 + $0x170] sm:$0xff]  }
  0x14   :  { %962 = vmatpush3.bf16.msra.mxu0 %v1090_v18  ;;  %v1128_v54 = vld [vmem:[%s1420_s1 + $0x1e0] sm:$0xff]   ;;  %v1132_v58 = vld [vmem:[%s1420_s1 + $0x1e8] sm:$0xff]   ;;  %v1135_v61 = vld [vmem:[%s1420_s1 + $0x130] sm:$0xff]  }
  0x15   :  { %984 = vmatpush3.bf16.msra.mxu1 %v1091_v19  ;;  %963 = vmatprep.subr.bf16.mxu0 %v1092_v20  ;;  %v1129_v55 = vld [vmem:[%s1420_s1 + $0x1a0] sm:$0xff]   ;;  %v1133_v59 = vld [vmem:[%s1420_s1 + $0x1a8] sm:$0xff]   ;;  %v1136_v62 = vld [vmem:[%s1420_s1 + $0x1f0] sm:$0xff]  }
  0x16   :  { %985 = vmatprep.subr.bf16.mxu1 %v1093_v21  ;;  %v1137_v63 = vld [vmem:[%s1420_s1 + $0x1b0] sm:$0xff]   ;;  %v1138_v0 = vld [vmem:[%s1420_s1 + $0x178] sm:$0xff]   ;;  %v1148_v9 = vld [vmem:[%s1420_s1 + $0x200] sm:$0xff]  }
  0x17   :  { %v1139_v1 = vld [vmem:[%s1420_s1 + $0x138] sm:$0xff]   ;;  %v1141_v3 = vld [vmem:[%s1421_s0 + $0x10] ss:$36 sps:$4 sm:$0xff]   ;;  %v1149_v10 = vld [vmem:[%s1420_s1 + $0x208] sm:$0xff]  }
  0x18   :  { %964 = vmatpush3.bf16.msra.mxu0 %v1094_v22  ;;  %v1140_v2 = vld [vmem:[%s1420_s1 + $0x1f8] sm:$0xff]   ;;  %v1150_v11 = vld [vmem:[%s1420_s1 + $0x210] sm:$0xff]   ;;  %v1152_v13 = vld [vmem:[%s1420_s1 + $0x220] sm:$0xff]  }
  0x19   :  { %986 = vmatpush3.bf16.msra.mxu1 %v1095_v23  ;;  %965 = vmatprep.subr.bf16.mxu0 %v1096_v24  ;;  %v1143_v4 = vld [vmem:[%s1421_s0 + $0x14] ss:$36 sps:$4 sm:$0xff]   ;;  %v1147_v8 = vld [vmem:[%s1421_s0 + $0x1c] ss:$36 sps:$4 sm:$0xff]   ;;  %v1153_v14 = vld [vmem:[%s1420_s1 + $0x228] sm:$0xff]  }
  0x1a   :  { %987 = vmatprep.subr.bf16.mxu1 %v1097_v25  ;;  %v1144_v5 = vld [vmem:[%s1420_s1 + $0x1b8] sm:$0xff]   ;;  %v1154_v15 = vld [vmem:[%s1420_s1 + $0x230] sm:$0xff]   ;;  %v1156_v17 = vld [vmem:[%s1421_s0 + $0x20] ss:$36 sps:$4 sm:$0xff]  }
  0x1b   :  { %v1145_v7 = vld [vmem:[%s1421_s0 + $0x18] ss:$36 sps:$4 sm:$0xff]  }
  0x1c   :  { %966 = vmatpush3.bf16.msra.mxu0 %v1098_v26  ;;  %v1151_v12 = vld [vmem:[%s1420_s1 + $0x218] sm:$0xff]  }
  0x1d   :  { %988 = vmatpush3.bf16.msra.mxu1 %v1099_v27  ;;  %967 = vmatprep.subr.bf16.mxu0 %v1100_v28  ;;  %v1155_v16 = vld [vmem:[%s1420_s1 + $0x238] sm:$0xff]  }
  0x1e   :  { %989 = vmatprep.subr.bf16.mxu1 %v1101_v29 }
  0x20   :  { %968 = vmatpush3.bf16.msra.mxu0 %v1102_v30 }
  0x21   :  { %990 = vmatpush3.bf16.msra.mxu1 %v1103_v31  ;;  %997 = vmatprep.subr.bf16.mxu0 %v1110_v36 }
  0x22   :  { %1019 = vmatprep.subr.bf16.mxu1 %v1112_v38 }
  0x23   :  { %677 = vmatmul.mubr.bf16.vlgmr.msra.gmra.mrb[0].mxu0 %v1104_v32 }
  0x24   :  { %718 = vmatmul.mubr.bf16.vlgmr.msra.gmra.mrb[0].mxu1 %v1107_v34  ;;  %998 = vmatpush3.bf16.msra.mxu0 %v1111_v37 }
  0x25   :  { %1020 = vmatpush3.bf16.msra.mxu1 %v1113_v39  ;;  %999 = vmatprep.subr.bf16.mxu0 %v1114_v40 }
  0x26   :  { %1021 = vmatprep.subr.bf16.mxu1 %v1116_v42  ;;  %758 = vmatprep.mubr.bf16.mxu0 %v1143_v4 }
  0x27   :  { %799 = vmatprep.mubr.bf16.mxu1 %v1147_v8 }
  0x28   :  { %1000 = vmatpush3.bf16.msra.mxu0 %v1115_v41 }
  0x29   :  { %1022 = vmatpush3.bf16.msra.mxu1 %v1117_v43  ;;  %1001 = vmatprep.subr.bf16.mxu0 %v1118_v44 }
  0x2a   :  { %1023 = vmatprep.subr.bf16.mxu1 %v1120_v46 }
  0x2c   :  { %1002 = vmatpush3.bf16.msra.mxu0 %v1119_v45 }
  0x2d   :  { %1024 = vmatpush3.bf16.msra.mxu1 %v1121_v47  ;;  %1003 = vmatprep.subr.bf16.mxu0 %v1122_v48 }
  0x2e   :  { %1025 = vmatprep.subr.bf16.mxu1 %v1124_v50 }
  0x30   :  { %1004 = vmatpush3.bf16.msra.mxu0 %v1123_v49 }
  0x31   :  { %1026 = vmatpush3.bf16.msra.mxu1 %v1125_v51  ;;  %1005 = vmatprep.subr.bf16.mxu0 %v1126_v52 }
  0x32   :  { %1027 = vmatprep.subr.bf16.mxu1 %v1128_v54 }
  0x34   :  { %1006 = vmatpush3.bf16.msra.mxu0 %v1127_v53 }
  0x35   :  { %1028 = vmatpush3.bf16.msra.mxu1 %v1129_v55  ;;  %1007 = vmatprep.subr.bf16.mxu0 %v1130_v56 }
  0x36   :  { %1029 = vmatprep.subr.bf16.mxu1 %v1132_v58 }
  0x38   :  { %1008 = vmatpush3.bf16.msra.mxu0 %v1131_v57 }
  0x39   :  { %1030 = vmatpush3.bf16.msra.mxu1 %v1133_v59  ;;  %1009 = vmatprep.subr.bf16.mxu0 %v1134_v60 }
  0x3a   :  { %1031 = vmatprep.subr.bf16.mxu1 %v1136_v62 }
  0x3c   :  { %1010 = vmatpush3.bf16.msra.mxu0 %v1135_v61 }
  0x3d   :  { %1032 = vmatpush3.bf16.msra.mxu1 %v1137_v63  ;;  %1011 = vmatprep.subr.bf16.mxu0 %v1138_v0 }
  0x3e   :  { %1033 = vmatprep.subr.bf16.mxu1 %v1140_v2 }
  0x40   :  { %1012 = vmatpush3.bf16.msra.mxu0 %v1139_v1 }
  0x41   :  { %1050 = vmatprep.subr.bf16.mxu0 %v1157_v6  ;;  %1034 = vmatpush3.bf16.msra.mxu1 %v1144_v5 }
  0x43   :  { %759 = vmatmul.mubr.bf16.vlgmr.msra.gmra.mrb[4].mxu0 %v1141_v3 }
  0x44   :  { %1066 = vmatprep.mubr.msk.bf16.mxu0 %vm1158_vm0, %v1157_v6  ;;  %1051 = vmatpush3.bf16.msra.mxu0 %v1148_v9 }
  0x45   :  { %800 = vmatmul.mubr.bf16.vlgmr.msra.gmra.mrb[4].mxu1 %v1145_v7  ;;  %1052 = vmatprep.subr.bf16.mxu0 %v1157_v6 }
  0x48   :  { %1053 = vmatpush3.bf16.msra.mxu0 %v1149_v10 }
  0x49   :  { %1054 = vmatprep.subr.bf16.mxu0 %v1157_v6 }
  0x4c   :  { %1055 = vmatpush3.bf16.msra.mxu0 %v1150_v11 }
  0x4d   :  { %1056 = vmatprep.subr.bf16.mxu0 %v1157_v6 }
  0x50   :  { %1057 = vmatpush3.bf16.msra.mxu0 %v1151_v12 }
  0x51   :  { %1058 = vmatprep.subr.bf16.mxu0 %v1157_v6 }
  0x54   :  { %1059 = vmatpush3.bf16.msra.mxu0 %v1152_v13 }
  0x55   :  { %1060 = vmatprep.subr.bf16.mxu0 %v1157_v6 }
  0x58   :  { %1061 = vmatpush3.bf16.msra.mxu0 %v1153_v14 }
  0x59   :  { %1062 = vmatprep.subr.bf16.mxu0 %v1157_v6 }
  0x5c   :  { %1063 = vmatpush3.bf16.msra.mxu0 %v1154_v15 }
  0x5d   :  { %1064 = vmatprep.subr.bf16.mxu0 %v1157_v6 }
  0x60   :  { %1065 = vmatpush3.bf16.msra.mxu0 %v1155_v16 }
  0x63   :  { %1067 = vmatmul.mubr.bf16.vlgmr.msra.gmra.mrb[8].mxu0 %v1156_v17 }
  0xf6   :  { %v969_v18 = vpop.f32.mrb[0].mxu0 }
  0xf7   :  { %v991_v19 = vpop.f32.mrb[0].mxu1  ;;  %v970_v20 = vpop.f32.mrb[1].mxu0 }
  0xf8   :  { %v971_v21 = vadd.f32 %v970_v20, %v969_v18  ;;  %v992_v22 = vpop.f32.mrb[1].mxu1  ;;  %v972_v23 = vpop.f32.mrb[2].mxu0 }
  0xf9   :  { %v993_v24 = vadd.f32 %v992_v22, %v991_v19  ;;  %v994_v25 = vpop.f32.mrb[2].mxu1  ;;  %v973_v26 = vpop.f32.mrb[3].mxu0 }
  0xfa   :  { %v974_v27 = vadd.f32 %v973_v26, %v972_v23  ;;  %v995_v28 = vpop.f32.mrb[3].mxu1 }
  0xfb   :  { %v720_v29 = vadd.f32 %v993_v24, %v971_v21  ;;  %v996_v30 = vadd.f32 %v995_v28, %v994_v25 }
  0xfd   :  { %v723_v31 = vadd.f32 %v996_v30, %v974_v27 }
 0x116   :  { %v1013_v32 = vpop.f32.mrb[4].mxu0 }
 0x117   :  { %v1014_v33 = vpop.f32.mrb[5].mxu0 }
 0x118   :  { %v1015_v34 = vadd.f32 %v1014_v33, %v1013_v32  ;;  %v1016_v35 = vpop.f32.mrb[6].mxu0  ;;  %v1035_v36 = vpop.f32.mrb[4].mxu1 }
 0x119   :  { %v1017_v37 = vpop.f32.mrb[7].mxu0  ;;  %v1036_v40 = vpop.f32.mrb[5].mxu1 }
 0x11a   :  { %v761_v38 = vadd.f32 %v1015_v34, %v720_v29  ;;  %v1018_v39 = vadd.f32 %v1017_v37, %v1016_v35  ;;  %v1037_v41 = vadd.f32 %v1036_v40, %v1035_v36  ;;  %v1038_v42 = vpop.f32.mrb[6].mxu1 }
 0x11b   :  { %v1039_v44 = vpop.f32.mrb[7].mxu1 }
 0x11c   :  { %v764_v43 = vadd.f32 %v1018_v39, %v723_v31  ;;  %v1040_v45 = vadd.f32 %v1039_v44, %v1038_v42  ;;  %v802_v46 = vadd.f32 %v1037_v41, %v761_v38 }
 0x11e   :  { %v805_v47 = vadd.f32 %v1040_v45, %v764_v43 }
 0x136   :  { %v842_v48 = vpop.f32.mrb[8].mxu0 }
 0x137   :  { %v843_v49 = vadd.f32 %v842_v48, %v802_v46  ;;  %v1068_v50 = vpop.f32.mrb[9].mxu0 }
 0x138   :  { %v845_v51 = vpop.f32.mrb[10].mxu0 }
 0x139   :  { %v846_v52 = vadd.f32 %v845_v51, %v805_v47  ;;  %v1069_v53 = vpop.f32.mrb[11].mxu0 }
 0x13b   :  { %v951_v54 = vpack.c.bf16 %v846_v52, %v843_v49 }
 0x13d   :  { %952 = vst [vmem:[%s1422_s2] sm:$0xff] %v951_v54  }

// kernel: sst_emotion_net_forward.40
= control target key start
LH: loop header
LB: loop body
LE: loop exit
PB: predicated region body
PF: predicated region fallthrough
CT: control target
= control target key end

     0   :  { %v437_v1 = vmov 0.0   ;;  %vm438_vm0 = vmmov 0   ;;  %s538_s1 = inlined_call_operand.vmem [shape: bf16[384,128], index: 1, kind: input, shape index: {}]   ;;  %s539_s0 = inlined_call_operand.vmem [shape: bf16[16,384], index: 0, kind: input, shape index: {}]   ;;  %s540_s2 = inlined_call_operand.vmem [shape: bf16[16,128], index: 2, kind: output, shape index: {}]  }
   0x1   :  { %v409_v0 = vld [vmem:[%s538_s1 + $0x40] sm:$0xff]   ;;  %387 = vmatprep.subr.bf16.mxu1 %v437_v1  ;;  %403 = vmatprep.mubr.msk.bf16.mxu1 %vm438_vm0, %v437_v1  ;;  %v412_v4 = vld [vmem:[%s538_s1 + $0x48] sm:$0xff]   ;;  %v415_v7 = vld [vmem:[%s538_s1 + $0x50] sm:$0xff]  }
   0x2   :  { %v410_v2 = vld [vmem:[%s538_s1] sm:$0xff]   ;;  %356 = vmatprep.subr.bf16.mxu0 %v409_v0  ;;  %v413_v5 = vld [vmem:[%s538_s1 + $0x8] sm:$0xff]   ;;  %v416_v8 = vld [vmem:[%s538_s1 + $0x10] sm:$0xff]  }
   0x3   :  { %v411_v3 = vld [vmem:[%s538_s1 + $0x80] sm:$0xff]   ;;  %357 = vmatpush3.bf16.msra.mxu0 %v410_v2  ;;  %v414_v6 = vld [vmem:[%s538_s1 + $0x88] sm:$0xff]   ;;  %v417_v9 = vld [vmem:[%s538_s1 + $0x90] sm:$0xff]  }
   0x4   :  { %388 = vmatpush3.bf16.msra.mxu1 %v411_v3  ;;  %358 = vmatprep.subr.bf16.mxu0 %v412_v4  ;;  %v418_v10 = vld [vmem:[%s538_s1 + $0x58] sm:$0xff]   ;;  %v421_v13 = vld [vmem:[%s538_s1 + $0x60] sm:$0xff]   ;;  %v424_v16 = vld [vmem:[%s538_s1 + $0x68] sm:$0xff]  }
   0x5   :  { %389 = vmatprep.subr.bf16.mxu1 %v437_v1  ;;  %v419_v11 = vld [vmem:[%s538_s1 + $0x18] sm:$0xff]   ;;  %v422_v14 = vld [vmem:[%s538_s1 + $0x20] sm:$0xff]   ;;  %v425_v17 = vld [vmem:[%s538_s1 + $0x28] sm:$0xff]  }
   0x6   :  { %v420_v12 = vld [vmem:[%s538_s1 + $0x98] sm:$0xff]   ;;  %v423_v15 = vld [vmem:[%s538_s1 + $0xa0] sm:$0xff]   ;;  %v426_v18 = vld [vmem:[%s538_s1 + $0xa8] sm:$0xff]  }
   0x7   :  { %359 = vmatpush3.bf16.msra.mxu0 %v413_v5  ;;  %v427_v19 = vld [vmem:[%s538_s1 + $0x70] sm:$0xff]   ;;  %v430_v22 = vld [vmem:[%s538_s1 + $0x78] sm:$0xff]   ;;  %v433_v26 = vld [vmem:[%s539_s0] ss:$12 sps:$4 sm:$0xff]  }
   0x8   :  { %390 = vmatpush3.bf16.msra.mxu1 %v414_v6  ;;  %360 = vmatprep.subr.bf16.mxu0 %v415_v7  ;;  %v428_v20 = vld [vmem:[%s538_s1 + $0x30] sm:$0xff]   ;;  %v431_v24 = vld [vmem:[%s538_s1 + $0x38] sm:$0xff]  }
   0x9   :  { %391 = vmatprep.subr.bf16.mxu1 %v437_v1  ;;  %v429_v21 = vld [vmem:[%s538_s1 + $0xb0] sm:$0xff]   ;;  %v432_v25 = vld [vmem:[%s538_s1 + $0xb8] sm:$0xff]  }
   0xa   :  { %v435_v23 = vld [vmem:[%s539_s0 + $0x4] ss:$12 sps:$4 sm:$0xff]   ;;  %v436_v27 = vld [vmem:[%s539_s0 + $0x8] ss:$12 sps:$4 sm:$0xff]  }
   0xb   :  { %361 = vmatpush3.bf16.msra.mxu0 %v416_v8  ;;  %256 = vmatprep.mubr.bf16.mxu0 %v435_v23 }
   0xc   :  { %392 = vmatpush3.bf16.msra.mxu1 %v417_v9  ;;  %362 = vmatprep.subr.bf16.mxu0 %v418_v10 }
   0xd   :  { %393 = vmatprep.subr.bf16.mxu1 %v437_v1 }
   0xf   :  { %363 = vmatpush3.bf16.msra.mxu0 %v419_v11 }
  0x10   :  { %394 = vmatpush3.bf16.msra.mxu1 %v420_v12  ;;  %364 = vmatprep.subr.bf16.mxu0 %v421_v13 }
  0x11   :  { %395 = vmatprep.subr.bf16.mxu1 %v437_v1 }
  0x13   :  { %365 = vmatpush3.bf16.msra.mxu0 %v422_v14 }
  0x14   :  { %396 = vmatpush3.bf16.msra.mxu1 %v423_v15  ;;  %366 = vmatprep.subr.bf16.mxu0 %v424_v16 }
  0x15   :  { %397 = vmatprep.subr.bf16.mxu1 %v437_v1 }
  0x17   :  { %367 = vmatpush3.bf16.msra.mxu0 %v425_v17 }
  0x18   :  { %398 = vmatpush3.bf16.msra.mxu1 %v426_v18  ;;  %368 = vmatprep.subr.bf16.mxu0 %v427_v19 }
  0x19   :  { %399 = vmatprep.subr.bf16.mxu1 %v437_v1 }
  0x1b   :  { %369 = vmatpush3.bf16.msra.mxu0 %v428_v20 }
  0x1c   :  { %400 = vmatpush3.bf16.msra.mxu1 %v429_v21  ;;  %370 = vmatprep.subr.bf16.mxu0 %v430_v22 }
  0x1d   :  { %401 = vmatprep.subr.bf16.mxu1 %v437_v1 }
  0x1f   :  { %371 = vmatpush3.bf16.msra.mxu0 %v431_v24 }
  0x20   :  { %402 = vmatpush3.bf16.msra.mxu1 %v432_v25 }
  0x22   :  { %257 = vmatmul.mubr.bf16.vlgmr.msra.gmra.mrb[0].mxu0 %v433_v26 }
  0x23   :  { %404 = vmatmul.mubr.bf16.vlgmr.msra.gmra.mrb[0].mxu1 %v436_v27 }
  0xf5   :  { %v372_v28 = vpop.f32.mrb[0].mxu0 }
  0xf6   :  { %v299_v29 = vpop.f32.mrb[0].mxu1  ;;  %v373_v30 = vpop.f32.mrb[1].mxu0 }
  0xf7   :  { %v374_v31 = vadd.f32 %v373_v30, %v372_v28  ;;  %v405_v32 = vpop.f32.mrb[1].mxu1  ;;  %v375_v33 = vpop.f32.mrb[2].mxu0 }
  0xf8   :  { %v302_v34 = vpop.f32.mrb[2].mxu1  ;;  %v376_v35 = vpop.f32.mrb[3].mxu0 }
  0xf9   :  { %v300_v36 = vadd.f32 %v374_v31, %v299_v29  ;;  %v377_v37 = vadd.f32 %v376_v35, %v375_v33  ;;  %v406_v38 = vpop.f32.mrb[3].mxu1 }
  0xfb   :  { %v303_v39 = vadd.f32 %v377_v37, %v302_v34 }
  0xfd   :  { %v354_v40 = vpack.c.bf16 %v303_v39, %v300_v36 }
  0xff   :  { %355 = vst [vmem:[%s540_s2] sm:$0xff] %v354_v40  }

// kernel: sst_emotion_net_forward.41
= control target key start
LH: loop header
LB: loop body
LE: loop exit
PB: predicated region body
PF: predicated region fallthrough
CT: control target
= control target key end

     0   :  { %v350_v5 = vmov 1966171168   ;;  %v30_v7 = vlaneseq  ;;  %v351_v45 = vmov 0   ;;  %s432_s1 = inlined_call_operand.vmem [shape: bf16[256,128], index: 1, kind: input, shape index: {}]   ;;  %s433_s2 = inlined_call_operand.vmem [shape: bf16[2,256], index: 2, kind: input, shape index: {}]   ;;  %s434_s0 = inlined_call_operand.vmem [shape: bf16[16,256], index: 0, kind: input, shape index: {}]   ;;  %s435_s3 = inlined_call_operand.vmem [shape: bf16[16,128], index: 3, kind: output, shape index: {}]  }
   0x1   :  { %v334_v0 = vld [vmem:[%s432_s1 + $0x40] sm:$0xff]   ;;  %v336_v2 = vld [vmem:[%s432_s1 + $0x48] sm:$0xff]   ;;  %v338_v4 = vld [vmem:[%s432_s1 + $0x50] sm:$0xff]   ;;  %v28_v6 = vunpack.c.l.s4 %v350_v5 }
   0x2   :  { %v335_v1 = vld [vmem:[%s432_s1] sm:$0xff]   ;;  %310 = vmatprep.subr.bf16.mxu0 %v334_v0  ;;  %v337_v3 = vld [vmem:[%s432_s1 + $0x8] sm:$0xff]   ;;  %v339_v8 = vld [vmem:[%s432_s1 + $0x10] sm:$0xff]   ;;  %v31_v11 = vshrl.u32 %v30_v7, 7 }
   0x3   :  { %311 = vmatpush3.bf16.msra.mxu0 %v335_v1  ;;  %v340_v9 = vld [vmem:[%s432_s1 + $0x58] sm:$0xff]   ;;  %v29_v10 = vunpack.c.0.s8 %v28_v6  ;;  %v342_v13 = vld [vmem:[%s432_s1 + $0x60] sm:$0xff]   ;;  %v344_v16 = vld [vmem:[%s432_s1 + $0x68] sm:$0xff]  }
   0x4   :  { %312 = vmatprep.subr.bf16.mxu0 %v336_v2  ;;  %v341_v12 = vld [vmem:[%s432_s1 + $0x18] sm:$0xff]   ;;  %v343_v15 = vld [vmem:[%s432_s1 + $0x20] sm:$0xff]   ;;  %v46_v20 = vsub.s32 0, %v31_v11  ;;  %v345_v21 = vld [vmem:[%s432_s1 + $0x28] sm:$0xff]  }
   0x5   :  { %v32_v14 = vsub.s32 %v29_v10, %v31_v11  ;;  %v280_v17 = vld.sshfl [vmem:[%s433_s2] sm:$0x11 pattern:$0x75316420]  ;;  %v346_v25 = vld [vmem:[%s432_s1 + $0x70] sm:$0xff]   ;;  %v348_v34 = vld [vmem:[%s432_s1 + $0x78] sm:$0xff]  }
   0x6   :  { %v26_v18 = vcombine.high %v280_v17, %v280_v17  ;;  %v347_v30 = vld [vmem:[%s432_s1 + $0x30] sm:$0xff]   ;;  %v15_v35 = vld [vmem:[%s434_s0] sm:$0xff]  ;;  %v16_v36 = vld [vmem:[%s434_s0 + $0x8] sm:$0xff] }
   0x7   :  { %313 = vmatpush3.bf16.msra.mxu0 %v337_v3  ;;  %v33_v19 = vrot.slane %v280_v17, %v32_v14  ;;  %v349_v39 = vld [vmem:[%s432_s1 + $0x38] sm:$0xff]  }
   0x8   :  { %314 = vmatprep.subr.bf16.mxu0 %v338_v4  ;;  %v40_v22 = vrot.slane %v26_v18, %v32_v14 }
   0x9   :  { %v42_v23 = vpack.i.b16 %v33_v19, %v33_v19  ;;  %v63_v24 = vshrl.u32 %v33_v19, 16 }
   0xa   :  { %v49_v27 = vpack.i.b16 %v40_v22, %v40_v22  ;;  %v70_v29 = vshrl.u32 %v40_v22, 16 }
   0xb   :  { %315 = vmatpush3.bf16.msra.mxu0 %v339_v8  ;;  %v47_v26 = vrot.slane %v42_v23, %v46_v20  ;;  %v64_v28 = vpack.i.b16 %v63_v24, %v63_v24 }
   0xc   :  { %316 = vmatprep.subr.bf16.mxu0 %v340_v9  ;;  %v54_v31 = vrot.slane %v49_v27, %v46_v20  ;;  %v71_v33 = vpack.i.b16 %v70_v29, %v70_v29 }
   0xd   :  { %v69_v32 = vrot.slane %v64_v28, %v46_v20 }
   0xe   :  { %v281_v37 = vcombine.low %v47_v26, %v54_v31  ;;  %v76_v38 = vrot.slane %v71_v33, %v46_v20 }
   0xf   :  { %317 = vmatpush3.bf16.msra.mxu0 %v341_v12 }
  0x10   :  { %318 = vmatprep.subr.bf16.mxu0 %v342_v13  ;;  %v61_v40 = vmul.bf16 %v281_v37, %v15_v35  ;;  %v62_v41 = vmul.bf16 %v281_v37, %v16_v36  ;;  %v282_v42 = vcombine.low %v69_v32, %v76_v38 }
  0x12   :  { %v83_v43 = vadd.bf16 %v282_v42, %v61_v40  ;;  %v84_v44 = vadd.bf16 %v282_v42, %v62_v41 }
  0x13   :  { %319 = vmatpush3.bf16.msra.mxu0 %v343_v15 }
  0x14   :  { %320 = vmatprep.subr.bf16.mxu0 %v344_v16  ;;  %v85_v46 = vmax.bf16 %v351_v45, %v83_v43  ;;  %v86_v47 = vmax.bf16 %v351_v45, %v84_v44 }
  0x16   :  { %v284_v48 = vcombine.high %v85_v46, %v86_v47  ;;  %v283_v49 = vcombine.low %v85_v46, %v86_v47 }
  0x17   :  { %321 = vmatpush3.bf16.msra.mxu0 %v345_v21 }
  0x18   :  { %322 = vmatprep.subr.bf16.mxu0 %v346_v25  ;;  %257 = vmatprep.mubr.bf16.mxu0 %v284_v48 }
  0x1b   :  { %323 = vmatpush3.bf16.msra.mxu0 %v347_v30 }
  0x1c   :  { %324 = vmatprep.subr.bf16.mxu0 %v348_v34 }
  0x1f   :  { %325 = vmatpush3.bf16.msra.mxu0 %v349_v39 }
  0x22   :  { %258 = vmatmul.mubr.bf16.vlgmr.msra.gmra.mrb[0].mxu0 %v283_v49 }
  0xf5   :  { %v326_v50 = vpop.f32.mrb[0].mxu0 }
  0xf6   :  { %v327_v51 = vpop.f32.mrb[1].mxu0 }
  0xf7   :  { %v328_v52 = vadd.f32 %v327_v51, %v326_v50  ;;  %v329_v53 = vpop.f32.mrb[2].mxu0 }
  0xf8   :  { %v330_v54 = vpop.f32.mrb[3].mxu0 }
  0xf9   :  { %v331_v55 = vadd.f32 %v330_v54, %v329_v53 }
  0xfb   :  { %v308_v56 = vpack.c.bf16 %v331_v55, %v328_v52 }
  0xfd   :  { %309 = vst [vmem:[%s435_s3] sm:$0xff] %v308_v56  }

</bundles_post_ra>
